<compile_context>
chip_gen: v7x
topology: tpu7x:2x2x1
jax: 0.10.0
libtpu: 0.0.40
codegen_flags: <defaults>
</compile_context>

<pallas_src>
import functools

import jax
import jax.numpy as jnp
from jax.experimental import pallas as pl
from jax.experimental.pallas import tpu as pltpu


LEAKY_SLOPE = 0.01   # nn.LeakyReLU default negative_slope
BN_EPS = 1e-5        # nn.BatchNorm1d default eps


# ----------------------------------------------------------------------------
# Kernel
# ----------------------------------------------------------------------------
def _actor_mlp_kernel(*refs, n_layers, quantized, col_offsets):
    """Fused forward: 6x (Linear [+ folded BN] + LeakyReLU) + Softmax.

    refs layout: x, w_0..w_{L-1}, sb_pack, out
      x       : (bb, Fin)          f32   VMEM (batch block)
      w_i     : (Fin_i, Fout_i)    int8 (fc2..fc5) or f32 (fc1, fc6), BN folded
      sb_pack : (2, Wtot_padded)   f32   row 0 = per-channel dequant scales,
                                         row 1 = biases (BN folded)
      out     : (bb, n_actions)    f32
    """
    x_ref = refs[0]
    w_refs = refs[1:1 + n_layers]
    sb_ref = refs[1 + n_layers]
    o_ref = refs[2 + n_layers]

    x = x_ref[...]  # f32 (bb, Fin)
    for i in range(n_layers):
        n_out = w_refs[i].shape[1]
        off = col_offsets[i]
        w = w_refs[i][...]
        if quantized[i]:
            # int8 values are exactly representable in bf16 (|q| <= 127).
            # Two-step cast (int8 -> f32 -> bf16) for robust lowering.
            w_bf16 = w.astype(jnp.float32).astype(jnp.bfloat16)
            y = jnp.dot(x.astype(jnp.bfloat16), w_bf16,
                        preferred_element_type=jnp.float32)
        else:
            # First / last layer kept in full f32 precision.
            y = jnp.dot(x.astype(jnp.float32), w,
                        preferred_element_type=jnp.float32)
        scale = sb_ref[0:1, off:off + n_out]   # (1, n_out) f32
        bias = sb_ref[1:2, off:off + n_out]    # (1, n_out) f32
        y = y * scale + bias                   # dequant + bias in f32
        if i < n_layers - 1:
            y = jnp.where(y > 0, y, LEAKY_SLOPE * y)   # LeakyReLU
            # Dropout: identity in eval mode.
            x = y.astype(jnp.bfloat16)                 # bf16 activation forward
        else:
            x = y                                      # final logits in f32

    # Softmax over actions (dim=-1), numerically stable, exact division.
    z = x - jnp.max(x, axis=-1, keepdims=True)
    e = jnp.exp(z)
    p = e / jnp.sum(e, axis=-1, keepdims=True)
    o_ref[...] = p.astype(o_ref.dtype)


# ----------------------------------------------------------------------------
# Parameter preparation: BN fold + per-channel int8 quantization + packing
# ----------------------------------------------------------------------------
def _prepare_params(params, batch):
    """Fold eval-mode BN into (W, b); quantize middle-layer weights to int8.

    BN is folded only when batch > 1, mirroring the PyTorch forward's
    `if x.size(0) > 1` gating.

    Returns:
      ws          : list of weight arrays (int8 for fc2..fc5, f32 for fc1/fc6)
      sb_pack     : (2, padded_width) f32  [scales row; biases row]
      quantized   : tuple[bool] per layer
      col_offsets : tuple[int] column offset of each layer in sb_pack
    """
    n = len(params)
    ws, scales, biases, quantized = [], [], [], []
    for i, (w, b, bn) in enumerate(params):
        w_eff = w.astype(jnp.float32)
        b_eff = b.astype(jnp.float32)
        if (bn is not None) and (batch > 1):
            gamma, beta, mean, var = bn
            s = gamma / jnp.sqrt(var + BN_EPS)           # (1, Fout)
            w_eff = w_eff * s                            # fold into weights
            b_eff = b_eff * s + (beta - mean * s)        # fold into bias
        quant = 0 < i < n - 1                            # fc2..fc5 only
        if quant:
            amax = jnp.max(jnp.abs(w_eff), axis=0, keepdims=True)   # (1, Fout)
            scale = jnp.where(amax > 0, amax / 127.0, 1.0)
            q = jnp.clip(jnp.round(w_eff / scale), -127, 127).astype(jnp.int8)
            ws.append(q)
            scales.append(scale)
        else:
            ws.append(w_eff)                             # keep f32
            scales.append(jnp.ones_like(b_eff))
        biases.append(b_eff)
        quantized.append(quant)

    # Pack per-channel scales and biases into one (2, padded) f32 array.
    col_offsets, off = [], 0
    for b in biases:
        col_offsets.append(off)
        off += b.shape[1]
    total = off
    padded = ((total + 127) // 128) * 128
    scale_row = jnp.concatenate([s.reshape(1, -1) for s in scales], axis=1)
    bias_row = jnp.concatenate([b.reshape(1, -1) for b in biases], axis=1)
    if padded > total:
        pad = padded - total
        scale_row = jnp.concatenate(
            [scale_row, jnp.ones((1, pad), jnp.float32)], axis=1)
        bias_row = jnp.concatenate(
            [bias_row, jnp.zeros((1, pad), jnp.float32)], axis=1)
    sb_pack = jnp.concatenate([scale_row, bias_row], axis=0)     # (2, padded)
    return ws, sb_pack, tuple(quantized), tuple(col_offsets)


# ----------------------------------------------------------------------------
# Wrapper
# ----------------------------------------------------------------------------
def actor_forward(state, params, *, max_block_b=256):
    """state: (B, input_dims) f32 -> action probabilities (B, n_actions) f32."""
    B, input_dims = state.shape
    ws, sb_pack, quantized, col_offsets = _prepare_params(params, B)
    n_layers = len(ws)
    n_actions = ws[-1].shape[1]

    # Batch tiling: weights use constant index_maps so they are fetched once
    # and stay VMEM-resident across batch blocks (amortizes the weight DMA).
    bb = B if B <= max_block_b else max_block_b
    grid = (pl.cdiv(B, bb),)

    kernel = functools.partial(_actor_mlp_kernel, n_layers=n_layers,
                               quantized=quantized, col_offsets=col_offsets)

    in_specs = [pl.BlockSpec((bb, input_dims), lambda i: (i, 0))]      # state
    for w in ws:
        in_specs.append(pl.BlockSpec(w.shape, lambda i: (0, 0)))       # weights
    in_specs.append(pl.BlockSpec(sb_pack.shape, lambda i: (0, 0)))     # scale/bias

    return pl.pallas_call(
        kernel,
        out_shape=jax.ShapeDtypeStruct((B, n_actions), jnp.float32),
        grid=grid,
        in_specs=in_specs,
        out_specs=pl.BlockSpec((bb, n_actions), lambda i: (i, 0)),
        compiler_params=pltpu.CompilerParams(
            dimension_semantics=("parallel",)),
    )(state, *ws, sb_pack)


# ----------------------------------------------------------------------------
# Parameter init (mirrors nn.Linear / nn.BatchNorm1d)
# ----------------------------------------------------------------------------
def init_params(input_dims, n_actions, key):
    """nn.Linear init U(-1/sqrt(fan_in), +1/sqrt(fan_in)); BN stats perturbed
    away from defaults so the BN-fold path is exercised numerically."""
    dims = [input_dims, 2048, 1024, 512, 256, 128, n_actions]
    params = []
    for i in range(len(dims) - 1):
        fan_in, fan_out = dims[i], dims[i + 1]
        key, kw, kb, kg, kbt, km, kv = jax.random.split(key, 7)
        bound = 1.0 / jnp.sqrt(fan_in)
        w = jax.random.uniform(kw, (fan_in, fan_out), jnp.float32, -bound, bound)
        b = jax.random.uniform(kb, (1, fan_out), jnp.float32, -bound, bound)
        has_bn = i < 5  # fc6 has no BatchNorm
        if has_bn:
            gamma = 1.0 + 0.1 * jax.random.normal(kg, (1, fan_out), jnp.float32)
            beta = 0.1 * jax.random.normal(kbt, (1, fan_out), jnp.float32)
            running_mean = 0.1 * jax.random.normal(km, (1, fan_out), jnp.float32)
            running_var = jax.random.uniform(kv, (1, fan_out), jnp.float32, 0.5, 1.5)
            bn = (gamma, beta, running_mean, running_var)
        else:
            bn = None
        params.append((w, b, bn))
    return params


# ----------------------------------------------------------------------------
# References
# ----------------------------------------------------------------------------
def reference_forward_exact(state, params):
    """Pure-JAX, full-f32 PyTorch eval-mode semantics (unfolded BN, no quant)."""
    B = state.shape[0]
    x = state
    n = len(params)
    for i, (w, b, bn) in enumerate(params):
        y = x @ w + b
        if (bn is not None) and (B > 1):
            gamma, beta, mean, var = bn
            y = (y - mean) / jnp.sqrt(var + BN_EPS) * gamma + beta
        if i < n - 1:
            y = jnp.where(y > 0, y, LEAKY_SLOPE * y)
        x = y
    return jax.nn.softmax(x, axis=-1)


def reference_forward_kernel_numerics(state, params):
    """Pure-JAX reference with the SAME numerics as the kernel (BN folded,
    int8/f32 weights, bf16 activations, f32 accumulation)."""
    ws, sb_pack, quantized, col_offsets = _prepare_params(params, state.shape[0])
    x = state.astype(jnp.float32)
    n = len(ws)
    for i in range(n):
        n_out = ws[i].shape[1]
        off = col_offsets[i]
        scale = sb_pack[0:1, off:off + n_out]
        bias = sb_pack[1:2, off:off + n_out]
        if quantized[i]:
            w_bf16 = ws[i].astype(jnp.float32).astype(jnp.bfloat16)
            y = jnp.dot(x.astype(jnp.bfloat16), w_bf16,
                        preferred_element_type=jnp.float32)
        else:
            y = jnp.dot(x.astype(jnp.float32), ws[i],
                        preferred_element_type=jnp.float32)
        y = y * scale + bias
        if i < n - 1:
            y = jnp.where(y > 0, y, LEAKY_SLOPE * y)
            x = y.astype(jnp.bfloat16)
        else:
            x = y
    z = x - jnp.max(x, axis=-1, keepdims=True)
    e = jnp.exp(z)
    return e / jnp.sum(e, axis=-1, keepdims=True)


if __name__ == "__main__":
    key = jax.random.PRNGKey(0)
    kp, kx = jax.random.split(key)

    input_dims = 32
    n_actions = 3
    batch = 8  # > 1 so the BatchNorm branches are exercised

    params = init_params(input_dims, n_actions, kp)
    state = jax.random.normal(kx, (batch, input_dims), jnp.float32)

    probs = actor_forward(state, params)
    probs = jax.block_until_ready(probs)

    assert probs.shape == (batch, n_actions), probs.shape

    # Tight check vs. a reference using identical numerics (validates lowering).
    ref_same = reference_forward_kernel_numerics(state, params)
    assert jnp.allclose(probs, ref_same, atol=1e-4, rtol=1e-4), (probs, ref_same)

    # Loose check vs. exact f32 PyTorch eval semantics (validates BN fold +
    # int8 per-channel quantization of the middle layers).
    ref_exact = reference_forward_exact(state, params)
    assert jnp.allclose(probs, ref_exact, atol=3e-2, rtol=3e-2), (probs, ref_exact)

    # Probabilities sum to 1.
    assert jnp.allclose(jnp.sum(probs, axis=-1), 1.0, atol=1e-5)

    print("KERNEL_OK")
</pallas_src>

<mosaic_0001>
module attributes {stable_mosaic.version = 11 : i64} {
  func.func @_actor_mlp_kernel(%arg0: i32, %arg1: memref<8x32xf32, #tpu.memory_space<vmem>>, %arg2: memref<32x2048xf32, #tpu.memory_space<vmem>>, %arg3: memref<2048x1024xi8, #tpu.memory_space<vmem>>, %arg4: memref<1024x512xi8, #tpu.memory_space<vmem>>, %arg5: memref<512x256xi8, #tpu.memory_space<vmem>>, %arg6: memref<256x128xi8, #tpu.memory_space<vmem>>, %arg7: memref<128x3xf32, #tpu.memory_space<vmem>>, %arg8: memref<2x4096xf32, #tpu.memory_space<vmem>>, %arg9: memref<8x3xf32, #tpu.memory_space<vmem>>) attributes {dimension_semantics = [#tpu.dimension_semantics<parallel>], iteration_bounds = array<i64: 1>, scalar_prefetch = 0 : i64, scratch_operands = 0 : i64, tpu.core_type = #tpu.core_type<tc>, window_params = [{transform_indices = @transform_0, window_bounds = array<i64: 8, 32>}, {pipeline_mode = #tpu.pipeline_mode<synchronous>, transform_indices = @transform_1, window_bounds = array<i64: 32, 2048>}, {pipeline_mode = #tpu.pipeline_mode<synchronous>, transform_indices = @transform_2, window_bounds = array<i64: 2048, 1024>}, {pipeline_mode = #tpu.pipeline_mode<synchronous>, transform_indices = @transform_3, window_bounds = array<i64: 1024, 512>}, {pipeline_mode = #tpu.pipeline_mode<synchronous>, transform_indices = @transform_4, window_bounds = array<i64: 512, 256>}, {pipeline_mode = #tpu.pipeline_mode<synchronous>, transform_indices = @transform_5, window_bounds = array<i64: 256, 128>}, {pipeline_mode = #tpu.pipeline_mode<synchronous>, transform_indices = @transform_6, window_bounds = array<i64: 128, 3>}, {pipeline_mode = #tpu.pipeline_mode<synchronous>, transform_indices = @transform_7, window_bounds = array<i64: 2, 4096>}, {transform_indices = @transform_8, window_bounds = array<i64: 8, 3>}]} {
    %c0 = arith.constant 0 : index
    %c0_0 = arith.constant 0 : index
    %0 = vector.load %arg1[%c0, %c0_0] : memref<8x32xf32, #tpu.memory_space<vmem>>, vector<8x32xf32>
    %c0_1 = arith.constant 0 : index
    %c0_2 = arith.constant 0 : index
    %1 = vector.load %arg2[%c0_1, %c0_2] : memref<32x2048xf32, #tpu.memory_space<vmem>>, vector<32x2048xf32>
    %cst = arith.constant dense<0.000000e+00> : vector<8x2048xf32>
    %2 = tpu.matmul %0, %1, %cst {dimension_numbers = #tpu.dot_dimension_numbers<[1], [0], [0], [1], [0, 0, 1, 1], [], []>} : vector<8x32xf32>, vector<32x2048xf32>, vector<8x2048xf32> -> vector<8x2048xf32>
    %c0_3 = arith.constant 0 : index
    %c0_4 = arith.constant 0 : index
    %3 = vector.load %arg8[%c0_3, %c0_4] : memref<2x4096xf32, #tpu.memory_space<vmem>>, vector<1x2048xf32>
    %c1 = arith.constant 1 : index
    %c0_5 = arith.constant 0 : index
    %4 = vector.load %arg8[%c1, %c0_5] : memref<2x4096xf32, #tpu.memory_space<vmem>>, vector<1x2048xf32>
    %5 = vector.broadcast %3 : vector<1x2048xf32> to vector<8x2048xf32>
    %6 = arith.mulf %2, %5 : vector<8x2048xf32>
    %7 = vector.broadcast %4 : vector<1x2048xf32> to vector<8x2048xf32>
    %8 = arith.addf %6, %7 : vector<8x2048xf32>
    %cst_6 = arith.constant 0.000000e+00 : f32
    %9 = vector.broadcast %cst_6 : f32 to vector<8x2048xf32>
    %10 = arith.cmpf ogt, %8, %9 : vector<8x2048xf32>
    %cst_7 = arith.constant 0.00999999977 : f32
    %11 = vector.broadcast %cst_7 : f32 to vector<8x2048xf32>
    %12 = arith.mulf %11, %8 : vector<8x2048xf32>
    %13 = arith.select %10, %8, %12 : vector<8x2048xi1>, vector<8x2048xf32>
    %14 = arith.truncf %13 : vector<8x2048xf32> to vector<8x2048xbf16>
    %c0_8 = arith.constant 0 : index
    %c0_9 = arith.constant 0 : index
    %15 = vector.load %arg3[%c0_8, %c0_9] : memref<2048x1024xi8, #tpu.memory_space<vmem>>, vector<2048x1024xi8>
    %16 = arith.sitofp %15 : vector<2048x1024xi8> to vector<2048x1024xf32>
    %17 = arith.truncf %16 : vector<2048x1024xf32> to vector<2048x1024xbf16>
    %cst_10 = arith.constant dense<0.000000e+00> : vector<8x1024xf32>
    %18 = tpu.matmul %14, %17, %cst_10 {dimension_numbers = #tpu.dot_dimension_numbers<[1], [0], [0], [1], [0, 0, 1, 1], [], []>} : vector<8x2048xbf16>, vector<2048x1024xbf16>, vector<8x1024xf32> -> vector<8x1024xf32>
    %c0_11 = arith.constant 0 : index
    %c2048 = arith.constant 2048 : index
    %19 = vector.load %arg8[%c0_11, %c2048] : memref<2x4096xf32, #tpu.memory_space<vmem>>, vector<1x1024xf32>
    %c1_12 = arith.constant 1 : index
    %c2048_13 = arith.constant 2048 : index
    %20 = vector.load %arg8[%c1_12, %c2048_13] : memref<2x4096xf32, #tpu.memory_space<vmem>>, vector<1x1024xf32>
    %21 = vector.broadcast %19 : vector<1x1024xf32> to vector<8x1024xf32>
    %22 = arith.mulf %18, %21 : vector<8x1024xf32>
    %23 = vector.broadcast %20 : vector<1x1024xf32> to vector<8x1024xf32>
    %24 = arith.addf %22, %23 : vector<8x1024xf32>
    %cst_14 = arith.constant 0.000000e+00 : f32
    %25 = vector.broadcast %cst_14 : f32 to vector<8x1024xf32>
    %26 = arith.cmpf ogt, %24, %25 : vector<8x1024xf32>
    %cst_15 = arith.constant 0.00999999977 : f32
    %27 = vector.broadcast %cst_15 : f32 to vector<8x1024xf32>
    %28 = arith.mulf %27, %24 : vector<8x1024xf32>
    %29 = arith.select %26, %24, %28 : vector<8x1024xi1>, vector<8x1024xf32>
    %30 = arith.truncf %29 : vector<8x1024xf32> to vector<8x1024xbf16>
    %c0_16 = arith.constant 0 : index
    %c0_17 = arith.constant 0 : index
    %31 = vector.load %arg4[%c0_16, %c0_17] : memref<1024x512xi8, #tpu.memory_space<vmem>>, vector<1024x512xi8>
    %32 = arith.sitofp %31 : vector<1024x512xi8> to vector<1024x512xf32>
    %33 = arith.truncf %32 : vector<1024x512xf32> to vector<1024x512xbf16>
    %cst_18 = arith.constant dense<0.000000e+00> : vector<8x512xf32>
    %34 = tpu.matmul %30, %33, %cst_18 {dimension_numbers = #tpu.dot_dimension_numbers<[1], [0], [0], [1], [0, 0, 1, 1], [], []>} : vector<8x1024xbf16>, vector<1024x512xbf16>, vector<8x512xf32> -> vector<8x512xf32>
    %c0_19 = arith.constant 0 : index
    %c3072 = arith.constant 3072 : index
    %35 = vector.load %arg8[%c0_19, %c3072] : memref<2x4096xf32, #tpu.memory_space<vmem>>, vector<1x512xf32>
    %c1_20 = arith.constant 1 : index
    %c3072_21 = arith.constant 3072 : index
    %36 = vector.load %arg8[%c1_20, %c3072_21] : memref<2x4096xf32, #tpu.memory_space<vmem>>, vector<1x512xf32>
    %37 = vector.broadcast %35 : vector<1x512xf32> to vector<8x512xf32>
    %38 = arith.mulf %34, %37 : vector<8x512xf32>
    %39 = vector.broadcast %36 : vector<1x512xf32> to vector<8x512xf32>
    %40 = arith.addf %38, %39 : vector<8x512xf32>
    %cst_22 = arith.constant 0.000000e+00 : f32
    %41 = vector.broadcast %cst_22 : f32 to vector<8x512xf32>
    %42 = arith.cmpf ogt, %40, %41 : vector<8x512xf32>
    %cst_23 = arith.constant 0.00999999977 : f32
    %43 = vector.broadcast %cst_23 : f32 to vector<8x512xf32>
    %44 = arith.mulf %43, %40 : vector<8x512xf32>
    %45 = arith.select %42, %40, %44 : vector<8x512xi1>, vector<8x512xf32>
    %46 = arith.truncf %45 : vector<8x512xf32> to vector<8x512xbf16>
    %c0_24 = arith.constant 0 : index
    %c0_25 = arith.constant 0 : index
    %47 = vector.load %arg5[%c0_24, %c0_25] : memref<512x256xi8, #tpu.memory_space<vmem>>, vector<512x256xi8>
    %48 = arith.sitofp %47 : vector<512x256xi8> to vector<512x256xf32>
    %49 = arith.truncf %48 : vector<512x256xf32> to vector<512x256xbf16>
    %cst_26 = arith.constant dense<0.000000e+00> : vector<8x256xf32>
    %50 = tpu.matmul %46, %49, %cst_26 {dimension_numbers = #tpu.dot_dimension_numbers<[1], [0], [0], [1], [0, 0, 1, 1], [], []>} : vector<8x512xbf16>, vector<512x256xbf16>, vector<8x256xf32> -> vector<8x256xf32>
    %c0_27 = arith.constant 0 : index
    %c3584 = arith.constant 3584 : index
    %51 = vector.load %arg8[%c0_27, %c3584] : memref<2x4096xf32, #tpu.memory_space<vmem>>, vector<1x256xf32>
    %c1_28 = arith.constant 1 : index
    %c3584_29 = arith.constant 3584 : index
    %52 = vector.load %arg8[%c1_28, %c3584_29] : memref<2x4096xf32, #tpu.memory_space<vmem>>, vector<1x256xf32>
    %53 = vector.broadcast %51 : vector<1x256xf32> to vector<8x256xf32>
    %54 = arith.mulf %50, %53 : vector<8x256xf32>
    %55 = vector.broadcast %52 : vector<1x256xf32> to vector<8x256xf32>
    %56 = arith.addf %54, %55 : vector<8x256xf32>
    %cst_30 = arith.constant 0.000000e+00 : f32
    %57 = vector.broadcast %cst_30 : f32 to vector<8x256xf32>
    %58 = arith.cmpf ogt, %56, %57 : vector<8x256xf32>
    %cst_31 = arith.constant 0.00999999977 : f32
    %59 = vector.broadcast %cst_31 : f32 to vector<8x256xf32>
    %60 = arith.mulf %59, %56 : vector<8x256xf32>
    %61 = arith.select %58, %56, %60 : vector<8x256xi1>, vector<8x256xf32>
    %62 = arith.truncf %61 : vector<8x256xf32> to vector<8x256xbf16>
    %c0_32 = arith.constant 0 : index
    %c0_33 = arith.constant 0 : index
    %63 = vector.load %arg6[%c0_32, %c0_33] : memref<256x128xi8, #tpu.memory_space<vmem>>, vector<256x128xi8>
    %64 = arith.sitofp %63 : vector<256x128xi8> to vector<256x128xf32>
    %65 = arith.truncf %64 : vector<256x128xf32> to vector<256x128xbf16>
    %cst_34 = arith.constant dense<0.000000e+00> : vector<8x128xf32>
    %66 = tpu.matmul %62, %65, %cst_34 {dimension_numbers = #tpu.dot_dimension_numbers<[1], [0], [0], [1], [0, 0, 1, 1], [], []>} : vector<8x256xbf16>, vector<256x128xbf16>, vector<8x128xf32> -> vector<8x128xf32>
    %c0_35 = arith.constant 0 : index
    %c3840 = arith.constant 3840 : index
    %67 = vector.load %arg8[%c0_35, %c3840] : memref<2x4096xf32, #tpu.memory_space<vmem>>, vector<1x128xf32>
    %c1_36 = arith.constant 1 : index
    %c3840_37 = arith.constant 3840 : index
    %68 = vector.load %arg8[%c1_36, %c3840_37] : memref<2x4096xf32, #tpu.memory_space<vmem>>, vector<1x128xf32>
    %69 = vector.broadcast %67 : vector<1x128xf32> to vector<8x128xf32>
    %70 = arith.mulf %66, %69 : vector<8x128xf32>
    %71 = vector.broadcast %68 : vector<1x128xf32> to vector<8x128xf32>
    %72 = arith.addf %70, %71 : vector<8x128xf32>
    %cst_38 = arith.constant 0.000000e+00 : f32
    %73 = vector.broadcast %cst_38 : f32 to vector<8x128xf32>
    %74 = arith.cmpf ogt, %72, %73 : vector<8x128xf32>
    %cst_39 = arith.constant 0.00999999977 : f32
    %75 = vector.broadcast %cst_39 : f32 to vector<8x128xf32>
    %76 = arith.mulf %75, %72 : vector<8x128xf32>
    %77 = arith.select %74, %72, %76 : vector<8x128xi1>, vector<8x128xf32>
    %78 = arith.truncf %77 : vector<8x128xf32> to vector<8x128xbf16>
    %c0_40 = arith.constant 0 : index
    %c0_41 = arith.constant 0 : index
    %79 = vector.load %arg7[%c0_40, %c0_41] : memref<128x3xf32, #tpu.memory_space<vmem>>, vector<128x3xf32>
    %80 = arith.extf %78 : vector<8x128xbf16> to vector<8x128xf32>
    %cst_42 = arith.constant dense<0.000000e+00> : vector<8x3xf32>
    %81 = tpu.matmul %80, %79, %cst_42 {dimension_numbers = #tpu.dot_dimension_numbers<[1], [0], [0], [1], [0, 0, 1, 1], [], []>} : vector<8x128xf32>, vector<128x3xf32>, vector<8x3xf32> -> vector<8x3xf32>
    %c0_43 = arith.constant 0 : index
    %c3968 = arith.constant 3968 : index
    %82 = vector.load %arg8[%c0_43, %c3968] : memref<2x4096xf32, #tpu.memory_space<vmem>>, vector<1x3xf32>
    %c1_44 = arith.constant 1 : index
    %c3968_45 = arith.constant 3968 : index
    %83 = vector.load %arg8[%c1_44, %c3968_45] : memref<2x4096xf32, #tpu.memory_space<vmem>>, vector<1x3xf32>
    %84 = vector.broadcast %82 : vector<1x3xf32> to vector<8x3xf32>
    %85 = arith.mulf %81, %84 : vector<8x3xf32>
    %86 = vector.broadcast %83 : vector<1x3xf32> to vector<8x3xf32>
    %87 = arith.addf %85, %86 : vector<8x3xf32>
    %cst_46 = arith.constant dense<0xFF800000> : vector<8xf32>
    %88 = vector.multi_reduction <maximumf>, %87, %cst_46 [1] : vector<8x3xf32> to vector<8xf32>
    %89 = vector.shape_cast %88 : vector<8xf32> to vector<8x1xf32>
    %90 = vector.broadcast %89 : vector<8x1xf32> to vector<8x3xf32>
    %91 = arith.subf %87, %90 : vector<8x3xf32>
    %92 = math.exp %91 : vector<8x3xf32>
    %cst_47 = arith.constant dense<0.000000e+00> : vector<8xf32>
    %93 = vector.multi_reduction <add>, %92, %cst_47 [1] : vector<8x3xf32> to vector<8xf32>
    %94 = vector.shape_cast %93 : vector<8xf32> to vector<8x1xf32>
    %95 = vector.broadcast %94 : vector<8x1xf32> to vector<8x3xf32>
    %96 = arith.divf %92, %95 : vector<8x3xf32>
    %c0_48 = arith.constant 0 : index
    %c0_49 = arith.constant 0 : index
    %97 = vector.load %arg9[%c0_48, %c0_49] : memref<8x3xf32, #tpu.memory_space<vmem>>, vector<8x3xf32>
    tpu.vector_store %arg9[%c0_48, %c0_49], %96 {strides = array<i32>} : memref<8x3xf32, #tpu.memory_space<vmem>>, vector<8x3xf32>,
    return
  }
  func.func @transform_0(%arg0: i32) -> (i32, i32) {
    %c0_i32 = arith.constant 0 : i32
    %c0_i32_0 = arith.constant 0 : i32
    return %arg0, %c0_i32 : i32, i32
  }
  func.func @transform_1(%arg0: i32) -> (i32, i32) {
    %c0_i32 = arith.constant 0 : i32
    %c0_i32_0 = arith.constant 0 : i32
    %c0_i32_1 = arith.constant 0 : i32
    return %c0_i32, %c0_i32_0 : i32, i32
  }
  func.func @transform_2(%arg0: i32) -> (i32, i32) {
    %c0_i32 = arith.constant 0 : i32
    %c0_i32_0 = arith.constant 0 : i32
    %c0_i32_1 = arith.constant 0 : i32
    return %c0_i32, %c0_i32_0 : i32, i32
  }
  func.func @transform_3(%arg0: i32) -> (i32, i32) {
    %c0_i32 = arith.constant 0 : i32
    %c0_i32_0 = arith.constant 0 : i32
    %c0_i32_1 = arith.constant 0 : i32
    return %c0_i32, %c0_i32_0 : i32, i32
  }
  func.func @transform_4(%arg0: i32) -> (i32, i32) {
    %c0_i32 = arith.constant 0 : i32
    %c0_i32_0 = arith.constant 0 : i32
    %c0_i32_1 = arith.constant 0 : i32
    return %c0_i32, %c0_i32_0 : i32, i32
  }
  func.func @transform_5(%arg0: i32) -> (i32, i32) {
    %c0_i32 = arith.constant 0 : i32
    %c0_i32_0 = arith.constant 0 : i32
    %c0_i32_1 = arith.constant 0 : i32
    return %c0_i32, %c0_i32_0 : i32, i32
  }
  func.func @transform_6(%arg0: i32) -> (i32, i32) {
    %c0_i32 = arith.constant 0 : i32
    %c0_i32_0 = arith.constant 0 : i32
    %c0_i32_1 = arith.constant 0 : i32
    return %c0_i32, %c0_i32_0 : i32, i32
  }
  func.func @transform_7(%arg0: i32) -> (i32, i32) {
    %c0_i32 = arith.constant 0 : i32
    %c0_i32_0 = arith.constant 0 : i32
    %c0_i32_1 = arith.constant 0 : i32
    return %c0_i32, %c0_i32_0 : i32, i32
  }
  func.func @transform_8(%arg0: i32) -> (i32, i32) {
    %c0_i32 = arith.constant 0 : i32
    %c0_i32_0 = arith.constant 0 : i32
    return %arg0, %c0_i32 : i32, i32
  }
}

</mosaic_0001>

<bundles_post_ra>
// kernel: tpu_custom_call.1
= control target key start
LH: loop header
LB: loop body
LE: loop exit
PB: predicated region body
PF: predicated region fallthrough
CT: control target
= control target key end

     0   :  { %13 = vsyncpa [#allocation3], 0  ;;  %s6272_s0 = inlined_call_operand.hbm [shape: f32[8,32], index: 0, kind: input, shape index: {}]   ;;  %s6273_s1 = inlined_call_operand.hbm [shape: f32[32,2048], index: 1, kind: input, shape index: {}]   ;;  %s6274_s2 = inlined_call_operand.hbm [shape: s8[2048,1024], index: 2, kind: input, shape index: {}]   ;;  %s6275_s3 = inlined_call_operand.hbm [shape: s8[1024,512], index: 3, kind: input, shape index: {}]   ;;  %s6276_s4 = inlined_call_operand.hbm [shape: s8[512,256], index: 4, kind: input, shape index: {}]   ;;  %s6277_s5 = inlined_call_operand.hbm [shape: s8[256,128], index: 5, kind: input, shape index: {}]   ;;  %s6278_s6 = inlined_call_operand.vmem [shape: f32[128,3], index: 6, kind: input, shape index: {}]   ;;  %s6279_s7 = inlined_call_operand.hbm [shape: f32[2,4096], index: 7, kind: input, shape index: {}]   ;;  %s6280_s8 = inlined_call_operand.vmem [shape: f32[8,3], index: 8, kind: output, shape index: {}]  }
   0x1   :  { %14 = vsyncpa [#allocation5], 0 }
   0x2   :  { %15 = vsyncpa [#allocation8], 0 }
   0x3   :  { %16 = vsyncpa [#allocation11], 0  ;;  %s5710_s27 = smov [#allocation4]   ;;  %s5548_s9 = scalar_lea.hbm %s6273_s1, 8192 }
   0x4   :  { %s32_s28 = sshll.u32 %s5710_s27, 4  ;;  %p5549_p0 = scmp.ne.s32.totalorder %s6273_s1, %s5548_s9  ;;  %s33_s28 = int_to_ptr.vmem [resolvable:$true] %s32_s28 }
   0x5   :  { %p5552_p1 = scmp.lt.u32.totalorder %s5548_s9, %s6273_s1 }
   0x7   :  { %p5554_p2 = pnand %p5552_p1, %p5549_p0 }
   0x9   :  { %5557 = shalt.err (!%p5554_p2)
}
   0xa   :  { %s5558_s14 = scalar_lea.vmem %s33_s28, 8192  ;;  %p5563_p4 = scmp.lt.s32.totalorder %s33_s28, %s33_s28 }
   0xb   :  { %p5559_p3 = scmp.ne.s32.totalorder %s33_s28, %s5558_s14  ;;  %p5564_p5 = scmp.lt.s32.totalorder %s5558_s14, %s5558_s14 }
   0xd   :  { %p5565_p6 = por %p5564_p5, %p5563_p4 }
   0xf   :  { %p5566_p7 = pnand %p5565_p6, %p5559_p3 }
  0x11   :  { %5569 = shalt.err (!%p5566_p7)
}
  0x12   :  { %s5711_s15 = smov 2048   ;;  %s5712_s16 = smov 128  }
  0x13   :  { %38 = dma.hbm_to_vmem [thread:$0]  %s6273_s1, 8192, %s33_s28, [#allocation5], %s5711_s15, %s5711_s15, %s5712_s16  }
  0x14   :  { %s5713_s19 = smov [#allocation7]   ;;  %s5570_s23 = scalar_lea.hbm %s6275_s3, 16384 }
  0x15   :  { %s56_s20 = sshll.u32 %s5713_s19, 4  ;;  %p5571_p8 = scmp.ne.s32.totalorder %s6275_s3, %s5570_s23  ;;  %s57_s20 = int_to_ptr.vmem [resolvable:$true] %s56_s20 }
  0x16   :  { %p5574_p9 = scmp.lt.u32.totalorder %s5570_s23, %s6275_s3 }
  0x18   :  { %p5576_p10 = pnand %p5574_p9, %p5571_p8 }
  0x1a   :  { %5579 = shalt.err (!%p5576_p10)
}
  0x1b   :  { %s5580_s29 = scalar_lea.vmem %s57_s20, 16384  ;;  %p5585_p12 = scmp.lt.s32.totalorder %s57_s20, %s57_s20 }
  0x1c   :  { %p5581_p11 = scmp.ne.s32.totalorder %s57_s20, %s5580_s29  ;;  %p5586_p13 = scmp.lt.s32.totalorder %s5580_s29, %s5580_s29 }
  0x1e   :  { %p5587_p0 = por %p5586_p13, %p5585_p12 }
  0x20   :  { %p5588_p1 = pnand %p5587_p0, %p5581_p11 }
  0x22   :  { %5591 = shalt.err (!%p5588_p1)
}
  0x23   :  { %s5714_s1 = smov 512   ;;  %s5715_s28 = smov 32  }
  0x24   :  { %62 = dma.hbm_to_vmem [thread:$0]  %s6275_s3, 16384, %s57_s20, [#allocation8], %s5714_s1, %s5714_s1, %s5715_s28  }
  0x25   :  { %s5716_s10 = smov [#allocation10]   ;;  %s5717_s12 = smov [#allocation2]  }
  0x26   :  { %s80_s11 = sshll.u32 %s5716_s10, 4  ;;  %s23_s13 = sshll.u32 %s5717_s12, 4  ;;  %s81_s11 = int_to_ptr.vmem [resolvable:$true] %s80_s11  ;;  %s24_s13 = int_to_ptr.vmem [resolvable:$true] %s23_s13 }
  0x27   :  { %s5592_s17 = scalar_lea.hbm %s6277_s5, 1024 }
  0x28   :  { %p5593_p2 = scmp.ne.s32.totalorder %s6277_s5, %s5592_s17  ;;  %p5596_p3 = scmp.lt.u32.totalorder %s5592_s17, %s6277_s5 }
  0x2a   :  { %p5598_p4 = pnand %p5596_p3, %p5593_p2 }
  0x2c   :  { %5601 = shalt.err (!%p5598_p4)
}
  0x2d   :  { %s5602_s3 = scalar_lea.vmem %s81_s11, 1024  ;;  %p5607_p6 = scmp.lt.s32.totalorder %s81_s11, %s81_s11 }
  0x2e   :  { %p5603_p5 = scmp.ne.s32.totalorder %s81_s11, %s5602_s3  ;;  %p5608_p7 = scmp.lt.s32.totalorder %s5602_s3, %s5602_s3 }
  0x30   :  { %p5609_p8 = por %p5608_p7, %p5607_p6 }
  0x32   :  { %p5610_p9 = pnand %p5609_p8, %p5603_p5 }
  0x34   :  { %5613 = shalt.err (!%p5610_p9)
}
  0x35   :  { %s5718_s20 = smov 8   ;;  %s5614_s27 = scalar_lea.hbm %s6272_s0, 128 }
  0x36   :  { %86 = dma.hbm_to_vmem [thread:$0]  %s6277_s5, 1024, %s81_s11, [#allocation11], %s5712_s16, %s5712_s16, %s5718_s20  }
  0x37   :  { %p5615_p10 = scmp.ne.s32.totalorder %s6272_s0, %s5614_s27  ;;  %p5618_p11 = scmp.lt.u32.totalorder %s5614_s27, %s6272_s0 }
  0x39   :  { %p5620_p12 = pnand %p5618_p11, %p5615_p10 }
  0x3b   :  { %5623 = shalt.err (!%p5620_p12)
}
  0x3c   :  { %s5624_s9 = scalar_lea.vmem %s24_s13, 128  ;;  %p5629_p0 = scmp.lt.s32.totalorder %s24_s13, %s24_s13 }
  0x3d   :  { %p5625_p13 = scmp.ne.s32.totalorder %s24_s13, %s5624_s9  ;;  %p5630_p1 = scmp.lt.s32.totalorder %s5624_s9, %s5624_s9 }
  0x3f   :  { %p5631_p2 = por %p5630_p1, %p5629_p0 }
  0x41   :  { %p5632_p3 = pnand %p5631_p2, %p5625_p13 }
  0x43   :  { %5635 = shalt.err (!%p5632_p3)
}
  0x44   :  { %26 = dma.hbm_to_vmem [thread:$0]  %s6272_s0, 128, %s24_s13, [#allocation3]  }
  0x45   :  { %s5719_s10 = smov [#allocation6]   ;;  %s5636_s15 = scalar_lea.hbm %s6274_s2, 65536 }
  0x46   :  { %s44_s11 = sshll.u32 %s5719_s10, 4  ;;  %p5637_p4 = scmp.ne.s32.totalorder %s6274_s2, %s5636_s15  ;;  %s45_s11 = int_to_ptr.vmem [resolvable:$true] %s44_s11 }
  0x47   :  { %p5640_p5 = scmp.lt.u32.totalorder %s5636_s15, %s6274_s2 }
  0x49   :  { %p5642_p6 = pnand %p5640_p5, %p5637_p4 }
  0x4b   :  { %5645 = shalt.err (!%p5642_p6)
}
  0x4c   :  { %s5646_s22 = scalar_lea.vmem %s45_s11, 65536  ;;  %p5651_p8 = scmp.lt.s32.totalorder %s45_s11, %s45_s11 }
  0x4d   :  { %p5647_p7 = scmp.ne.s32.totalorder %s45_s11, %s5646_s22  ;;  %p5652_p9 = scmp.lt.s32.totalorder %s5646_s22, %s5646_s22 }
  0x4f   :  { %p5653_p10 = por %p5652_p9, %p5651_p8 }
  0x51   :  { %p5654_p11 = pnand %p5653_p10, %p5647_p7 }
  0x53   :  { %5657 = shalt.err (!%p5654_p11)
}
  0x54   :  { %s5720_s0 = smov 1024   ;;  %s5721_s13 = smov 64  }
  0x55   :  { %50 = dma.hbm_to_vmem [thread:$0]  %s6274_s2, 65536, %s45_s11, [#allocation5], %s5720_s0, %s5720_s0, %s5721_s13  }
  0x56   :  { %s5722_s23 = smov [#allocation9]   ;;  %s5658_s27 = scalar_lea.hbm %s6276_s4, 4096 }
  0x57   :  { %s68_s24 = sshll.u32 %s5722_s23, 4  ;;  %p5659_p12 = scmp.ne.s32.totalorder %s6276_s4, %s5658_s27  ;;  %s69_s24 = int_to_ptr.vmem [resolvable:$true] %s68_s24 }
  0x58   :  { %p5662_p13 = scmp.lt.u32.totalorder %s5658_s27, %s6276_s4 }
  0x5a   :  { %p5664_p0 = pnand %p5662_p13, %p5659_p12 }
  0x5c   :  { %5667 = shalt.err (!%p5664_p0)
}
  0x5d   :  { %s5668_s9 = scalar_lea.vmem %s69_s24, 4096  ;;  %p5673_p2 = scmp.lt.s32.totalorder %s69_s24, %s69_s24 }
  0x5e   :  { %p5669_p1 = scmp.ne.s32.totalorder %s69_s24, %s5668_s9  ;;  %p5674_p3 = scmp.lt.s32.totalorder %s5668_s9, %s5668_s9 }
  0x60   :  { %p5675_p4 = por %p5674_p3, %p5673_p2 }
  0x62   :  { %p5676_p5 = pnand %p5675_p4, %p5669_p1 }
  0x64   :  { %5679 = shalt.err (!%p5676_p5)
}
  0x65   :  { %s5723_s2 = smov 256   ;;  %s5724_s5 = smov 16  }
  0x66   :  { %74 = dma.hbm_to_vmem [thread:$0]  %s6276_s4, 4096, %s69_s24, [#allocation8], %s5723_s2, %s5723_s2, %s5724_s5  }
  0x67   :  { %s5725_s11 = smov [#allocation12]   ;;  %s5680_s17 = scalar_lea.hbm %s6279_s7, 1024 }
  0x68   :  { %s95_s12 = sshll.u32 %s5725_s11, 4  ;;  %p5681_p6 = scmp.ne.s32.totalorder %s6279_s7, %s5680_s17  ;;  %s96_s12 = int_to_ptr.vmem [resolvable:$true] %s95_s12 }
  0x69   :  { %p5684_p7 = scmp.lt.u32.totalorder %s5680_s17, %s6279_s7 }
  0x6b   :  { %p5686_p8 = pnand %p5684_p7, %p5681_p6 }
  0x6d   :  { %5689 = shalt.err (!%p5686_p8)
}
  0x6e   :  { %s5690_s0 = scalar_lea.vmem %s96_s12, 1024  ;;  %p5695_p10 = scmp.lt.s32.totalorder %s96_s12, %s96_s12 }
  0x6f   :  { %p5691_p9 = scmp.ne.s32.totalorder %s96_s12, %s5690_s0  ;;  %p5696_p11 = scmp.lt.s32.totalorder %s5690_s0, %s5690_s0 }
  0x71   :  { %p5697_p12 = por %p5696_p11, %p5695_p10 }
  0x73   :  { %p5698_p13 = pnand %p5697_p12, %p5691_p9 }
  0x75   :  { %5701 = shalt.err (!%p5698_p13)
}
  0x76   :  { %98 = dma.hbm_to_vmem [thread:$0]  %s6279_s7, 1024, %s96_s12, [#allocation11]  }
  0x77   :  { %5702 = dma.done.wait [#allocation3], 128  }
  0x78   :  { %5703 = vsyncadd [#allocation3], 4294967168 }
  0x79   :  { %5704 = dma.done.wait [#allocation5], 73728  }
  0x7a   :  { %5705 = vsyncadd [#allocation5], 4294893568 }
  0x7b   :  { %5706 = dma.done.wait [#allocation8], 20480  }
  0x7c   :  { %5707 = vsyncadd [#allocation8], 4294946816 }
  0x7d   :  { %5708 = dma.done.wait [#allocation11], 2048  }
  0x7e   :  { %5709 = vsyncadd [#allocation11], 4294965248  ;;  %v5726_v0 = vmov 0.0   ;;  %v123_v1 = vld [vmem:[#allocation4 + $0x8] sm:$0xff]  ;;  %v122_v3 = vld [vmem:[#allocation4] sm:$0xff]  ;;  %vm186_vm0 = vcmask 261120  }
  0x7f   :  { %254 = vmatprep.mubr.f32.mxu1 %v5726_v0  ;;  %v139_v2 = vld [vmem:[#allocation4 + $0x88] sm:$0xff]  ;;  %v138_v5 = vld [vmem:[#allocation4 + $0x80] sm:$0xff]  ;;  %v125_v12 = vld [vmem:[#allocation4 + $0x18] sm:$0xff] }
  0x80   :  { %v5291_v4 = vpack.c.bf16 %v139_v2, %v123_v1  ;;  %v155_v6 = vld [vmem:[#allocation4 + $0x108] sm:$0xff]  ;;  %v5293_v8 = vpack.c.bf16 %v138_v5, %v122_v3  ;;  %v154_v10 = vld [vmem:[#allocation4 + $0x100] sm:$0xff]  ;;  %v141_v13 = vld [vmem:[#allocation4 + $0x98] sm:$0xff] }
  0x81   :  { %v171_v7 = vld [vmem:[#allocation4 + $0x188] sm:$0xff]  ;;  %v170_v11 = vld [vmem:[#allocation4 + $0x180] sm:$0xff]  ;;  %v5299_v15 = vpack.c.bf16 %v141_v13, %v125_v12  ;;  %v124_v16 = vld [vmem:[#allocation4 + $0x10] sm:$0xff] }
  0x82   :  { %v5295_v9 = vpack.c.bf16 %v171_v7, %v155_v6  ;;  %5292 = vmatprep.subr.bf16.mxu1 %v5291_v4  ;;  %v5297_v14 = vpack.c.bf16 %v170_v11, %v154_v10  ;;  %v140_v17 = vld [vmem:[#allocation4 + $0x90] sm:$0xff]  ;;  %v157_v18 = vld [vmem:[#allocation4 + $0x118] sm:$0xff]  ;;  %v127_v25 = vld [vmem:[#allocation4 + $0x28] sm:$0xff] }
  0x83   :  { %5294 = vmatpush1.bf16.msra.mxu1 %v5293_v8  ;;  %v173_v19 = vld [vmem:[#allocation4 + $0x198] sm:$0xff]  ;;  %v5301_v21 = vpack.c.bf16 %v140_v17, %v124_v16  ;;  %v156_v23 = vld [vmem:[#allocation4 + $0x110] sm:$0xff]  ;;  %v143_v26 = vld [vmem:[#allocation4 + $0xa8] sm:$0xff] }
  0x84   :  { %5296 = vmatprep.subr.bf16.mxu1 %v5295_v9  ;;  %v5862_v20 = vld [vmem:[#allocation2] sm:$0xff]  ;;  %v5303_v22 = vpack.c.bf16 %v173_v19, %v157_v18  ;;  %v172_v24 = vld [vmem:[#allocation4 + $0x190] sm:$0xff]  ;;  %v5307_v28 = vpack.c.bf16 %v143_v26, %v127_v25  ;;  %v126_v29 = vld [vmem:[#allocation4 + $0x20] sm:$0xff] }
  0x85   :  { %v5305_v27 = vpack.c.bf16 %v172_v24, %v156_v23  ;;  %v142_v30 = vld [vmem:[#allocation4 + $0xa0] sm:$0xff]  ;;  %v159_v31 = vld [vmem:[#allocation4 + $0x128] sm:$0xff]  ;;  %v129_v37 = vld [vmem:[#allocation4 + $0x38] sm:$0xff] }
  0x86   :  { %v175_v32 = vld [vmem:[#allocation4 + $0x1a8] sm:$0xff]  ;;  %v5309_v33 = vpack.c.bf16 %v142_v30, %v126_v29  ;;  %v158_v35 = vld [vmem:[#allocation4 + $0x120] sm:$0xff]  ;;  %v145_v38 = vld [vmem:[#allocation4 + $0xb8] sm:$0xff] }
  0x87   :  { %5298 = vmatpush1.bf16.msra.mxu1 %v5297_v14  ;;  %v5311_v34 = vpack.c.bf16 %v175_v32, %v159_v31  ;;  %v174_v36 = vld [vmem:[#allocation4 + $0x1a0] sm:$0xff]  ;;  %v5315_v40 = vpack.c.bf16 %v145_v38, %v129_v37  ;;  %v128_v41 = vld [vmem:[#allocation4 + $0x30] sm:$0xff]  ;;  %v1026_v43 = vld [vmem:[#allocation6 + $0x8] sm:$0xff] }
  0x88   :  { %5300 = vmatprep.subr.bf16.mxu1 %v5299_v15  ;;  %v5313_v39 = vpack.c.bf16 %v174_v36, %v158_v35  ;;  %v144_v42 = vld [vmem:[#allocation4 + $0xb0] sm:$0xff]  ;;  %v161_v44 = vld [vmem:[#allocation4 + $0x138] sm:$0xff]  ;;  %v1538_v46 = vunpack.c.l.s8.bf16 %v1026_v43  ;;  %v1546_v47 = vunpack.c.h.s8.bf16 %v1026_v43  ;;  %v1025_v48 = vld [vmem:[#allocation6] sm:$0xff] }
  0x89   :  { %v177_v45 = vld [vmem:[#allocation4 + $0x1b8] sm:$0xff]  ;;  %v1537_v49 = vunpack.c.l.s8.bf16 %v1025_v48  ;;  %v1034_v50 = vld [vmem:[#allocation6 + $0x48] sm:$0xff]  ;;  %v5317_v51 = vpack.c.bf16 %v144_v42, %v128_v41  ;;  %v160_v53 = vld [vmem:[#allocation4 + $0x130] sm:$0xff]  ;;  %v1545_v55 = vunpack.c.h.s8.bf16 %v1025_v48 }
  0x8a   :  { %5205 = vmatmul.mubr.msk.f32.vlgmr.msra.gmra.mrb[0].mxu1 %vm186_vm0, %v5862_v20  ;;  %2561 = vmatprep.subr.bf16.mxu0 %v1538_v46  ;;  %v5319_v52 = vpack.c.bf16 %v177_v45, %v161_v44  ;;  %v176_v54 = vld [vmem:[#allocation4 + $0x1b0] sm:$0xff]  ;;  %v131_v56 = vld [vmem:[#allocation4 + $0x48] sm:$0xff]  ;;  %v1554_v58 = vunpack.c.l.s8.bf16 %v1034_v50  ;;  %v1033_v59 = vld [vmem:[#allocation6 + $0x40] sm:$0xff]  ;;  %v1562_v4 = vunpack.c.h.s8.bf16 %v1034_v50 }
  0x8b   :  { %5302 = vmatpush1.bf16.msra.mxu1 %v5301_v21  ;;  %325 = vmatprep.mubr.f32.mxu1 %v5726_v0  ;;  %v147_v57 = vld [vmem:[#allocation4 + $0xc8] sm:$0xff]  ;;  %v5321_v60 = vpack.c.bf16 %v176_v54, %v160_v53  ;;  %v130_v62 = vld [vmem:[#allocation4 + $0x40] sm:$0xff]  ;;  %v1553_v1 = vunpack.c.l.s8.bf16 %v1033_v59  ;;  %v1561_v10 = vunpack.c.h.s8.bf16 %v1033_v59  ;;  %v133_v11 = vld [vmem:[#allocation4 + $0x58] sm:$0xff] }
  0x8c   :  { %5304 = vmatprep.subr.bf16.mxu1 %v5303_v22  ;;  %2562 = vmatpush1.bf16.msra.mxu0 %v1537_v49  ;;  %v5323_v61 = vpack.c.bf16 %v147_v57, %v131_v56  ;;  %v146_v63 = vld [vmem:[#allocation4 + $0xc0] sm:$0xff]  ;;  %v163_v2 = vld [vmem:[#allocation4 + $0x148] sm:$0xff]  ;;  %v149_v12 = vld [vmem:[#allocation4 + $0xd8] sm:$0xff] }
  0x8d   :  { %2563 = vmatprep.subr.bf16.mxu0 %v1546_v47  ;;  %v179_v3 = vld [vmem:[#allocation4 + $0x1c8] sm:$0xff]  ;;  %v5325_v6 = vpack.c.bf16 %v146_v63, %v130_v62  ;;  %v162_v8 = vld [vmem:[#allocation4 + $0x140] sm:$0xff]  ;;  %v5331_v16 = vpack.c.bf16 %v149_v12, %v133_v11  ;;  %v132_v17 = vld [vmem:[#allocation4 + $0x50] sm:$0xff] }
  0x8e   :  { %v1042_v5 = vld [vmem:[#allocation6 + $0x88] sm:$0xff]  ;;  %v5327_v7 = vpack.c.bf16 %v179_v3, %v163_v2  ;;  %v178_v9 = vld [vmem:[#allocation4 + $0x1c0] sm:$0xff]  ;;  %v148_v18 = vld [vmem:[#allocation4 + $0xd0] sm:$0xff] }
  0x8f   :  { %5306 = vmatpush1.bf16.msra.mxu1 %v5305_v27  ;;  %v1570_v13 = vunpack.c.l.s8.bf16 %v1042_v5  ;;  %v1041_v14 = vld [vmem:[#allocation6 + $0x80] sm:$0xff]  ;;  %v5329_v15 = vpack.c.bf16 %v178_v9, %v162_v8  ;;  %v165_v21 = vld [vmem:[#allocation4 + $0x158] sm:$0xff]  ;;  %v1578_v23 = vunpack.c.h.s8.bf16 %v1042_v5  ;;  %v1050_v24 = vld [vmem:[#allocation6 + $0xc8] sm:$0xff]  ;;  %v5333_v25 = vpack.c.bf16 %v148_v18, %v132_v17 }
  0x90   :  { %5308 = vmatprep.subr.bf16.mxu1 %v5307_v28  ;;  %2564 = vmatpush1.bf16.msra.mxu0 %v1545_v55  ;;  %v1569_v19 = vunpack.c.l.s8.bf16 %v1041_v14  ;;  %v181_v22 = vld [vmem:[#allocation4 + $0x1d8] sm:$0xff]  ;;  %v164_v27 = vld [vmem:[#allocation4 + $0x150] sm:$0xff]  ;;  %v1577_v29 = vunpack.c.h.s8.bf16 %v1041_v14  ;;  %v135_v30 = vld [vmem:[#allocation4 + $0x68] sm:$0xff]  ;;  %v1586_v32 = vunpack.c.l.s8.bf16 %v1050_v24  ;;  %v1594_v41 = vunpack.c.h.s8.bf16 %v1050_v24 }
  0x91   :  { %2565 = vmatprep.subr.bf16.mxu0 %v1554_v58  ;;  %v5335_v26 = vpack.c.bf16 %v181_v22, %v165_v21  ;;  %v180_v28 = vld [vmem:[#allocation4 + $0x1d0] sm:$0xff]  ;;  %v151_v31 = vld [vmem:[#allocation4 + $0xe8] sm:$0xff]  ;;  %v134_v36 = vld [vmem:[#allocation4 + $0x60] sm:$0xff] }
  0x92   :  { %5206 = vmatmul.mubr.msk.f32.vlgmr.msra.gmra.mrb[2].mxu1 %vm186_vm0, %v5862_v20  ;;  %v5339_v35 = vpack.c.bf16 %v151_v31, %v135_v30  ;;  %v150_v37 = vld [vmem:[#allocation4 + $0xe0] sm:$0xff]  ;;  %v1058_v42 = vld [vmem:[#allocation6 + $0x108] sm:$0xff]  ;;  %v137_v48 = vld [vmem:[#allocation4 + $0x78] sm:$0xff] }
  0x93   :  { %5310 = vmatpush1.bf16.msra.mxu1 %v5309_v33  ;;  %396 = vmatprep.mubr.f32.mxu1 %v5726_v0  ;;  %v1049_v33 = vld [vmem:[#allocation6 + $0xc0] sm:$0xff]  ;;  %v5341_v43 = vpack.c.bf16 %v150_v37, %v134_v36  ;;  %v153_v49 = vld [vmem:[#allocation4 + $0xf8] sm:$0xff]  ;;  %v1602_v50 = vunpack.c.l.s8.bf16 %v1058_v42  ;;  %v136_v54 = vld [vmem:[#allocation4 + $0x70] sm:$0xff]  ;;  %v1610_v59 = vunpack.c.h.s8.bf16 %v1058_v42 }
  0x94   :  { %5312 = vmatprep.subr.bf16.mxu1 %v5311_v34  ;;  %2566 = vmatpush1.bf16.msra.mxu0 %v1553_v1  ;;  %v5337_v34 = vpack.c.bf16 %v180_v28, %v164_v27  ;;  %v1585_v38 = vunpack.c.l.s8.bf16 %v1049_v33  ;;  %v166_v45 = vld [vmem:[#allocation4 + $0x160] sm:$0xff]  ;;  %v1593_v47 = vunpack.c.h.s8.bf16 %v1049_v33  ;;  %v5347_v53 = vpack.c.bf16 %v153_v49, %v137_v48  ;;  %v152_v55 = vld [vmem:[#allocation4 + $0xf0] sm:$0xff]  ;;  %v169_v57 = vld [vmem:[#allocation4 + $0x178] sm:$0xff] }
  0x95   :  { %2567 = vmatprep.subr.bf16.mxu0 %v1562_v4  ;;  %v182_v46 = vld [vmem:[#allocation4 + $0x1e0] sm:$0xff]  ;;  %v185_v58 = vld [vmem:[#allocation4 + $0x1f8] sm:$0xff]  ;;  %v168_v63 = vld [vmem:[#allocation4 + $0x170] sm:$0xff] }
  0x96   :  { %v5351_v62 = vpack.c.bf16 %v185_v58, %v169_v57  ;;  %v184_v1 = vld [vmem:[#allocation4 + $0x1f0] sm:$0xff]  ;;  %v1028_v3 = vld [vmem:[#allocation6 + $0x18] sm:$0xff]  ;;  %v1065_v5 = vld [vmem:[#allocation6 + $0x140] sm:$0xff] }
  0x97   :  { %5314 = vmatpush1.bf16.msra.mxu1 %v5313_v39  ;;  %v167_v39 = vld [vmem:[#allocation4 + $0x168] sm:$0xff]  ;;  %v1027_v8 = vld [vmem:[#allocation6 + $0x10] sm:$0xff]  ;;  %v1617_v9 = vunpack.c.l.s8.bf16 %v1065_v5  ;;  %v1625_v14 = vunpack.c.h.s8.bf16 %v1065_v5  ;;  %v1073_v17 = vld [vmem:[#allocation6 + $0x180] sm:$0xff] }
  0x98   :  { %5316 = vmatprep.subr.bf16.mxu1 %v5315_v40  ;;  %2568 = vmatpush1.bf16.msra.mxu0 %v1561_v10  ;;  %v183_v40 = vld [vmem:[#allocation4 + $0x1e8] sm:$0xff]  ;;  %v1539_v12 = vunpack.c.l.s8.bf16 %v1027_v8  ;;  %v1547_v18 = vunpack.c.h.s8.bf16 %v1027_v8  ;;  %v1035_v21 = vld [vmem:[#allocation6 + $0x50] sm:$0xff]  ;;  %v1633_v22 = vunpack.c.l.s8.bf16 %v1073_v17  ;;  %v1052_v31 = vld [vmem:[#allocation6 + $0xd8] sm:$0xff] }
  0x99   :  { %2569 = vmatprep.subr.bf16.mxu0 %v1570_v13  ;;  %v5343_v44 = vpack.c.bf16 %v183_v40, %v167_v39  ;;  %v1074_v11 = vld [vmem:[#allocation6 + $0x188] sm:$0xff]  ;;  %v1548_v13 = vunpack.c.h.s8.bf16 %v1028_v3  ;;  %v1555_v24 = vunpack.c.l.s8.bf16 %v1035_v21  ;;  %v1563_v27 = vunpack.c.h.s8.bf16 %v1035_v21  ;;  %v1043_v28 = vld [vmem:[#allocation6 + $0x90] sm:$0xff]  ;;  %v1060_v37 = vld [vmem:[#allocation6 + $0x118] sm:$0xff] }
  0x9a   :  { %5207 = vmatmul.mubr.msk.f32.vlgmr.msra.gmra.mrb[4].mxu1 %vm186_vm0, %v5862_v20  ;;  %v1588_v33 = vunpack.c.l.s8.bf16 %v1052_v31  ;;  %v1596_v36 = vunpack.c.h.s8.bf16 %v1052_v31  ;;  %v1641_v39 = vunpack.c.h.s8.bf16 %v1073_v17  ;;  %v1604_v40 = vunpack.c.l.s8.bf16 %v1060_v37  ;;  %v1082_v42 = vld [vmem:[#allocation6 + $0x1c8] sm:$0xff]  ;;  %v1068_v48 = vld [vmem:[#allocation6 + $0x158] sm:$0xff] }
  0x9b   :  { %5318 = vmatpush1.bf16.msra.mxu1 %v5317_v51  ;;  %467 = vmatprep.mubr.f32.mxu1 %v5726_v0  ;;  %v1057_v51 = vld [vmem:[#allocation6 + $0x100] sm:$0xff]  ;;  %v1658_v49 = vunpack.c.h.s8.bf16 %v1082_v42  ;;  %v1628_v57 = vunpack.c.h.s8.bf16 %v1068_v48  ;;  %v1076_v58 = vld [vmem:[#allocation6 + $0x198] sm:$0xff] }
  0x9c   :  { %5320 = vmatprep.subr.bf16.mxu1 %v5319_v52  ;;  %2570 = vmatpush1.bf16.msra.mxu0 %v1569_v19  ;;  %v5345_v52 = vpack.c.bf16 %v182_v46, %v166_v45  ;;  %v1601_v56 = vunpack.c.l.s8.bf16 %v1057_v51  ;;  %v1609_v2 = vunpack.c.h.s8.bf16 %v1057_v51 }
  0x9d   :  { %2571 = vmatprep.subr.bf16.mxu0 %v1578_v23  ;;  %v1642_v23 = vunpack.c.h.s8.bf16 %v1074_v11 }
  0x9f   :  { %5322 = vmatpush1.bf16.msra.mxu1 %v5321_v60  ;;  %v1066_v60 = vld [vmem:[#allocation6 + $0x148] sm:$0xff] }
  0xa0   :  { %5324 = vmatprep.subr.bf16.mxu1 %v5323_v61  ;;  %2572 = vmatpush1.bf16.msra.mxu0 %v1577_v29  ;;  %v5349_v61 = vpack.c.bf16 %v152_v55, %v136_v54  ;;  %v1618_v4 = vunpack.c.l.s8.bf16 %v1066_v60  ;;  %v1626_v10 = vunpack.c.h.s8.bf16 %v1066_v60  ;;  %v1571_v29 = vunpack.c.l.s8.bf16 %v1043_v28  ;;  %v5887_v54 = vld [vmem:[#allocation6 + $0x208] sm:$0xff] }
  0xa1   :  { %2573 = vmatprep.subr.bf16.mxu0 %v1586_v32  ;;  %v1579_v32 = vunpack.c.h.s8.bf16 %v1043_v28  ;;  %v1666_v55 = vunpack.c.l.s8.bf16 %v5887_v54  ;;  %v1636_v60 = vunpack.c.l.s8.bf16 %v1076_v58 }
  0xa2   :  { %5208 = vmatmul.mubr.msk.f32.vlgmr.msra.gmra.mrb[6].mxu1 %vm186_vm0, %v5862_v20 }
  0xa3   :  { %5326 = vmatpush1.bf16.msra.mxu1 %v5325_v6  ;;  %538 = vmatprep.mubr.f32.mxu1 %v5726_v0  ;;  %v5353_v6 = vpack.c.bf16 %v184_v1, %v168_v63  ;;  %v1644_v63 = vunpack.c.h.s8.bf16 %v1076_v58  ;;  %v1084_v1 = vld [vmem:[#allocation6 + $0x1d8] sm:$0xff] }
  0xa4   :  { %5328 = vmatprep.subr.bf16.mxu1 %v5327_v7  ;;  %2574 = vmatpush1.bf16.msra.mxu0 %v1585_v38  ;;  %v1540_v7 = vunpack.c.l.s8.bf16 %v1028_v3  ;;  %v1652_v3 = vunpack.c.l.s8.bf16 %v1084_v1 }
  0xa5   :  { %2575 = vmatprep.subr.bf16.mxu0 %v1594_v41  ;;  %v1059_v41 = vld [vmem:[#allocation6 + $0x110] sm:$0xff] }
  0xa6   :  { %v1603_v45 = vunpack.c.l.s8.bf16 %v1059_v41 }
  0xa7   :  { %5330 = vmatpush1.bf16.msra.mxu1 %v5329_v15  ;;  %v1036_v15 = vld [vmem:[#allocation6 + $0x58] sm:$0xff] }
  0xa8   :  { %5332 = vmatprep.subr.bf16.mxu1 %v5331_v16  ;;  %2576 = vmatpush1.bf16.msra.mxu0 %v1593_v47  ;;  %v1634_v16 = vunpack.c.l.s8.bf16 %v1074_v11  ;;  %v1556_v19 = vunpack.c.l.s8.bf16 %v1036_v15  ;;  %v1612_v47 = vunpack.c.h.s8.bf16 %v1060_v37 }
  0xa9   :  { %2577 = vmatprep.subr.bf16.mxu0 %v1602_v50  ;;  %v1611_v50 = vunpack.c.h.s8.bf16 %v1059_v41  ;;  %v1674_v41 = vunpack.c.h.s8.bf16 %v5887_v54 }
  0xaa   :  { %5209 = vmatmul.mubr.msk.f32.vlgmr.msra.gmra.mrb[8].mxu1 %vm186_vm0, %v5862_v20 }
  0xab   :  { %5334 = vmatpush1.bf16.msra.mxu1 %v5333_v25  ;;  %609 = vmatprep.mubr.f32.mxu1 %v5726_v0  ;;  %v1564_v25 = vunpack.c.h.s8.bf16 %v1036_v15  ;;  %v5900_v15 = vld [vmem:[#allocation12 + $0x1] ss:$2 sm:$0xff] }
  0xac   :  { %5336 = vmatprep.subr.bf16.mxu1 %v5335_v26  ;;  %2578 = vmatpush1.bf16.msra.mxu0 %v1601_v56  ;;  %v1044_v26 = vld [vmem:[#allocation6 + $0x98] sm:$0xff] }
  0xad   :  { %2579 = vmatprep.subr.bf16.mxu0 %v1610_v59  ;;  %v1580_v30 = vunpack.c.h.s8.bf16 %v1044_v26 }
  0xaf   :  { %5338 = vmatpush1.bf16.msra.mxu1 %v5337_v34  ;;  %v1051_v34 = vld [vmem:[#allocation6 + $0xd0] sm:$0xff] }
  0xb0   :  { %5340 = vmatprep.subr.bf16.mxu1 %v5339_v35  ;;  %2580 = vmatpush1.bf16.msra.mxu0 %v1609_v2  ;;  %v1587_v35 = vunpack.c.l.s8.bf16 %v1051_v34  ;;  %v1595_v38 = vunpack.c.h.s8.bf16 %v1051_v34 }
  0xb1   :  { %2581 = vmatprep.subr.bf16.mxu0 %v1618_v4  ;;  %v1083_v4 = vld [vmem:[#allocation6 + $0x1d0] sm:$0xff] }
  0xb2   :  { %5210 = vmatmul.mubr.msk.f32.vlgmr.msra.gmra.mrb[10].mxu1 %vm186_vm0, %v5862_v20  ;;  %v1651_v5 = vunpack.c.l.s8.bf16 %v1083_v4  ;;  %v1659_v8 = vunpack.c.h.s8.bf16 %v1083_v4 }
  0xb3   :  { %5342 = vmatpush1.bf16.msra.mxu1 %v5341_v43  ;;  %680 = vmatprep.mubr.f32.mxu1 %v5726_v0  ;;  %v1650_v43 = vunpack.c.l.s8.bf16 %v1082_v42 }
  0xb4   :  { %5344 = vmatprep.subr.bf16.mxu1 %v5343_v44  ;;  %2582 = vmatpush1.bf16.msra.mxu0 %v1617_v9  ;;  %v1081_v44 = vld [vmem:[#allocation6 + $0x1c0] sm:$0xff] }
  0xb5   :  { %2583 = vmatprep.subr.bf16.mxu0 %v1626_v10  ;;  %v1649_v46 = vunpack.c.l.s8.bf16 %v1081_v44  ;;  %v1657_v51 = vunpack.c.h.s8.bf16 %v1081_v44  ;;  %v767_v10 = vlaneseq  ;;  %v1098_v44 = vld [vmem:[#allocation6 + $0x248] sm:$0xff] }
  0xb7   :  { %5346 = vmatpush1.bf16.msra.mxu1 %v5345_v52  ;;  %v1620_v52 = vunpack.c.l.s8.bf16 %v1068_v48  ;;  %v5890_v11 = vshrl.u32 %v767_v10, 7 }
  0xb8   :  { %5348 = vmatprep.subr.bf16.mxu1 %v5347_v53  ;;  %2584 = vmatpush1.bf16.msra.mxu0 %v1625_v14  ;;  %v1067_v53 = vld [vmem:[#allocation6 + $0x150] sm:$0xff] }
  0xb9   :  { %2585 = vmatprep.subr.bf16.mxu0 %v1634_v16  ;;  %v1619_v56 = vunpack.c.l.s8.bf16 %v1067_v53  ;;  %v1627_v59 = vunpack.c.h.s8.bf16 %v1067_v53  ;;  %v5898_v14 = vsub.s32 1, %v5890_v11 }
  0xba   :  { %5211 = vmatmul.mubr.msk.f32.vlgmr.msra.gmra.mrb[12].mxu1 %vm186_vm0, %v5862_v20 }
  0xbb   :  { %5350 = vmatpush1.bf16.msra.mxu1 %v5349_v61  ;;  %751 = vmatprep.mubr.f32.mxu1 %v5726_v0  ;;  %v1075_v61 = vld [vmem:[#allocation6 + $0x190] sm:$0xff]  ;;  %v872_v21 = vrot.slane %v5900_v15, %v5898_v14 }
  0xbc   :  { %5352 = vmatprep.subr.bf16.mxu1 %v5351_v62  ;;  %2586 = vmatpush1.bf16.msra.mxu0 %v1633_v22  ;;  %v1635_v62 = vunpack.c.l.s8.bf16 %v1075_v61  ;;  %v1643_v2 = vunpack.c.h.s8.bf16 %v1075_v61 }
  0xbd   :  { %2587 = vmatprep.subr.bf16.mxu0 %v1642_v23 }
  0xbf   :  { %5354 = vmatpush1.bf16.msra.mxu1 %v5353_v6  ;;  %v1660_v6 = vunpack.c.h.s8.bf16 %v1084_v1 }
  0xc0   :  { %2889 = vmatprep.subr.bf16.mxu1 %v1540_v7  ;;  %2588 = vmatpush1.bf16.msra.mxu0 %v1641_v39  ;;  %v1092_v7 = vld [vmem:[#allocation6 + $0x218] sm:$0xff] }
  0xc1   :  { %2589 = vmatprep.subr.bf16.mxu0 %v1650_v43  ;;  %v1668_v9 = vunpack.c.l.s8.bf16 %v1092_v7  ;;  %v1676_v42 = vunpack.c.h.s8.bf16 %v1092_v7 }
  0xc2   :  { %5212 = vmatmul.mubr.msk.f32.vlgmr.msra.gmra.mrb[14].mxu1 %vm186_vm0, %v5862_v20  ;;  %v1572_v20 = vunpack.c.l.s8.bf16 %v1044_v26 }
  0xc3   :  { %2890 = vmatpush1.bf16.msra.mxu1 %v1539_v12  ;;  %v5893_v12 = vsub.s32 0, %v5890_v11 }
  0xc4   :  { %2891 = vmatprep.subr.bf16.mxu1 %v1548_v13  ;;  %2590 = vmatpush1.bf16.msra.mxu0 %v1649_v46  ;;  %v5895_v13 = vld [vmem:[#allocation12] ss:$2 sm:$0xff] }
  0xc5   :  { %2591 = vmatprep.subr.bf16.mxu0 %v1658_v49  ;;  %v770_v16 = vrot.slane %v5895_v13, %v5893_v12  ;;  %v774_v17 = vrot.slane %v5895_v13, %v5898_v14  ;;  %v1682_v49 = vunpack.c.l.s8.bf16 %v1098_v44 }
  0xc7   :  { %2892 = vmatpush1.bf16.msra.mxu1 %v1547_v18  ;;  %v868_v18 = vrot.slane %v5900_v15, %v5893_v12 }
  0xc8   :  { %2893 = vmatprep.subr.bf16.mxu1 %v1556_v19  ;;  %2592 = vmatpush1.bf16.msra.mxu0 %v1657_v51  ;;  %v1097_v51 = vld [vmem:[#allocation6 + $0x240] sm:$0xff] }
  0xc9   :  { %2602 = vmatprep.subr.bf16.mxu0 %v1666_v55  ;;  %v1689_v1 = vunpack.c.h.s8.bf16 %v1097_v51 }
  0xcb   :  { %2894 = vmatpush1.bf16.msra.mxu1 %v1555_v24 }
  0xcc   :  { %2895 = vmatprep.subr.bf16.mxu1 %v1564_v25  ;;  %v5911_v25 = vsub.s32 3, %v5890_v11 }
  0xce   :  { %v782_v31 = vrot.slane %v5895_v13, %v5911_v25 }
  0xcf   :  { %2896 = vmatpush1.bf16.msra.mxu1 %v1563_v27 }
  0xd0   :  { %2897 = vmatprep.subr.bf16.mxu1 %v1572_v20 }
  0xd3   :  { %2898 = vmatpush1.bf16.msra.mxu1 %v1571_v29  ;;  %v1089_v29 = vld [vmem:[#allocation6 + $0x200] sm:$0xff] }
  0xd4   :  { %2899 = vmatprep.subr.bf16.mxu1 %v1580_v30  ;;  %v1091_v30 = vld [vmem:[#allocation6 + $0x210] sm:$0xff]  ;;  %v1665_v37 = vunpack.c.l.s8.bf16 %v1089_v29 }
  0xd5   :  { %v1675_v48 = vunpack.c.h.s8.bf16 %v1091_v30 }
  0xd7   :  { %2900 = vmatpush1.bf16.msra.mxu1 %v1579_v32 }
  0xd8   :  { %2901 = vmatprep.subr.bf16.mxu1 %v1588_v33 }
  0xdb   :  { %2902 = vmatpush1.bf16.msra.mxu1 %v1587_v35  ;;  %v880_v35 = vrot.slane %v5900_v15, %v5911_v25 }
  0xdc   :  { %2903 = vmatprep.subr.bf16.mxu1 %v1596_v36 }
  0xdf   :  { %2904 = vmatpush1.bf16.msra.mxu1 %v1595_v38  ;;  %v1667_v38 = vunpack.c.l.s8.bf16 %v1091_v30  ;;  %v1124_v30 = vld [vmem:[#allocation6 + $0x318] sm:$0xff] }
  0xe0   :  { %2905 = vmatprep.subr.bf16.mxu1 %v1604_v40 }
  0xe3   :  { %2906 = vmatpush1.bf16.msra.mxu1 %v1603_v45  ;;  %v1100_v45 = vld [vmem:[#allocation6 + $0x258] sm:$0xff] }
  0xe4   :  { %2907 = vmatprep.subr.bf16.mxu1 %v1612_v47  ;;  %v1673_v47 = vunpack.c.h.s8.bf16 %v1089_v29  ;;  %v1692_v61 = vunpack.c.h.s8.bf16 %v1100_v45  ;;  %v1122_v29 = vld [vmem:[#allocation6 + $0x308] sm:$0xff] }
  0xe7   :  { %2908 = vmatpush1.bf16.msra.mxu1 %v1611_v50  ;;  %v1684_v50 = vunpack.c.l.s8.bf16 %v1100_v45  ;;  %v1132_v45 = vld [vmem:[#allocation6 + $0x358] sm:$0xff] }
  0xe8   :  { %2909 = vmatprep.subr.bf16.mxu1 %v1620_v52  ;;  %v1099_v52 = vld [vmem:[#allocation6 + $0x250] sm:$0xff] }
  0xeb   :  { %2910 = vmatpush1.bf16.msra.mxu1 %v1619_v56  ;;  %v1681_v56 = vunpack.c.l.s8.bf16 %v1097_v51  ;;  %v1131_v51 = vld [vmem:[#allocation6 + $0x350] sm:$0xff] }
  0xec   :  { %2911 = vmatprep.subr.bf16.mxu1 %v1628_v57  ;;  %v1683_v57 = vunpack.c.l.s8.bf16 %v1099_v52 }
  0xef   :  { %2912 = vmatpush1.bf16.msra.mxu1 %v1627_v59 }
  0xf0   :  { %2913 = vmatprep.subr.bf16.mxu1 %v1636_v60  ;;  %v1690_v60 = vunpack.c.h.s8.bf16 %v1098_v44  ;;  %v1130_v44 = vld [vmem:[#allocation6 + $0x348] sm:$0xff] }
  0xf3   :  { %2914 = vmatpush1.bf16.msra.mxu1 %v1635_v62  ;;  %v1106_v62 = vld [vmem:[#allocation6 + $0x288] sm:$0xff] }
  0xf4   :  { %2915 = vmatprep.subr.bf16.mxu1 %v1644_v63  ;;  %v1108_v63 = vld [vmem:[#allocation6 + $0x298] sm:$0xff] }
  0xf5   :  { %v1700_v4 = vunpack.c.l.s8.bf16 %v1108_v63  ;;  %v1708_v10 = vunpack.c.h.s8.bf16 %v1108_v63 }
  0xf7   :  { %2916 = vmatpush1.bf16.msra.mxu1 %v1643_v2  ;;  %v1691_v2 = vunpack.c.h.s8.bf16 %v1099_v52 }
  0xf8   :  { %2917 = vmatprep.subr.bf16.mxu1 %v1652_v3  ;;  %v1698_v3 = vunpack.c.l.s8.bf16 %v1106_v62 }
  0xfb   :  { %2918 = vmatpush1.bf16.msra.mxu1 %v1651_v5  ;;  %v1105_v5 = vld [vmem:[#allocation6 + $0x280] sm:$0xff] }
  0xfc   :  { %2919 = vmatprep.subr.bf16.mxu1 %v1660_v6  ;;  %v1107_v6 = vld [vmem:[#allocation6 + $0x290] sm:$0xff]  ;;  %v1697_v7 = vunpack.c.l.s8.bf16 %v1105_v5 }
  0xff   :  { %2920 = vmatpush1.bf16.msra.mxu1 %v1659_v8  ;;  %v1699_v8 = vunpack.c.l.s8.bf16 %v1107_v6 }
 0x100   :  { %2930 = vmatprep.subr.bf16.mxu1 %v1668_v9  ;;  %v1706_v9 = vunpack.c.h.s8.bf16 %v1106_v62  ;;  %v5940_v62 = vsub.s32 5, %v5890_v11 }
 0x15d   :  { %v256_v19 = vpop.f32.mrb[0].mxu1 }
 0x15e   :  { %v847_v22 = vmul.f32 %v770_v16, %v256_v19  ;;  %v258_v23 = vpop.f32.mrb[1].mxu1  ;;  %v1114_v16 = vld [vmem:[#allocation6 + $0x2c8] sm:$0xff]  ;;  %v1707_v19 = vunpack.c.h.s8.bf16 %v1107_v6 }
 0x15f   :  { %v848_v24 = vmul.f32 %v774_v17, %v258_v23  ;;  %v1116_v17 = vld [vmem:[#allocation6 + $0x2d8] sm:$0xff]  ;;  %v1113_v23 = vld [vmem:[#allocation6 + $0x2c0] sm:$0xff] }
 0x160   :  { %v945_v26 = vadd.f32 %v868_v18, %v847_v22  ;;  %v1705_v18 = vunpack.c.h.s8.bf16 %v1105_v5  ;;  %v1716_v22 = vunpack.c.l.s8.bf16 %v1116_v17  ;;  %v1139_v5 = vld [vmem:[#allocation6 + $0x390] sm:$0xff] }
 0x161   :  { %v946_v27 = vadd.f32 %v872_v21, %v848_v24  ;;  %v1714_v21 = vunpack.c.l.s8.bf16 %v1114_v16  ;;  %v1115_v24 = vld [vmem:[#allocation6 + $0x2d0] sm:$0xff] }
 0x162   :  { %vm961_vm1 = vcmp.gt.f32.partialorder %v945_v26, 0.0  ;;  %v977_v20 = vmul.f32 0.01, %v945_v26 }
 0x163   :  { %vm962_vm2 = vcmp.gt.f32.partialorder %v946_v27, 0.0  ;;  %v978_v28 = vmul.f32 0.01, %v946_v27 }
 0x164   :  { %v993_v32 = vsel %vm961_vm1, %v945_v26, %v977_v20  ;;  %v1713_v26 = vunpack.c.l.s8.bf16 %v1113_v23  ;;  %v1722_v20 = vunpack.c.h.s8.bf16 %v1114_v16 }
 0x165   :  { %v994_v33 = vsel %vm962_vm2, %v946_v27, %v978_v28  ;;  %v5915_v34 = vpop.f32.mrb[2].mxu1  ;;  %v5921_v40 = vpack.c.bf16 %v993_v32, %v993_v32  ;;  %v1715_v27 = vunpack.c.l.s8.bf16 %v1115_v24  ;;  %v1724_v28 = vunpack.c.h.s8.bf16 %v1116_v17 }
 0x166   :  { %v5919_v36 = vpack.c.bf16 %v994_v33, %v994_v33  ;;  %v329_v39 = vpop.f32.mrb[3].mxu1  ;;  %v1723_v32 = vunpack.c.h.s8.bf16 %v1115_v24  ;;  %v1730_v33 = vunpack.c.l.s8.bf16 %v1122_v29 }
 0x167   :  { %v850_v43 = vmul.f32 %v782_v31, %v329_v39  ;;  %v1721_v31 = vunpack.c.h.s8.bf16 %v1113_v23  ;;  %v1148_v23 = vld [vmem:[#allocation6 + $0x3d8] sm:$0xff] }
 0x168   :  { %2593 = vmatprep.mubr.bf16.mxu0 %v5919_v36  ;;  %2921 = vmatprep.mubr.bf16.mxu1 %v5919_v36 }
 0x169   :  { %2594 = vmatmul.mubr.bf16.vlgmr.msra.gmra.mrb[0].mxu0 %v5921_v40  ;;  %2922 = vmatmul.mubr.bf16.vlgmr.msra.gmra.mrb[16].mxu1 %v5921_v40  ;;  %v948_v46 = vadd.f32 %v880_v35, %v850_v43  ;;  %v1732_v35 = vunpack.c.l.s8.bf16 %v1124_v30  ;;  %v1740_v43 = vunpack.c.h.s8.bf16 %v1124_v30  ;;  %v1145_v30 = vld [vmem:[#allocation6 + $0x3c0] sm:$0xff] }
 0x16a   :  { %2603 = vmatpush1.bf16.msra.mxu0 %v1665_v37  ;;  %2931 = vmatpush1.bf16.msra.mxu1 %v1667_v38  ;;  %v1121_v37 = vld [vmem:[#allocation6 + $0x300] sm:$0xff]  ;;  %v1123_v38 = vld [vmem:[#allocation6 + $0x310] sm:$0xff] }
 0x16b   :  { %2604 = vmatprep.subr.bf16.mxu0 %v1674_v41  ;;  %2932 = vmatprep.subr.bf16.mxu1 %v1676_v42  ;;  %vm964_vm3 = vcmp.gt.f32.partialorder %v948_v46, 0.0  ;;  %v980_v53 = vmul.f32 0.01, %v948_v46  ;;  %v1729_v39 = vunpack.c.l.s8.bf16 %v1121_v37  ;;  %v1731_v41 = vunpack.c.l.s8.bf16 %v1123_v38 }
 0x16c   :  { %v1738_v42 = vunpack.c.h.s8.bf16 %v1122_v29  ;;  %v1780_v29 = vunpack.c.l.s8.bf16 %v1148_v23 }
 0x16d   :  { %v996_v54 = vsel %vm964_vm3, %v948_v46, %v980_v53  ;;  %v5928_v55 = vpop.f32.mrb[4].mxu1  ;;  %v1737_v46 = vunpack.c.h.s8.bf16 %v1121_v37  ;;  %v1747_v53 = vunpack.c.l.s8.bf16 %v1131_v51 }
 0x16e   :  { %2605 = vmatpush1.bf16.msra.mxu0 %v1673_v47  ;;  %2933 = vmatpush1.bf16.msra.mxu1 %v1675_v48  ;;  %v5930_v58 = vpack.c.bf16 %v996_v54, %v996_v54  ;;  %v5932_v59 = vpop.f32.mrb[5].mxu1  ;;  %v1739_v47 = vunpack.c.h.s8.bf16 %v1123_v38  ;;  %v1746_v48 = vunpack.c.l.s8.bf16 %v1130_v44  ;;  %v1754_v54 = vunpack.c.h.s8.bf16 %v1130_v44 }
 0x16f   :  { %2606 = vmatprep.subr.bf16.mxu0 %v1682_v49  ;;  %2934 = vmatprep.subr.bf16.mxu1 %v1684_v50  ;;  %v1748_v49 = vunpack.c.l.s8.bf16 %v1132_v45  ;;  %v1129_v50 = vld [vmem:[#allocation6 + $0x340] sm:$0xff]  ;;  %v1788_v38 = vunpack.c.h.s8.bf16 %v1148_v23 }
 0x170   :  { %2634 = vmatprep.mubr.bf16.mxu0 %v5930_v58  ;;  %2962 = vmatprep.mubr.bf16.mxu1 %v5930_v58  ;;  %v1745_v52 = vunpack.c.l.s8.bf16 %v1129_v50  ;;  %v1753_v63 = vunpack.c.h.s8.bf16 %v1129_v50  ;;  %v1155_v50 = vld [vmem:[#allocation6 + $0x410] sm:$0xff]  ;;  %v1161_v23 = vld [vmem:[#allocation6 + $0x440] sm:$0xff] }
 0x172   :  { %2607 = vmatpush1.bf16.msra.mxu0 %v1681_v56  ;;  %2935 = vmatpush1.bf16.msra.mxu1 %v1683_v57  ;;  %v1756_v56 = vunpack.c.h.s8.bf16 %v1132_v45  ;;  %v1138_v57 = vld [vmem:[#allocation6 + $0x388] sm:$0xff]  ;;  %v1785_v45 = vunpack.c.h.s8.bf16 %v1145_v30 }
 0x173   :  { %2608 = vmatprep.subr.bf16.mxu0 %v1690_v60  ;;  %2936 = vmatprep.subr.bf16.mxu1 %v1692_v61  ;;  %v1140_v60 = vld [vmem:[#allocation6 + $0x398] sm:$0xff]  ;;  %v5937_v61 = vsub.s32 2, %v5890_v11  ;;  %v1770_v16 = vunpack.c.h.s8.bf16 %v1138_v57 }
 0x174   :  { %v1772_v17 = vunpack.c.h.s8.bf16 %v1140_v60 }
 0x175   :  { %v778_v6 = vrot.slane %v5895_v13, %v5937_v61 }
 0x176   :  { %2609 = vmatpush1.bf16.msra.mxu0 %v1689_v1  ;;  %2937 = vmatpush1.bf16.msra.mxu1 %v1691_v2  ;;  %v1755_v1 = vunpack.c.h.s8.bf16 %v1131_v51  ;;  %v1762_v2 = vunpack.c.l.s8.bf16 %v1138_v57  ;;  %v1795_v57 = vunpack.c.l.s8.bf16 %v1155_v50 }
 0x177   :  { %2610 = vmatprep.subr.bf16.mxu0 %v1698_v3  ;;  %2938 = vmatprep.subr.bf16.mxu1 %v1700_v4  ;;  %v1764_v3 = vunpack.c.l.s8.bf16 %v1140_v60  ;;  %v1137_v4 = vld [vmem:[#allocation6 + $0x380] sm:$0xff] }
 0x17a   :  { %2611 = vmatpush1.bf16.msra.mxu0 %v1697_v7  ;;  %2939 = vmatpush1.bf16.msra.mxu1 %v1699_v8  ;;  %v790_v7 = vrot.slane %v5895_v13, %v5940_v62  ;;  %v1761_v8 = vunpack.c.l.s8.bf16 %v1137_v4 }
 0x17b   :  { %2612 = vmatprep.subr.bf16.mxu0 %v1706_v9  ;;  %2940 = vmatprep.subr.bf16.mxu1 %v1708_v10  ;;  %v1763_v9 = vunpack.c.l.s8.bf16 %v1139_v5  ;;  %v5946_v10 = vpop.f32.mrb[6].mxu1 }
 0x17c   :  { %v852_v24 = vmul.f32 %v790_v7, %v5932_v59 }
 0x17e   :  { %2613 = vmatpush1.bf16.msra.mxu0 %v1705_v18  ;;  %2941 = vmatpush1.bf16.msra.mxu1 %v1707_v19  ;;  %v5948_v18 = vpop.f32.mrb[7].mxu1  ;;  %v849_v19 = vmul.f32 %v778_v6, %v5915_v34  ;;  %v1147_v34 = vld [vmem:[#allocation6 + $0x3d0] sm:$0xff]  ;;  %v1164_v6 = vld [vmem:[#allocation6 + $0x458] sm:$0xff] }
 0x17f   :  { %2614 = vmatprep.subr.bf16.mxu0 %v1714_v21  ;;  %2942 = vmatprep.subr.bf16.mxu1 %v1716_v22  ;;  %v876_v21 = vrot.slane %v5900_v15, %v5937_v61  ;;  %v1146_v22 = vld [vmem:[#allocation6 + $0x3c8] sm:$0xff]  ;;  %v5956_v59 = vpop.f32.mrb[8].mxu1 }
 0x180   :  { %v1786_v37 = vunpack.c.h.s8.bf16 %v1146_v22 }
 0x182   :  { %2615 = vmatpush1.bf16.msra.mxu0 %v1713_v26  ;;  %2943 = vmatpush1.bf16.msra.mxu1 %v1715_v27  ;;  %v888_v26 = vrot.slane %v5900_v15, %v5940_v62  ;;  %v1769_v27 = vunpack.c.h.s8.bf16 %v1137_v4 }
 0x183   :  { %2616 = vmatprep.subr.bf16.mxu0 %v1722_v20  ;;  %2944 = vmatprep.subr.bf16.mxu1 %v1724_v28  ;;  %v1771_v20 = vunpack.c.h.s8.bf16 %v1139_v5  ;;  %v1778_v28 = vunpack.c.l.s8.bf16 %v1146_v22  ;;  %v1162_v5 = vld [vmem:[#allocation6 + $0x448] sm:$0xff]  ;;  %v1812_v22 = vunpack.c.l.s8.bf16 %v1164_v6 }
 0x186   :  { %2617 = vmatpush1.bf16.msra.mxu0 %v1721_v31  ;;  %2945 = vmatpush1.bf16.msra.mxu1 %v1723_v32  ;;  %v947_v31 = vadd.f32 %v876_v21, %v849_v19  ;;  %v950_v32 = vadd.f32 %v888_v26, %v852_v24  ;;  %v1810_v21 = vunpack.c.l.s8.bf16 %v1162_v5  ;;  %v1163_v24 = vld [vmem:[#allocation6 + $0x450] sm:$0xff]  ;;  %v5979_v26 = vsub.s32 4, %v5890_v11 }
 0x187   :  { %2618 = vmatprep.subr.bf16.mxu0 %v1730_v33  ;;  %2946 = vmatprep.subr.bf16.mxu1 %v1732_v35  ;;  %v1777_v33 = vunpack.c.l.s8.bf16 %v1145_v30  ;;  %v1779_v35 = vunpack.c.l.s8.bf16 %v1147_v34 }
 0x188   :  { %vm963_vm4 = vcmp.gt.f32.partialorder %v947_v31, 0.0  ;;  %v982_v44 = vmul.f32 0.01, %v950_v32  ;;  %vm966_vm5 = vcmp.gt.f32.partialorder %v950_v32, 0.0 }
 0x18a   :  { %2619 = vmatpush1.bf16.msra.mxu0 %v1729_v39  ;;  %2947 = vmatpush1.bf16.msra.mxu1 %v1731_v41  ;;  %v979_v39 = vmul.f32 0.01, %v947_v31  ;;  %v1154_v41 = vld [vmem:[#allocation6 + $0x408] sm:$0xff] }
 0x18b   :  { %2620 = vmatprep.subr.bf16.mxu0 %v1738_v42  ;;  %2948 = vmatprep.subr.bf16.mxu1 %v1740_v43  ;;  %v1156_v42 = vld [vmem:[#allocation6 + $0x418] sm:$0xff]  ;;  %v5958_v43 = vpop.f32.mrb[9].mxu1 }
 0x18c   :  { %v995_v51 = vsel %vm963_vm4, %v947_v31, %v979_v39  ;;  %v611_v60 = vpop.f32.mrb[10].mxu1  ;;  %v1804_v4 = vunpack.c.h.s8.bf16 %v1156_v42  ;;  %v1820_v31 = vunpack.c.h.s8.bf16 %v1164_v6  ;;  %v1178_v6 = vld [vmem:[#allocation6 + $0x4c8] sm:$0xff] }
 0x18e   :  { %2621 = vmatpush1.bf16.msra.mxu0 %v1737_v46  ;;  %2949 = vmatpush1.bf16.msra.mxu1 %v1739_v47  ;;  %v1787_v46 = vunpack.c.h.s8.bf16 %v1147_v34  ;;  %v1794_v47 = vunpack.c.l.s8.bf16 %v1154_v41  ;;  %v1818_v34 = vunpack.c.h.s8.bf16 %v1162_v5 }
 0x18f   :  { %2622 = vmatprep.subr.bf16.mxu0 %v1746_v48  ;;  %2950 = vmatprep.subr.bf16.mxu1 %v1748_v49  ;;  %v1796_v48 = vunpack.c.l.s8.bf16 %v1156_v42  ;;  %v1153_v49 = vld [vmem:[#allocation6 + $0x400] sm:$0xff]  ;;  %v1819_v42 = vunpack.c.h.s8.bf16 %v1163_v24 }
 0x192   :  { %2623 = vmatpush1.bf16.msra.mxu0 %v1745_v52  ;;  %2951 = vmatpush1.bf16.msra.mxu1 %v1747_v53  ;;  %v998_v52 = vsel %vm966_vm5, %v950_v32, %v982_v44  ;;  %v5960_v53 = vld [vmem:[#allocation12 + $0x10] ss:$2 sm:$0xff] }
 0x193   :  { %2624 = vmatprep.subr.bf16.mxu0 %v1754_v54  ;;  %2952 = vmatprep.subr.bf16.mxu1 %v1756_v56  ;;  %v5962_v54 = vld [vmem:[#allocation12 + $0x11] ss:$2 sm:$0xff]  ;;  %v1793_v56 = vunpack.c.l.s8.bf16 %v1153_v49  ;;  %v5970_v7 = vpack.c.bf16 %v998_v52, %v998_v52 }
 0x194   :  { %v916_v30 = vrot.slane %v5962_v54, %v5979_v26  ;;  %v920_v39 = vrot.slane %v5962_v54, %v5940_v62 }
 0x196   :  { %2625 = vmatpush1.bf16.msra.mxu0 %v1753_v63  ;;  %2953 = vmatpush1.bf16.msra.mxu1 %v1755_v1  ;;  %v810_v63 = vrot.slane %v5960_v53, %v5937_v61  ;;  %v908_v1 = vrot.slane %v5962_v54, %v5937_v61 }
 0x197   :  { %2626 = vmatprep.subr.bf16.mxu0 %v1762_v2  ;;  %2954 = vmatprep.subr.bf16.mxu1 %v1764_v3  ;;  %v5968_v2 = vpack.c.bf16 %v995_v51, %v995_v51  ;;  %v1802_v3 = vunpack.c.h.s8.bf16 %v1154_v41  ;;  %v1817_v41 = vunpack.c.h.s8.bf16 %v1161_v23 }
 0x19a   :  { %2627 = vmatpush1.bf16.msra.mxu0 %v1761_v8  ;;  %2955 = vmatpush1.bf16.msra.mxu1 %v1763_v9  ;;  %v857_v8 = vmul.f32 %v810_v63, %v611_v60  ;;  %v5974_v9 = vpop.f32.mrb[11].mxu1 }
 0x19b   :  { %2628 = vmatprep.subr.bf16.mxu0 %v1770_v16  ;;  %2956 = vmatprep.subr.bf16.mxu1 %v1772_v17  ;;  %v1801_v16 = vunpack.c.h.s8.bf16 %v1153_v49  ;;  %v1803_v17 = vunpack.c.h.s8.bf16 %v1155_v50  ;;  %v1171_v49 = vld [vmem:[#allocation6 + $0x490] sm:$0xff]  ;;  %v5994_v50 = vsub.s32 6, %v5890_v11 }
 0x19c   :  { %v5976_v19 = vadd.f32 %v908_v1, %v857_v8  ;;  %v1180_v8 = vld [vmem:[#allocation6 + $0x4d8] sm:$0xff] }
 0x19d   :  { %v826_v63 = vrot.slane %v5960_v53, %v5994_v50 }
 0x19e   :  { %2629 = vmatpush1.bf16.msra.mxu0 %v1769_v27  ;;  %2957 = vmatpush1.bf16.msra.mxu1 %v1771_v20  ;;  %v1809_v27 = vunpack.c.l.s8.bf16 %v1161_v23  ;;  %v1811_v20 = vunpack.c.l.s8.bf16 %v1163_v24  ;;  %vm971_vm12 = vcmp.gt.f32.partialorder %v5976_v19, 0.0 }
 0x19f   :  { %2630 = vmatprep.subr.bf16.mxu0 %v1778_v28  ;;  %2958 = vmatprep.subr.bf16.mxu1 %v1780_v29  ;;  %v682_v28 = vpop.f32.mrb[12].mxu1  ;;  %v818_v29 = vrot.slane %v5960_v53, %v5979_v26 }
 0x1a0   :  { %v684_v32 = vpop.f32.mrb[13].mxu1 }
 0x1a1   :  { %v753_v60 = vpop.f32.mrb[14].mxu1 }
 0x1a2   :  { %2631 = vmatpush1.bf16.msra.mxu0 %v1777_v33  ;;  %2959 = vmatpush1.bf16.msra.mxu1 %v1779_v35  ;;  %v1170_v33 = vld [vmem:[#allocation6 + $0x488] sm:$0xff]  ;;  %v1172_v35 = vld [vmem:[#allocation6 + $0x498] sm:$0xff]  ;;  %v755_v5 = vpop.f32.mrb[15].mxu1 }
 0x1a3   :  { %2632 = vmatprep.subr.bf16.mxu0 %v1786_v37  ;;  %2960 = vmatprep.subr.bf16.mxu1 %v1788_v38  ;;  %v859_v37 = vmul.f32 %v818_v29, %v682_v28  ;;  %v822_v38 = vrot.slane %v5960_v53, %v5940_v62  ;;  %v1834_v1 = vunpack.c.h.s8.bf16 %v1170_v33  ;;  %v1177_v28 = vld [vmem:[#allocation6 + $0x4c0] sm:$0xff]  ;;  %v1179_v29 = vld [vmem:[#allocation6 + $0x4d0] sm:$0xff] }
 0x1a5   :  { %v5991_v44 = vadd.f32 %v916_v30, %v859_v37  ;;  %v1188_v37 = vld [vmem:[#allocation6 + $0x518] sm:$0xff] }
 0x1a6   :  { %2633 = vmatpush1.bf16.msra.mxu0 %v1785_v45  ;;  %2961 = vmatpush1.bf16.msra.mxu1 %v1787_v46  ;;  %v860_v45 = vmul.f32 %v822_v38, %v684_v32  ;;  %v1826_v46 = vunpack.c.l.s8.bf16 %v1170_v33  ;;  %v1850_v32 = vunpack.c.h.s8.bf16 %v1178_v6  ;;  %v1852_v33 = vunpack.c.h.s8.bf16 %v1180_v8 }
 0x1a7   :  { %2643 = vmatprep.subr.bf16.mxu0 %v1794_v47  ;;  %2971 = vmatprep.subr.bf16.mxu1 %v1796_v48  ;;  %v1828_v47 = vunpack.c.l.s8.bf16 %v1172_v35  ;;  %v1169_v48 = vld [vmem:[#allocation6 + $0x480] sm:$0xff]  ;;  %v1849_v38 = vunpack.c.h.s8.bf16 %v1177_v28  ;;  %vm973_vm14 = vcmp.gt.f32.partialorder %v5991_v44, 0.0 }
 0x1a8   :  { %v5996_v51 = vadd.f32 %v920_v39, %v860_v45  ;;  %v1825_v52 = vunpack.c.l.s8.bf16 %v1169_v48  ;;  %v1851_v39 = vunpack.c.h.s8.bf16 %v1179_v29  ;;  %v1185_v45 = vld [vmem:[#allocation6 + $0x500] sm:$0xff] }
 0x1a9   :  { %2635 = vmatmul.mubr.bf16.vlgmr.msra.gmra.mrb[0].mxu0 %v5968_v2  ;;  %2963 = vmatmul.mubr.bf16.vlgmr.msra.gmra.mrb[16].mxu1 %v5968_v2 }
 0x1aa   :  { %2644 = vmatpush1.bf16.msra.mxu0 %v1793_v56  ;;  %2972 = vmatpush1.bf16.msra.mxu1 %v1795_v57  ;;  %v1827_v56 = vunpack.c.l.s8.bf16 %v1171_v49  ;;  %v5999_v57 = vsub.s32 7, %v5890_v11  ;;  %vm974_vm13 = vcmp.gt.f32.partialorder %v5996_v51, 0.0 }
 0x1ab   :  { %2645 = vmatprep.subr.bf16.mxu0 %v1802_v3  ;;  %2973 = vmatprep.subr.bf16.mxu1 %v1804_v4  ;;  %v1836_v3 = vunpack.c.h.s8.bf16 %v1172_v35  ;;  %v924_v4 = vrot.slane %v5962_v54, %v5994_v50  ;;  %v1186_v35 = vld [vmem:[#allocation6 + $0x508] sm:$0xff] }
 0x1ac   :  { %2675 = vmatprep.mubr.bf16.mxu0 %v5970_v7  ;;  %3003 = vmatprep.mubr.bf16.mxu1 %v5970_v7  ;;  %v928_v11 = vrot.slane %v5962_v54, %v5999_v57 }
 0x1ae   :  { %2646 = vmatpush1.bf16.msra.mxu0 %v1801_v16  ;;  %2974 = vmatpush1.bf16.msra.mxu1 %v1803_v17  ;;  %v861_v16 = vmul.f32 %v826_v63, %v753_v60  ;;  %v830_v17 = vrot.slane %v5960_v53, %v5999_v57  ;;  %v1196_v60 = vld [vmem:[#allocation6 + $0x558] sm:$0xff]  ;;  %v1865_v63 = vunpack.c.h.s8.bf16 %v1185_v45 }
 0x1af   :  { %2647 = vmatprep.subr.bf16.mxu0 %v1810_v21  ;;  %2975 = vmatprep.subr.bf16.mxu1 %v1812_v22  ;;  %v1833_v21 = vunpack.c.h.s8.bf16 %v1169_v48  ;;  %v1835_v22 = vunpack.c.h.s8.bf16 %v1171_v49  ;;  %v1866_v49 = vunpack.c.h.s8.bf16 %v1186_v35 }
 0x1b0   :  { %v6009_v23 = vadd.f32 %v924_v4, %v861_v16  ;;  %v862_v24 = vmul.f32 %v830_v17, %v755_v5  ;;  %v1876_v4 = vunpack.c.l.s8.bf16 %v1196_v60  ;;  %v1193_v5 = vld [vmem:[#allocation6 + $0x540] sm:$0xff] }
 0x1b2   :  { %2648 = vmatpush1.bf16.msra.mxu0 %v1809_v27  ;;  %2976 = vmatpush1.bf16.msra.mxu1 %v1811_v20  ;;  %v1842_v27 = vunpack.c.l.s8.bf16 %v1178_v6  ;;  %v1844_v20 = vunpack.c.l.s8.bf16 %v1180_v8  ;;  %v6011_v30 = vadd.f32 %v928_v11, %v862_v24  ;;  %v1195_v6 = vld [vmem:[#allocation6 + $0x550] sm:$0xff]  ;;  %v1873_v8 = vunpack.c.l.s8.bf16 %v1193_v5 }
 0x1b3   :  { %2649 = vmatprep.subr.bf16.mxu0 %v1818_v34  ;;  %2977 = vmatprep.subr.bf16.mxu1 %v1820_v31  ;;  %v1841_v34 = vunpack.c.l.s8.bf16 %v1177_v28  ;;  %v1843_v31 = vunpack.c.l.s8.bf16 %v1179_v29  ;;  %v1875_v16 = vunpack.c.l.s8.bf16 %v1195_v6  ;;  %v1884_v11 = vunpack.c.h.s8.bf16 %v1196_v60  ;;  %v1201_v29 = vld [vmem:[#allocation6 + $0x580] sm:$0xff] }
 0x1b4   :  { %v1881_v24 = vunpack.c.h.s8.bf16 %v1193_v5  ;;  %v1218_v5 = vld [vmem:[#allocation6 + $0x608] sm:$0xff]  ;;  %vm976_vm15 = vcmp.gt.f32.partialorder %v6011_v30, 0.0  ;;  %vm975_vm0 = vcmp.gt.f32.partialorder %v6009_v23, 0.0 }
 0x1b6   :  { %2650 = vmatpush1.bf16.msra.mxu0 %v1817_v41  ;;  %2978 = vmatpush1.bf16.msra.mxu1 %v1819_v42  ;;  %v1858_v41 = vunpack.c.l.s8.bf16 %v1186_v35  ;;  %v1860_v42 = vunpack.c.l.s8.bf16 %v1188_v37 }
 0x1b7   :  { %2651 = vmatprep.subr.bf16.mxu0 %v1826_v46  ;;  %2979 = vmatprep.subr.bf16.mxu1 %v1828_v47  ;;  %v1187_v46 = vld [vmem:[#allocation6 + $0x510] sm:$0xff]  ;;  %v1857_v47 = vunpack.c.l.s8.bf16 %v1185_v45  ;;  %v1212_v45 = vld [vmem:[#allocation6 + $0x5d8] sm:$0xff] }
 0x1b8   :  { %v1859_v48 = vunpack.c.l.s8.bf16 %v1187_v46 }
 0x1ba   :  { %2652 = vmatpush1.bf16.msra.mxu0 %v1825_v52  ;;  %2980 = vmatpush1.bf16.msra.mxu1 %v1827_v56  ;;  %v1868_v52 = vunpack.c.h.s8.bf16 %v1188_v37  ;;  %v1194_v56 = vld [vmem:[#allocation6 + $0x548] sm:$0xff] }
 0x1bb   :  { %2653 = vmatprep.subr.bf16.mxu0 %v1834_v1  ;;  %2981 = vmatprep.subr.bf16.mxu1 %v1836_v3  ;;  %v1867_v1 = vunpack.c.h.s8.bf16 %v1187_v46  ;;  %v1874_v3 = vunpack.c.l.s8.bf16 %v1194_v56  ;;  %v1882_v17 = vunpack.c.h.s8.bf16 %v1194_v56  ;;  %v1209_v56 = vld [vmem:[#allocation6 + $0x5c0] sm:$0xff] }
 0x1be   :  { %2654 = vmatpush1.bf16.msra.mxu0 %v1833_v21  ;;  %2982 = vmatpush1.bf16.msra.mxu1 %v1835_v22  ;;  %v1202_v21 = vld [vmem:[#allocation6 + $0x588] sm:$0xff]  ;;  %v1204_v22 = vld [vmem:[#allocation6 + $0x598] sm:$0xff] }
 0x1bf   :  { %2655 = vmatprep.subr.bf16.mxu0 %v1842_v27  ;;  %2983 = vmatprep.subr.bf16.mxu1 %v1844_v20  ;;  %v1883_v27 = vunpack.c.h.s8.bf16 %v1195_v6  ;;  %v1890_v20 = vunpack.c.l.s8.bf16 %v1202_v21  ;;  %v1892_v28 = vunpack.c.l.s8.bf16 %v1204_v22  ;;  %v1898_v37 = vunpack.c.h.s8.bf16 %v1202_v21  ;;  %v1220_v6 = vld [vmem:[#allocation6 + $0x618] sm:$0xff] }
 0x1c0   :  { %v1924_v21 = vunpack.c.l.s8.bf16 %v1220_v6 }
 0x1c2   :  { %2656 = vmatpush1.bf16.msra.mxu0 %v1841_v34  ;;  %2984 = vmatpush1.bf16.msra.mxu1 %v1843_v31  ;;  %v1203_v34 = vld [vmem:[#allocation6 + $0x590] sm:$0xff]  ;;  %v786_v31 = vrot.slane %v5895_v13, %v5979_v26 }
 0x1c3   :  { %2657 = vmatprep.subr.bf16.mxu0 %v1850_v32  ;;  %2985 = vmatprep.subr.bf16.mxu1 %v1852_v33  ;;  %v798_v32 = vrot.slane %v5895_v13, %v5999_v57  ;;  %v1889_v33 = vunpack.c.l.s8.bf16 %v1201_v29  ;;  %v1891_v35 = vunpack.c.l.s8.bf16 %v1203_v34  ;;  %v896_v13 = vrot.slane %v5900_v15, %v5999_v57 }
 0x1c5   :  { %v854_v46 = vmul.f32 %v798_v32, %v5948_v18  ;;  %v1932_v32 = vunpack.c.h.s8.bf16 %v1220_v6 }
 0x1c6   :  { %2658 = vmatpush1.bf16.msra.mxu0 %v1849_v38  ;;  %2986 = vmatpush1.bf16.msra.mxu1 %v1851_v39  ;;  %v1900_v38 = vunpack.c.h.s8.bf16 %v1204_v22  ;;  %v851_v39 = vmul.f32 %v786_v31, %v5928_v55  ;;  %v1211_v55 = vld [vmem:[#allocation6 + $0x5d0] sm:$0xff]  ;;  %v1217_v22 = vld [vmem:[#allocation6 + $0x600] sm:$0xff]  ;;  %v1930_v31 = vunpack.c.h.s8.bf16 %v1218_v5 }
 0x1c7   :  { %2659 = vmatprep.subr.bf16.mxu0 %v1858_v41  ;;  %2987 = vmatprep.subr.bf16.mxu1 %v1860_v42  ;;  %v884_v41 = vrot.slane %v5900_v15, %v5979_v26  ;;  %v1210_v42 = vld [vmem:[#allocation6 + $0x5c8] sm:$0xff]  ;;  %v1916_v15 = vunpack.c.h.s8.bf16 %v1212_v45 }
 0x1c8   :  { %v1914_v18 = vunpack.c.h.s8.bf16 %v1210_v42 }
 0x1c9   :  { %v949_v60 = vadd.f32 %v884_v41, %v851_v39 }
 0x1ca   :  { %2660 = vmatpush1.bf16.msra.mxu0 %v1857_v47  ;;  %2988 = vmatpush1.bf16.msra.mxu1 %v1859_v48  ;;  %v1897_v47 = vunpack.c.h.s8.bf16 %v1201_v29  ;;  %v1899_v48 = vunpack.c.h.s8.bf16 %v1203_v34 }
 0x1cb   :  { %2661 = vmatprep.subr.bf16.mxu0 %v1866_v49  ;;  %2989 = vmatprep.subr.bf16.mxu1 %v1868_v52  ;;  %v1906_v49 = vunpack.c.l.s8.bf16 %v1210_v42  ;;  %v1908_v52 = vunpack.c.l.s8.bf16 %v1212_v45  ;;  %vm965_vm6 = vcmp.gt.f32.partialorder %v949_v60, 0.0  ;;  %v1225_v45 = vld [vmem:[#allocation6 + $0x640] sm:$0xff] }
 0x1ce   :  { %2662 = vmatpush1.bf16.msra.mxu0 %v1865_v63  ;;  %2990 = vmatpush1.bf16.msra.mxu1 %v1867_v1  ;;  %v952_v63 = vadd.f32 %v896_v13, %v854_v46  ;;  %v1905_v1 = vunpack.c.l.s8.bf16 %v1209_v56  ;;  %v1227_v46 = vld [vmem:[#allocation6 + $0x650] sm:$0xff]  ;;  %v1937_v13 = vunpack.c.l.s8.bf16 %v1225_v45 }
 0x1cf   :  { %2663 = vmatprep.subr.bf16.mxu0 %v1874_v3  ;;  %2991 = vmatprep.subr.bf16.mxu1 %v1876_v4  ;;  %v1907_v3 = vunpack.c.l.s8.bf16 %v1211_v55  ;;  %v981_v4 = vmul.f32 0.01, %v949_v60 }
 0x1d0   :  { %vm968_vm7 = vcmp.gt.f32.partialorder %v952_v63, 0.0 }
 0x1d2   :  { %2664 = vmatpush1.bf16.msra.mxu0 %v1873_v8  ;;  %2992 = vmatpush1.bf16.msra.mxu1 %v1875_v16  ;;  %v984_v8 = vmul.f32 0.01, %v952_v63  ;;  %v1913_v16 = vunpack.c.h.s8.bf16 %v1209_v56  ;;  %v1236_v56 = vld [vmem:[#allocation6 + $0x698] sm:$0xff] }
 0x1d3   :  { %2665 = vmatprep.subr.bf16.mxu0 %v1882_v17  ;;  %2993 = vmatprep.subr.bf16.mxu1 %v1884_v11  ;;  %v1915_v17 = vunpack.c.h.s8.bf16 %v1211_v55  ;;  %v1922_v11 = vunpack.c.l.s8.bf16 %v1218_v5  ;;  %v1945_v55 = vunpack.c.h.s8.bf16 %v1225_v45  ;;  %v1964_v6 = vunpack.c.h.s8.bf16 %v1236_v56  ;;  %v1251_v45 = vld [vmem:[#allocation6 + $0x710] sm:$0xff] }
 0x1d6   :  { %2666 = vmatpush1.bf16.msra.mxu0 %v1881_v24  ;;  %2994 = vmatpush1.bf16.msra.mxu1 %v1883_v27  ;;  %v1219_v24 = vld [vmem:[#allocation6 + $0x610] sm:$0xff]  ;;  %v997_v27 = vsel %vm965_vm6, %v949_v60, %v981_v4  ;;  %v1947_v60 = vunpack.c.h.s8.bf16 %v1227_v46 }
 0x1d7   :  { %2667 = vmatprep.subr.bf16.mxu0 %v1890_v20  ;;  %2995 = vmatprep.subr.bf16.mxu1 %v1892_v28  ;;  %v1000_v20 = vsel %vm968_vm7, %v952_v63, %v984_v8  ;;  %v1921_v28 = vunpack.c.l.s8.bf16 %v1217_v22  ;;  %v1923_v29 = vunpack.c.l.s8.bf16 %v1219_v24  ;;  %v6023_v34 = vpack.c.bf16 %v997_v27, %v997_v27  ;;  %v1242_v8 = vld [vmem:[#allocation6 + $0x6c8] sm:$0xff]  ;;  %v1243_v27 = vld [vmem:[#allocation6 + $0x6d0] sm:$0xff] }
 0x1d8   :  { %v1931_v39 = vunpack.c.h.s8.bf16 %v1219_v24  ;;  %v1241_v24 = vld [vmem:[#allocation6 + $0x6c0] sm:$0xff] }
 0x1da   :  { %2668 = vmatpush1.bf16.msra.mxu0 %v1889_v33  ;;  %2996 = vmatpush1.bf16.msra.mxu1 %v1891_v35  ;;  %v1226_v33 = vld [vmem:[#allocation6 + $0x648] sm:$0xff]  ;;  %v1228_v35 = vld [vmem:[#allocation6 + $0x658] sm:$0xff] }
 0x1db   :  { %2669 = vmatprep.subr.bf16.mxu0 %v1898_v37  ;;  %2997 = vmatprep.subr.bf16.mxu1 %v1900_v38  ;;  %v6025_v37 = vpack.c.bf16 %v1000_v20, %v1000_v20  ;;  %v1929_v38 = vunpack.c.h.s8.bf16 %v1217_v22  ;;  %v1938_v41 = vunpack.c.l.s8.bf16 %v1226_v33  ;;  %v1940_v42 = vunpack.c.l.s8.bf16 %v1228_v35 }
 0x1dc   :  { %v1969_v20 = vunpack.c.l.s8.bf16 %v1241_v24 }
 0x1de   :  { %2670 = vmatpush1.bf16.msra.mxu0 %v1897_v47  ;;  %2998 = vmatpush1.bf16.msra.mxu1 %v1899_v48  ;;  %v1939_v47 = vunpack.c.l.s8.bf16 %v1227_v46  ;;  %v1946_v48 = vunpack.c.h.s8.bf16 %v1226_v33  ;;  %v1252_v33 = vld [vmem:[#allocation6 + $0x718] sm:$0xff] }
 0x1df   :  { %2671 = vmatprep.subr.bf16.mxu0 %v1906_v49  ;;  %2999 = vmatprep.subr.bf16.mxu1 %v1908_v52  ;;  %v1948_v49 = vunpack.c.h.s8.bf16 %v1228_v35  ;;  %v1234_v52 = vld [vmem:[#allocation6 + $0x688] sm:$0xff]  ;;  %v1977_v35 = vunpack.c.h.s8.bf16 %v1241_v24  ;;  %v1267_v24 = vld [vmem:[#allocation6 + $0x790] sm:$0xff] }
 0x1e0   :  { %v1954_v63 = vunpack.c.l.s8.bf16 %v1234_v52  ;;  %v1962_v5 = vunpack.c.h.s8.bf16 %v1234_v52  ;;  %v1260_v52 = vld [vmem:[#allocation6 + $0x758] sm:$0xff] }
 0x1e2   :  { %2672 = vmatpush1.bf16.msra.mxu0 %v1905_v1  ;;  %3000 = vmatpush1.bf16.msra.mxu1 %v1907_v3  ;;  %v1956_v1 = vunpack.c.l.s8.bf16 %v1236_v56  ;;  %v1233_v3 = vld [vmem:[#allocation6 + $0x680] sm:$0xff] }
 0x1e3   :  { %2673 = vmatprep.subr.bf16.mxu0 %v1914_v18  ;;  %3001 = vmatprep.subr.bf16.mxu1 %v1916_v15  ;;  %v1235_v18 = vld [vmem:[#allocation6 + $0x690] sm:$0xff]  ;;  %v1953_v15 = vunpack.c.l.s8.bf16 %v1233_v3 }
 0x1e4   :  { %v1955_v4 = vunpack.c.l.s8.bf16 %v1235_v18 }
 0x1e6   :  { %2674 = vmatpush1.bf16.msra.mxu0 %v1913_v16  ;;  %3002 = vmatpush1.bf16.msra.mxu1 %v1915_v17  ;;  %v1244_v16 = vld [vmem:[#allocation6 + $0x6d8] sm:$0xff]  ;;  %v1961_v17 = vunpack.c.h.s8.bf16 %v1233_v3  ;;  %v1259_v3 = vld [vmem:[#allocation6 + $0x750] sm:$0xff] }
 0x1e7   :  { %2684 = vmatprep.subr.bf16.mxu0 %v1922_v11  ;;  %3012 = vmatprep.subr.bf16.mxu1 %v1924_v21  ;;  %v1963_v11 = vunpack.c.h.s8.bf16 %v1235_v18  ;;  %v1970_v21 = vunpack.c.l.s8.bf16 %v1242_v8  ;;  %v1972_v22 = vunpack.c.l.s8.bf16 %v1244_v16 }
 0x1e9   :  { %2676 = vmatmul.mubr.bf16.vlgmr.msra.gmra.mrb[0].mxu0 %v6023_v34  ;;  %3004 = vmatmul.mubr.bf16.vlgmr.msra.gmra.mrb[16].mxu1 %v6023_v34 }
 0x1ea   :  { %2685 = vmatpush1.bf16.msra.mxu0 %v1921_v28  ;;  %3013 = vmatpush1.bf16.msra.mxu1 %v1923_v29  ;;  %v1971_v28 = vunpack.c.l.s8.bf16 %v1243_v27  ;;  %v1978_v29 = vunpack.c.h.s8.bf16 %v1242_v8  ;;  %v1268_v8 = vld [vmem:[#allocation6 + $0x798] sm:$0xff] }
 0x1eb   :  { %2686 = vmatprep.subr.bf16.mxu0 %v1930_v31  ;;  %3014 = vmatprep.subr.bf16.mxu1 %v1932_v32  ;;  %v1980_v31 = vunpack.c.h.s8.bf16 %v1244_v16  ;;  %v1250_v32 = vld [vmem:[#allocation6 + $0x708] sm:$0xff] }
 0x1ec   :  { %2716 = vmatprep.mubr.bf16.mxu0 %v6025_v37  ;;  %3044 = vmatprep.mubr.bf16.mxu1 %v6025_v37 }
 0x1ee   :  { %2687 = vmatpush1.bf16.msra.mxu0 %v1929_v38  ;;  %3015 = vmatpush1.bf16.msra.mxu1 %v1931_v39  ;;  %v1979_v38 = vunpack.c.h.s8.bf16 %v1243_v27  ;;  %v1986_v39 = vunpack.c.l.s8.bf16 %v1250_v32  ;;  %v5542_v27 = vld [vmem:[#allocation12] ss:$2 sm:$0xff] }
 0x1ef   :  { %2688 = vmatprep.subr.bf16.mxu0 %v1938_v41  ;;  %3016 = vmatprep.subr.bf16.mxu1 %v1940_v42  ;;  %v1988_v41 = vunpack.c.l.s8.bf16 %v1252_v33  ;;  %v1249_v42 = vld [vmem:[#allocation6 + $0x700] sm:$0xff] }
 0x1f0   :  { %v1985_v46 = vunpack.c.l.s8.bf16 %v1249_v42  ;;  %v1993_v56 = vunpack.c.h.s8.bf16 %v1249_v42  ;;  %v1276_v42 = vld [vmem:[#allocation6 + $0x7d8] sm:$0xff] }
 0x1f2   :  { %2689 = vmatpush1.bf16.msra.mxu0 %v1937_v13  ;;  %3017 = vmatpush1.bf16.msra.mxu1 %v1939_v47  ;;  %v1987_v13 = vunpack.c.l.s8.bf16 %v1251_v45  ;;  %v1994_v47 = vunpack.c.h.s8.bf16 %v1250_v32 }
 0x1f3   :  { %2690 = vmatprep.subr.bf16.mxu0 %v1946_v48  ;;  %3018 = vmatprep.subr.bf16.mxu1 %v1948_v49  ;;  %v1996_v48 = vunpack.c.h.s8.bf16 %v1252_v33  ;;  %v1258_v49 = vld [vmem:[#allocation6 + $0x748] sm:$0xff]  ;;  %v2028_v33 = vunpack.c.h.s8.bf16 %v1268_v8 }
 0x1f6   :  { %2691 = vmatpush1.bf16.msra.mxu0 %v1945_v55  ;;  %3019 = vmatpush1.bf16.msra.mxu1 %v1947_v60  ;;  %v1995_v55 = vunpack.c.h.s8.bf16 %v1251_v45  ;;  %v2002_v60 = vunpack.c.l.s8.bf16 %v1258_v49 }
 0x1f7   :  { %2692 = vmatprep.subr.bf16.mxu0 %v1954_v63  ;;  %3020 = vmatprep.subr.bf16.mxu1 %v1956_v1  ;;  %v2004_v63 = vunpack.c.l.s8.bf16 %v1260_v52  ;;  %v1257_v1 = vld [vmem:[#allocation6 + $0x740] sm:$0xff] }
 0x1f8   :  { %v2001_v18 = vunpack.c.l.s8.bf16 %v1257_v1  ;;  %v2009_v16 = vunpack.c.h.s8.bf16 %v1257_v1 }
 0x1fa   :  { %2693 = vmatpush1.bf16.msra.mxu0 %v1953_v15  ;;  %3021 = vmatpush1.bf16.msra.mxu1 %v1955_v4  ;;  %v2003_v15 = vunpack.c.l.s8.bf16 %v1259_v3  ;;  %v2010_v4 = vunpack.c.h.s8.bf16 %v1258_v49  ;;  %v1273_v49 = vld [vmem:[#allocation6 + $0x7c0] sm:$0xff] }
 0x1fb   :  { %2694 = vmatprep.subr.bf16.mxu0 %v1962_v5  ;;  %3022 = vmatprep.subr.bf16.mxu1 %v1964_v6  ;;  %v2012_v5 = vunpack.c.h.s8.bf16 %v1260_v52  ;;  %v1266_v6 = vld [vmem:[#allocation6 + $0x788] sm:$0xff] }
 0x1fc   :  { %v2026_v32 = vunpack.c.h.s8.bf16 %v1266_v6 }
 0x1fe   :  { %2695 = vmatpush1.bf16.msra.mxu0 %v1961_v17  ;;  %3023 = vmatpush1.bf16.msra.mxu1 %v1963_v11  ;;  %v2011_v17 = vunpack.c.h.s8.bf16 %v1259_v3  ;;  %v2018_v11 = vunpack.c.l.s8.bf16 %v1266_v6  ;;  %v1282_v3 = vld [vmem:[#allocation6 + $0x808] sm:$0xff] }
 0x1ff   :  { %2696 = vmatprep.subr.bf16.mxu0 %v1970_v21  ;;  %3024 = vmatprep.subr.bf16.mxu1 %v1972_v22  ;;  %v2020_v21 = vunpack.c.l.s8.bf16 %v1268_v8  ;;  %v1265_v22 = vld [vmem:[#allocation6 + $0x780] sm:$0xff] }
 0x200   :  { %v1281_v8 = vld [vmem:[#allocation6 + $0x800] sm:$0xff] }
 0x202   :  { %2697 = vmatpush1.bf16.msra.mxu0 %v1969_v20  ;;  %3025 = vmatpush1.bf16.msra.mxu1 %v1971_v28  ;;  %v794_v20 = vrot.slane %v5542_v27, %v5994_v50  ;;  %v806_v28 = vrot.slane %v5960_v53, %v5898_v14  ;;  %v904_v53 = vrot.slane %v5962_v54, %v5898_v14  ;;  %v2044_v54 = vunpack.c.h.s8.bf16 %v1276_v42 }
 0x203   :  { %2698 = vmatprep.subr.bf16.mxu0 %v1978_v29  ;;  %3026 = vmatprep.subr.bf16.mxu1 %v1980_v31  ;;  %v2017_v29 = vunpack.c.l.s8.bf16 %v1265_v22  ;;  %v2019_v31 = vunpack.c.l.s8.bf16 %v1267_v24 }
 0x204   :  { %v856_v45 = vmul.f32 %v806_v28, %v5958_v43 }
 0x206   :  { %2699 = vmatpush1.bf16.msra.mxu0 %v1977_v35  ;;  %3027 = vmatpush1.bf16.msra.mxu1 %v1979_v38  ;;  %v853_v35 = vmul.f32 %v794_v20, %v5946_v10  ;;  %v5543_v38 = vld [vmem:[#allocation12 + $0x1] ss:$2 sm:$0xff]  ;;  %v1275_v10 = vld [vmem:[#allocation6 + $0x7d0] sm:$0xff]  ;;  %v2058_v20 = vunpack.c.h.s8.bf16 %v1282_v3 }
 0x207   :  { %2700 = vmatprep.subr.bf16.mxu0 %v1986_v39  ;;  %3028 = vmatprep.subr.bf16.mxu1 %v1988_v41  ;;  %v892_v39 = vrot.slane %v5543_v38, %v5994_v50  ;;  %v1274_v41 = vld [vmem:[#allocation6 + $0x7c8] sm:$0xff] }
 0x208   :  { %v2042_v43 = vunpack.c.h.s8.bf16 %v1274_v41 }
 0x209   :  { %v951_v52 = vadd.f32 %v892_v39, %v853_v35  ;;  %v1289_v39 = vld [vmem:[#allocation6 + $0x840] sm:$0xff] }
 0x20a   :  { %2701 = vmatpush1.bf16.msra.mxu0 %v1985_v46  ;;  %3029 = vmatpush1.bf16.msra.mxu1 %v1987_v13  ;;  %v2025_v46 = vunpack.c.h.s8.bf16 %v1265_v22  ;;  %v2027_v13 = vunpack.c.h.s8.bf16 %v1267_v24 }
 0x20b   :  { %2702 = vmatprep.subr.bf16.mxu0 %v1994_v47  ;;  %3030 = vmatprep.subr.bf16.mxu1 %v1996_v48  ;;  %v2034_v47 = vunpack.c.l.s8.bf16 %v1274_v41  ;;  %v2036_v48 = vunpack.c.l.s8.bf16 %v1276_v42  ;;  %vm967_vm8 = vcmp.gt.f32.partialorder %v951_v52, 0.0  ;;  %v1291_v41 = vld [vmem:[#allocation6 + $0x850] sm:$0xff]  ;;  %v2065_v42 = vunpack.c.l.s8.bf16 %v1289_v39 }
 0x20e   :  { %2703 = vmatpush1.bf16.msra.mxu0 %v1993_v56  ;;  %3031 = vmatpush1.bf16.msra.mxu1 %v1995_v55  ;;  %v954_v56 = vadd.f32 %v904_v53, %v856_v45  ;;  %v2033_v55 = vunpack.c.l.s8.bf16 %v1273_v49  ;;  %v2067_v45 = vunpack.c.l.s8.bf16 %v1291_v41 }
 0x20f   :  { %2704 = vmatprep.subr.bf16.mxu0 %v2002_v60  ;;  %3032 = vmatprep.subr.bf16.mxu1 %v2004_v63  ;;  %v2035_v60 = vunpack.c.l.s8.bf16 %v1275_v10  ;;  %v983_v63 = vmul.f32 0.01, %v951_v52 }
 0x210   :  { %v986_v1 = vmul.f32 0.01, %v954_v56  ;;  %vm970_vm9 = vcmp.gt.f32.partialorder %v954_v56, 0.0 }
 0x212   :  { %2705 = vmatpush1.bf16.msra.mxu0 %v2001_v18  ;;  %3033 = vmatpush1.bf16.msra.mxu1 %v2003_v15  ;;  %v1284_v18 = vld [vmem:[#allocation6 + $0x818] sm:$0xff]  ;;  %v2041_v15 = vunpack.c.h.s8.bf16 %v1273_v49  ;;  %v2075_v49 = vunpack.c.h.s8.bf16 %v1291_v41 }
 0x213   :  { %2706 = vmatprep.subr.bf16.mxu0 %v2010_v4  ;;  %3034 = vmatprep.subr.bf16.mxu1 %v2012_v5  ;;  %v2043_v4 = vunpack.c.h.s8.bf16 %v1275_v10  ;;  %v2050_v5 = vunpack.c.l.s8.bf16 %v1282_v3  ;;  %v2052_v6 = vunpack.c.l.s8.bf16 %v1284_v18  ;;  %v2060_v28 = vunpack.c.h.s8.bf16 %v1284_v18  ;;  %v1308_v3 = vld [vmem:[#allocation6 + $0x8d8] sm:$0xff] }
 0x216   :  { %2707 = vmatpush1.bf16.msra.mxu0 %v2009_v16  ;;  %3035 = vmatpush1.bf16.msra.mxu1 %v2011_v17  ;;  %v1283_v16 = vld [vmem:[#allocation6 + $0x810] sm:$0xff]  ;;  %v999_v17 = vsel %vm967_vm8, %v951_v52, %v983_v63 }
 0x217   :  { %2708 = vmatprep.subr.bf16.mxu0 %v2018_v11  ;;  %3036 = vmatprep.subr.bf16.mxu1 %v2020_v21  ;;  %v1002_v11 = vsel %vm970_vm9, %v954_v56, %v986_v1  ;;  %v2049_v21 = vunpack.c.l.s8.bf16 %v1281_v8  ;;  %v2051_v22 = vunpack.c.l.s8.bf16 %v1283_v16  ;;  %v6039_v24 = vpack.c.bf16 %v999_v17, %v999_v17  ;;  %v1297_v56 = vld [vmem:[#allocation6 + $0x880] sm:$0xff]  ;;  %v1306_v1 = vld [vmem:[#allocation6 + $0x8c8] sm:$0xff] }
 0x218   :  { %v6041_v27 = vpack.c.bf16 %v1002_v11, %v1002_v11  ;;  %v2089_v18 = vunpack.c.h.s8.bf16 %v1297_v56  ;;  %v2106_v11 = vunpack.c.h.s8.bf16 %v1306_v1 }
 0x21a   :  { %2709 = vmatpush1.bf16.msra.mxu0 %v2017_v29  ;;  %3037 = vmatpush1.bf16.msra.mxu1 %v2019_v31  ;;  %v1290_v29 = vld [vmem:[#allocation6 + $0x848] sm:$0xff]  ;;  %v1292_v31 = vld [vmem:[#allocation6 + $0x858] sm:$0xff] }
 0x21b   :  { %2710 = vmatprep.subr.bf16.mxu0 %v2026_v32  ;;  %3038 = vmatprep.subr.bf16.mxu1 %v2028_v33  ;;  %v2057_v32 = vunpack.c.h.s8.bf16 %v1281_v8  ;;  %v2059_v33 = vunpack.c.h.s8.bf16 %v1283_v16  ;;  %v2066_v35 = vunpack.c.l.s8.bf16 %v1290_v29  ;;  %v2068_v38 = vunpack.c.l.s8.bf16 %v1292_v31  ;;  %v1307_v8 = vld [vmem:[#allocation6 + $0x8d0] sm:$0xff] }
 0x21c   :  { %v2074_v53 = vunpack.c.h.s8.bf16 %v1290_v29  ;;  %v2099_v17 = vunpack.c.l.s8.bf16 %v1307_v8  ;;  %v2107_v29 = vunpack.c.h.s8.bf16 %v1307_v8 }
 0x21e   :  { %2711 = vmatpush1.bf16.msra.mxu0 %v2025_v46  ;;  %3039 = vmatpush1.bf16.msra.mxu1 %v2027_v13  ;;  %v2076_v46 = vunpack.c.h.s8.bf16 %v1292_v31  ;;  %v1298_v13 = vld [vmem:[#allocation6 + $0x888] sm:$0xff] }
 0x21f   :  { %2712 = vmatprep.subr.bf16.mxu0 %v2034_v47  ;;  %3040 = vmatprep.subr.bf16.mxu1 %v2036_v48  ;;  %v1300_v47 = vld [vmem:[#allocation6 + $0x898] sm:$0xff]  ;;  %v2073_v48 = vunpack.c.h.s8.bf16 %v1289_v39  ;;  %v2082_v10 = vunpack.c.l.s8.bf16 %v1298_v13 }
 0x220   :  { %v2084_v52 = vunpack.c.l.s8.bf16 %v1300_v47  ;;  %v2092_v63 = vunpack.c.h.s8.bf16 %v1300_v47 }
 0x222   :  { %2713 = vmatpush1.bf16.msra.mxu0 %v2033_v55  ;;  %3041 = vmatpush1.bf16.msra.mxu1 %v2035_v60  ;;  %v1299_v55 = vld [vmem:[#allocation6 + $0x890] sm:$0xff]  ;;  %v2081_v60 = vunpack.c.l.s8.bf16 %v1297_v56 }
 0x223   :  { %2714 = vmatprep.subr.bf16.mxu0 %v2042_v43  ;;  %3042 = vmatprep.subr.bf16.mxu1 %v2044_v54  ;;  %v2083_v43 = vunpack.c.l.s8.bf16 %v1299_v55  ;;  %v2090_v54 = vunpack.c.h.s8.bf16 %v1298_v13 }
 0x226   :  { %2715 = vmatpush1.bf16.msra.mxu0 %v2041_v15  ;;  %3043 = vmatpush1.bf16.msra.mxu1 %v2043_v4  ;;  %v2091_v15 = vunpack.c.h.s8.bf16 %v1299_v55  ;;  %v2098_v4 = vunpack.c.l.s8.bf16 %v1306_v1 }
 0x227   :  { %2725 = vmatprep.subr.bf16.mxu0 %v2050_v5  ;;  %3053 = vmatprep.subr.bf16.mxu1 %v2052_v6  ;;  %v2100_v5 = vunpack.c.l.s8.bf16 %v1308_v3  ;;  %v1305_v6 = vld [vmem:[#allocation6 + $0x8c0] sm:$0xff] }
 0x228   :  { %v2097_v16 = vunpack.c.l.s8.bf16 %v1305_v6 }
 0x229   :  { %2717 = vmatmul.mubr.bf16.vlgmr.msra.gmra.mrb[0].mxu0 %v6039_v24  ;;  %3045 = vmatmul.mubr.bf16.vlgmr.msra.gmra.mrb[16].mxu1 %v6039_v24 }
 0x22a   :  { %2726 = vmatpush1.bf16.msra.mxu0 %v2049_v21  ;;  %3054 = vmatpush1.bf16.msra.mxu1 %v2051_v22  ;;  %v2108_v21 = vunpack.c.h.s8.bf16 %v1308_v3  ;;  %v1314_v22 = vld [vmem:[#allocation6 + $0x908] sm:$0xff] }
 0x22b   :  { %2757 = vmatprep.mubr.bf16.mxu0 %v6041_v27  ;;  %3085 = vmatprep.mubr.bf16.mxu1 %v6041_v27  ;;  %v2114_v31 = vunpack.c.l.s8.bf16 %v1314_v22  ;;  %v2122_v41 = vunpack.c.h.s8.bf16 %v1314_v22 }
 0x22c   :  { %2727 = vmatprep.subr.bf16.mxu0 %v2058_v20  ;;  %3055 = vmatprep.subr.bf16.mxu1 %v2060_v28  ;;  %v1316_v20 = vld [vmem:[#allocation6 + $0x918] sm:$0xff]  ;;  %v2105_v28 = vunpack.c.h.s8.bf16 %v1305_v6 }
 0x22e   :  { %2728 = vmatpush1.bf16.msra.mxu0 %v2057_v32  ;;  %3056 = vmatpush1.bf16.msra.mxu1 %v2059_v33  ;;  %v2116_v32 = vunpack.c.l.s8.bf16 %v1316_v20  ;;  %v1313_v33 = vld [vmem:[#allocation6 + $0x900] sm:$0xff] }
 0x22f   :  { %2729 = vmatprep.subr.bf16.mxu0 %v2066_v35  ;;  %3057 = vmatprep.subr.bf16.mxu1 %v2068_v38  ;;  %v1315_v35 = vld [vmem:[#allocation6 + $0x910] sm:$0xff]  ;;  %v2113_v38 = vunpack.c.l.s8.bf16 %v1313_v33 }
 0x230   :  { %v2115_v39 = vunpack.c.l.s8.bf16 %v1315_v35  ;;  %v2123_v13 = vunpack.c.h.s8.bf16 %v1315_v35 }
 0x232   :  { %2730 = vmatpush1.bf16.msra.mxu0 %v2065_v42  ;;  %3058 = vmatpush1.bf16.msra.mxu1 %v2067_v45  ;;  %v2124_v42 = vunpack.c.h.s8.bf16 %v1316_v20  ;;  %v1322_v45 = vld [vmem:[#allocation6 + $0x948] sm:$0xff]  ;;  %v5545_v20 = vld [vmem:[#allocation12 + $0x11] ss:$2 sm:$0xff] }
 0x233   :  { %2731 = vmatprep.subr.bf16.mxu0 %v2074_v53  ;;  %3059 = vmatprep.subr.bf16.mxu1 %v2076_v46  ;;  %v1324_v53 = vld [vmem:[#allocation6 + $0x958] sm:$0xff]  ;;  %v2121_v46 = vunpack.c.h.s8.bf16 %v1313_v33  ;;  %v2130_v47 = vunpack.c.l.s8.bf16 %v1322_v45  ;;  %v2138_v55 = vunpack.c.h.s8.bf16 %v1322_v45  ;;  %v912_v33 = vrot.slane %v5545_v20, %v5911_v25  ;;  %v1339_v45 = vld [vmem:[#allocation6 + $0x9d0] sm:$0xff] }
 0x236   :  { %2732 = vmatpush1.bf16.msra.mxu0 %v2073_v48  ;;  %3060 = vmatpush1.bf16.msra.mxu1 %v2075_v49  ;;  %v2132_v48 = vunpack.c.l.s8.bf16 %v1324_v53  ;;  %v1321_v49 = vld [vmem:[#allocation6 + $0x940] sm:$0xff] }
 0x237   :  { %2733 = vmatprep.subr.bf16.mxu0 %v2082_v10  ;;  %3061 = vmatprep.subr.bf16.mxu1 %v2084_v52  ;;  %v1323_v10 = vld [vmem:[#allocation6 + $0x950] sm:$0xff]  ;;  %v2129_v52 = vunpack.c.l.s8.bf16 %v1321_v49 }
 0x238   :  { %v2131_v56 = vunpack.c.l.s8.bf16 %v1323_v10  ;;  %v2139_v1 = vunpack.c.h.s8.bf16 %v1323_v10  ;;  %v1348_v10 = vld [vmem:[#allocation6 + $0xa18] sm:$0xff] }
 0x23a   :  { %2734 = vmatpush1.bf16.msra.mxu0 %v2081_v60  ;;  %3062 = vmatpush1.bf16.msra.mxu1 %v2083_v43  ;;  %v2140_v60 = vunpack.c.h.s8.bf16 %v1324_v53  ;;  %v1330_v43 = vld [vmem:[#allocation6 + $0x988] sm:$0xff] }
 0x23b   :  { %2735 = vmatprep.subr.bf16.mxu0 %v2090_v54  ;;  %3063 = vmatprep.subr.bf16.mxu1 %v2092_v63  ;;  %v1332_v54 = vld [vmem:[#allocation6 + $0x998] sm:$0xff]  ;;  %v2137_v63 = vunpack.c.h.s8.bf16 %v1321_v49  ;;  %v2146_v3 = vunpack.c.l.s8.bf16 %v1330_v43  ;;  %v1346_v49 = vld [vmem:[#allocation6 + $0xa08] sm:$0xff] }
 0x23e   :  { %2736 = vmatpush1.bf16.msra.mxu0 %v2089_v18  ;;  %3064 = vmatpush1.bf16.msra.mxu1 %v2091_v15  ;;  %v2148_v18 = vunpack.c.l.s8.bf16 %v1332_v54  ;;  %v1329_v15 = vld [vmem:[#allocation6 + $0x980] sm:$0xff] }
 0x23f   :  { %2737 = vmatprep.subr.bf16.mxu0 %v2098_v4  ;;  %3065 = vmatprep.subr.bf16.mxu1 %v2100_v5  ;;  %v1331_v4 = vld [vmem:[#allocation6 + $0x990] sm:$0xff]  ;;  %v2153_v35 = vunpack.c.h.s8.bf16 %v1329_v15 }
 0x240   :  { %v5544_v5 = vld [vmem:[#allocation12 + $0x10] ss:$2 sm:$0xff] }
 0x241   :  { %v802_v6 = vrot.slane %v5544_v5, %v5893_v12  ;;  %v814_v8 = vrot.slane %v5544_v5, %v5911_v25 }
 0x242   :  { %2738 = vmatpush1.bf16.msra.mxu0 %v2097_v16  ;;  %3066 = vmatpush1.bf16.msra.mxu1 %v2099_v17  ;;  %v2145_v16 = vunpack.c.l.s8.bf16 %v1329_v15  ;;  %v2147_v17 = vunpack.c.l.s8.bf16 %v1331_v4 }
 0x243   :  { %2739 = vmatprep.subr.bf16.mxu0 %v2106_v11  ;;  %3067 = vmatprep.subr.bf16.mxu1 %v2108_v21  ;;  %v2154_v11 = vunpack.c.h.s8.bf16 %v1330_v43  ;;  %v2156_v21 = vunpack.c.h.s8.bf16 %v1332_v54  ;;  %v855_v22 = vmul.f32 %v802_v6, %v5956_v59  ;;  %v2180_v43 = vunpack.c.l.s8.bf16 %v1348_v10  ;;  %v1345_v54 = vld [vmem:[#allocation6 + $0xa00] sm:$0xff] }
 0x244   :  { %v2186_v6 = vunpack.c.h.s8.bf16 %v1346_v49 }
 0x246   :  { %2740 = vmatpush1.bf16.msra.mxu0 %v2105_v28  ;;  %3068 = vmatpush1.bf16.msra.mxu1 %v2107_v29  ;;  %v900_v28 = vrot.slane %v5545_v20, %v5893_v12  ;;  %v1338_v29 = vld [vmem:[#allocation6 + $0x9c8] sm:$0xff]  ;;  %v1353_v20 = vld [vmem:[#allocation6 + $0xa40] sm:$0xff] }
 0x247   :  { %2741 = vmatprep.subr.bf16.mxu0 %v2114_v31  ;;  %3069 = vmatprep.subr.bf16.mxu1 %v2116_v32  ;;  %v1340_v31 = vld [vmem:[#allocation6 + $0x9d8] sm:$0xff]  ;;  %v858_v32 = vmul.f32 %v814_v8, %v5974_v9  ;;  %v2170_v9 = vunpack.c.h.s8.bf16 %v1338_v29  ;;  %v2188_v8 = vunpack.c.h.s8.bf16 %v1348_v10 }
 0x248   :  { %v953_v59 = vadd.f32 %v900_v28, %v855_v22  ;;  %v1372_v10 = vld [vmem:[#allocation6 + $0xad8] sm:$0xff] }
 0x249   :  { %v956_v53 = vadd.f32 %v912_v33, %v858_v32 }
 0x24a   :  { %2742 = vmatpush1.bf16.msra.mxu0 %v2113_v38  ;;  %3070 = vmatpush1.bf16.msra.mxu1 %v2115_v39  ;;  %v2155_v38 = vunpack.c.h.s8.bf16 %v1331_v4  ;;  %v2162_v39 = vunpack.c.l.s8.bf16 %v1338_v29  ;;  %vm969_vm10 = vcmp.gt.f32.partialorder %v953_v59, 0.0  ;;  %v1355_v29 = vld [vmem:[#allocation6 + $0xa50] sm:$0xff] }
 0x24b   :  { %2743 = vmatprep.subr.bf16.mxu0 %v2122_v41  ;;  %3071 = vmatprep.subr.bf16.mxu1 %v2124_v42  ;;  %v2164_v41 = vunpack.c.l.s8.bf16 %v1340_v31  ;;  %v1337_v42 = vld [vmem:[#allocation6 + $0x9c0] sm:$0xff]  ;;  %vm972_vm11 = vcmp.gt.f32.partialorder %v956_v53, 0.0  ;;  %v2195_v32 = vunpack.c.l.s8.bf16 %v1355_v29 }
 0x24e   :  { %2744 = vmatpush1.bf16.msra.mxu0 %v2121_v46  ;;  %3072 = vmatpush1.bf16.msra.mxu1 %v2123_v13  ;;  %v2161_v46 = vunpack.c.l.s8.bf16 %v1337_v42  ;;  %v2163_v13 = vunpack.c.l.s8.bf16 %v1339_v45 }
 0x24f   :  { %2745 = vmatprep.subr.bf16.mxu0 %v2130_v47  ;;  %3073 = vmatprep.subr.bf16.mxu1 %v2132_v48  ;;  %v2172_v47 = vunpack.c.h.s8.bf16 %v1340_v31  ;;  %v985_v48 = vmul.f32 0.01, %v953_v59  ;;  %v2193_v31 = vunpack.c.l.s8.bf16 %v1353_v20 }
 0x252   :  { %2746 = vmatpush1.bf16.msra.mxu0 %v2129_v52  ;;  %3074 = vmatpush1.bf16.msra.mxu1 %v2131_v56  ;;  %v988_v52 = vmul.f32 0.01, %v956_v53  ;;  %v2169_v56 = vunpack.c.h.s8.bf16 %v1337_v42  ;;  %v2203_v42 = vunpack.c.h.s8.bf16 %v1355_v29 }
 0x253   :  { %2747 = vmatprep.subr.bf16.mxu0 %v2138_v55  ;;  %3075 = vmatprep.subr.bf16.mxu1 %v2140_v60  ;;  %v2171_v55 = vunpack.c.h.s8.bf16 %v1339_v45  ;;  %v2178_v60 = vunpack.c.l.s8.bf16 %v1346_v49  ;;  %v1370_v49 = vld [vmem:[#allocation6 + $0xac8] sm:$0xff] }
 0x256   :  { %2748 = vmatpush1.bf16.msra.mxu0 %v2137_v63  ;;  %3076 = vmatpush1.bf16.msra.mxu1 %v2139_v1  ;;  %v1001_v63 = vsel %vm969_vm10, %v953_v59, %v985_v48  ;;  %v1347_v1 = vld [vmem:[#allocation6 + $0xa10] sm:$0xff]  ;;  %v1361_v59 = vld [vmem:[#allocation6 + $0xa80] sm:$0xff] }
 0x257   :  { %2749 = vmatprep.subr.bf16.mxu0 %v2146_v3  ;;  %3077 = vmatprep.subr.bf16.mxu1 %v2148_v18  ;;  %v1004_v3 = vsel %vm972_vm11, %v956_v53, %v988_v52  ;;  %v2177_v18 = vunpack.c.l.s8.bf16 %v1345_v54  ;;  %v6053_v15 = vpack.c.bf16 %v1001_v63, %v1001_v63  ;;  %v2179_v4 = vunpack.c.l.s8.bf16 %v1347_v1 }
 0x258   :  { %v6055_v5 = vpack.c.bf16 %v1004_v3, %v1004_v3  ;;  %v2217_v52 = vunpack.c.h.s8.bf16 %v1361_v59  ;;  %v2234_v3 = vunpack.c.h.s8.bf16 %v1370_v49 }
 0x25a   :  { %2750 = vmatpush1.bf16.msra.mxu0 %v2145_v16  ;;  %3078 = vmatpush1.bf16.msra.mxu1 %v2147_v17  ;;  %v1354_v16 = vld [vmem:[#allocation6 + $0xa48] sm:$0xff]  ;;  %v1356_v17 = vld [vmem:[#allocation6 + $0xa58] sm:$0xff] }
 0x25b   :  { %2751 = vmatprep.subr.bf16.mxu0 %v2154_v11  ;;  %3079 = vmatprep.subr.bf16.mxu1 %v2156_v21  ;;  %v2185_v11 = vunpack.c.h.s8.bf16 %v1345_v54  ;;  %v2187_v21 = vunpack.c.h.s8.bf16 %v1347_v1  ;;  %v2194_v22 = vunpack.c.l.s8.bf16 %v1354_v16  ;;  %v2196_v28 = vunpack.c.l.s8.bf16 %v1356_v17  ;;  %v1371_v54 = vld [vmem:[#allocation6 + $0xad0] sm:$0xff] }
 0x25c   :  { %v2202_v33 = vunpack.c.h.s8.bf16 %v1354_v16  ;;  %v2227_v1 = vunpack.c.l.s8.bf16 %v1371_v54  ;;  %v2235_v16 = vunpack.c.h.s8.bf16 %v1371_v54 }
 0x25e   :  { %2752 = vmatpush1.bf16.msra.mxu0 %v2153_v35  ;;  %3080 = vmatpush1.bf16.msra.mxu1 %v2155_v38  ;;  %v2204_v35 = vunpack.c.h.s8.bf16 %v1356_v17  ;;  %v1362_v38 = vld [vmem:[#allocation6 + $0xa88] sm:$0xff] }
 0x25f   :  { %2753 = vmatprep.subr.bf16.mxu0 %v2162_v39  ;;  %3081 = vmatprep.subr.bf16.mxu1 %v2164_v41  ;;  %v1364_v39 = vld [vmem:[#allocation6 + $0xa98] sm:$0xff]  ;;  %v2201_v41 = vunpack.c.h.s8.bf16 %v1353_v20  ;;  %v2210_v45 = vunpack.c.l.s8.bf16 %v1362_v38 }
 0x260   :  { %v2212_v53 = vunpack.c.l.s8.bf16 %v1364_v39  ;;  %v2220_v48 = vunpack.c.h.s8.bf16 %v1364_v39 }
 0x262   :  { %2754 = vmatpush1.bf16.msra.mxu0 %v2161_v46  ;;  %3082 = vmatpush1.bf16.msra.mxu1 %v2163_v13  ;;  %v1363_v46 = vld [vmem:[#allocation6 + $0xa90] sm:$0xff]  ;;  %v2209_v13 = vunpack.c.l.s8.bf16 %v1361_v59 }
 0x263   :  { %2755 = vmatprep.subr.bf16.mxu0 %v2170_v9  ;;  %3083 = vmatprep.subr.bf16.mxu1 %v2172_v47  ;;  %v2211_v9 = vunpack.c.l.s8.bf16 %v1363_v46  ;;  %v2218_v47 = vunpack.c.h.s8.bf16 %v1362_v38 }
 0x266   :  { %2756 = vmatpush1.bf16.msra.mxu0 %v2169_v56  ;;  %3084 = vmatpush1.bf16.msra.mxu1 %v2171_v55  ;;  %v2219_v56 = vunpack.c.h.s8.bf16 %v1363_v46  ;;  %v2226_v55 = vunpack.c.l.s8.bf16 %v1370_v49 }
 0x267   :  { %2766 = vmatprep.subr.bf16.mxu0 %v2178_v60  ;;  %3094 = vmatprep.subr.bf16.mxu1 %v2180_v43  ;;  %v1369_v60 = vld [vmem:[#allocation6 + $0xac0] sm:$0xff]  ;;  %v2228_v43 = vunpack.c.l.s8.bf16 %v1372_v10 }
 0x268   :  { %v2225_v63 = vunpack.c.l.s8.bf16 %v1369_v60 }
 0x269   :  { %2758 = vmatmul.mubr.bf16.vlgmr.msra.gmra.mrb[0].mxu0 %v6053_v15  ;;  %3086 = vmatmul.mubr.bf16.vlgmr.msra.gmra.mrb[16].mxu1 %v6053_v15 }
 0x26a   :  { %2767 = vmatpush1.bf16.msra.mxu0 %v2177_v18  ;;  %2798 = vmatprep.mubr.bf16.mxu0 %v6055_v5  ;;  %v2236_v18 = vunpack.c.h.s8.bf16 %v1372_v10 }
 0x26b   :  { %3095 = vmatpush1.bf16.msra.mxu1 %v2179_v4  ;;  %3126 = vmatprep.mubr.bf16.mxu1 %v6055_v5  ;;  %v1378_v4 = vld [vmem:[#allocation6 + $0xb08] sm:$0xff] }
 0x26c   :  { %2768 = vmatprep.subr.bf16.mxu0 %v2186_v6  ;;  %3096 = vmatprep.subr.bf16.mxu1 %v2188_v8  ;;  %v1380_v6 = vld [vmem:[#allocation6 + $0xb18] sm:$0xff]  ;;  %v2233_v8 = vunpack.c.h.s8.bf16 %v1369_v60  ;;  %v2242_v17 = vunpack.c.l.s8.bf16 %v1378_v4  ;;  %v2250_v29 = vunpack.c.h.s8.bf16 %v1378_v4 }
 0x26e   :  { %2769 = vmatpush1.bf16.msra.mxu0 %v2185_v11  ;;  %v1377_v11 = vld [vmem:[#allocation6 + $0xb00] sm:$0xff] }
 0x26f   :  { %3097 = vmatpush1.bf16.msra.mxu1 %v2187_v21  ;;  %2770 = vmatprep.subr.bf16.mxu0 %v2194_v22  ;;  %v2244_v21 = vunpack.c.l.s8.bf16 %v1380_v6  ;;  %v1379_v22 = vld [vmem:[#allocation6 + $0xb10] sm:$0xff]  ;;  %v2241_v20 = vunpack.c.l.s8.bf16 %v1377_v11 }
 0x270   :  { %3098 = vmatprep.subr.bf16.mxu1 %v2196_v28  ;;  %v2243_v28 = vunpack.c.l.s8.bf16 %v1379_v22  ;;  %v2251_v38 = vunpack.c.h.s8.bf16 %v1379_v22 }
 0x272   :  { %2771 = vmatpush1.bf16.msra.mxu0 %v2193_v31  ;;  %v2252_v31 = vunpack.c.h.s8.bf16 %v1380_v6 }
 0x273   :  { %3099 = vmatpush1.bf16.msra.mxu1 %v2195_v32  ;;  %2772 = vmatprep.subr.bf16.mxu0 %v2202_v33  ;;  %v1386_v32 = vld [vmem:[#allocation6 + $0xb48] sm:$0xff]  ;;  %v1388_v33 = vld [vmem:[#allocation6 + $0xb58] sm:$0xff] }
 0x274   :  { %3100 = vmatprep.subr.bf16.mxu1 %v2204_v35  ;;  %v2249_v35 = vunpack.c.h.s8.bf16 %v1377_v11  ;;  %v2258_v39 = vunpack.c.l.s8.bf16 %v1386_v32  ;;  %v2266_v46 = vunpack.c.h.s8.bf16 %v1386_v32  ;;  %v990_v32 = vmul.f32 0.01, %v5996_v51 }
 0x276   :  { %2773 = vmatpush1.bf16.msra.mxu0 %v2201_v41  ;;  %v1385_v41 = vld [vmem:[#allocation6 + $0xb40] sm:$0xff] }
 0x277   :  { %3101 = vmatpush1.bf16.msra.mxu1 %v2203_v42  ;;  %2774 = vmatprep.subr.bf16.mxu0 %v2210_v45  ;;  %v2260_v42 = vunpack.c.l.s8.bf16 %v1388_v33  ;;  %v1387_v45 = vld [vmem:[#allocation6 + $0xb50] sm:$0xff]  ;;  %v2257_v59 = vunpack.c.l.s8.bf16 %v1385_v41 }
 0x278   :  { %3102 = vmatprep.subr.bf16.mxu1 %v2212_v53  ;;  %v2259_v53 = vunpack.c.l.s8.bf16 %v1387_v45  ;;  %v2267_v49 = vunpack.c.h.s8.bf16 %v1387_v45  ;;  %v1411_v45 = vld [vmem:[#allocation6 + $0xc10] sm:$0xff] }
 0x27a   :  { %2775 = vmatpush1.bf16.msra.mxu0 %v2209_v13  ;;  %v2268_v13 = vunpack.c.h.s8.bf16 %v1388_v33 }
 0x27b   :  { %3103 = vmatpush1.bf16.msra.mxu1 %v2211_v9  ;;  %2776 = vmatprep.subr.bf16.mxu0 %v2218_v47  ;;  %v1394_v9 = vld [vmem:[#allocation6 + $0xb88] sm:$0xff]  ;;  %v1396_v47 = vld [vmem:[#allocation6 + $0xb98] sm:$0xff] }
 0x27c   :  { %3104 = vmatprep.subr.bf16.mxu1 %v2220_v48  ;;  %v2265_v48 = vunpack.c.h.s8.bf16 %v1385_v41  ;;  %v2274_v10 = vunpack.c.l.s8.bf16 %v1394_v9  ;;  %v2282_v54 = vunpack.c.h.s8.bf16 %v1394_v9 }
 0x27e   :  { %2777 = vmatpush1.bf16.msra.mxu0 %v2217_v52  ;;  %v1393_v52 = vld [vmem:[#allocation6 + $0xb80] sm:$0xff] }
 0x27f   :  { %3105 = vmatpush1.bf16.msra.mxu1 %v2219_v56  ;;  %2778 = vmatprep.subr.bf16.mxu0 %v2226_v55  ;;  %v2276_v56 = vunpack.c.l.s8.bf16 %v1396_v47  ;;  %v1395_v55 = vld [vmem:[#allocation6 + $0xb90] sm:$0xff]  ;;  %v2273_v60 = vunpack.c.l.s8.bf16 %v1393_v52 }
 0x280   :  { %3106 = vmatprep.subr.bf16.mxu1 %v2228_v43  ;;  %v2275_v43 = vunpack.c.l.s8.bf16 %v1395_v55  ;;  %v2283_v4 = vunpack.c.h.s8.bf16 %v1395_v55 }
 0x282   :  { %2779 = vmatpush1.bf16.msra.mxu0 %v2225_v63  ;;  %v2284_v63 = vunpack.c.h.s8.bf16 %v1396_v47  ;;  %v1418_v47 = vld [vmem:[#allocation6 + $0xc48] sm:$0xff] }
 0x283   :  { %3107 = vmatpush1.bf16.msra.mxu1 %v2227_v1  ;;  %2780 = vmatprep.subr.bf16.mxu0 %v2234_v3  ;;  %v1402_v1 = vld [vmem:[#allocation6 + $0xbc8] sm:$0xff]  ;;  %v1404_v3 = vld [vmem:[#allocation6 + $0xbd8] sm:$0xff] }
 0x284   :  { %3108 = vmatprep.subr.bf16.mxu1 %v2236_v18  ;;  %v2281_v18 = vunpack.c.h.s8.bf16 %v1393_v52  ;;  %v2290_v6 = vunpack.c.l.s8.bf16 %v1402_v1  ;;  %v2298_v22 = vunpack.c.h.s8.bf16 %v1402_v1  ;;  %v2322_v52 = vunpack.c.l.s8.bf16 %v1418_v47 }
 0x286   :  { %2781 = vmatpush1.bf16.msra.mxu0 %v2233_v8  ;;  %v1401_v8 = vld [vmem:[#allocation6 + $0xbc0] sm:$0xff] }
 0x287   :  { %3109 = vmatpush1.bf16.msra.mxu1 %v2235_v16  ;;  %2782 = vmatprep.subr.bf16.mxu0 %v2242_v17  ;;  %v2292_v16 = vunpack.c.l.s8.bf16 %v1404_v3  ;;  %v1403_v17 = vld [vmem:[#allocation6 + $0xbd0] sm:$0xff]  ;;  %v2289_v11 = vunpack.c.l.s8.bf16 %v1401_v8  ;;  %v2297_v33 = vunpack.c.h.s8.bf16 %v1401_v8 }
 0x288   :  { %3110 = vmatprep.subr.bf16.mxu1 %v2244_v21  ;;  %v2291_v21 = vunpack.c.l.s8.bf16 %v1403_v17 }
 0x28a   :  { %2783 = vmatpush1.bf16.msra.mxu0 %v2241_v20  ;;  %v987_v20 = vmul.f32 0.01, %v5976_v19 }
 0x28b   :  { %3111 = vmatpush1.bf16.msra.mxu1 %v2243_v28  ;;  %2784 = vmatprep.subr.bf16.mxu0 %v2250_v29  ;;  %v2300_v28 = vunpack.c.h.s8.bf16 %v1404_v3  ;;  %v1410_v29 = vld [vmem:[#allocation6 + $0xc08] sm:$0xff] }
 0x28c   :  { %3112 = vmatprep.subr.bf16.mxu1 %v2252_v31  ;;  %v1412_v31 = vld [vmem:[#allocation6 + $0xc18] sm:$0xff]  ;;  %v1003_v41 = vsel %vm971_vm12, %v5976_v19, %v987_v20  ;;  %v2314_v9 = vunpack.c.h.s8.bf16 %v1410_v29  ;;  %v1426_v3 = vld [vmem:[#allocation6 + $0xc88] sm:$0xff] }
 0x28d   :  { %v2316_v19 = vunpack.c.h.s8.bf16 %v1412_v31  ;;  %v2338_v8 = vunpack.c.l.s8.bf16 %v1426_v3  ;;  %v2346_v20 = vunpack.c.h.s8.bf16 %v1426_v3 }
 0x28e   :  { %2785 = vmatpush1.bf16.msra.mxu0 %v2249_v35  ;;  %v2299_v35 = vunpack.c.h.s8.bf16 %v1403_v17 }
 0x28f   :  { %3113 = vmatpush1.bf16.msra.mxu1 %v2251_v38  ;;  %2786 = vmatprep.subr.bf16.mxu0 %v2258_v39  ;;  %v2306_v38 = vunpack.c.l.s8.bf16 %v1410_v29  ;;  %v1409_v39 = vld [vmem:[#allocation6 + $0xc00] sm:$0xff]  ;;  %v1434_v29 = vld [vmem:[#allocation6 + $0xcc8] sm:$0xff] }
 0x290   :  { %3114 = vmatprep.subr.bf16.mxu1 %v2260_v42  ;;  %v2308_v42 = vunpack.c.l.s8.bf16 %v1412_v31  ;;  %v1436_v31 = vld [vmem:[#allocation6 + $0xcd8] sm:$0xff] }
 0x292   :  { %2787 = vmatpush1.bf16.msra.mxu0 %v2257_v59  ;;  %v1006_v59 = vsel %vm974_vm13, %v5996_v51, %v990_v32  ;;  %v2313_v51 = vunpack.c.h.s8.bf16 %v1409_v39 }
 0x293   :  { %3115 = vmatpush1.bf16.msra.mxu1 %v2259_v53  ;;  %2788 = vmatprep.subr.bf16.mxu0 %v2266_v46  ;;  %v2305_v53 = vunpack.c.l.s8.bf16 %v1409_v39  ;;  %v6067_v46 = vpack.c.bf16 %v1003_v41, %v1003_v41  ;;  %v2356_v39 = vunpack.c.l.s8.bf16 %v1436_v31  ;;  %v1435_v41 = vld [vmem:[#allocation6 + $0xcd0] sm:$0xff] }
 0x294   :  { %3116 = vmatprep.subr.bf16.mxu1 %v2268_v13  ;;  %v2307_v13 = vunpack.c.l.s8.bf16 %v1411_v45 }
 0x296   :  { %2789 = vmatpush1.bf16.msra.mxu0 %v2265_v48  ;;  %v6069_v48 = vpack.c.bf16 %v1006_v59, %v1006_v59  ;;  %v2362_v59 = vunpack.c.h.s8.bf16 %v1434_v29 }
 0x297   :  { %3117 = vmatpush1.bf16.msra.mxu1 %v2267_v49  ;;  %2790 = vmatprep.subr.bf16.mxu0 %v2274_v10  ;;  %v1420_v49 = vld [vmem:[#allocation6 + $0xc58] sm:$0xff]  ;;  %v2315_v10 = vunpack.c.h.s8.bf16 %v1411_v45  ;;  %v2355_v45 = vunpack.c.l.s8.bf16 %v1435_v41 }
 0x298   :  { %3118 = vmatprep.subr.bf16.mxu1 %v2276_v56  ;;  %v1417_v56 = vld [vmem:[#allocation6 + $0xc40] sm:$0xff]  ;;  %v2324_v55 = vunpack.c.l.s8.bf16 %v1420_v49  ;;  %v2332_v1 = vunpack.c.h.s8.bf16 %v1420_v49 }
 0x29a   :  { %2791 = vmatpush1.bf16.msra.mxu0 %v2273_v60  ;;  %v1419_v60 = vld [vmem:[#allocation6 + $0xc50] sm:$0xff] }
 0x29b   :  { %3119 = vmatpush1.bf16.msra.mxu1 %v2275_v43  ;;  %2792 = vmatprep.subr.bf16.mxu0 %v2282_v54  ;;  %v2321_v43 = vunpack.c.l.s8.bf16 %v1417_v56  ;;  %v2323_v54 = vunpack.c.l.s8.bf16 %v1419_v60 }
 0x29c   :  { %3120 = vmatprep.subr.bf16.mxu1 %v2284_v63  ;;  %v2330_v63 = vunpack.c.h.s8.bf16 %v1418_v47 }
 0x29e   :  { %2793 = vmatpush1.bf16.msra.mxu0 %v2281_v18  ;;  %v1428_v18 = vld [vmem:[#allocation6 + $0xc98] sm:$0xff] }
 0x29f   :  { %3121 = vmatpush1.bf16.msra.mxu1 %v2283_v4  ;;  %2794 = vmatprep.subr.bf16.mxu0 %v2290_v6  ;;  %v2329_v4 = vunpack.c.h.s8.bf16 %v1417_v56  ;;  %v2331_v6 = vunpack.c.h.s8.bf16 %v1419_v60  ;;  %v2340_v17 = vunpack.c.l.s8.bf16 %v1428_v18 }
 0x2a0   :  { %3122 = vmatprep.subr.bf16.mxu1 %v2292_v16  ;;  %v1425_v16 = vld [vmem:[#allocation6 + $0xc80] sm:$0xff] }
 0x2a1   :  { %v2345_v32 = vunpack.c.h.s8.bf16 %v1425_v16 }
 0x2a2   :  { %2795 = vmatpush1.bf16.msra.mxu0 %v2289_v11  ;;  %v1427_v11 = vld [vmem:[#allocation6 + $0xc90] sm:$0xff] }
 0x2a3   :  { %3123 = vmatpush1.bf16.msra.mxu1 %v2291_v21  ;;  %2796 = vmatprep.subr.bf16.mxu0 %v2298_v22  ;;  %v2337_v21 = vunpack.c.l.s8.bf16 %v1425_v16  ;;  %v2339_v22 = vunpack.c.l.s8.bf16 %v1427_v11 }
 0x2a4   :  { %3124 = vmatprep.subr.bf16.mxu1 %v2300_v28  ;;  %v2348_v28 = vunpack.c.h.s8.bf16 %v1428_v18 }
 0x2a6   :  { %2797 = vmatpush1.bf16.msra.mxu0 %v2297_v33  ;;  %v2347_v33 = vunpack.c.h.s8.bf16 %v1427_v11 }
 0x2a7   :  { %3125 = vmatpush1.bf16.msra.mxu1 %v2299_v35  ;;  %2807 = vmatprep.subr.bf16.mxu0 %v2306_v38  ;;  %v2354_v35 = vunpack.c.l.s8.bf16 %v1434_v29  ;;  %v1433_v38 = vld [vmem:[#allocation6 + $0xcc0] sm:$0xff] }
 0x2a8   :  { %3135 = vmatprep.subr.bf16.mxu1 %v2308_v42  ;;  %v2353_v42 = vunpack.c.l.s8.bf16 %v1433_v38  ;;  %v2361_v47 = vunpack.c.h.s8.bf16 %v1433_v38 }
 0x2a9   :  { %2799 = vmatmul.mubr.bf16.vlgmr.msra.gmra.mrb[0].mxu0 %v6067_v46 }
 0x2aa   :  { %3127 = vmatmul.mubr.bf16.vlgmr.msra.gmra.mrb[16].mxu1 %v6067_v46  ;;  %2808 = vmatpush1.bf16.msra.mxu0 %v2305_v53  ;;  %v2364_v53 = vunpack.c.h.s8.bf16 %v1436_v31 }
 0x2ab   :  { %2839 = vmatprep.mubr.bf16.mxu0 %v6069_v48  ;;  %3136 = vmatpush1.bf16.msra.mxu1 %v2307_v13  ;;  %v1442_v13 = vld [vmem:[#allocation6 + $0xd08] sm:$0xff] }
 0x2ac   :  { %3167 = vmatprep.mubr.bf16.mxu1 %v6069_v48  ;;  %2809 = vmatprep.subr.bf16.mxu0 %v2314_v9  ;;  %v1444_v9 = vld [vmem:[#allocation6 + $0xd18] sm:$0xff]  ;;  %v2370_v49 = vunpack.c.l.s8.bf16 %v1442_v13  ;;  %v2378_v60 = vunpack.c.h.s8.bf16 %v1442_v13 }
 0x2ad   :  { %3137 = vmatprep.subr.bf16.mxu1 %v2316_v19  ;;  %v2363_v19 = vunpack.c.h.s8.bf16 %v1435_v41 }
 0x2ae   :  { %2810 = vmatpush1.bf16.msra.mxu0 %v2313_v51  ;;  %v1441_v51 = vld [vmem:[#allocation6 + $0xd00] sm:$0xff] }
 0x2af   :  { %3138 = vmatpush1.bf16.msra.mxu1 %v2315_v10  ;;  %2811 = vmatprep.subr.bf16.mxu0 %v2322_v52  ;;  %v2372_v10 = vunpack.c.l.s8.bf16 %v1444_v9  ;;  %v1443_v52 = vld [vmem:[#allocation6 + $0xd10] sm:$0xff]  ;;  %v2369_v56 = vunpack.c.l.s8.bf16 %v1441_v51 }
 0x2b0   :  { %3139 = vmatprep.subr.bf16.mxu1 %v2324_v55  ;;  %v2371_v55 = vunpack.c.l.s8.bf16 %v1443_v52  ;;  %v2379_v3 = vunpack.c.h.s8.bf16 %v1443_v52 }
 0x2b2   :  { %2812 = vmatpush1.bf16.msra.mxu0 %v2321_v43  ;;  %v2380_v43 = vunpack.c.h.s8.bf16 %v1444_v9 }
 0x2b3   :  { %3140 = vmatpush1.bf16.msra.mxu1 %v2323_v54  ;;  %2813 = vmatprep.subr.bf16.mxu0 %v2330_v63  ;;  %v1450_v54 = vld [vmem:[#allocation6 + $0xd48] sm:$0xff]  ;;  %v1452_v63 = vld [vmem:[#allocation6 + $0xd58] sm:$0xff] }
 0x2b4   :  { %3141 = vmatprep.subr.bf16.mxu1 %v2332_v1  ;;  %v2377_v1 = vunpack.c.h.s8.bf16 %v1441_v51  ;;  %v2386_v18 = vunpack.c.l.s8.bf16 %v1450_v54  ;;  %v2394_v11 = vunpack.c.h.s8.bf16 %v1450_v54  ;;  %v992_v54 = vmul.f32 0.01, %v6011_v30 }
 0x2b6   :  { %2814 = vmatpush1.bf16.msra.mxu0 %v2329_v4  ;;  %v1449_v4 = vld [vmem:[#allocation6 + $0xd40] sm:$0xff] }
 0x2b7   :  { %3142 = vmatpush1.bf16.msra.mxu1 %v2331_v6  ;;  %2815 = vmatprep.subr.bf16.mxu0 %v2338_v8  ;;  %v2388_v6 = vunpack.c.l.s8.bf16 %v1452_v63  ;;  %v1451_v8 = vld [vmem:[#allocation6 + $0xd50] sm:$0xff]  ;;  %v2385_v16 = vunpack.c.l.s8.bf16 %v1449_v4 }
 0x2b8   :  { %3143 = vmatprep.subr.bf16.mxu1 %v2340_v17  ;;  %v2387_v17 = vunpack.c.l.s8.bf16 %v1451_v8  ;;  %v2395_v29 = vunpack.c.h.s8.bf16 %v1451_v8  ;;  %v1475_v8 = vld [vmem:[#allocation6 + $0xe10] sm:$0xff] }
 0x2ba   :  { %2816 = vmatpush1.bf16.msra.mxu0 %v2337_v21  ;;  %v2396_v21 = vunpack.c.h.s8.bf16 %v1452_v63 }
 0x2bb   :  { %3144 = vmatpush1.bf16.msra.mxu1 %v2339_v22  ;;  %2817 = vmatprep.subr.bf16.mxu0 %v2346_v20  ;;  %v1458_v22 = vld [vmem:[#allocation6 + $0xd88] sm:$0xff]  ;;  %v1460_v20 = vld [vmem:[#allocation6 + $0xd98] sm:$0xff] }
 0x2bc   :  { %3145 = vmatprep.subr.bf16.mxu1 %v2348_v28  ;;  %v2393_v28 = vunpack.c.h.s8.bf16 %v1449_v4  ;;  %v2402_v31 = vunpack.c.l.s8.bf16 %v1458_v22  ;;  %v2410_v41 = vunpack.c.h.s8.bf16 %v1458_v22 }
 0x2be   :  { %2818 = vmatpush1.bf16.msra.mxu0 %v2345_v32  ;;  %v1457_v32 = vld [vmem:[#allocation6 + $0xd80] sm:$0xff] }
 0x2bf   :  { %3146 = vmatpush1.bf16.msra.mxu1 %v2347_v33  ;;  %2819 = vmatprep.subr.bf16.mxu0 %v2354_v35  ;;  %v2404_v33 = vunpack.c.l.s8.bf16 %v1460_v20  ;;  %v1459_v35 = vld [vmem:[#allocation6 + $0xd90] sm:$0xff]  ;;  %v2401_v38 = vunpack.c.l.s8.bf16 %v1457_v32 }
 0x2c0   :  { %3147 = vmatprep.subr.bf16.mxu1 %v2356_v39  ;;  %v2403_v39 = vunpack.c.l.s8.bf16 %v1459_v35  ;;  %v2411_v13 = vunpack.c.h.s8.bf16 %v1459_v35 }
 0x2c2   :  { %2820 = vmatpush1.bf16.msra.mxu0 %v2353_v42  ;;  %v2412_v42 = vunpack.c.h.s8.bf16 %v1460_v20  ;;  %v1482_v20 = vld [vmem:[#allocation6 + $0xe48] sm:$0xff] }
 0x2c3   :  { %3148 = vmatpush1.bf16.msra.mxu1 %v2355_v45  ;;  %2821 = vmatprep.subr.bf16.mxu0 %v2362_v59  ;;  %v1466_v45 = vld [vmem:[#allocation6 + $0xdc8] sm:$0xff]  ;;  %v1468_v59 = vld [vmem:[#allocation6 + $0xdd8] sm:$0xff] }
 0x2c4   :  { %3149 = vmatprep.subr.bf16.mxu1 %v2364_v53  ;;  %v2409_v53 = vunpack.c.h.s8.bf16 %v1457_v32  ;;  %v2418_v9 = vunpack.c.l.s8.bf16 %v1466_v45  ;;  %v2426_v52 = vunpack.c.h.s8.bf16 %v1466_v45  ;;  %v2450_v32 = vunpack.c.l.s8.bf16 %v1482_v20 }
 0x2c6   :  { %2822 = vmatpush1.bf16.msra.mxu0 %v2361_v47  ;;  %v1465_v47 = vld [vmem:[#allocation6 + $0xdc0] sm:$0xff] }
 0x2c7   :  { %3150 = vmatpush1.bf16.msra.mxu1 %v2363_v19  ;;  %2823 = vmatprep.subr.bf16.mxu0 %v2370_v49  ;;  %v2420_v19 = vunpack.c.l.s8.bf16 %v1468_v59  ;;  %v1467_v49 = vld [vmem:[#allocation6 + $0xdd0] sm:$0xff]  ;;  %v2417_v51 = vunpack.c.l.s8.bf16 %v1465_v47  ;;  %v2425_v63 = vunpack.c.h.s8.bf16 %v1465_v47 }
 0x2c8   :  { %3151 = vmatprep.subr.bf16.mxu1 %v2372_v10  ;;  %v2419_v10 = vunpack.c.l.s8.bf16 %v1467_v49 }
 0x2ca   :  { %2824 = vmatpush1.bf16.msra.mxu0 %v2369_v56  ;;  %v989_v56 = vmul.f32 0.01, %v5991_v44 }
 0x2cb   :  { %3152 = vmatpush1.bf16.msra.mxu1 %v2371_v55  ;;  %2825 = vmatprep.subr.bf16.mxu0 %v2378_v60  ;;  %v2428_v55 = vunpack.c.h.s8.bf16 %v1468_v59  ;;  %v1474_v60 = vld [vmem:[#allocation6 + $0xe08] sm:$0xff] }
 0x2cc   :  { %3153 = vmatprep.subr.bf16.mxu1 %v2380_v43  ;;  %v1476_v43 = vld [vmem:[#allocation6 + $0xe18] sm:$0xff]  ;;  %v1005_v4 = vsel %vm973_vm14, %v5991_v44, %v989_v56  ;;  %v2442_v22 = vunpack.c.h.s8.bf16 %v1474_v60  ;;  %v1490_v59 = vld [vmem:[#allocation6 + $0xe88] sm:$0xff] }
 0x2cd   :  { %v2444_v44 = vunpack.c.h.s8.bf16 %v1476_v43  ;;  %v2466_v47 = vunpack.c.l.s8.bf16 %v1490_v59  ;;  %v2474_v56 = vunpack.c.h.s8.bf16 %v1490_v59 }
 0x2ce   :  { %2826 = vmatpush1.bf16.msra.mxu0 %v2377_v1  ;;  %v2427_v1 = vunpack.c.h.s8.bf16 %v1467_v49 }
 0x2cf   :  { %3154 = vmatpush1.bf16.msra.mxu1 %v2379_v3  ;;  %2827 = vmatprep.subr.bf16.mxu0 %v2386_v18  ;;  %v2434_v3 = vunpack.c.l.s8.bf16 %v1474_v60  ;;  %v1473_v18 = vld [vmem:[#allocation6 + $0xe00] sm:$0xff]  ;;  %v1498_v60 = vld [vmem:[#allocation6 + $0xec8] sm:$0xff] }
 0x2d0   :  { %3155 = vmatprep.subr.bf16.mxu1 %v2388_v6  ;;  %v2436_v6 = vunpack.c.l.s8.bf16 %v1476_v43  ;;  %v1500_v43 = vld [vmem:[#allocation6 + $0xed8] sm:$0xff] }
 0x2d2   :  { %2828 = vmatpush1.bf16.msra.mxu0 %v2385_v16  ;;  %v1008_v16 = vsel %vm976_vm15, %v6011_v30, %v992_v54  ;;  %v2441_v30 = vunpack.c.h.s8.bf16 %v1473_v18  ;;  %vm5728_vm15 = vmmov 0  }
 0x2d3   :  { %3156 = vmatpush1.bf16.msra.mxu1 %v2387_v17  ;;  %2829 = vmatprep.subr.bf16.mxu0 %v2394_v11  ;;  %v2433_v17 = vunpack.c.l.s8.bf16 %v1473_v18  ;;  %v6081_v11 = vpack.c.bf16 %v1005_v4, %v1005_v4  ;;  %v2484_v18 = vunpack.c.l.s8.bf16 %v1500_v43  ;;  %v1499_v4 = vld [vmem:[#allocation6 + $0xed0] sm:$0xff] }
 0x2d4   :  { %3157 = vmatprep.subr.bf16.mxu1 %v2396_v21  ;;  %v2435_v21 = vunpack.c.l.s8.bf16 %v1475_v8 }
 0x2d6   :  { %2830 = vmatpush1.bf16.msra.mxu0 %v2393_v28  ;;  %v6083_v28 = vpack.c.bf16 %v1008_v16, %v1008_v16  ;;  %v2490_v16 = vunpack.c.h.s8.bf16 %v1498_v60 }
 0x2d7   :  { %3158 = vmatpush1.bf16.msra.mxu1 %v2395_v29  ;;  %2831 = vmatprep.subr.bf16.mxu0 %v2402_v31  ;;  %v1484_v29 = vld [vmem:[#allocation6 + $0xe58] sm:$0xff]  ;;  %v2443_v31 = vunpack.c.h.s8.bf16 %v1475_v8  ;;  %v2483_v8 = vunpack.c.l.s8.bf16 %v1499_v4 }
 0x2d8   :  { %3159 = vmatprep.subr.bf16.mxu1 %v2404_v33  ;;  %v1481_v33 = vld [vmem:[#allocation6 + $0xe40] sm:$0xff]  ;;  %v2452_v35 = vunpack.c.l.s8.bf16 %v1484_v29  ;;  %v2460_v45 = vunpack.c.h.s8.bf16 %v1484_v29 }
 0x2da   :  { %2832 = vmatpush1.bf16.msra.mxu0 %v2401_v38  ;;  %v1483_v38 = vld [vmem:[#allocation6 + $0xe50] sm:$0xff] }
 0x2db   :  { %3160 = vmatpush1.bf16.msra.mxu1 %v2403_v39  ;;  %2833 = vmatprep.subr.bf16.mxu0 %v2410_v41  ;;  %v2449_v39 = vunpack.c.l.s8.bf16 %v1481_v33  ;;  %v2451_v41 = vunpack.c.l.s8.bf16 %v1483_v38 }
 0x2dc   :  { %3161 = vmatprep.subr.bf16.mxu1 %v2412_v42  ;;  %v2458_v42 = vunpack.c.h.s8.bf16 %v1482_v20 }
 0x2de   :  { %2834 = vmatpush1.bf16.msra.mxu0 %v2409_v53  ;;  %v1492_v53 = vld [vmem:[#allocation6 + $0xe98] sm:$0xff] }
 0x2df   :  { %3162 = vmatpush1.bf16.msra.mxu1 %v2411_v13  ;;  %2835 = vmatprep.subr.bf16.mxu0 %v2418_v9  ;;  %v2457_v13 = vunpack.c.h.s8.bf16 %v1481_v33  ;;  %v2459_v9 = vunpack.c.h.s8.bf16 %v1483_v38  ;;  %v2468_v49 = vunpack.c.l.s8.bf16 %v1492_v53 }
 0x2e0   :  { %3163 = vmatprep.subr.bf16.mxu1 %v2420_v19  ;;  %v1489_v19 = vld [vmem:[#allocation6 + $0xe80] sm:$0xff] }
 0x2e1   :  { %v2473_v54 = vunpack.c.h.s8.bf16 %v1489_v19 }
 0x2e2   :  { %2836 = vmatpush1.bf16.msra.mxu0 %v2417_v51  ;;  %v1491_v51 = vld [vmem:[#allocation6 + $0xe90] sm:$0xff] }
 0x2e3   :  { %3164 = vmatpush1.bf16.msra.mxu1 %v2419_v10  ;;  %2837 = vmatprep.subr.bf16.mxu0 %v2426_v52  ;;  %v2465_v10 = vunpack.c.l.s8.bf16 %v1489_v19  ;;  %v2467_v52 = vunpack.c.l.s8.bf16 %v1491_v51 }
 0x2e4   :  { %3165 = vmatprep.subr.bf16.mxu1 %v2428_v55  ;;  %v2476_v55 = vunpack.c.h.s8.bf16 %v1492_v53 }
 0x2e6   :  { %2838 = vmatpush1.bf16.msra.mxu0 %v2425_v63  ;;  %v2475_v63 = vunpack.c.h.s8.bf16 %v1491_v51 }
 0x2e7   :  { %3166 = vmatpush1.bf16.msra.mxu1 %v2427_v1  ;;  %2848 = vmatprep.subr.bf16.mxu0 %v2434_v3  ;;  %v2482_v1 = vunpack.c.l.s8.bf16 %v1498_v60  ;;  %v1497_v3 = vld [vmem:[#allocation6 + $0xec0] sm:$0xff] }
 0x2e8   :  { %3176 = vmatprep.subr.bf16.mxu1 %v2436_v6  ;;  %v2481_v6 = vunpack.c.l.s8.bf16 %v1497_v3  ;;  %v2489_v20 = vunpack.c.h.s8.bf16 %v1497_v3 }
 0x2e9   :  { %2840 = vmatmul.mubr.bf16.vlgmr.msra.gmra.mrb[0].mxu0 %v6081_v11 }
 0x2ea   :  { %3168 = vmatmul.mubr.bf16.vlgmr.msra.gmra.mrb[16].mxu1 %v6081_v11  ;;  %2849 = vmatpush1.bf16.msra.mxu0 %v2433_v17  ;;  %v2492_v17 = vunpack.c.h.s8.bf16 %v1500_v43 }
 0x2eb   :  { %2880 = vmatprep.mubr.bf16.mxu0 %v6083_v28  ;;  %3177 = vmatpush1.bf16.msra.mxu1 %v2435_v21  ;;  %v1506_v21 = vld [vmem:[#allocation6 + $0xf08] sm:$0xff] }
 0x2ec   :  { %3208 = vmatprep.mubr.bf16.mxu1 %v6083_v28  ;;  %2850 = vmatprep.subr.bf16.mxu0 %v2442_v22  ;;  %v1508_v22 = vld [vmem:[#allocation6 + $0xf18] sm:$0xff]  ;;  %v2498_v29 = vunpack.c.l.s8.bf16 %v1506_v21  ;;  %v2506_v38 = vunpack.c.h.s8.bf16 %v1506_v21 }
 0x2ed   :  { %3178 = vmatprep.subr.bf16.mxu1 %v2444_v44  ;;  %v2491_v44 = vunpack.c.h.s8.bf16 %v1499_v4 }
 0x2ee   :  { %2851 = vmatpush1.bf16.msra.mxu0 %v2441_v30  ;;  %v1505_v30 = vld [vmem:[#allocation6 + $0xf00] sm:$0xff] }
 0x2ef   :  { %3179 = vmatpush1.bf16.msra.mxu1 %v2443_v31  ;;  %2852 = vmatprep.subr.bf16.mxu0 %v2450_v32  ;;  %v2500_v31 = vunpack.c.l.s8.bf16 %v1508_v22  ;;  %v1507_v32 = vld [vmem:[#allocation6 + $0xf10] sm:$0xff]  ;;  %v2497_v33 = vunpack.c.l.s8.bf16 %v1505_v30 }
 0x2f0   :  { %3180 = vmatprep.subr.bf16.mxu1 %v2452_v35  ;;  %v2499_v35 = vunpack.c.l.s8.bf16 %v1507_v32  ;;  %v2507_v59 = vunpack.c.h.s8.bf16 %v1507_v32 }
 0x2f2   :  { %2853 = vmatpush1.bf16.msra.mxu0 %v2449_v39  ;;  %v2508_v39 = vunpack.c.h.s8.bf16 %v1508_v22 }
 0x2f3   :  { %3181 = vmatpush1.bf16.msra.mxu1 %v2451_v41  ;;  %2854 = vmatprep.subr.bf16.mxu0 %v2458_v42  ;;  %v1514_v41 = vld [vmem:[#allocation6 + $0xf48] sm:$0xff]  ;;  %v1516_v42 = vld [vmem:[#allocation6 + $0xf58] sm:$0xff] }
 0x2f4   :  { %3182 = vmatprep.subr.bf16.mxu1 %v2460_v45  ;;  %v2505_v45 = vunpack.c.h.s8.bf16 %v1505_v30  ;;  %v2514_v53 = vunpack.c.l.s8.bf16 %v1514_v41  ;;  %v2522_v51 = vunpack.c.h.s8.bf16 %v1514_v41 }
 0x2f6   :  { %2855 = vmatpush1.bf16.msra.mxu0 %v2457_v13  ;;  %v1513_v13 = vld [vmem:[#allocation6 + $0xf40] sm:$0xff] }
 0x2f7   :  { %3183 = vmatpush1.bf16.msra.mxu1 %v2459_v9  ;;  %2856 = vmatprep.subr.bf16.mxu0 %v2466_v47  ;;  %v2516_v9 = vunpack.c.l.s8.bf16 %v1516_v42  ;;  %v1515_v47 = vld [vmem:[#allocation6 + $0xf50] sm:$0xff]  ;;  %v2513_v19 = vunpack.c.l.s8.bf16 %v1513_v13 }
 0x2f8   :  { %3184 = vmatprep.subr.bf16.mxu1 %v2468_v49  ;;  %v2515_v49 = vunpack.c.l.s8.bf16 %v1515_v47  ;;  %v2523_v60 = vunpack.c.h.s8.bf16 %v1515_v47 }
 0x2fa   :  { %2857 = vmatpush1.bf16.msra.mxu0 %v2465_v10  ;;  %v2524_v10 = vunpack.c.h.s8.bf16 %v1516_v42 }
 0x2fb   :  { %3185 = vmatpush1.bf16.msra.mxu1 %v2467_v52  ;;  %2858 = vmatprep.subr.bf16.mxu0 %v2474_v56  ;;  %v1522_v52 = vld [vmem:[#allocation6 + $0xf88] sm:$0xff]  ;;  %v1524_v56 = vld [vmem:[#allocation6 + $0xf98] sm:$0xff] }
 0x2fc   :  { %3186 = vmatprep.subr.bf16.mxu1 %v2476_v55  ;;  %v2521_v55 = vunpack.c.h.s8.bf16 %v1513_v13  ;;  %v2530_v43 = vunpack.c.l.s8.bf16 %v1522_v52  ;;  %v2538_v4 = vunpack.c.h.s8.bf16 %v1522_v52 }
 0x2fe   :  { %2859 = vmatpush1.bf16.msra.mxu0 %v2473_v54  ;;  %v1521_v54 = vld [vmem:[#allocation6 + $0xf80] sm:$0xff] }
 0x2ff   :  { %3187 = vmatpush1.bf16.msra.mxu1 %v2475_v63  ;;  %2860 = vmatprep.subr.bf16.mxu0 %v2482_v1  ;;  %v2532_v63 = vunpack.c.l.s8.bf16 %v1524_v56  ;;  %v1523_v1 = vld [vmem:[#allocation6 + $0xf90] sm:$0xff]  ;;  %v2529_v3 = vunpack.c.l.s8.bf16 %v1521_v54 }
 0x300   :  { %3188 = vmatprep.subr.bf16.mxu1 %v2484_v18  ;;  %v2531_v18 = vunpack.c.l.s8.bf16 %v1523_v1  ;;  %v2539_v21 = vunpack.c.h.s8.bf16 %v1523_v1 }
 0x302   :  { %2861 = vmatpush1.bf16.msra.mxu0 %v2481_v6  ;;  %v2540_v6 = vunpack.c.h.s8.bf16 %v1524_v56  ;;  %v1040_v56 = vld [vmem:[#allocation6 + $0x78] sm:$0xff] }
 0x303   :  { %3189 = vmatpush1.bf16.msra.mxu1 %v2483_v8  ;;  %2862 = vmatprep.subr.bf16.mxu0 %v2490_v16  ;;  %v1530_v8 = vld [vmem:[#allocation6 + $0xfc8] sm:$0xff]  ;;  %v1532_v16 = vld [vmem:[#allocation6 + $0xfd8] sm:$0xff] }
 0x304   :  { %3190 = vmatprep.subr.bf16.mxu1 %v2492_v17  ;;  %v2537_v17 = vunpack.c.h.s8.bf16 %v1521_v54  ;;  %v2546_v22 = vunpack.c.l.s8.bf16 %v1530_v8  ;;  %v2554_v32 = vunpack.c.h.s8.bf16 %v1530_v8  ;;  %v1560_v54 = vunpack.c.l.s8.bf16 %v1040_v56  ;;  %v1048_v8 = vld [vmem:[#allocation6 + $0xb8] sm:$0xff] }
 0x306   :  { %2863 = vmatpush1.bf16.msra.mxu0 %v2489_v20  ;;  %v1529_v20 = vld [vmem:[#allocation6 + $0xfc0] sm:$0xff] }
 0x307   :  { %3191 = vmatpush1.bf16.msra.mxu1 %v2491_v44  ;;  %2864 = vmatprep.subr.bf16.mxu0 %v2498_v29  ;;  %v2548_v44 = vunpack.c.l.s8.bf16 %v1532_v16  ;;  %v1531_v29 = vld [vmem:[#allocation6 + $0xfd0] sm:$0xff]  ;;  %v2545_v30 = vunpack.c.l.s8.bf16 %v1529_v20  ;;  %v2553_v41 = vunpack.c.h.s8.bf16 %v1529_v20 }
 0x308   :  { %3192 = vmatprep.subr.bf16.mxu1 %v2500_v31  ;;  %v2547_v31 = vunpack.c.l.s8.bf16 %v1531_v29  ;;  %v2555_v42 = vunpack.c.h.s8.bf16 %v1531_v29  ;;  %v1047_v20 = vld [vmem:[#allocation6 + $0xb0] sm:$0xff] }
 0x309   :  { %v1575_v29 = vunpack.c.l.s8.bf16 %v1047_v20 }
 0x30a   :  { %2865 = vmatpush1.bf16.msra.mxu0 %v2497_v33  ;;  %v991_v33 = vmul.f32 0.01, %v6009_v23 }
 0x30b   :  { %3193 = vmatpush1.bf16.msra.mxu1 %v2499_v35  ;;  %2866 = vmatprep.subr.bf16.mxu0 %v2506_v38  ;;  %v2556_v35 = vunpack.c.h.s8.bf16 %v1532_v16  ;;  %v1030_v38 = vld [vmem:[#allocation6 + $0x28] sm:$0xff] }
 0x30c   :  { %3194 = vmatprep.subr.bf16.mxu1 %v2508_v39  ;;  %v1032_v39 = vld [vmem:[#allocation6 + $0x38] sm:$0xff] }
 0x30d   :  { %v1544_v13 = vunpack.c.l.s8.bf16 %v1032_v39  ;;  %v1552_v52 = vunpack.c.h.s8.bf16 %v1032_v39 }
 0x30e   :  { %2867 = vmatpush1.bf16.msra.mxu0 %v2505_v45  ;;  %v1542_v45 = vunpack.c.l.s8.bf16 %v1030_v38 }
 0x30f   :  { %3195 = vmatpush1.bf16.msra.mxu1 %v2507_v59  ;;  %2868 = vmatprep.subr.bf16.mxu0 %v2514_v53  ;;  %v1029_v59 = vld [vmem:[#allocation6 + $0x20] sm:$0xff]  ;;  %v1007_v53 = vsel %vm975_vm0, %v6009_v23, %v991_v33  ;;  %v1056_v33 = vld [vmem:[#allocation6 + $0xf8] sm:$0xff] }
 0x310   :  { %3196 = vmatprep.subr.bf16.mxu1 %v2516_v9  ;;  %v1031_v9 = vld [vmem:[#allocation6 + $0x30] sm:$0xff]  ;;  %v1541_v47 = vunpack.c.l.s8.bf16 %v1029_v59  ;;  %v1549_v23 = vunpack.c.h.s8.bf16 %v1029_v59 }
 0x312   :  { %2869 = vmatpush1.bf16.msra.mxu0 %v2513_v19  ;;  %v6092_v19 = vpack.c.bf16 %v1007_v53, %v1007_v53 }
 0x313   :  { %3197 = vmatpush1.bf16.msra.mxu1 %v2515_v49  ;;  %2870 = vmatprep.subr.bf16.mxu0 %v2522_v51  ;;  %v1543_v49 = vunpack.c.l.s8.bf16 %v1031_v9  ;;  %v1550_v51 = vunpack.c.h.s8.bf16 %v1030_v38  ;;  %v1583_v38 = vunpack.c.h.s8.bf16 %v1047_v20 }
 0x314   :  { %3198 = vmatprep.subr.bf16.mxu1 %v2524_v10  ;;  %v1038_v10 = vld [vmem:[#allocation6 + $0x68] sm:$0xff] }
 0x316   :  { %2871 = vmatpush1.bf16.msra.mxu0 %v2521_v55  ;;  %v1551_v55 = vunpack.c.h.s8.bf16 %v1031_v9  ;;  %v1600_v9 = vunpack.c.h.s8.bf16 %v1056_v33 }
 0x317   :  { %3199 = vmatpush1.bf16.msra.mxu1 %v2523_v60  ;;  %2872 = vmatprep.subr.bf16.mxu0 %v2530_v43  ;;  %v1558_v60 = vunpack.c.l.s8.bf16 %v1038_v10  ;;  %v1037_v43 = vld [vmem:[#allocation6 + $0x60] sm:$0xff] }
 0x318   :  { %3200 = vmatprep.subr.bf16.mxu1 %v2532_v63  ;;  %v1039_v63 = vld [vmem:[#allocation6 + $0x70] sm:$0xff]  ;;  %v1557_v1 = vunpack.c.l.s8.bf16 %v1037_v43  ;;  %v1565_v16 = vunpack.c.h.s8.bf16 %v1037_v43 }
 0x31a   :  { %2873 = vmatpush1.bf16.msra.mxu0 %v2529_v3  ;;  %v1559_v3 = vunpack.c.l.s8.bf16 %v1039_v63 }
 0x31b   :  { %3201 = vmatpush1.bf16.msra.mxu1 %v2531_v18  ;;  %2874 = vmatprep.subr.bf16.mxu0 %v2538_v4  ;;  %v1566_v18 = vunpack.c.h.s8.bf16 %v1038_v10  ;;  %v1568_v4 = vunpack.c.h.s8.bf16 %v1040_v56  ;;  %v1061_v56 = vld [vmem:[#allocation6 + $0x120] sm:$0xff] }
 0x31c   :  { %3202 = vmatprep.subr.bf16.mxu1 %v2540_v6  ;;  %v1046_v6 = vld [vmem:[#allocation6 + $0xa8] sm:$0xff] }
 0x31e   :  { %2875 = vmatpush1.bf16.msra.mxu0 %v2537_v17  ;;  %v1567_v17 = vunpack.c.h.s8.bf16 %v1039_v63 }
 0x31f   :  { %3203 = vmatpush1.bf16.msra.mxu1 %v2539_v21  ;;  %2876 = vmatprep.subr.bf16.mxu0 %v2546_v22  ;;  %v1045_v21 = vld [vmem:[#allocation6 + $0xa0] sm:$0xff]  ;;  %v1576_v22 = vunpack.c.l.s8.bf16 %v1048_v8 }
 0x320   :  { %3204 = vmatprep.subr.bf16.mxu1 %v2548_v44  ;;  %v1573_v44 = vunpack.c.l.s8.bf16 %v1045_v21 }
 0x322   :  { %2877 = vmatpush1.bf16.msra.mxu0 %v2545_v30  ;;  %v1582_v30 = vunpack.c.h.s8.bf16 %v1046_v6 }
 0x323   :  { %3205 = vmatpush1.bf16.msra.mxu1 %v2547_v31  ;;  %2878 = vmatprep.subr.bf16.mxu0 %v2554_v32  ;;  %v1584_v31 = vunpack.c.h.s8.bf16 %v1048_v8  ;;  %v1054_v32 = vld [vmem:[#allocation6 + $0xe8] sm:$0xff]  ;;  %v1069_v8 = vld [vmem:[#allocation6 + $0x160] sm:$0xff] }
 0x324   :  { %3206 = vmatprep.subr.bf16.mxu1 %v2556_v35  ;;  %v1581_v35 = vunpack.c.h.s8.bf16 %v1045_v21  ;;  %v1590_v39 = vunpack.c.l.s8.bf16 %v1054_v32 }
 0x326   :  { %2879 = vmatpush1.bf16.msra.mxu0 %v2553_v41  ;;  %v1053_v41 = vld [vmem:[#allocation6 + $0xe0] sm:$0xff] }
 0x327   :  { %3207 = vmatpush1.bf16.msra.mxu1 %v2555_v42  ;;  %3217 = vmatprep.subr.bf16.mxu0 %v1542_v45  ;;  %v1592_v42 = vunpack.c.l.s8.bf16 %v1056_v33  ;;  %v1055_v45 = vld [vmem:[#allocation6 + $0xf0] sm:$0xff]  ;;  %v1589_v59 = vunpack.c.l.s8.bf16 %v1053_v41  ;;  %v1077_v33 = vld [vmem:[#allocation6 + $0x1a0] sm:$0xff] }
 0x328   :  { %3545 = vmatprep.subr.bf16.mxu1 %v1544_v13  ;;  %v1591_v53 = vunpack.c.l.s8.bf16 %v1055_v45  ;;  %v1598_v13 = vunpack.c.h.s8.bf16 %v1054_v32  ;;  %v1599_v10 = vunpack.c.h.s8.bf16 %v1055_v45 }
 0x329   :  { %2881 = vmatmul.mubr.bf16.vlgmr.msra.gmra.mrb[0].mxu0 %v6092_v19 }
 0x32a   :  { %3209 = vmatmul.mubr.bf16.vlgmr.msra.gmra.mrb[16].mxu1 %v6092_v19  ;;  %3218 = vmatpush1.bf16.msra.mxu0 %v1541_v47  ;;  %v1062_v47 = vld [vmem:[#allocation6 + $0x128] sm:$0xff] }
 0x32b   :  { %3249 = vmatprep.mubr.bf16.mxu0 %v5919_v36  ;;  %3546 = vmatpush1.bf16.msra.mxu1 %v1543_v49  ;;  %v1064_v49 = vld [vmem:[#allocation6 + $0x138] sm:$0xff] }
 0x32c   :  { %3577 = vmatprep.mubr.bf16.mxu1 %v5919_v36  ;;  %3219 = vmatprep.subr.bf16.mxu0 %v1550_v51  ;;  %v1574_v36 = vunpack.c.l.s8.bf16 %v1046_v6  ;;  %v1597_v51 = vunpack.c.h.s8.bf16 %v1053_v41  ;;  %v1616_v63 = vunpack.c.h.s8.bf16 %v1064_v49 }
 0x32d   :  { %3547 = vmatprep.subr.bf16.mxu1 %v1552_v52  ;;  %v1606_v52 = vunpack.c.l.s8.bf16 %v1062_v47 }
 0x32e   :  { %3220 = vmatpush1.bf16.msra.mxu0 %v1549_v23  ;;  %v1608_v23 = vunpack.c.l.s8.bf16 %v1064_v49  ;;  %v1085_v49 = vld [vmem:[#allocation6 + $0x1e0] sm:$0xff] }
 0x32f   :  { %3548 = vmatpush1.bf16.msra.mxu1 %v1551_v55  ;;  %3221 = vmatprep.subr.bf16.mxu0 %v1558_v60  ;;  %v1063_v55 = vld [vmem:[#allocation6 + $0x130] sm:$0xff]  ;;  %v1605_v60 = vunpack.c.l.s8.bf16 %v1061_v56 }
 0x330   :  { %3549 = vmatprep.subr.bf16.mxu1 %v1560_v54  ;;  %v1607_v43 = vunpack.c.l.s8.bf16 %v1063_v55  ;;  %v1614_v54 = vunpack.c.h.s8.bf16 %v1062_v47 }
 0x332   :  { %3222 = vmatpush1.bf16.msra.mxu0 %v1557_v1  ;;  %v1070_v1 = vld [vmem:[#allocation6 + $0x168] sm:$0xff] }
 0x333   :  { %3550 = vmatpush1.bf16.msra.mxu1 %v1559_v3  ;;  %3223 = vmatprep.subr.bf16.mxu0 %v1566_v18  ;;  %v1072_v3 = vld [vmem:[#allocation6 + $0x178] sm:$0xff]  ;;  %v1613_v18 = vunpack.c.h.s8.bf16 %v1061_v56  ;;  %v1622_v6 = vunpack.c.l.s8.bf16 %v1070_v1 }
 0x334   :  { %3551 = vmatprep.subr.bf16.mxu1 %v1568_v4  ;;  %v1615_v4 = vunpack.c.h.s8.bf16 %v1063_v55  ;;  %v1632_v20 = vunpack.c.h.s8.bf16 %v1072_v3 }
 0x336   :  { %3224 = vmatpush1.bf16.msra.mxu0 %v1565_v16  ;;  %v1624_v16 = vunpack.c.l.s8.bf16 %v1072_v3  ;;  %v1093_v3 = vld [vmem:[#allocation6 + $0x220] sm:$0xff] }
 0x337   :  { %3552 = vmatpush1.bf16.msra.mxu1 %v1567_v17  ;;  %3225 = vmatprep.subr.bf16.mxu0 %v1574_v36  ;;  %v1071_v17 = vld [vmem:[#allocation6 + $0x170] sm:$0xff]  ;;  %v1621_v36 = vunpack.c.l.s8.bf16 %v1069_v8 }
 0x338   :  { %3553 = vmatprep.subr.bf16.mxu1 %v1576_v22  ;;  %v1623_v21 = vunpack.c.l.s8.bf16 %v1071_v17  ;;  %v1630_v22 = vunpack.c.h.s8.bf16 %v1070_v1 }
 0x33a   :  { %3226 = vmatpush1.bf16.msra.mxu0 %v1573_v44  ;;  %v1078_v44 = vld [vmem:[#allocation6 + $0x1a8] sm:$0xff] }
 0x33b   :  { %3554 = vmatpush1.bf16.msra.mxu1 %v1575_v29  ;;  %3227 = vmatprep.subr.bf16.mxu0 %v1582_v30  ;;  %v1080_v29 = vld [vmem:[#allocation6 + $0x1b8] sm:$0xff]  ;;  %v1629_v30 = vunpack.c.h.s8.bf16 %v1069_v8  ;;  %v1638_v32 = vunpack.c.l.s8.bf16 %v1078_v44 }
 0x33c   :  { %3555 = vmatprep.subr.bf16.mxu1 %v1584_v31  ;;  %v1631_v31 = vunpack.c.h.s8.bf16 %v1071_v17  ;;  %v1648_v45 = vunpack.c.h.s8.bf16 %v1080_v29  ;;  %v1102_v17 = vld [vmem:[#allocation6 + $0x268] sm:$0xff] }
 0x33e   :  { %3228 = vmatpush1.bf16.msra.mxu0 %v1581_v35  ;;  %v1640_v35 = vunpack.c.l.s8.bf16 %v1080_v29  ;;  %v1101_v29 = vld [vmem:[#allocation6 + $0x260] sm:$0xff] }
 0x33f   :  { %3556 = vmatpush1.bf16.msra.mxu1 %v1583_v38  ;;  %3229 = vmatprep.subr.bf16.mxu0 %v1590_v39  ;;  %v1079_v38 = vld [vmem:[#allocation6 + $0x1b0] sm:$0xff]  ;;  %v1637_v39 = vunpack.c.l.s8.bf16 %v1077_v33 }
 0x340   :  { %3557 = vmatprep.subr.bf16.mxu1 %v1592_v42  ;;  %v1639_v41 = vunpack.c.l.s8.bf16 %v1079_v38  ;;  %v1646_v42 = vunpack.c.h.s8.bf16 %v1078_v44  ;;  %v1686_v44 = vunpack.c.l.s8.bf16 %v1102_v17 }
 0x342   :  { %3230 = vmatpush1.bf16.msra.mxu0 %v1589_v59  ;;  %v1086_v59 = vld [vmem:[#allocation6 + $0x1e8] sm:$0xff] }
 0x343   :  { %3558 = vmatpush1.bf16.msra.mxu1 %v1591_v53  ;;  %3231 = vmatprep.subr.bf16.mxu0 %v1598_v13  ;;  %v1088_v53 = vld [vmem:[#allocation6 + $0x1f8] sm:$0xff]  ;;  %v1645_v13 = vunpack.c.h.s8.bf16 %v1077_v33  ;;  %v1654_v47 = vunpack.c.l.s8.bf16 %v1086_v59 }
 0x344   :  { %3559 = vmatprep.subr.bf16.mxu1 %v1600_v9  ;;  %v1647_v9 = vunpack.c.h.s8.bf16 %v1079_v38  ;;  %v1664_v55 = vunpack.c.h.s8.bf16 %v1088_v53  ;;  %v1110_v38 = vld [vmem:[#allocation6 + $0x2a8] sm:$0xff] }
 0x346   :  { %3232 = vmatpush1.bf16.msra.mxu0 %v1597_v51  ;;  %v1656_v51 = vunpack.c.l.s8.bf16 %v1088_v53  ;;  %v1111_v53 = vld [vmem:[#allocation6 + $0x2b0] sm:$0xff] }
 0x347   :  { %3560 = vmatpush1.bf16.msra.mxu1 %v1599_v10  ;;  %3233 = vmatprep.subr.bf16.mxu0 %v1606_v52  ;;  %v1087_v10 = vld [vmem:[#allocation6 + $0x1f0] sm:$0xff]  ;;  %v1653_v52 = vunpack.c.l.s8.bf16 %v1085_v49 }
 0x348   :  { %3561 = vmatprep.subr.bf16.mxu1 %v1608_v23  ;;  %v1655_v56 = vunpack.c.l.s8.bf16 %v1087_v10  ;;  %v1662_v23 = vunpack.c.h.s8.bf16 %v1086_v59 }
 0x34a   :  { %3234 = vmatpush1.bf16.msra.mxu0 %v1605_v60  ;;  %v1094_v60 = vld [vmem:[#allocation6 + $0x228] sm:$0xff] }
 0x34b   :  { %3562 = vmatpush1.bf16.msra.mxu1 %v1607_v43  ;;  %3235 = vmatprep.subr.bf16.mxu0 %v1614_v54  ;;  %v1096_v43 = vld [vmem:[#allocation6 + $0x238] sm:$0xff]  ;;  %v1661_v54 = vunpack.c.h.s8.bf16 %v1085_v49  ;;  %v1670_v1 = vunpack.c.l.s8.bf16 %v1094_v60 }
 0x34c   :  { %3563 = vmatprep.subr.bf16.mxu1 %v1616_v63  ;;  %v1663_v63 = vunpack.c.h.s8.bf16 %v1087_v10  ;;  %v1120_v10 = vld [vmem:[#allocation6 + $0x2f8] sm:$0xff] }
 0x34e   :  { %3236 = vmatpush1.bf16.msra.mxu0 %v1613_v18  ;;  %v1672_v18 = vunpack.c.l.s8.bf16 %v1096_v43 }
 0x34f   :  { %3564 = vmatpush1.bf16.msra.mxu1 %v1615_v4  ;;  %3237 = vmatprep.subr.bf16.mxu0 %v1622_v6  ;;  %v1095_v4 = vld [vmem:[#allocation6 + $0x230] sm:$0xff]  ;;  %v1669_v6 = vunpack.c.l.s8.bf16 %v1093_v3 }
 0x350   :  { %3565 = vmatprep.subr.bf16.mxu1 %v1624_v16  ;;  %v1671_v8 = vunpack.c.l.s8.bf16 %v1095_v4  ;;  %v1678_v16 = vunpack.c.h.s8.bf16 %v1094_v60  ;;  %v1720_v60 = vunpack.c.l.s8.bf16 %v1120_v10 }
 0x352   :  { %3238 = vmatpush1.bf16.msra.mxu0 %v1621_v36  ;;  %v1680_v36 = vunpack.c.h.s8.bf16 %v1096_v43  ;;  %v1119_v43 = vld [vmem:[#allocation6 + $0x2f0] sm:$0xff] }
 0x353   :  { %3566 = vmatpush1.bf16.msra.mxu1 %v1623_v21  ;;  %3239 = vmatprep.subr.bf16.mxu0 %v1630_v22  ;;  %v1104_v21 = vld [vmem:[#allocation6 + $0x278] sm:$0xff]  ;;  %v1677_v22 = vunpack.c.h.s8.bf16 %v1093_v3  ;;  %v1728_v3 = vunpack.c.h.s8.bf16 %v1120_v10  ;;  %v1143_v10 = vld [vmem:[#allocation6 + $0x3b0] sm:$0xff] }
 0x354   :  { %3567 = vmatprep.subr.bf16.mxu1 %v1632_v20  ;;  %v1679_v20 = vunpack.c.h.s8.bf16 %v1095_v4  ;;  %v1128_v4 = vld [vmem:[#allocation6 + $0x338] sm:$0xff] }
 0x356   :  { %3240 = vmatpush1.bf16.msra.mxu0 %v1629_v30  ;;  %v1688_v30 = vunpack.c.l.s8.bf16 %v1104_v21 }
 0x357   :  { %3568 = vmatpush1.bf16.msra.mxu1 %v1631_v31  ;;  %3241 = vmatprep.subr.bf16.mxu0 %v1638_v32  ;;  %v1103_v31 = vld [vmem:[#allocation6 + $0x270] sm:$0xff]  ;;  %v1685_v32 = vunpack.c.l.s8.bf16 %v1101_v29 }
 0x358   :  { %3569 = vmatprep.subr.bf16.mxu1 %v1640_v35  ;;  %v1687_v33 = vunpack.c.l.s8.bf16 %v1103_v31  ;;  %v1696_v35 = vunpack.c.h.s8.bf16 %v1104_v21  ;;  %v1127_v21 = vld [vmem:[#allocation6 + $0x330] sm:$0xff] }
 0x35a   :  { %3242 = vmatpush1.bf16.msra.mxu0 %v1637_v39  ;;  %v1112_v39 = vld [vmem:[#allocation6 + $0x2b8] sm:$0xff] }
 0x35b   :  { %3570 = vmatpush1.bf16.msra.mxu1 %v1639_v41  ;;  %3243 = vmatprep.subr.bf16.mxu0 %v1646_v42  ;;  %v1693_v41 = vunpack.c.h.s8.bf16 %v1101_v29  ;;  %v1695_v42 = vunpack.c.h.s8.bf16 %v1103_v31  ;;  %v1704_v59 = vunpack.c.l.s8.bf16 %v1112_v39  ;;  %v1712_v49 = vunpack.c.h.s8.bf16 %v1112_v39  ;;  %v1136_v31 = vld [vmem:[#allocation6 + $0x378] sm:$0xff]  ;;  %v1135_v39 = vld [vmem:[#allocation6 + $0x370] sm:$0xff] }
 0x35c   :  { %3571 = vmatprep.subr.bf16.mxu1 %v1648_v45  ;;  %v1109_v45 = vld [vmem:[#allocation6 + $0x2a0] sm:$0xff]  ;;  %v1744_v29 = vunpack.c.h.s8.bf16 %v1128_v4 }
 0x35e   :  { %3244 = vmatpush1.bf16.msra.mxu0 %v1645_v13  ;;  %v1701_v13 = vunpack.c.l.s8.bf16 %v1109_v45 }
 0x35f   :  { %3572 = vmatpush1.bf16.msra.mxu1 %v1647_v9  ;;  %3245 = vmatprep.subr.bf16.mxu0 %v1654_v47  ;;  %v1703_v9 = vunpack.c.l.s8.bf16 %v1111_v53  ;;  %v1710_v47 = vunpack.c.h.s8.bf16 %v1110_v38 }
 0x360   :  { %3573 = vmatprep.subr.bf16.mxu1 %v1656_v51  ;;  %v1118_v51 = vld [vmem:[#allocation6 + $0x2e8] sm:$0xff] }
 0x362   :  { %3246 = vmatpush1.bf16.msra.mxu0 %v1653_v52  ;;  %v1709_v52 = vunpack.c.h.s8.bf16 %v1109_v45  ;;  %v1760_v45 = vunpack.c.h.s8.bf16 %v1136_v31 }
 0x363   :  { %3574 = vmatpush1.bf16.msra.mxu1 %v1655_v56  ;;  %3247 = vmatprep.subr.bf16.mxu0 %v1662_v23  ;;  %v1711_v56 = vunpack.c.h.s8.bf16 %v1111_v53  ;;  %v1718_v23 = vunpack.c.l.s8.bf16 %v1118_v51  ;;  %v1144_v53 = vld [vmem:[#allocation6 + $0x3b8] sm:$0xff] }
 0x364   :  { %3575 = vmatprep.subr.bf16.mxu1 %v1664_v55  ;;  %v1117_v55 = vld [vmem:[#allocation6 + $0x2e0] sm:$0xff] }
 0x366   :  { %3248 = vmatpush1.bf16.msra.mxu0 %v1661_v54  ;;  %v1717_v54 = vunpack.c.l.s8.bf16 %v1117_v55 }
 0x367   :  { %3576 = vmatpush1.bf16.msra.mxu1 %v1663_v63  ;;  %3258 = vmatprep.subr.bf16.mxu0 %v1670_v1  ;;  %v1719_v63 = vunpack.c.l.s8.bf16 %v1119_v43  ;;  %v1726_v1 = vunpack.c.h.s8.bf16 %v1118_v51  ;;  %v1768_v51 = vunpack.c.l.s8.bf16 %v1144_v53 }
 0x368   :  { %3586 = vmatprep.subr.bf16.mxu1 %v1672_v18  ;;  %v1126_v18 = vld [vmem:[#allocation6 + $0x328] sm:$0xff] }
 0x369   :  { %3250 = vmatmul.mubr.bf16.vlgmr.msra.gmra.mrb[4].mxu0 %v5921_v40 }
 0x36a   :  { %3578 = vmatmul.mubr.bf16.vlgmr.msra.gmra.mrb[20].mxu1 %v5921_v40  ;;  %3259 = vmatpush1.bf16.msra.mxu0 %v1669_v6  ;;  %v1694_v40 = vunpack.c.h.s8.bf16 %v1102_v17  ;;  %v1725_v6 = vunpack.c.h.s8.bf16 %v1117_v55  ;;  %v1125_v17 = vld [vmem:[#allocation6 + $0x320] sm:$0xff]  ;;  %v1776_v55 = vunpack.c.h.s8.bf16 %v1144_v53  ;;  %v1167_v53 = vld [vmem:[#allocation6 + $0x470] sm:$0xff] }
 0x36b   :  { %3290 = vmatprep.mubr.bf16.mxu0 %v5930_v58  ;;  %3587 = vmatpush1.bf16.msra.mxu1 %v1671_v8  ;;  %v1727_v8 = vunpack.c.h.s8.bf16 %v1119_v43  ;;  %v1152_v43 = vld [vmem:[#allocation6 + $0x3f8] sm:$0xff] }
 0x36c   :  { %3618 = vmatprep.mubr.bf16.mxu1 %v5930_v58  ;;  %3260 = vmatprep.subr.bf16.mxu0 %v1678_v16  ;;  %v1702_v58 = vunpack.c.l.s8.bf16 %v1110_v38  ;;  %v1734_v16 = vunpack.c.l.s8.bf16 %v1126_v18  ;;  %v1752_v38 = vunpack.c.l.s8.bf16 %v1136_v31  ;;  %v1159_v31 = vld [vmem:[#allocation6 + $0x430] sm:$0xff] }
 0x36d   :  { %3588 = vmatprep.subr.bf16.mxu1 %v1680_v36  ;;  %v1736_v36 = vunpack.c.l.s8.bf16 %v1128_v4  ;;  %v1151_v4 = vld [vmem:[#allocation6 + $0x3f0] sm:$0xff] }
 0x36e   :  { %3261 = vmatpush1.bf16.msra.mxu0 %v1677_v22  ;;  %v1733_v22 = vunpack.c.l.s8.bf16 %v1125_v17 }
 0x36f   :  { %3589 = vmatpush1.bf16.msra.mxu1 %v1679_v20  ;;  %3262 = vmatprep.subr.bf16.mxu0 %v1686_v44  ;;  %v1735_v20 = vunpack.c.l.s8.bf16 %v1127_v21  ;;  %v1742_v44 = vunpack.c.h.s8.bf16 %v1126_v18  ;;  %v1784_v18 = vunpack.c.l.s8.bf16 %v1152_v43 }
 0x370   :  { %3590 = vmatprep.subr.bf16.mxu1 %v1688_v30  ;;  %v1134_v30 = vld [vmem:[#allocation6 + $0x368] sm:$0xff] }
 0x372   :  { %3263 = vmatpush1.bf16.msra.mxu0 %v1685_v32  ;;  %v1741_v32 = vunpack.c.h.s8.bf16 %v1125_v17  ;;  %v1792_v17 = vunpack.c.h.s8.bf16 %v1152_v43 }
 0x373   :  { %3591 = vmatpush1.bf16.msra.mxu1 %v1687_v33  ;;  %3264 = vmatprep.subr.bf16.mxu0 %v1694_v40  ;;  %v1743_v33 = vunpack.c.h.s8.bf16 %v1127_v21  ;;  %v1750_v40 = vunpack.c.l.s8.bf16 %v1134_v30  ;;  %v1160_v21 = vld [vmem:[#allocation6 + $0x438] sm:$0xff] }
 0x374   :  { %3592 = vmatprep.subr.bf16.mxu1 %v1696_v35  ;;  %v1133_v35 = vld [vmem:[#allocation6 + $0x360] sm:$0xff] }
 0x376   :  { %3265 = vmatpush1.bf16.msra.mxu0 %v1693_v41  ;;  %v1749_v41 = vunpack.c.l.s8.bf16 %v1133_v35 }
 0x377   :  { %3593 = vmatpush1.bf16.msra.mxu1 %v1695_v42  ;;  %3266 = vmatprep.subr.bf16.mxu0 %v1702_v58  ;;  %v1751_v42 = vunpack.c.l.s8.bf16 %v1135_v39  ;;  %v1758_v58 = vunpack.c.h.s8.bf16 %v1134_v30  ;;  %v1800_v30 = vunpack.c.l.s8.bf16 %v1160_v21 }
 0x378   :  { %3594 = vmatprep.subr.bf16.mxu1 %v1704_v59  ;;  %v1142_v59 = vld [vmem:[#allocation6 + $0x3a8] sm:$0xff] }
 0x37a   :  { %3267 = vmatpush1.bf16.msra.mxu0 %v1701_v13  ;;  %v1757_v13 = vunpack.c.h.s8.bf16 %v1133_v35  ;;  %v1166_v35 = vld [vmem:[#allocation6 + $0x468] sm:$0xff] }
 0x37b   :  { %3595 = vmatpush1.bf16.msra.mxu1 %v1703_v9  ;;  %3268 = vmatprep.subr.bf16.mxu0 %v1710_v47  ;;  %v1759_v9 = vunpack.c.h.s8.bf16 %v1135_v39  ;;  %v1766_v47 = vunpack.c.l.s8.bf16 %v1142_v59  ;;  %v1168_v39 = vld [vmem:[#allocation6 + $0x478] sm:$0xff] }
 0x37c   :  { %3596 = vmatprep.subr.bf16.mxu1 %v1712_v49  ;;  %v1141_v49 = vld [vmem:[#allocation6 + $0x3a0] sm:$0xff] }
 0x37e   :  { %3269 = vmatpush1.bf16.msra.mxu0 %v1709_v52  ;;  %v1765_v52 = vunpack.c.l.s8.bf16 %v1141_v49 }
 0x37f   :  { %3597 = vmatpush1.bf16.msra.mxu1 %v1711_v56  ;;  %3270 = vmatprep.subr.bf16.mxu0 %v1718_v23  ;;  %v1767_v56 = vunpack.c.l.s8.bf16 %v1143_v10  ;;  %v1774_v23 = vunpack.c.h.s8.bf16 %v1142_v59  ;;  %v1816_v59 = vunpack.c.l.s8.bf16 %v1168_v39 }
 0x380   :  { %3598 = vmatprep.subr.bf16.mxu1 %v1720_v60  ;;  %v1150_v60 = vld [vmem:[#allocation6 + $0x3e8] sm:$0xff] }
 0x382   :  { %3271 = vmatpush1.bf16.msra.mxu0 %v1717_v54  ;;  %v1773_v54 = vunpack.c.h.s8.bf16 %v1141_v49  ;;  %v1174_v49 = vld [vmem:[#allocation6 + $0x4a8] sm:$0xff] }
 0x383   :  { %3599 = vmatpush1.bf16.msra.mxu1 %v1719_v63  ;;  %3272 = vmatprep.subr.bf16.mxu0 %v1726_v1  ;;  %v1775_v63 = vunpack.c.h.s8.bf16 %v1143_v10  ;;  %v1782_v1 = vunpack.c.l.s8.bf16 %v1150_v60 }
 0x384   :  { %3600 = vmatprep.subr.bf16.mxu1 %v1728_v3  ;;  %v1149_v3 = vld [vmem:[#allocation6 + $0x3e0] sm:$0xff] }
 0x386   :  { %3273 = vmatpush1.bf16.msra.mxu0 %v1725_v6  ;;  %v1781_v6 = vunpack.c.l.s8.bf16 %v1149_v3 }
 0x387   :  { %3601 = vmatpush1.bf16.msra.mxu1 %v1727_v8  ;;  %3274 = vmatprep.subr.bf16.mxu0 %v1734_v16  ;;  %v1783_v8 = vunpack.c.l.s8.bf16 %v1151_v4  ;;  %v1790_v16 = vunpack.c.h.s8.bf16 %v1150_v60 }
 0x388   :  { %3602 = vmatprep.subr.bf16.mxu1 %v1736_v36  ;;  %v1158_v36 = vld [vmem:[#allocation6 + $0x428] sm:$0xff] }
 0x38a   :  { %3275 = vmatpush1.bf16.msra.mxu0 %v1733_v22  ;;  %v1789_v22 = vunpack.c.h.s8.bf16 %v1149_v3  ;;  %v1184_v3 = vld [vmem:[#allocation6 + $0x4f8] sm:$0xff] }
 0x38b   :  { %3603 = vmatpush1.bf16.msra.mxu1 %v1735_v20  ;;  %3276 = vmatprep.subr.bf16.mxu0 %v1742_v44  ;;  %v1791_v20 = vunpack.c.h.s8.bf16 %v1151_v4  ;;  %v1798_v44 = vunpack.c.l.s8.bf16 %v1158_v36 }
 0x38c   :  { %3604 = vmatprep.subr.bf16.mxu1 %v1744_v29  ;;  %v1157_v29 = vld [vmem:[#allocation6 + $0x420] sm:$0xff] }
 0x38e   :  { %3277 = vmatpush1.bf16.msra.mxu0 %v1741_v32  ;;  %v1797_v32 = vunpack.c.l.s8.bf16 %v1157_v29 }
 0x38f   :  { %3605 = vmatpush1.bf16.msra.mxu1 %v1743_v33  ;;  %3278 = vmatprep.subr.bf16.mxu0 %v1750_v40  ;;  %v1799_v33 = vunpack.c.l.s8.bf16 %v1159_v31  ;;  %v1806_v40 = vunpack.c.h.s8.bf16 %v1158_v36 }
 0x390   :  { %3606 = vmatprep.subr.bf16.mxu1 %v1752_v38  ;;  %v1808_v38 = vunpack.c.h.s8.bf16 %v1160_v21 }
 0x392   :  { %3279 = vmatpush1.bf16.msra.mxu0 %v1749_v41  ;;  %v1805_v41 = vunpack.c.h.s8.bf16 %v1157_v29  ;;  %v1192_v29 = vld [vmem:[#allocation6 + $0x538] sm:$0xff] }
 0x393   :  { %3607 = vmatpush1.bf16.msra.mxu1 %v1751_v42  ;;  %3280 = vmatprep.subr.bf16.mxu0 %v1758_v58  ;;  %v1807_v42 = vunpack.c.h.s8.bf16 %v1159_v31  ;;  %v1814_v58 = vunpack.c.l.s8.bf16 %v1166_v35 }
 0x394   :  { %3608 = vmatprep.subr.bf16.mxu1 %v1760_v45  ;;  %v1165_v45 = vld [vmem:[#allocation6 + $0x460] sm:$0xff] }
 0x395   :  { %v1821_v10 = vunpack.c.h.s8.bf16 %v1165_v45 }
 0x396   :  { %3281 = vmatpush1.bf16.msra.mxu0 %v1757_v13  ;;  %v1813_v13 = vunpack.c.l.s8.bf16 %v1165_v45  ;;  %v1200_v45 = vld [vmem:[#allocation6 + $0x578] sm:$0xff] }
 0x397   :  { %3609 = vmatpush1.bf16.msra.mxu1 %v1759_v9  ;;  %3282 = vmatprep.subr.bf16.mxu0 %v1766_v47  ;;  %v1815_v9 = vunpack.c.l.s8.bf16 %v1167_v53  ;;  %v1824_v47 = vunpack.c.h.s8.bf16 %v1168_v39 }
 0x398   :  { %3610 = vmatprep.subr.bf16.mxu1 %v1768_v51  ;;  %v1176_v51 = vld [vmem:[#allocation6 + $0x4b8] sm:$0xff] }
 0x39a   :  { %3283 = vmatpush1.bf16.msra.mxu0 %v1765_v52  ;;  %v1823_v52 = vunpack.c.h.s8.bf16 %v1167_v53 }
 0x39b   :  { %3611 = vmatpush1.bf16.msra.mxu1 %v1767_v56  ;;  %3284 = vmatprep.subr.bf16.mxu0 %v1774_v23  ;;  %v1173_v56 = vld [vmem:[#allocation6 + $0x4a0] sm:$0xff]  ;;  %v1832_v23 = vunpack.c.l.s8.bf16 %v1176_v51 }
 0x39c   :  { %3612 = vmatprep.subr.bf16.mxu1 %v1776_v55  ;;  %v1175_v55 = vld [vmem:[#allocation6 + $0x4b0] sm:$0xff]  ;;  %v1829_v60 = vunpack.c.l.s8.bf16 %v1173_v56 }
 0x39d   :  { %v1831_v43 = vunpack.c.l.s8.bf16 %v1175_v55  ;;  %v1839_v4 = vunpack.c.h.s8.bf16 %v1175_v55 }
 0x39e   :  { %3285 = vmatpush1.bf16.msra.mxu0 %v1773_v54  ;;  %v1838_v54 = vunpack.c.h.s8.bf16 %v1174_v49 }
 0x39f   :  { %3613 = vmatpush1.bf16.msra.mxu1 %v1775_v63  ;;  %3286 = vmatprep.subr.bf16.mxu0 %v1782_v1  ;;  %v1840_v63 = vunpack.c.h.s8.bf16 %v1176_v51  ;;  %v1182_v1 = vld [vmem:[#allocation6 + $0x4e8] sm:$0xff] }
 0x3a0   :  { %3614 = vmatprep.subr.bf16.mxu1 %v1784_v18  ;;  %v1837_v18 = vunpack.c.h.s8.bf16 %v1173_v56  ;;  %v1208_v56 = vld [vmem:[#allocation6 + $0x5b8] sm:$0xff] }
 0x3a2   :  { %3287 = vmatpush1.bf16.msra.mxu0 %v1781_v6  ;;  %v1846_v6 = vunpack.c.l.s8.bf16 %v1182_v1 }
 0x3a3   :  { %3615 = vmatpush1.bf16.msra.mxu1 %v1783_v8  ;;  %3288 = vmatprep.subr.bf16.mxu0 %v1790_v16  ;;  %v1181_v8 = vld [vmem:[#allocation6 + $0x4e0] sm:$0xff]  ;;  %v1848_v16 = vunpack.c.l.s8.bf16 %v1184_v3 }
 0x3a4   :  { %3616 = vmatprep.subr.bf16.mxu1 %v1792_v17  ;;  %v1183_v17 = vld [vmem:[#allocation6 + $0x4f0] sm:$0xff]  ;;  %v1845_v36 = vunpack.c.l.s8.bf16 %v1181_v8 }
 0x3a5   :  { %v1847_v21 = vunpack.c.l.s8.bf16 %v1183_v17  ;;  %v1855_v31 = vunpack.c.h.s8.bf16 %v1183_v17 }
 0x3a6   :  { %3289 = vmatpush1.bf16.msra.mxu0 %v1789_v22  ;;  %v1854_v22 = vunpack.c.h.s8.bf16 %v1182_v1 }
 0x3a7   :  { %3617 = vmatpush1.bf16.msra.mxu1 %v1791_v20  ;;  %3299 = vmatprep.subr.bf16.mxu0 %v1798_v44  ;;  %v1856_v20 = vunpack.c.h.s8.bf16 %v1184_v3  ;;  %v1190_v44 = vld [vmem:[#allocation6 + $0x528] sm:$0xff] }
 0x3a8   :  { %3627 = vmatprep.subr.bf16.mxu1 %v1800_v30  ;;  %v1853_v30 = vunpack.c.h.s8.bf16 %v1181_v8  ;;  %v1216_v8 = vld [vmem:[#allocation6 + $0x5f8] sm:$0xff] }
 0x3a9   :  { %3291 = vmatmul.mubr.bf16.vlgmr.msra.gmra.mrb[4].mxu0 %v5968_v2 }
 0x3aa   :  { %3619 = vmatmul.mubr.bf16.vlgmr.msra.gmra.mrb[20].mxu1 %v5968_v2  ;;  %3300 = vmatpush1.bf16.msra.mxu0 %v1797_v32  ;;  %v1822_v2 = vunpack.c.h.s8.bf16 %v1166_v35  ;;  %v1862_v32 = vunpack.c.l.s8.bf16 %v1190_v44  ;;  %v1191_v35 = vld [vmem:[#allocation6 + $0x530] sm:$0xff] }
 0x3ab   :  { %3331 = vmatprep.mubr.bf16.mxu0 %v5970_v7  ;;  %3628 = vmatpush1.bf16.msra.mxu1 %v1799_v33  ;;  %v1189_v33 = vld [vmem:[#allocation6 + $0x520] sm:$0xff]  ;;  %v1863_v39 = vunpack.c.l.s8.bf16 %v1191_v35  ;;  %v1871_v53 = vunpack.c.h.s8.bf16 %v1191_v35 }
 0x3ac   :  { %3659 = vmatprep.mubr.bf16.mxu1 %v5970_v7  ;;  %3301 = vmatprep.subr.bf16.mxu0 %v1806_v40  ;;  %v1830_v7 = vunpack.c.l.s8.bf16 %v1174_v49  ;;  %v1864_v40 = vunpack.c.l.s8.bf16 %v1192_v29 }
 0x3ad   :  { %3629 = vmatprep.subr.bf16.mxu1 %v1808_v38  ;;  %v1861_v38 = vunpack.c.l.s8.bf16 %v1189_v33 }
 0x3ae   :  { %3302 = vmatpush1.bf16.msra.mxu0 %v1805_v41  ;;  %v1870_v41 = vunpack.c.h.s8.bf16 %v1190_v44 }
 0x3af   :  { %3630 = vmatpush1.bf16.msra.mxu1 %v1807_v42  ;;  %3303 = vmatprep.subr.bf16.mxu0 %v1814_v58  ;;  %v1872_v42 = vunpack.c.h.s8.bf16 %v1192_v29  ;;  %v1198_v58 = vld [vmem:[#allocation6 + $0x568] sm:$0xff] }
 0x3b0   :  { %3631 = vmatprep.subr.bf16.mxu1 %v1816_v59  ;;  %v1869_v59 = vunpack.c.h.s8.bf16 %v1189_v33  ;;  %v1224_v33 = vld [vmem:[#allocation6 + $0x638] sm:$0xff] }
 0x3b2   :  { %3304 = vmatpush1.bf16.msra.mxu0 %v1813_v13  ;;  %v1878_v13 = vunpack.c.l.s8.bf16 %v1198_v58 }
 0x3b3   :  { %3632 = vmatpush1.bf16.msra.mxu1 %v1815_v9  ;;  %3305 = vmatprep.subr.bf16.mxu0 %v1822_v2  ;;  %v1197_v9 = vld [vmem:[#allocation6 + $0x560] sm:$0xff]  ;;  %v1880_v2 = vunpack.c.l.s8.bf16 %v1200_v45 }
 0x3b4   :  { %3633 = vmatprep.subr.bf16.mxu1 %v1824_v47  ;;  %v1199_v47 = vld [vmem:[#allocation6 + $0x570] sm:$0xff]  ;;  %v1877_v49 = vunpack.c.l.s8.bf16 %v1197_v9 }
 0x3b5   :  { %v1879_v51 = vunpack.c.l.s8.bf16 %v1199_v47  ;;  %v1887_v55 = vunpack.c.h.s8.bf16 %v1199_v47 }
 0x3b6   :  { %3306 = vmatpush1.bf16.msra.mxu0 %v1821_v10  ;;  %v1886_v10 = vunpack.c.h.s8.bf16 %v1198_v58 }
 0x3b7   :  { %3634 = vmatpush1.bf16.msra.mxu1 %v1823_v52  ;;  %3307 = vmatprep.subr.bf16.mxu0 %v1830_v7  ;;  %v1888_v52 = vunpack.c.h.s8.bf16 %v1200_v45  ;;  %v1206_v7 = vld [vmem:[#allocation6 + $0x5a8] sm:$0xff] }
 0x3b8   :  { %3635 = vmatprep.subr.bf16.mxu1 %v1832_v23  ;;  %v1885_v23 = vunpack.c.h.s8.bf16 %v1197_v9  ;;  %v1232_v9 = vld [vmem:[#allocation6 + $0x678] sm:$0xff] }
 0x3ba   :  { %3308 = vmatpush1.bf16.msra.mxu0 %v1829_v60  ;;  %v1894_v60 = vunpack.c.l.s8.bf16 %v1206_v7 }
 0x3bb   :  { %3636 = vmatpush1.bf16.msra.mxu1 %v1831_v43  ;;  %3309 = vmatprep.subr.bf16.mxu0 %v1838_v54  ;;  %v1205_v43 = vld [vmem:[#allocation6 + $0x5a0] sm:$0xff]  ;;  %v1896_v54 = vunpack.c.l.s8.bf16 %v1208_v56 }
 0x3bc   :  { %3637 = vmatprep.subr.bf16.mxu1 %v1840_v63  ;;  %v1207_v63 = vld [vmem:[#allocation6 + $0x5b0] sm:$0xff]  ;;  %v1893_v1 = vunpack.c.l.s8.bf16 %v1205_v43 }
 0x3bd   :  { %v1895_v3 = vunpack.c.l.s8.bf16 %v1207_v63  ;;  %v1903_v17 = vunpack.c.h.s8.bf16 %v1207_v63  ;;  %v1237_v63 = vld [vmem:[#allocation6 + $0x6a0] sm:$0xff] }
 0x3be   :  { %3310 = vmatpush1.bf16.msra.mxu0 %v1837_v18  ;;  %v1902_v18 = vunpack.c.h.s8.bf16 %v1206_v7 }
 0x3bf   :  { %3638 = vmatpush1.bf16.msra.mxu1 %v1839_v4  ;;  %3311 = vmatprep.subr.bf16.mxu0 %v1846_v6  ;;  %v1904_v4 = vunpack.c.h.s8.bf16 %v1208_v56  ;;  %v1214_v6 = vld [vmem:[#allocation6 + $0x5e8] sm:$0xff] }
 0x3c0   :  { %3639 = vmatprep.subr.bf16.mxu1 %v1848_v16  ;;  %v1901_v16 = vunpack.c.h.s8.bf16 %v1205_v43 }
 0x3c2   :  { %3312 = vmatpush1.bf16.msra.mxu0 %v1845_v36  ;;  %v1910_v36 = vunpack.c.l.s8.bf16 %v1214_v6 }
 0x3c3   :  { %3640 = vmatpush1.bf16.msra.mxu1 %v1847_v21  ;;  %3313 = vmatprep.subr.bf16.mxu0 %v1854_v22  ;;  %v1213_v21 = vld [vmem:[#allocation6 + $0x5e0] sm:$0xff]  ;;  %v1912_v22 = vunpack.c.l.s8.bf16 %v1216_v8 }
 0x3c4   :  { %3641 = vmatprep.subr.bf16.mxu1 %v1856_v20  ;;  %v1215_v20 = vld [vmem:[#allocation6 + $0x5f0] sm:$0xff]  ;;  %v1909_v44 = vunpack.c.l.s8.bf16 %v1213_v21 }
 0x3c5   :  { %v1911_v29 = vunpack.c.l.s8.bf16 %v1215_v20  ;;  %v1919_v35 = vunpack.c.h.s8.bf16 %v1215_v20  ;;  %v1245_v20 = vld [vmem:[#allocation6 + $0x6e0] sm:$0xff] }
 0x3c6   :  { %3314 = vmatpush1.bf16.msra.mxu0 %v1853_v30  ;;  %v1918_v30 = vunpack.c.h.s8.bf16 %v1214_v6 }
 0x3c7   :  { %3642 = vmatpush1.bf16.msra.mxu1 %v1855_v31  ;;  %3315 = vmatprep.subr.bf16.mxu0 %v1862_v32  ;;  %v1920_v31 = vunpack.c.h.s8.bf16 %v1216_v8  ;;  %v1222_v32 = vld [vmem:[#allocation6 + $0x628] sm:$0xff] }
 0x3c8   :  { %3643 = vmatprep.subr.bf16.mxu1 %v1864_v40  ;;  %v1917_v40 = vunpack.c.h.s8.bf16 %v1213_v21 }
 0x3ca   :  { %3316 = vmatpush1.bf16.msra.mxu0 %v1861_v38  ;;  %v1926_v38 = vunpack.c.l.s8.bf16 %v1222_v32 }
 0x3cb   :  { %3644 = vmatpush1.bf16.msra.mxu1 %v1863_v39  ;;  %3317 = vmatprep.subr.bf16.mxu0 %v1870_v41  ;;  %v1221_v39 = vld [vmem:[#allocation6 + $0x620] sm:$0xff]  ;;  %v1928_v41 = vunpack.c.l.s8.bf16 %v1224_v33 }
 0x3cc   :  { %3645 = vmatprep.subr.bf16.mxu1 %v1872_v42  ;;  %v1223_v42 = vld [vmem:[#allocation6 + $0x630] sm:$0xff]  ;;  %v1925_v58 = vunpack.c.l.s8.bf16 %v1221_v39 }
 0x3cd   :  { %v1927_v45 = vunpack.c.l.s8.bf16 %v1223_v42  ;;  %v1935_v47 = vunpack.c.h.s8.bf16 %v1223_v42 }
 0x3ce   :  { %3318 = vmatpush1.bf16.msra.mxu0 %v1869_v59  ;;  %v1934_v59 = vunpack.c.h.s8.bf16 %v1222_v32 }
 0x3cf   :  { %3646 = vmatpush1.bf16.msra.mxu1 %v1871_v53  ;;  %3319 = vmatprep.subr.bf16.mxu0 %v1878_v13  ;;  %v1230_v53 = vld [vmem:[#allocation6 + $0x668] sm:$0xff]  ;;  %v1936_v13 = vunpack.c.h.s8.bf16 %v1224_v33 }
 0x3d0   :  { %3647 = vmatprep.subr.bf16.mxu1 %v1880_v2  ;;  %v1933_v2 = vunpack.c.h.s8.bf16 %v1221_v39 }
 0x3d2   :  { %3320 = vmatpush1.bf16.msra.mxu0 %v1877_v49  ;;  %v1942_v49 = vunpack.c.l.s8.bf16 %v1230_v53 }
 0x3d3   :  { %3648 = vmatpush1.bf16.msra.mxu1 %v1879_v51  ;;  %3321 = vmatprep.subr.bf16.mxu0 %v1886_v10  ;;  %v1229_v51 = vld [vmem:[#allocation6 + $0x660] sm:$0xff]  ;;  %v1944_v10 = vunpack.c.l.s8.bf16 %v1232_v9 }
 0x3d4   :  { %3649 = vmatprep.subr.bf16.mxu1 %v1888_v52  ;;  %v1231_v52 = vld [vmem:[#allocation6 + $0x670] sm:$0xff]  ;;  %v1941_v7 = vunpack.c.l.s8.bf16 %v1229_v51  ;;  %v1949_v43 = vunpack.c.h.s8.bf16 %v1229_v51 }
 0x3d5   :  { %v1943_v56 = vunpack.c.l.s8.bf16 %v1231_v52  ;;  %v1255_v51 = vld [vmem:[#allocation6 + $0x730] sm:$0xff] }
 0x3d6   :  { %3322 = vmatpush1.bf16.msra.mxu0 %v1885_v23  ;;  %v1952_v23 = vunpack.c.h.s8.bf16 %v1232_v9 }
 0x3d7   :  { %3650 = vmatpush1.bf16.msra.mxu1 %v1887_v55  ;;  %3323 = vmatprep.subr.bf16.mxu0 %v1894_v60  ;;  %v1238_v55 = vld [vmem:[#allocation6 + $0x6a8] sm:$0xff]  ;;  %v1240_v60 = vld [vmem:[#allocation6 + $0x6b8] sm:$0xff] }
 0x3d8   :  { %3651 = vmatprep.subr.bf16.mxu1 %v1896_v54  ;;  %v1951_v54 = vunpack.c.h.s8.bf16 %v1231_v52  ;;  %v1966_v6 = vunpack.c.h.s8.bf16 %v1238_v55  ;;  %v1968_v8 = vunpack.c.h.s8.bf16 %v1240_v60  ;;  %v1991_v52 = vunpack.c.l.s8.bf16 %v1255_v51 }
 0x3da   :  { %3324 = vmatpush1.bf16.msra.mxu0 %v1893_v1  ;;  %v1960_v1 = vunpack.c.l.s8.bf16 %v1240_v60  ;;  %v1999_v60 = vunpack.c.h.s8.bf16 %v1255_v51  ;;  %v1288_v51 = vld [vmem:[#allocation6 + $0x838] sm:$0xff] }
 0x3db   :  { %3652 = vmatpush1.bf16.msra.mxu1 %v1895_v3  ;;  %3325 = vmatprep.subr.bf16.mxu0 %v1902_v18  ;;  %v1239_v3 = vld [vmem:[#allocation6 + $0x6b0] sm:$0xff]  ;;  %v1957_v18 = vunpack.c.l.s8.bf16 %v1237_v63 }
 0x3dc   :  { %3653 = vmatprep.subr.bf16.mxu1 %v1904_v4  ;;  %v1959_v4 = vunpack.c.l.s8.bf16 %v1239_v3  ;;  %v1967_v21 = vunpack.c.h.s8.bf16 %v1239_v3 }
 0x3de   :  { %3326 = vmatpush1.bf16.msra.mxu0 %v1901_v16  ;;  %v1246_v16 = vld [vmem:[#allocation6 + $0x6e8] sm:$0xff] }
 0x3df   :  { %3654 = vmatpush1.bf16.msra.mxu1 %v1903_v17  ;;  %3327 = vmatprep.subr.bf16.mxu0 %v1910_v36  ;;  %v1248_v17 = vld [vmem:[#allocation6 + $0x6f8] sm:$0xff]  ;;  %v1965_v36 = vunpack.c.h.s8.bf16 %v1237_v63  ;;  %v1982_v42 = vunpack.c.h.s8.bf16 %v1246_v16  ;;  %v1263_v63 = vld [vmem:[#allocation6 + $0x770] sm:$0xff] }
 0x3e0   :  { %3655 = vmatprep.subr.bf16.mxu1 %v1912_v22  ;;  %v1974_v22 = vunpack.c.l.s8.bf16 %v1246_v16  ;;  %v2007_v3 = vunpack.c.l.s8.bf16 %v1263_v63 }
 0x3e2   :  { %3328 = vmatpush1.bf16.msra.mxu0 %v1909_v44 }
 0x3e3   :  { %3656 = vmatpush1.bf16.msra.mxu1 %v1911_v29  ;;  %3329 = vmatprep.subr.bf16.mxu0 %v1918_v30  ;;  %v1976_v29 = vunpack.c.l.s8.bf16 %v1248_v17  ;;  %v1247_v30 = vld [vmem:[#allocation6 + $0x6f0] sm:$0xff] }
 0x3e4   :  { %3657 = vmatprep.subr.bf16.mxu1 %v1920_v31  ;;  %v1983_v9 = vunpack.c.h.s8.bf16 %v1247_v30 }
 0x3e6   :  { %3330 = vmatpush1.bf16.msra.mxu0 %v1917_v40 }
 0x3e7   :  { %3658 = vmatpush1.bf16.msra.mxu1 %v1919_v35  ;;  %3340 = vmatprep.subr.bf16.mxu0 %v1926_v38  ;;  %v1973_v35 = vunpack.c.l.s8.bf16 %v1245_v20 }
 0x3e8   :  { %3668 = vmatprep.subr.bf16.mxu1 %v1928_v41  ;;  %v1975_v41 = vunpack.c.l.s8.bf16 %v1247_v30 }
 0x3e9   :  { %3332 = vmatmul.mubr.bf16.vlgmr.msra.gmra.mrb[4].mxu0 %v6023_v34 }
 0x3ea   :  { %3660 = vmatmul.mubr.bf16.vlgmr.msra.gmra.mrb[20].mxu1 %v6023_v34  ;;  %3341 = vmatpush1.bf16.msra.mxu0 %v1925_v58  ;;  %v1950_v34 = vunpack.c.h.s8.bf16 %v1230_v53  ;;  %v1256_v53 = vld [vmem:[#allocation6 + $0x738] sm:$0xff] }
 0x3eb   :  { %3372 = vmatprep.mubr.bf16.mxu0 %v6025_v37  ;;  %3669 = vmatpush1.bf16.msra.mxu1 %v1927_v45  ;;  %v1984_v45 = vunpack.c.h.s8.bf16 %v1248_v17  ;;  %v2015_v17 = vunpack.c.h.s8.bf16 %v1263_v63  ;;  %v1296_v63 = vld [vmem:[#allocation6 + $0x878] sm:$0xff] }
 0x3ec   :  { %3700 = vmatprep.mubr.bf16.mxu1 %v6025_v37  ;;  %3342 = vmatprep.subr.bf16.mxu0 %v1934_v59  ;;  %v1958_v37 = vunpack.c.l.s8.bf16 %v1238_v55  ;;  %v1254_v59 = vld [vmem:[#allocation6 + $0x728] sm:$0xff] }
 0x3ed   :  { %3670 = vmatprep.subr.bf16.mxu1 %v1936_v13  ;;  %v1981_v13 = vunpack.c.h.s8.bf16 %v1245_v20  ;;  %v1271_v20 = vld [vmem:[#allocation6 + $0x7b0] sm:$0xff] }
 0x3ee   :  { %3343 = vmatpush1.bf16.msra.mxu0 %v1933_v2  ;;  %v1990_v2 = vunpack.c.l.s8.bf16 %v1254_v59  ;;  %v2023_v30 = vunpack.c.l.s8.bf16 %v1271_v20 }
 0x3ef   :  { %3671 = vmatpush1.bf16.msra.mxu1 %v1935_v47  ;;  %3344 = vmatprep.subr.bf16.mxu0 %v1942_v49  ;;  %v1253_v47 = vld [vmem:[#allocation6 + $0x720] sm:$0xff]  ;;  %v1992_v49 = vunpack.c.l.s8.bf16 %v1256_v53 }
 0x3f0   :  { %3672 = vmatprep.subr.bf16.mxu1 %v1944_v10  ;;  %v1989_v10 = vunpack.c.l.s8.bf16 %v1253_v47  ;;  %v1997_v55 = vunpack.c.h.s8.bf16 %v1253_v47 }
 0x3f2   :  { %3345 = vmatpush1.bf16.msra.mxu0 %v1941_v7  ;;  %v1998_v7 = vunpack.c.h.s8.bf16 %v1254_v59 }
 0x3f3   :  { %3673 = vmatpush1.bf16.msra.mxu1 %v1943_v56  ;;  %3346 = vmatprep.subr.bf16.mxu0 %v1950_v34  ;;  %v2000_v56 = vunpack.c.h.s8.bf16 %v1256_v53  ;;  %v1262_v34 = vld [vmem:[#allocation6 + $0x768] sm:$0xff]  ;;  %v1279_v53 = vld [vmem:[#allocation6 + $0x7f0] sm:$0xff] }
 0x3f4   :  { %3674 = vmatprep.subr.bf16.mxu1 %v1952_v23  ;;  %v1264_v23 = vld [vmem:[#allocation6 + $0x778] sm:$0xff] }
 0x3f6   :  { %3347 = vmatpush1.bf16.msra.mxu0 %v1949_v43  ;;  %v2006_v43 = vunpack.c.l.s8.bf16 %v1262_v34 }
 0x3f7   :  { %3675 = vmatpush1.bf16.msra.mxu1 %v1951_v54  ;;  %3348 = vmatprep.subr.bf16.mxu0 %v1958_v37  ;;  %v1261_v54 = vld [vmem:[#allocation6 + $0x760] sm:$0xff]  ;;  %v2008_v37 = vunpack.c.l.s8.bf16 %v1264_v23 }
 0x3f8   :  { %3676 = vmatprep.subr.bf16.mxu1 %v1960_v1  ;;  %v2005_v1 = vunpack.c.l.s8.bf16 %v1261_v54  ;;  %v2013_v16 = vunpack.c.h.s8.bf16 %v1261_v54  ;;  %v1294_v54 = vld [vmem:[#allocation6 + $0x868] sm:$0xff] }
 0x3fa   :  { %3349 = vmatpush1.bf16.msra.mxu0 %v1957_v18  ;;  %v2014_v18 = vunpack.c.h.s8.bf16 %v1262_v34  ;;  %v2056_v34 = vunpack.c.l.s8.bf16 %v1288_v51 }
 0x3fb   :  { %3677 = vmatpush1.bf16.msra.mxu1 %v1959_v4  ;;  %3350 = vmatprep.subr.bf16.mxu0 %v1966_v6  ;;  %v2016_v4 = vunpack.c.h.s8.bf16 %v1264_v23  ;;  %v1270_v6 = vld [vmem:[#allocation6 + $0x7a8] sm:$0xff]  ;;  %v1287_v23 = vld [vmem:[#allocation6 + $0x830] sm:$0xff] }
 0x3fc   :  { %v6110_v44 = vpop.f32.mrb[0].mxu0  ;;  %3678 = vmatprep.subr.bf16.mxu1 %v1968_v8  ;;  %v1272_v8 = vld [vmem:[#allocation6 + $0x7b8] sm:$0xff] }
 0x3fd   :  { %v6112_v31 = vpop.f32.mrb[16].mxu1  ;;  %v6114_v32 = vpop.f32.mrb[1].mxu0 }
 0x3fe   :  { %v6116_v33 = vpop.f32.mrb[17].mxu1  ;;  %v2886_v40 = vpop.f32.mrb[2].mxu0  ;;  %3351 = vmatpush1.bf16.msra.mxu0 %v1965_v36  ;;  %v2022_v36 = vunpack.c.l.s8.bf16 %v1270_v6 }
 0x3ff   :  { %v3214_v38 = vpop.f32.mrb[18].mxu1  ;;  %3679 = vmatpush1.bf16.msra.mxu1 %v1967_v21  ;;  %v2887_v39 = vpop.f32.mrb[3].mxu0  ;;  %3352 = vmatprep.subr.bf16.mxu0 %v1974_v22  ;;  %v1269_v21 = vld [vmem:[#allocation6 + $0x7a0] sm:$0xff]  ;;  %v2024_v22 = vunpack.c.l.s8.bf16 %v1272_v8  ;;  %v2030_v40 = vunpack.c.h.s8.bf16 %v1270_v6  ;;  %v2072_v6 = vunpack.c.l.s8.bf16 %v1296_v63 }
 0x400   :  { %v3215_v58 = vpop.f32.mrb[19].mxu1  ;;  %3680 = vmatprep.subr.bf16.mxu1 %v1976_v29  ;;  %v2021_v29 = vunpack.c.l.s8.bf16 %v1269_v21  ;;  %v1278_v38 = vld [vmem:[#allocation6 + $0x7e8] sm:$0xff]  ;;  %v1280_v39 = vld [vmem:[#allocation6 + $0x7f8] sm:$0xff] }
 0x401   :  { %v2038_v58 = vunpack.c.l.s8.bf16 %v1278_v38  ;;  %v2040_v59 = vunpack.c.l.s8.bf16 %v1280_v39  ;;  %v2048_v47 = vunpack.c.h.s8.bf16 %v1280_v39 }
 0x402   :  { %3353 = vmatpush1.bf16.msra.mxu0 %v1973_v35  ;;  %v2032_v35 = vunpack.c.h.s8.bf16 %v1272_v8  ;;  %v1295_v8 = vld [vmem:[#allocation6 + $0x870] sm:$0xff] }
 0x403   :  { %3681 = vmatpush1.bf16.msra.mxu1 %v1975_v41  ;;  %3354 = vmatprep.subr.bf16.mxu0 %v1982_v42  ;;  %v2029_v41 = vunpack.c.h.s8.bf16 %v1269_v21  ;;  %v2031_v42 = vunpack.c.h.s8.bf16 %v1271_v20  ;;  %v1302_v21 = vld [vmem:[#allocation6 + $0x8a8] sm:$0xff] }
 0x404   :  { %3682 = vmatprep.subr.bf16.mxu1 %v1984_v45  ;;  %v1277_v45 = vld [vmem:[#allocation6 + $0x7e0] sm:$0xff] }
 0x406   :  { %3355 = vmatpush1.bf16.msra.mxu0 %v1981_v13  ;;  %v2037_v13 = vunpack.c.l.s8.bf16 %v1277_v45 }
 0x407   :  { %3683 = vmatpush1.bf16.msra.mxu1 %v1983_v9  ;;  %3356 = vmatprep.subr.bf16.mxu0 %v1990_v2  ;;  %v2039_v9 = vunpack.c.l.s8.bf16 %v1279_v53  ;;  %v2046_v2 = vunpack.c.h.s8.bf16 %v1278_v38 }
 0x408   :  { %3684 = vmatprep.subr.bf16.mxu1 %v1992_v49  ;;  %v1286_v49 = vld [vmem:[#allocation6 + $0x828] sm:$0xff] }
 0x40a   :  { %3357 = vmatpush1.bf16.msra.mxu0 %v1989_v10  ;;  %v2045_v10 = vunpack.c.h.s8.bf16 %v1277_v45  ;;  %v1312_v45 = vld [vmem:[#allocation6 + $0x8f8] sm:$0xff] }
 0x40b   :  { %3685 = vmatpush1.bf16.msra.mxu1 %v1991_v52  ;;  %3358 = vmatprep.subr.bf16.mxu0 %v1998_v7  ;;  %v2047_v52 = vunpack.c.h.s8.bf16 %v1279_v53  ;;  %v2054_v7 = vunpack.c.l.s8.bf16 %v1286_v49 }
 0x40c   :  { %3686 = vmatprep.subr.bf16.mxu1 %v2000_v56  ;;  %v1285_v56 = vld [vmem:[#allocation6 + $0x820] sm:$0xff] }
 0x40e   :  { %3359 = vmatpush1.bf16.msra.mxu0 %v1997_v55  ;;  %v2053_v55 = vunpack.c.l.s8.bf16 %v1285_v56 }
 0x40f   :  { %3687 = vmatpush1.bf16.msra.mxu1 %v1999_v60  ;;  %3360 = vmatprep.subr.bf16.mxu0 %v2006_v43  ;;  %v2055_v60 = vunpack.c.l.s8.bf16 %v1287_v23  ;;  %v2062_v43 = vunpack.c.h.s8.bf16 %v1286_v49 }
 0x410   :  { %3688 = vmatprep.subr.bf16.mxu1 %v2008_v37  ;;  %v2064_v37 = vunpack.c.h.s8.bf16 %v1288_v51 }
 0x412   :  { %3361 = vmatpush1.bf16.msra.mxu0 %v2005_v1  ;;  %v2061_v1 = vunpack.c.h.s8.bf16 %v1285_v56  ;;  %v1320_v56 = vld [vmem:[#allocation6 + $0x938] sm:$0xff] }
 0x413   :  { %3689 = vmatpush1.bf16.msra.mxu1 %v2007_v3  ;;  %3362 = vmatprep.subr.bf16.mxu0 %v2014_v18  ;;  %v2063_v3 = vunpack.c.h.s8.bf16 %v1287_v23  ;;  %v2070_v18 = vunpack.c.l.s8.bf16 %v1294_v54 }
 0x414   :  { %3690 = vmatprep.subr.bf16.mxu1 %v2016_v4  ;;  %v1293_v4 = vld [vmem:[#allocation6 + $0x860] sm:$0xff] }
 0x415   :  { %v2077_v20 = vunpack.c.h.s8.bf16 %v1293_v4 }
 0x416   :  { %3363 = vmatpush1.bf16.msra.mxu0 %v2013_v16  ;;  %v2069_v16 = vunpack.c.l.s8.bf16 %v1293_v4  ;;  %v1328_v4 = vld [vmem:[#allocation6 + $0x978] sm:$0xff] }
 0x417   :  { %3691 = vmatpush1.bf16.msra.mxu1 %v2015_v17  ;;  %3364 = vmatprep.subr.bf16.mxu0 %v2022_v36  ;;  %v2071_v17 = vunpack.c.l.s8.bf16 %v1295_v8  ;;  %v2080_v36 = vunpack.c.h.s8.bf16 %v1296_v63 }
 0x418   :  { %3692 = vmatprep.subr.bf16.mxu1 %v2024_v22  ;;  %v1304_v22 = vld [vmem:[#allocation6 + $0x8b8] sm:$0xff] }
 0x41a   :  { %3365 = vmatpush1.bf16.msra.mxu0 %v2021_v29  ;;  %v2079_v29 = vunpack.c.h.s8.bf16 %v1295_v8 }
 0x41b   :  { %3693 = vmatpush1.bf16.msra.mxu1 %v2023_v30  ;;  %3366 = vmatprep.subr.bf16.mxu0 %v2030_v40  ;;  %v1301_v30 = vld [vmem:[#allocation6 + $0x8a0] sm:$0xff]  ;;  %v2088_v40 = vunpack.c.l.s8.bf16 %v1304_v22 }
 0x41c   :  { %3694 = vmatprep.subr.bf16.mxu1 %v2032_v35  ;;  %v1303_v35 = vld [vmem:[#allocation6 + $0x8b0] sm:$0xff]  ;;  %v2085_v38 = vunpack.c.l.s8.bf16 %v1301_v30 }
 0x41d   :  { %v2087_v39 = vunpack.c.l.s8.bf16 %v1303_v35  ;;  %v2095_v53 = vunpack.c.h.s8.bf16 %v1303_v35 }
 0x41e   :  { %3367 = vmatpush1.bf16.msra.mxu0 %v2029_v41  ;;  %v2094_v41 = vunpack.c.h.s8.bf16 %v1302_v21 }
 0x41f   :  { %3695 = vmatpush1.bf16.msra.mxu1 %v2031_v42  ;;  %3368 = vmatprep.subr.bf16.mxu0 %v2038_v58  ;;  %v2096_v42 = vunpack.c.h.s8.bf16 %v1304_v22  ;;  %v1310_v58 = vld [vmem:[#allocation6 + $0x8e8] sm:$0xff] }
 0x420   :  { %3696 = vmatprep.subr.bf16.mxu1 %v2040_v59  ;;  %v2093_v59 = vunpack.c.h.s8.bf16 %v1301_v30  ;;  %v1336_v30 = vld [vmem:[#allocation6 + $0x9b8] sm:$0xff] }
 0x422   :  { %3369 = vmatpush1.bf16.msra.mxu0 %v2037_v13  ;;  %v2102_v13 = vunpack.c.l.s8.bf16 %v1310_v58 }
 0x423   :  { %3697 = vmatpush1.bf16.msra.mxu1 %v2039_v9  ;;  %3370 = vmatprep.subr.bf16.mxu0 %v2046_v2  ;;  %v1309_v9 = vld [vmem:[#allocation6 + $0x8e0] sm:$0xff]  ;;  %v2104_v2 = vunpack.c.l.s8.bf16 %v1312_v45 }
 0x424   :  { %3698 = vmatprep.subr.bf16.mxu1 %v2048_v47  ;;  %v1311_v47 = vld [vmem:[#allocation6 + $0x8f0] sm:$0xff]  ;;  %v2101_v49 = vunpack.c.l.s8.bf16 %v1309_v9 }
 0x425   :  { %v2103_v51 = vunpack.c.l.s8.bf16 %v1311_v47  ;;  %v2111_v23 = vunpack.c.h.s8.bf16 %v1311_v47 }
 0x426   :  { %3371 = vmatpush1.bf16.msra.mxu0 %v2045_v10  ;;  %v2110_v10 = vunpack.c.h.s8.bf16 %v1310_v58 }
 0x427   :  { %3699 = vmatpush1.bf16.msra.mxu1 %v2047_v52  ;;  %3381 = vmatprep.subr.bf16.mxu0 %v2054_v7  ;;  %v2112_v52 = vunpack.c.h.s8.bf16 %v1312_v45  ;;  %v1318_v7 = vld [vmem:[#allocation6 + $0x928] sm:$0xff] }
 0x428   :  { %3709 = vmatprep.subr.bf16.mxu1 %v2056_v34  ;;  %v2109_v34 = vunpack.c.h.s8.bf16 %v1309_v9  ;;  %v1344_v9 = vld [vmem:[#allocation6 + $0x9f8] sm:$0xff] }
 0x429   :  { %3373 = vmatmul.mubr.bf16.vlgmr.msra.gmra.mrb[4].mxu0 %v6039_v24 }
 0x42a   :  { %3701 = vmatmul.mubr.bf16.vlgmr.msra.gmra.mrb[20].mxu1 %v6039_v24  ;;  %3382 = vmatpush1.bf16.msra.mxu0 %v2053_v55  ;;  %v2078_v24 = vunpack.c.h.s8.bf16 %v1294_v54  ;;  %v2118_v55 = vunpack.c.l.s8.bf16 %v1318_v7  ;;  %v1319_v54 = vld [vmem:[#allocation6 + $0x930] sm:$0xff] }
 0x42b   :  { %3413 = vmatprep.mubr.bf16.mxu0 %v6041_v27  ;;  %3710 = vmatpush1.bf16.msra.mxu1 %v2055_v60  ;;  %v1317_v60 = vld [vmem:[#allocation6 + $0x920] sm:$0xff]  ;;  %v2119_v63 = vunpack.c.l.s8.bf16 %v1319_v54  ;;  %v2127_v8 = vunpack.c.h.s8.bf16 %v1319_v54 }
 0x42c   :  { %3741 = vmatprep.mubr.bf16.mxu1 %v6041_v27  ;;  %3383 = vmatprep.subr.bf16.mxu0 %v2062_v43  ;;  %v2086_v27 = vunpack.c.l.s8.bf16 %v1302_v21  ;;  %v2120_v43 = vunpack.c.l.s8.bf16 %v1320_v56 }
 0x42d   :  { %3711 = vmatprep.subr.bf16.mxu1 %v2064_v37  ;;  %v2117_v37 = vunpack.c.l.s8.bf16 %v1317_v60 }
 0x42e   :  { %3384 = vmatpush1.bf16.msra.mxu0 %v2061_v1  ;;  %v2126_v1 = vunpack.c.h.s8.bf16 %v1318_v7 }
 0x42f   :  { %3712 = vmatpush1.bf16.msra.mxu1 %v2063_v3  ;;  %3385 = vmatprep.subr.bf16.mxu0 %v2070_v18  ;;  %v2128_v3 = vunpack.c.h.s8.bf16 %v1320_v56  ;;  %v1326_v18 = vld [vmem:[#allocation6 + $0x968] sm:$0xff] }
 0x430   :  { %3713 = vmatprep.subr.bf16.mxu1 %v2072_v6  ;;  %v2125_v6 = vunpack.c.h.s8.bf16 %v1317_v60  ;;  %v1352_v60 = vld [vmem:[#allocation6 + $0xa38] sm:$0xff] }
 0x432   :  { %3386 = vmatpush1.bf16.msra.mxu0 %v2069_v16  ;;  %v2134_v16 = vunpack.c.l.s8.bf16 %v1326_v18 }
 0x433   :  { %3714 = vmatpush1.bf16.msra.mxu1 %v2071_v17  ;;  %3387 = vmatprep.subr.bf16.mxu0 %v2078_v24  ;;  %v1325_v17 = vld [vmem:[#allocation6 + $0x960] sm:$0xff]  ;;  %v2136_v24 = vunpack.c.l.s8.bf16 %v1328_v4 }
 0x434   :  { %3715 = vmatprep.subr.bf16.mxu1 %v2080_v36  ;;  %v1327_v36 = vld [vmem:[#allocation6 + $0x970] sm:$0xff]  ;;  %v2133_v21 = vunpack.c.l.s8.bf16 %v1325_v17 }
 0x435   :  { %v2135_v22 = vunpack.c.l.s8.bf16 %v1327_v36  ;;  %v2143_v35 = vunpack.c.h.s8.bf16 %v1327_v36 }
 0x436   :  { %3388 = vmatpush1.bf16.msra.mxu0 %v2077_v20  ;;  %v2142_v20 = vunpack.c.h.s8.bf16 %v1326_v18 }
 0x437   :  { %3716 = vmatpush1.bf16.msra.mxu1 %v2079_v29  ;;  %3389 = vmatprep.subr.bf16.mxu0 %v2086_v27  ;;  %v2144_v29 = vunpack.c.h.s8.bf16 %v1328_v4  ;;  %v1334_v27 = vld [vmem:[#allocation6 + $0x9a8] sm:$0xff] }
 0x438   :  { %3717 = vmatprep.subr.bf16.mxu1 %v2088_v40  ;;  %v2141_v40 = vunpack.c.h.s8.bf16 %v1325_v17  ;;  %v1360_v17 = vld [vmem:[#allocation6 + $0xa78] sm:$0xff] }
 0x43a   :  { %3390 = vmatpush1.bf16.msra.mxu0 %v2085_v38  ;;  %v2150_v38 = vunpack.c.l.s8.bf16 %v1334_v27 }
 0x43b   :  { %3718 = vmatpush1.bf16.msra.mxu1 %v2087_v39  ;;  %3391 = vmatprep.subr.bf16.mxu0 %v2094_v41  ;;  %v1333_v39 = vld [vmem:[#allocation6 + $0x9a0] sm:$0xff]  ;;  %v2152_v41 = vunpack.c.l.s8.bf16 %v1336_v30 }
 0x43c   :  { %3719 = vmatprep.subr.bf16.mxu1 %v2096_v42  ;;  %v1335_v42 = vld [vmem:[#allocation6 + $0x9b0] sm:$0xff]  ;;  %v2149_v58 = vunpack.c.l.s8.bf16 %v1333_v39 }
 0x43d   :  { %v2151_v45 = vunpack.c.l.s8.bf16 %v1335_v42  ;;  %v2159_v47 = vunpack.c.h.s8.bf16 %v1335_v42  ;;  %v1365_v42 = vld [vmem:[#allocation6 + $0xaa0] sm:$0xff] }
 0x43e   :  { %3392 = vmatpush1.bf16.msra.mxu0 %v2093_v59  ;;  %v2158_v59 = vunpack.c.h.s8.bf16 %v1334_v27 }
 0x43f   :  { %3720 = vmatpush1.bf16.msra.mxu1 %v2095_v53  ;;  %3393 = vmatprep.subr.bf16.mxu0 %v2102_v13  ;;  %v2160_v53 = vunpack.c.h.s8.bf16 %v1336_v30  ;;  %v1342_v13 = vld [vmem:[#allocation6 + $0x9e8] sm:$0xff] }
 0x440   :  { %3721 = vmatprep.subr.bf16.mxu1 %v2104_v2  ;;  %v2157_v2 = vunpack.c.h.s8.bf16 %v1333_v39 }
 0x442   :  { %3394 = vmatpush1.bf16.msra.mxu0 %v2101_v49  ;;  %v2166_v49 = vunpack.c.l.s8.bf16 %v1342_v13 }
 0x443   :  { %3722 = vmatpush1.bf16.msra.mxu1 %v2103_v51  ;;  %3395 = vmatprep.subr.bf16.mxu0 %v2110_v10  ;;  %v1341_v51 = vld [vmem:[#allocation6 + $0x9e0] sm:$0xff]  ;;  %v2168_v10 = vunpack.c.l.s8.bf16 %v1344_v9 }
 0x444   :  { %3723 = vmatprep.subr.bf16.mxu1 %v2112_v52  ;;  %v1343_v52 = vld [vmem:[#allocation6 + $0x9f0] sm:$0xff]  ;;  %v2165_v7 = vunpack.c.l.s8.bf16 %v1341_v51 }
 0x445   :  { %v2167_v56 = vunpack.c.l.s8.bf16 %v1343_v52  ;;  %v2175_v54 = vunpack.c.h.s8.bf16 %v1343_v52  ;;  %v1373_v52 = vld [vmem:[#allocation6 + $0xae0] sm:$0xff] }
 0x446   :  { %3396 = vmatpush1.bf16.msra.mxu0 %v2109_v34  ;;  %v2174_v34 = vunpack.c.h.s8.bf16 %v1342_v13 }
 0x447   :  { %3724 = vmatpush1.bf16.msra.mxu1 %v2111_v23  ;;  %3397 = vmatprep.subr.bf16.mxu0 %v2118_v55  ;;  %v2176_v23 = vunpack.c.h.s8.bf16 %v1344_v9  ;;  %v1350_v55 = vld [vmem:[#allocation6 + $0xa28] sm:$0xff] }
 0x448   :  { %3725 = vmatprep.subr.bf16.mxu1 %v2120_v43  ;;  %v2173_v43 = vunpack.c.h.s8.bf16 %v1341_v51 }
 0x44a   :  { %3398 = vmatpush1.bf16.msra.mxu0 %v2117_v37  ;;  %v2182_v37 = vunpack.c.l.s8.bf16 %v1350_v55 }
 0x44b   :  { %3726 = vmatpush1.bf16.msra.mxu1 %v2119_v63  ;;  %3399 = vmatprep.subr.bf16.mxu0 %v2126_v1  ;;  %v1349_v63 = vld [vmem:[#allocation6 + $0xa20] sm:$0xff]  ;;  %v2184_v1 = vunpack.c.l.s8.bf16 %v1352_v60 }
 0x44c   :  { %3727 = vmatprep.subr.bf16.mxu1 %v2128_v3  ;;  %v1351_v3 = vld [vmem:[#allocation6 + $0xa30] sm:$0xff]  ;;  %v2181_v18 = vunpack.c.l.s8.bf16 %v1349_v63 }
 0x44d   :  { %v2183_v4 = vunpack.c.l.s8.bf16 %v1351_v3  ;;  %v2191_v36 = vunpack.c.h.s8.bf16 %v1351_v3  ;;  %v1381_v3 = vld [vmem:[#allocation6 + $0xb20] sm:$0xff] }
 0x44e   :  { %3400 = vmatpush1.bf16.msra.mxu0 %v2125_v6  ;;  %v2190_v6 = vunpack.c.h.s8.bf16 %v1350_v55 }
 0x44f   :  { %3728 = vmatpush1.bf16.msra.mxu1 %v2127_v8  ;;  %3401 = vmatprep.subr.bf16.mxu0 %v2134_v16  ;;  %v1358_v8 = vld [vmem:[#allocation6 + $0xa68] sm:$0xff]  ;;  %v2192_v16 = vunpack.c.h.s8.bf16 %v1352_v60 }
 0x450   :  { %3729 = vmatprep.subr.bf16.mxu1 %v2136_v24  ;;  %v2189_v24 = vunpack.c.h.s8.bf16 %v1349_v63 }
 0x452   :  { %3402 = vmatpush1.bf16.msra.mxu0 %v2133_v21  ;;  %v2198_v21 = vunpack.c.l.s8.bf16 %v1358_v8 }
 0x453   :  { %3730 = vmatpush1.bf16.msra.mxu1 %v2135_v22  ;;  %3403 = vmatprep.subr.bf16.mxu0 %v2142_v20  ;;  %v1357_v22 = vld [vmem:[#allocation6 + $0xa60] sm:$0xff]  ;;  %v2200_v20 = vunpack.c.l.s8.bf16 %v1360_v17 }
 0x454   :  { %3731 = vmatprep.subr.bf16.mxu1 %v2144_v29  ;;  %v1359_v29 = vld [vmem:[#allocation6 + $0xa70] sm:$0xff]  ;;  %v2197_v27 = vunpack.c.l.s8.bf16 %v1357_v22  ;;  %v2205_v39 = vunpack.c.h.s8.bf16 %v1357_v22 }
 0x455   :  { %v2199_v30 = vunpack.c.l.s8.bf16 %v1359_v29 }
 0x456   :  { %3404 = vmatpush1.bf16.msra.mxu0 %v2141_v40  ;;  %v2208_v40 = vunpack.c.h.s8.bf16 %v1360_v17 }
 0x457   :  { %3732 = vmatpush1.bf16.msra.mxu1 %v2143_v35  ;;  %3405 = vmatprep.subr.bf16.mxu0 %v2150_v38  ;;  %v1366_v35 = vld [vmem:[#allocation6 + $0xaa8] sm:$0xff]  ;;  %v1368_v38 = vld [vmem:[#allocation6 + $0xab8] sm:$0xff] }
 0x458   :  { %3733 = vmatprep.subr.bf16.mxu1 %v2152_v41  ;;  %v2207_v41 = vunpack.c.h.s8.bf16 %v1359_v29  ;;  %v2222_v13 = vunpack.c.h.s8.bf16 %v1366_v35  ;;  %v2224_v9 = vunpack.c.h.s8.bf16 %v1368_v38  ;;  %v1389_v29 = vld [vmem:[#allocation6 + $0xb60] sm:$0xff] }
 0x45a   :  { %3406 = vmatpush1.bf16.msra.mxu0 %v2149_v58  ;;  %v2216_v58 = vunpack.c.l.s8.bf16 %v1368_v38 }
 0x45b   :  { %3734 = vmatpush1.bf16.msra.mxu1 %v2151_v45  ;;  %3407 = vmatprep.subr.bf16.mxu0 %v2158_v59  ;;  %v1367_v45 = vld [vmem:[#allocation6 + $0xab0] sm:$0xff]  ;;  %v2213_v59 = vunpack.c.l.s8.bf16 %v1365_v42 }
 0x45c   :  { %3735 = vmatprep.subr.bf16.mxu1 %v2160_v53  ;;  %v2215_v53 = vunpack.c.l.s8.bf16 %v1367_v45  ;;  %v2223_v51 = vunpack.c.h.s8.bf16 %v1367_v45  ;;  %v1397_v45 = vld [vmem:[#allocation6 + $0xba0] sm:$0xff] }
 0x45e   :  { %3408 = vmatpush1.bf16.msra.mxu0 %v2157_v2  ;;  %v1374_v2 = vld [vmem:[#allocation6 + $0xae8] sm:$0xff] }
 0x45f   :  { %3736 = vmatpush1.bf16.msra.mxu1 %v2159_v47  ;;  %3409 = vmatprep.subr.bf16.mxu0 %v2166_v49  ;;  %v1376_v47 = vld [vmem:[#allocation6 + $0xaf8] sm:$0xff]  ;;  %v2221_v49 = vunpack.c.h.s8.bf16 %v1365_v42  ;;  %v2238_v55 = vunpack.c.h.s8.bf16 %v1374_v2 }
 0x460   :  { %3737 = vmatprep.subr.bf16.mxu1 %v2168_v10  ;;  %v2230_v10 = vunpack.c.l.s8.bf16 %v1374_v2  ;;  %v2240_v60 = vunpack.c.h.s8.bf16 %v1376_v47 }
 0x462   :  { %3410 = vmatpush1.bf16.msra.mxu0 %v2165_v7  ;;  %v2232_v7 = vunpack.c.l.s8.bf16 %v1376_v47 }
 0x463   :  { %3738 = vmatpush1.bf16.msra.mxu1 %v2167_v56  ;;  %3411 = vmatprep.subr.bf16.mxu0 %v2174_v34  ;;  %v1375_v56 = vld [vmem:[#allocation6 + $0xaf0] sm:$0xff]  ;;  %v2229_v34 = vunpack.c.l.s8.bf16 %v1373_v52 }
 0x464   :  { %3739 = vmatprep.subr.bf16.mxu1 %v2176_v23  ;;  %v2231_v23 = vunpack.c.l.s8.bf16 %v1375_v56  ;;  %v2239_v63 = vunpack.c.h.s8.bf16 %v1375_v56  ;;  %v1405_v56 = vld [vmem:[#allocation6 + $0xbe0] sm:$0xff] }
 0x466   :  { %3412 = vmatpush1.bf16.msra.mxu0 %v2173_v43  ;;  %v1382_v43 = vld [vmem:[#allocation6 + $0xb28] sm:$0xff] }
 0x467   :  { %3740 = vmatpush1.bf16.msra.mxu1 %v2175_v54  ;;  %3422 = vmatprep.subr.bf16.mxu0 %v2182_v37  ;;  %v1384_v54 = vld [vmem:[#allocation6 + $0xb38] sm:$0xff]  ;;  %v2237_v37 = vunpack.c.h.s8.bf16 %v1373_v52 }
 0x468   :  { %3750 = vmatprep.subr.bf16.mxu1 %v2184_v1  ;;  %v2246_v1 = vunpack.c.l.s8.bf16 %v1382_v43  ;;  %v2256_v17 = vunpack.c.h.s8.bf16 %v1384_v54 }
 0x469   :  { %3414 = vmatmul.mubr.bf16.vlgmr.msra.gmra.mrb[4].mxu0 %v6053_v15 }
 0x46a   :  { %3742 = vmatmul.mubr.bf16.vlgmr.msra.gmra.mrb[20].mxu1 %v6053_v15  ;;  %3423 = vmatpush1.bf16.msra.mxu0 %v2181_v18  ;;  %v2206_v15 = vunpack.c.h.s8.bf16 %v1358_v8  ;;  %v2248_v18 = vunpack.c.l.s8.bf16 %v1384_v54 }
 0x46b   :  { %3454 = vmatprep.mubr.bf16.mxu0 %v6055_v5  ;;  %3751 = vmatpush1.bf16.msra.mxu1 %v2183_v4  ;;  %v1383_v4 = vld [vmem:[#allocation6 + $0xb30] sm:$0xff] }
 0x46c   :  { %3782 = vmatprep.mubr.bf16.mxu1 %v6055_v5  ;;  %3424 = vmatprep.subr.bf16.mxu0 %v2190_v6  ;;  %v2214_v5 = vunpack.c.l.s8.bf16 %v1366_v35  ;;  %v2245_v6 = vunpack.c.l.s8.bf16 %v1381_v3  ;;  %v2247_v8 = vunpack.c.l.s8.bf16 %v1383_v4  ;;  %v2255_v22 = vunpack.c.h.s8.bf16 %v1383_v4  ;;  %v1413_v4 = vld [vmem:[#allocation6 + $0xc20] sm:$0xff] }
 0x46d   :  { %3752 = vmatprep.subr.bf16.mxu1 %v2192_v16  ;;  %v2254_v16 = vunpack.c.h.s8.bf16 %v1382_v43 }
 0x46e   :  { %3425 = vmatpush1.bf16.msra.mxu0 %v2189_v24  ;;  %v1390_v24 = vld [vmem:[#allocation6 + $0xb68] sm:$0xff] }
 0x46f   :  { %3753 = vmatpush1.bf16.msra.mxu1 %v2191_v36  ;;  %3426 = vmatprep.subr.bf16.mxu0 %v2198_v21  ;;  %v1392_v36 = vld [vmem:[#allocation6 + $0xb78] sm:$0xff]  ;;  %v2253_v21 = vunpack.c.h.s8.bf16 %v1381_v3  ;;  %v2270_v35 = vunpack.c.h.s8.bf16 %v1390_v24 }
 0x470   :  { %3754 = vmatprep.subr.bf16.mxu1 %v2200_v20  ;;  %v2262_v20 = vunpack.c.l.s8.bf16 %v1390_v24  ;;  %v2272_v38 = vunpack.c.h.s8.bf16 %v1392_v36 }
 0x472   :  { %3427 = vmatpush1.bf16.msra.mxu0 %v2197_v27  ;;  %v2264_v27 = vunpack.c.l.s8.bf16 %v1392_v36  ;;  %v1422_v36 = vld [vmem:[#allocation6 + $0xc68] sm:$0xff] }
 0x473   :  { %3755 = vmatpush1.bf16.msra.mxu1 %v2199_v30  ;;  %3428 = vmatprep.subr.bf16.mxu0 %v2206_v15  ;;  %v1391_v30 = vld [vmem:[#allocation6 + $0xb70] sm:$0xff]  ;;  %v2261_v15 = vunpack.c.l.s8.bf16 %v1389_v29 }
 0x474   :  { %3756 = vmatprep.subr.bf16.mxu1 %v2208_v40  ;;  %v2263_v40 = vunpack.c.l.s8.bf16 %v1391_v30  ;;  %v2271_v42 = vunpack.c.h.s8.bf16 %v1391_v30  ;;  %v1421_v30 = vld [vmem:[#allocation6 + $0xc60] sm:$0xff] }
 0x476   :  { %3429 = vmatpush1.bf16.msra.mxu0 %v2205_v39  ;;  %v1398_v39 = vld [vmem:[#allocation6 + $0xba8] sm:$0xff] }
 0x477   :  { %3757 = vmatpush1.bf16.msra.mxu1 %v2207_v41  ;;  %3430 = vmatprep.subr.bf16.mxu0 %v2214_v5  ;;  %v1400_v41 = vld [vmem:[#allocation6 + $0xbb8] sm:$0xff]  ;;  %v2269_v5 = vunpack.c.h.s8.bf16 %v1389_v29  ;;  %v2286_v2 = vunpack.c.h.s8.bf16 %v1398_v39 }
 0x478   :  { %3758 = vmatprep.subr.bf16.mxu1 %v2216_v58  ;;  %v2278_v58 = vunpack.c.l.s8.bf16 %v1398_v39  ;;  %v2288_v47 = vunpack.c.h.s8.bf16 %v1400_v41 }
 0x47a   :  { %3431 = vmatpush1.bf16.msra.mxu0 %v2213_v59  ;;  %v2280_v59 = vunpack.c.l.s8.bf16 %v1400_v41  ;;  %v1430_v41 = vld [vmem:[#allocation6 + $0xca8] sm:$0xff] }
 0x47b   :  { %3759 = vmatpush1.bf16.msra.mxu1 %v2215_v53  ;;  %3432 = vmatprep.subr.bf16.mxu0 %v2222_v13  ;;  %v1399_v53 = vld [vmem:[#allocation6 + $0xbb0] sm:$0xff]  ;;  %v2277_v13 = vunpack.c.l.s8.bf16 %v1397_v45 }
 0x47c   :  { %3760 = vmatprep.subr.bf16.mxu1 %v2224_v9  ;;  %v2279_v9 = vunpack.c.l.s8.bf16 %v1399_v53  ;;  %v2287_v52 = vunpack.c.h.s8.bf16 %v1399_v53  ;;  %v1431_v53 = vld [vmem:[#allocation6 + $0xcb0] sm:$0xff] }
 0x47e   :  { %3433 = vmatpush1.bf16.msra.mxu0 %v2221_v49  ;;  %v1406_v49 = vld [vmem:[#allocation6 + $0xbe8] sm:$0xff] }
 0x47f   :  { %3761 = vmatpush1.bf16.msra.mxu1 %v2223_v51  ;;  %3434 = vmatprep.subr.bf16.mxu0 %v2230_v10  ;;  %v1408_v51 = vld [vmem:[#allocation6 + $0xbf8] sm:$0xff]  ;;  %v2285_v10 = vunpack.c.h.s8.bf16 %v1397_v45  ;;  %v2302_v43 = vunpack.c.h.s8.bf16 %v1406_v49  ;;  %v1429_v45 = vld [vmem:[#allocation6 + $0xca0] sm:$0xff] }
 0x480   :  { %3762 = vmatprep.subr.bf16.mxu1 %v2232_v7  ;;  %v2294_v7 = vunpack.c.l.s8.bf16 %v1406_v49  ;;  %v2304_v54 = vunpack.c.h.s8.bf16 %v1408_v51  ;;  %v1438_v49 = vld [vmem:[#allocation6 + $0xce8] sm:$0xff] }
 0x482   :  { %3435 = vmatpush1.bf16.msra.mxu0 %v2229_v34  ;;  %v2296_v34 = vunpack.c.l.s8.bf16 %v1408_v51  ;;  %v1440_v51 = vld [vmem:[#allocation6 + $0xcf8] sm:$0xff] }
 0x483   :  { %3763 = vmatpush1.bf16.msra.mxu1 %v2231_v23  ;;  %3436 = vmatprep.subr.bf16.mxu0 %v2238_v55  ;;  %v1407_v23 = vld [vmem:[#allocation6 + $0xbf0] sm:$0xff]  ;;  %v2293_v55 = vunpack.c.l.s8.bf16 %v1405_v56 }
 0x484   :  { %3764 = vmatprep.subr.bf16.mxu1 %v2240_v60  ;;  %v2295_v60 = vunpack.c.l.s8.bf16 %v1407_v23  ;;  %v2303_v3 = vunpack.c.h.s8.bf16 %v1407_v23  ;;  %v1439_v23 = vld [vmem:[#allocation6 + $0xcf0] sm:$0xff] }
 0x486   :  { %3437 = vmatpush1.bf16.msra.mxu0 %v2237_v37  ;;  %v1414_v37 = vld [vmem:[#allocation6 + $0xc28] sm:$0xff] }
 0x487   :  { %3765 = vmatpush1.bf16.msra.mxu1 %v2239_v63  ;;  %3438 = vmatprep.subr.bf16.mxu0 %v2246_v1  ;;  %v1416_v63 = vld [vmem:[#allocation6 + $0xc38] sm:$0xff]  ;;  %v2301_v1 = vunpack.c.h.s8.bf16 %v1405_v56  ;;  %v2318_v24 = vunpack.c.h.s8.bf16 %v1414_v37  ;;  %v1437_v56 = vld [vmem:[#allocation6 + $0xce0] sm:$0xff] }
 0x488   :  { %3766 = vmatprep.subr.bf16.mxu1 %v2248_v18  ;;  %v2310_v18 = vunpack.c.l.s8.bf16 %v1414_v37  ;;  %v1446_v37 = vld [vmem:[#allocation6 + $0xd28] sm:$0xff] }
 0x48a   :  { %3439 = vmatpush1.bf16.msra.mxu0 %v2245_v6  ;;  %v2312_v6 = vunpack.c.l.s8.bf16 %v1416_v63 }
 0x48b   :  { %3767 = vmatpush1.bf16.msra.mxu1 %v2247_v8  ;;  %3440 = vmatprep.subr.bf16.mxu0 %v2254_v16  ;;  %v1415_v8 = vld [vmem:[#allocation6 + $0xc30] sm:$0xff]  ;;  %v2309_v16 = vunpack.c.l.s8.bf16 %v1413_v4 }
 0x48c   :  { %3768 = vmatprep.subr.bf16.mxu1 %v2256_v17  ;;  %v2311_v17 = vunpack.c.l.s8.bf16 %v1415_v8  ;;  %v2319_v29 = vunpack.c.h.s8.bf16 %v1415_v8  ;;  %v1447_v8 = vld [vmem:[#allocation6 + $0xd30] sm:$0xff] }
 0x48e   :  { %3441 = vmatpush1.bf16.msra.mxu0 %v2253_v21  ;;  %v2320_v21 = vunpack.c.h.s8.bf16 %v1416_v63  ;;  %v1448_v63 = vld [vmem:[#allocation6 + $0xd38] sm:$0xff] }
 0x48f   :  { %3769 = vmatpush1.bf16.msra.mxu1 %v2255_v22  ;;  %3442 = vmatprep.subr.bf16.mxu0 %v2262_v20  ;;  %v1424_v22 = vld [vmem:[#allocation6 + $0xc78] sm:$0xff]  ;;  %v2317_v20 = vunpack.c.h.s8.bf16 %v1413_v4  ;;  %v1445_v4 = vld [vmem:[#allocation6 + $0xd20] sm:$0xff] }
 0x490   :  { %3770 = vmatprep.subr.bf16.mxu1 %v2264_v27  ;;  %v2326_v27 = vunpack.c.l.s8.bf16 %v1422_v36  ;;  %v2336_v39 = vunpack.c.h.s8.bf16 %v1424_v22 }
 0x492   :  { %3443 = vmatpush1.bf16.msra.mxu0 %v2261_v15  ;;  %v2328_v15 = vunpack.c.l.s8.bf16 %v1424_v22  ;;  %v1456_v22 = vld [vmem:[#allocation6 + $0xd78] sm:$0xff] }
 0x493   :  { %3771 = vmatpush1.bf16.msra.mxu1 %v2263_v40  ;;  %3444 = vmatprep.subr.bf16.mxu0 %v2270_v35  ;;  %v1423_v40 = vld [vmem:[#allocation6 + $0xc70] sm:$0xff]  ;;  %v2325_v35 = vunpack.c.l.s8.bf16 %v1421_v30 }
 0x494   :  { %3772 = vmatprep.subr.bf16.mxu1 %v2272_v38  ;;  %v2327_v38 = vunpack.c.l.s8.bf16 %v1423_v40 }
 0x496   :  { %3445 = vmatpush1.bf16.msra.mxu0 %v2269_v5  ;;  %v1432_v5 = vld [vmem:[#allocation6 + $0xcb8] sm:$0xff] }
 0x497   :  { %3773 = vmatpush1.bf16.msra.mxu1 %v2271_v42  ;;  %3446 = vmatprep.subr.bf16.mxu0 %v2278_v58  ;;  %v2333_v42 = vunpack.c.h.s8.bf16 %v1421_v30  ;;  %v2335_v58 = vunpack.c.h.s8.bf16 %v1423_v40  ;;  %v1453_v30 = vld [vmem:[#allocation6 + $0xd60] sm:$0xff]  ;;  %v1455_v40 = vld [vmem:[#allocation6 + $0xd70] sm:$0xff] }
 0x498   :  { %3774 = vmatprep.subr.bf16.mxu1 %v2280_v59  ;;  %v2344_v59 = vunpack.c.l.s8.bf16 %v1432_v5 }
 0x49a   :  { %3447 = vmatpush1.bf16.msra.mxu0 %v2277_v13  ;;  %v2341_v13 = vunpack.c.l.s8.bf16 %v1429_v45 }
 0x49b   :  { %3775 = vmatpush1.bf16.msra.mxu1 %v2279_v9  ;;  %3448 = vmatprep.subr.bf16.mxu0 %v2286_v2  ;;  %v2343_v9 = vunpack.c.l.s8.bf16 %v1431_v53  ;;  %v2350_v2 = vunpack.c.h.s8.bf16 %v1430_v41 }
 0x49c   :  { %3776 = vmatprep.subr.bf16.mxu1 %v2288_v47  ;;  %v2352_v47 = vunpack.c.h.s8.bf16 %v1432_v5  ;;  %v1464_v5 = vld [vmem:[#allocation6 + $0xdb8] sm:$0xff] }
 0x49e   :  { %3449 = vmatpush1.bf16.msra.mxu0 %v2285_v10  ;;  %v2349_v10 = vunpack.c.h.s8.bf16 %v1429_v45  ;;  %v1461_v45 = vld [vmem:[#allocation6 + $0xda0] sm:$0xff] }
 0x49f   :  { %3777 = vmatpush1.bf16.msra.mxu1 %v2287_v52  ;;  %3450 = vmatprep.subr.bf16.mxu0 %v2294_v7  ;;  %v2351_v52 = vunpack.c.h.s8.bf16 %v1431_v53  ;;  %v2358_v7 = vunpack.c.l.s8.bf16 %v1438_v49  ;;  %v1463_v53 = vld [vmem:[#allocation6 + $0xdb0] sm:$0xff] }
 0x4a0   :  { %3778 = vmatprep.subr.bf16.mxu1 %v2296_v34  ;;  %v2360_v34 = vunpack.c.l.s8.bf16 %v1440_v51 }
 0x4a2   :  { %3451 = vmatpush1.bf16.msra.mxu0 %v2293_v55  ;;  %v2357_v55 = vunpack.c.l.s8.bf16 %v1437_v56 }
 0x4a3   :  { %3779 = vmatpush1.bf16.msra.mxu1 %v2295_v60  ;;  %3452 = vmatprep.subr.bf16.mxu0 %v2302_v43  ;;  %v2359_v60 = vunpack.c.l.s8.bf16 %v1439_v23  ;;  %v2366_v43 = vunpack.c.h.s8.bf16 %v1438_v49  ;;  %v1470_v49 = vld [vmem:[#allocation6 + $0xde8] sm:$0xff] }
 0x4a4   :  { %3780 = vmatprep.subr.bf16.mxu1 %v2304_v54  ;;  %v2368_v54 = vunpack.c.h.s8.bf16 %v1440_v51  ;;  %v1472_v51 = vld [vmem:[#allocation6 + $0xdf8] sm:$0xff] }
 0x4a6   :  { %3453 = vmatpush1.bf16.msra.mxu0 %v2301_v1  ;;  %v2365_v1 = vunpack.c.h.s8.bf16 %v1437_v56  ;;  %v1469_v56 = vld [vmem:[#allocation6 + $0xde0] sm:$0xff] }
 0x4a7   :  { %3781 = vmatpush1.bf16.msra.mxu1 %v2303_v3  ;;  %3463 = vmatprep.subr.bf16.mxu0 %v2310_v18  ;;  %v2367_v3 = vunpack.c.h.s8.bf16 %v1439_v23  ;;  %v2374_v18 = vunpack.c.l.s8.bf16 %v1446_v37  ;;  %v1471_v23 = vld [vmem:[#allocation6 + $0xdf0] sm:$0xff] }
 0x4a8   :  { %3791 = vmatprep.subr.bf16.mxu1 %v2312_v6  ;;  %v2376_v6 = vunpack.c.l.s8.bf16 %v1448_v63 }
 0x4a9   :  { %3455 = vmatmul.mubr.bf16.vlgmr.msra.gmra.mrb[4].mxu0 %v6067_v46 }
 0x4aa   :  { %3783 = vmatmul.mubr.bf16.vlgmr.msra.gmra.mrb[20].mxu1 %v6067_v46  ;;  %3464 = vmatpush1.bf16.msra.mxu0 %v2309_v16  ;;  %v2334_v46 = vunpack.c.h.s8.bf16 %v1422_v36  ;;  %v2373_v16 = vunpack.c.l.s8.bf16 %v1445_v4  ;;  %v2384_v36 = vunpack.c.h.s8.bf16 %v1448_v63  ;;  %v1480_v63 = vld [vmem:[#allocation6 + $0xe38] sm:$0xff] }
 0x4ab   :  { %3495 = vmatprep.mubr.bf16.mxu0 %v6069_v48  ;;  %3792 = vmatpush1.bf16.msra.mxu1 %v2311_v17  ;;  %v2375_v17 = vunpack.c.l.s8.bf16 %v1447_v8 }
 0x4ac   :  { %3823 = vmatprep.mubr.bf16.mxu1 %v6069_v48  ;;  %3465 = vmatprep.subr.bf16.mxu0 %v2318_v24  ;;  %v2342_v48 = vunpack.c.l.s8.bf16 %v1430_v41  ;;  %v2382_v24 = vunpack.c.h.s8.bf16 %v1446_v37  ;;  %v1462_v41 = vld [vmem:[#allocation6 + $0xda8] sm:$0xff] }
 0x4ad   :  { %3793 = vmatprep.subr.bf16.mxu1 %v2320_v21  ;;  %v1454_v21 = vld [vmem:[#allocation6 + $0xd68] sm:$0xff] }
 0x4ae   :  { %3466 = vmatpush1.bf16.msra.mxu0 %v2317_v20  ;;  %v2381_v20 = vunpack.c.h.s8.bf16 %v1445_v4  ;;  %v1478_v37 = vld [vmem:[#allocation6 + $0xe28] sm:$0xff]  ;;  %v1477_v4 = vld [vmem:[#allocation6 + $0xe20] sm:$0xff] }
 0x4af   :  { %3794 = vmatpush1.bf16.msra.mxu1 %v2319_v29  ;;  %3467 = vmatprep.subr.bf16.mxu0 %v2326_v27  ;;  %v2383_v29 = vunpack.c.h.s8.bf16 %v1447_v8  ;;  %v2390_v27 = vunpack.c.l.s8.bf16 %v1454_v21  ;;  %v1479_v8 = vld [vmem:[#allocation6 + $0xe30] sm:$0xff] }
 0x4b0   :  { %3795 = vmatprep.subr.bf16.mxu1 %v2328_v15  ;;  %v2392_v15 = vunpack.c.l.s8.bf16 %v1456_v22 }
 0x4b2   :  { %3468 = vmatpush1.bf16.msra.mxu0 %v2325_v35  ;;  %v2389_v35 = vunpack.c.l.s8.bf16 %v1453_v30 }
 0x4b3   :  { %3796 = vmatpush1.bf16.msra.mxu1 %v2327_v38  ;;  %3469 = vmatprep.subr.bf16.mxu0 %v2334_v46  ;;  %v2391_v38 = vunpack.c.l.s8.bf16 %v1455_v40  ;;  %v2398_v46 = vunpack.c.h.s8.bf16 %v1454_v21  ;;  %v2448_v21 = vunpack.c.h.s8.bf16 %v1480_v63 }
 0x4b4   :  { %3797 = vmatprep.subr.bf16.mxu1 %v2336_v39  ;;  %v2400_v39 = vunpack.c.h.s8.bf16 %v1456_v22  ;;  %v1488_v22 = vld [vmem:[#allocation6 + $0xe78] sm:$0xff] }
 0x4b6   :  { %3470 = vmatpush1.bf16.msra.mxu0 %v2333_v42  ;;  %v2397_v42 = vunpack.c.h.s8.bf16 %v1453_v30  ;;  %v1485_v30 = vld [vmem:[#allocation6 + $0xe60] sm:$0xff] }
 0x4b7   :  { %3798 = vmatpush1.bf16.msra.mxu1 %v2335_v58  ;;  %3471 = vmatprep.subr.bf16.mxu0 %v2342_v48  ;;  %v2399_v58 = vunpack.c.h.s8.bf16 %v1455_v40  ;;  %v2406_v48 = vunpack.c.l.s8.bf16 %v1462_v41  ;;  %v1487_v40 = vld [vmem:[#allocation6 + $0xe70] sm:$0xff] }
 0x4b8   :  { %3799 = vmatprep.subr.bf16.mxu1 %v2344_v59  ;;  %v2408_v59 = vunpack.c.l.s8.bf16 %v1464_v5 }
 0x4ba   :  { %3472 = vmatpush1.bf16.msra.mxu0 %v2341_v13  ;;  %v2405_v13 = vunpack.c.l.s8.bf16 %v1461_v45 }
 0x4bb   :  { %3800 = vmatpush1.bf16.msra.mxu1 %v2343_v9  ;;  %3473 = vmatprep.subr.bf16.mxu0 %v2350_v2  ;;  %v2407_v9 = vunpack.c.l.s8.bf16 %v1463_v53  ;;  %v2414_v2 = vunpack.c.h.s8.bf16 %v1462_v41  ;;  %v1496_v41 = vld [vmem:[#allocation6 + $0xeb8] sm:$0xff] }
 0x4bc   :  { %3801 = vmatprep.subr.bf16.mxu1 %v2352_v47  ;;  %v2416_v47 = vunpack.c.h.s8.bf16 %v1464_v5  ;;  %v2461_v5 = vunpack.c.h.s8.bf16 %v1485_v30 }
 0x4be   :  { %3474 = vmatpush1.bf16.msra.mxu0 %v2349_v10  ;;  %v2413_v10 = vunpack.c.h.s8.bf16 %v1461_v45  ;;  %v1495_v45 = vld [vmem:[#allocation6 + $0xeb0] sm:$0xff] }
 0x4bf   :  { %3802 = vmatpush1.bf16.msra.mxu1 %v2351_v52  ;;  %3475 = vmatprep.subr.bf16.mxu0 %v2358_v7  ;;  %v2415_v52 = vunpack.c.h.s8.bf16 %v1463_v53  ;;  %v2422_v7 = vunpack.c.l.s8.bf16 %v1470_v49  ;;  %v2471_v53 = vunpack.c.l.s8.bf16 %v1495_v45 }
 0x4c0   :  { %3803 = vmatprep.subr.bf16.mxu1 %v2360_v34  ;;  %v2424_v34 = vunpack.c.l.s8.bf16 %v1472_v51 }
 0x4c2   :  { %3476 = vmatpush1.bf16.msra.mxu0 %v2357_v55  ;;  %v2421_v55 = vunpack.c.l.s8.bf16 %v1469_v56 }
 0x4c3   :  { %3804 = vmatpush1.bf16.msra.mxu1 %v2359_v60  ;;  %3477 = vmatprep.subr.bf16.mxu0 %v2366_v43  ;;  %v2423_v60 = vunpack.c.l.s8.bf16 %v1471_v23  ;;  %v2430_v43 = vunpack.c.h.s8.bf16 %v1470_v49 }
 0x4c4   :  { %3805 = vmatprep.subr.bf16.mxu1 %v2368_v54  ;;  %v2432_v54 = vunpack.c.h.s8.bf16 %v1472_v51  ;;  %v2479_v51 = vunpack.c.h.s8.bf16 %v1495_v45 }
 0x4c6   :  { %3478 = vmatpush1.bf16.msra.mxu0 %v2365_v1  ;;  %v2429_v1 = vunpack.c.h.s8.bf16 %v1469_v56  ;;  %v1503_v56 = vld [vmem:[#allocation6 + $0xef0] sm:$0xff] }
 0x4c7   :  { %3806 = vmatpush1.bf16.msra.mxu1 %v2367_v3  ;;  %3479 = vmatprep.subr.bf16.mxu0 %v2374_v18  ;;  %v2431_v3 = vunpack.c.h.s8.bf16 %v1471_v23  ;;  %v2438_v18 = vunpack.c.l.s8.bf16 %v1478_v37  ;;  %v2487_v23 = vunpack.c.l.s8.bf16 %v1503_v56 }
 0x4c8   :  { %3807 = vmatprep.subr.bf16.mxu1 %v2376_v6  ;;  %v2440_v6 = vunpack.c.l.s8.bf16 %v1480_v63  ;;  %v2495_v63 = vunpack.c.h.s8.bf16 %v1503_v56 }
 0x4ca   :  { %3480 = vmatpush1.bf16.msra.mxu0 %v2373_v16  ;;  %v2437_v16 = vunpack.c.l.s8.bf16 %v1477_v4 }
 0x4cb   :  { %3808 = vmatpush1.bf16.msra.mxu1 %v2375_v17  ;;  %3481 = vmatprep.subr.bf16.mxu0 %v2382_v24  ;;  %v2439_v17 = vunpack.c.l.s8.bf16 %v1479_v8  ;;  %v2446_v24 = vunpack.c.h.s8.bf16 %v1478_v37 }
 0x4cc   :  { %3809 = vmatprep.subr.bf16.mxu1 %v2384_v36  ;;  %v1486_v36 = vld [vmem:[#allocation6 + $0xe68] sm:$0xff] }
 0x4ce   :  { %3482 = vmatpush1.bf16.msra.mxu0 %v2381_v20  ;;  %v2445_v20 = vunpack.c.h.s8.bf16 %v1477_v4  ;;  %v1511_v4 = vld [vmem:[#allocation6 + $0xf30] sm:$0xff] }
 0x4cf   :  { %3810 = vmatpush1.bf16.msra.mxu1 %v2383_v29  ;;  %3483 = vmatprep.subr.bf16.mxu0 %v2390_v27  ;;  %v2447_v29 = vunpack.c.h.s8.bf16 %v1479_v8  ;;  %v2454_v27 = vunpack.c.l.s8.bf16 %v1486_v36  ;;  %v2503_v8 = vunpack.c.l.s8.bf16 %v1511_v4 }
 0x4d0   :  { %3811 = vmatprep.subr.bf16.mxu1 %v2392_v15  ;;  %v2456_v15 = vunpack.c.l.s8.bf16 %v1488_v22 }
 0x4d2   :  { %3484 = vmatpush1.bf16.msra.mxu0 %v2389_v35  ;;  %v2453_v35 = vunpack.c.l.s8.bf16 %v1485_v30  ;;  %v1519_v30 = vld [vmem:[#allocation6 + $0xf70] sm:$0xff] }
 0x4d3   :  { %3812 = vmatpush1.bf16.msra.mxu1 %v2391_v38  ;;  %3485 = vmatprep.subr.bf16.mxu0 %v2398_v46  ;;  %v2455_v38 = vunpack.c.l.s8.bf16 %v1487_v40  ;;  %v2464_v46 = vunpack.c.h.s8.bf16 %v1488_v22  ;;  %v2511_v22 = vunpack.c.h.s8.bf16 %v1511_v4 }
 0x4d4   :  { %3813 = vmatprep.subr.bf16.mxu1 %v2400_v39  ;;  %v1494_v39 = vld [vmem:[#allocation6 + $0xea8] sm:$0xff] }
 0x4d6   :  { %3486 = vmatpush1.bf16.msra.mxu0 %v2397_v42  ;;  %v2463_v42 = vunpack.c.h.s8.bf16 %v1487_v40  ;;  %v2519_v40 = vunpack.c.l.s8.bf16 %v1519_v30 }
 0x4d7   :  { %3814 = vmatpush1.bf16.msra.mxu1 %v2399_v58  ;;  %3487 = vmatprep.subr.bf16.mxu0 %v2406_v48  ;;  %v1493_v58 = vld [vmem:[#allocation6 + $0xea0] sm:$0xff]  ;;  %v2472_v48 = vunpack.c.l.s8.bf16 %v1496_v41 }
 0x4d8   :  { %3815 = vmatprep.subr.bf16.mxu1 %v2408_v59  ;;  %v2469_v59 = vunpack.c.l.s8.bf16 %v1493_v58  ;;  %v2477_v49 = vunpack.c.h.s8.bf16 %v1493_v58 }
 0x4da   :  { %3488 = vmatpush1.bf16.msra.mxu0 %v2405_v13  ;;  %v2478_v13 = vunpack.c.h.s8.bf16 %v1494_v39 }
 0x4db   :  { %3816 = vmatpush1.bf16.msra.mxu1 %v2407_v9  ;;  %3489 = vmatprep.subr.bf16.mxu0 %v2414_v2  ;;  %v2480_v9 = vunpack.c.h.s8.bf16 %v1496_v41  ;;  %v1502_v2 = vld [vmem:[#allocation6 + $0xee8] sm:$0xff] }
 0x4dc   :  { %3817 = vmatprep.subr.bf16.mxu1 %v2416_v47  ;;  %v1504_v47 = vld [vmem:[#allocation6 + $0xef8] sm:$0xff]  ;;  %v6134_v41 = vld [vmem:[#allocation12 + $0x20] ss:$2 sm:$0xff] }
 0x4dd   :  { %v3885_v45 = vrot.slane %v6134_v41, %v5898_v14 }
 0x4de   :  { %3490 = vmatpush1.bf16.msra.mxu0 %v2413_v10  ;;  %v2486_v10 = vunpack.c.l.s8.bf16 %v1502_v2 }
 0x4df   :  { %3818 = vmatpush1.bf16.msra.mxu1 %v2415_v52  ;;  %3491 = vmatprep.subr.bf16.mxu0 %v2422_v7  ;;  %v1501_v52 = vld [vmem:[#allocation6 + $0xee0] sm:$0xff]  ;;  %v2488_v7 = vunpack.c.l.s8.bf16 %v1504_v47 }
 0x4e0   :  { %3819 = vmatprep.subr.bf16.mxu1 %v2424_v34  ;;  %v2485_v34 = vunpack.c.l.s8.bf16 %v1501_v52  ;;  %v2493_v37 = vunpack.c.h.s8.bf16 %v1501_v52 }
 0x4e2   :  { %3492 = vmatpush1.bf16.msra.mxu0 %v2421_v55  ;;  %v2494_v55 = vunpack.c.h.s8.bf16 %v1502_v2 }
 0x4e3   :  { %3820 = vmatpush1.bf16.msra.mxu1 %v2423_v60  ;;  %3493 = vmatprep.subr.bf16.mxu0 %v2430_v43  ;;  %v2496_v60 = vunpack.c.h.s8.bf16 %v1504_v47  ;;  %v1510_v43 = vld [vmem:[#allocation6 + $0xf28] sm:$0xff] }
 0x4e4   :  { %3821 = vmatprep.subr.bf16.mxu1 %v2432_v54  ;;  %v1512_v54 = vld [vmem:[#allocation6 + $0xf38] sm:$0xff]  ;;  %v1534_v47 = vld [vmem:[#allocation6 + $0xfe8] sm:$0xff] }
 0x4e5   :  { %v2550_v56 = vunpack.c.l.s8.bf16 %v1534_v47 }
 0x4e6   :  { %3494 = vmatpush1.bf16.msra.mxu0 %v2429_v1  ;;  %v2502_v1 = vunpack.c.l.s8.bf16 %v1510_v43 }
 0x4e7   :  { %3822 = vmatpush1.bf16.msra.mxu1 %v2431_v3  ;;  %3504 = vmatprep.subr.bf16.mxu0 %v2438_v18  ;;  %v1509_v3 = vld [vmem:[#allocation6 + $0xf20] sm:$0xff]  ;;  %v2504_v18 = vunpack.c.l.s8.bf16 %v1512_v54 }
 0x4e8   :  { %3832 = vmatprep.subr.bf16.mxu1 %v2440_v6  ;;  %v2501_v6 = vunpack.c.l.s8.bf16 %v1509_v3 }
 0x4e9   :  { %3496 = vmatmul.mubr.bf16.vlgmr.msra.gmra.mrb[4].mxu0 %v6081_v11 }
 0x4ea   :  { %3824 = vmatmul.mubr.bf16.vlgmr.msra.gmra.mrb[20].mxu1 %v6081_v11  ;;  %3505 = vmatpush1.bf16.msra.mxu0 %v2437_v16  ;;  %v2462_v11 = vunpack.c.h.s8.bf16 %v1486_v36  ;;  %v2510_v16 = vunpack.c.h.s8.bf16 %v1510_v43  ;;  %v1520_v36 = vld [vmem:[#allocation6 + $0xf78] sm:$0xff] }
 0x4eb   :  { %3536 = vmatprep.mubr.bf16.mxu0 %v6083_v28  ;;  %3833 = vmatpush1.bf16.msra.mxu1 %v2439_v17  ;;  %v2512_v17 = vunpack.c.h.s8.bf16 %v1512_v54 }
 0x4ec   :  { %3864 = vmatprep.mubr.bf16.mxu1 %v6083_v28  ;;  %3506 = vmatprep.subr.bf16.mxu0 %v2446_v24  ;;  %v2470_v28 = vunpack.c.l.s8.bf16 %v1494_v39  ;;  %v1518_v24 = vld [vmem:[#allocation6 + $0xf68] sm:$0xff] }
 0x4ed   :  { %3834 = vmatprep.subr.bf16.mxu1 %v2448_v21  ;;  %v2509_v21 = vunpack.c.h.s8.bf16 %v1509_v3 }
 0x4ee   :  { %3507 = vmatpush1.bf16.msra.mxu0 %v2445_v20  ;;  %v2518_v20 = vunpack.c.l.s8.bf16 %v1518_v24 }
 0x4ef   :  { %3835 = vmatpush1.bf16.msra.mxu1 %v2447_v29  ;;  %3508 = vmatprep.subr.bf16.mxu0 %v2454_v27  ;;  %v1517_v29 = vld [vmem:[#allocation6 + $0xf60] sm:$0xff]  ;;  %v2520_v27 = vunpack.c.l.s8.bf16 %v1520_v36 }
 0x4f0   :  { %3836 = vmatprep.subr.bf16.mxu1 %v2456_v15  ;;  %v2517_v15 = vunpack.c.l.s8.bf16 %v1517_v29  ;;  %v2525_v39 = vunpack.c.h.s8.bf16 %v1517_v29 }
 0x4f2   :  { %3509 = vmatpush1.bf16.msra.mxu0 %v2453_v35  ;;  %v2526_v35 = vunpack.c.h.s8.bf16 %v1518_v24 }
 0x4f3   :  { %3837 = vmatpush1.bf16.msra.mxu1 %v2455_v38  ;;  %3510 = vmatprep.subr.bf16.mxu0 %v2462_v11  ;;  %v2528_v38 = vunpack.c.h.s8.bf16 %v1520_v36  ;;  %v1526_v11 = vld [vmem:[#allocation6 + $0xfa8] sm:$0xff] }
 0x4f4   :  { %3838 = vmatprep.subr.bf16.mxu1 %v2464_v46  ;;  %v1528_v46 = vld [vmem:[#allocation6 + $0xfb8] sm:$0xff] }
 0x4f5   :  { %v2536_v58 = vunpack.c.l.s8.bf16 %v1528_v46  ;;  %v2544_v2 = vunpack.c.h.s8.bf16 %v1528_v46  ;;  %v4013_v46 = vld [vmem:[#allocation7 + $0x30] sm:$0xff] }
 0x4f6   :  { %3511 = vmatpush1.bf16.msra.mxu0 %v2461_v5  ;;  %v2527_v5 = vunpack.c.h.s8.bf16 %v1519_v30  ;;  %v4014_v30 = vld [vmem:[#allocation7 + $0x38] sm:$0xff] }
 0x4f7   :  { %3839 = vmatpush1.bf16.msra.mxu1 %v2463_v42  ;;  %3512 = vmatprep.subr.bf16.mxu0 %v2470_v28  ;;  %v2534_v42 = vunpack.c.l.s8.bf16 %v1526_v11  ;;  %v1525_v28 = vld [vmem:[#allocation6 + $0xfa0] sm:$0xff] }
 0x4f8   :  { %3840 = vmatprep.subr.bf16.mxu1 %v2472_v48  ;;  %v1527_v48 = vld [vmem:[#allocation6 + $0xfb0] sm:$0xff]  ;;  %v2541_v52 = vunpack.c.h.s8.bf16 %v1525_v28 }
 0x4fa   :  { %3513 = vmatpush1.bf16.msra.mxu0 %v2469_v59  ;;  %v2533_v59 = vunpack.c.l.s8.bf16 %v1525_v28  ;;  %v4016_v28 = vld [vmem:[#allocation7 + $0x48] sm:$0xff] }
 0x4fb   :  { %3841 = vmatpush1.bf16.msra.mxu1 %v2471_v53  ;;  %3514 = vmatprep.subr.bf16.mxu0 %v2478_v13  ;;  %v6138_v53 = vld [vmem:[#allocation12 + $0x21] ss:$2 sm:$0xff]  ;;  %v2535_v13 = vunpack.c.l.s8.bf16 %v1527_v48 }
 0x4fc   :  { %3842 = vmatprep.subr.bf16.mxu1 %v2480_v9  ;;  %v2542_v9 = vunpack.c.h.s8.bf16 %v1526_v11  ;;  %v4146_v11 = vunpack.c.l.s8.bf16 %v4014_v30 }
 0x4fe   :  { %3515 = vmatpush1.bf16.msra.mxu0 %v2477_v49  ;;  %v1536_v49 = vld [vmem:[#allocation6 + $0xff8] sm:$0xff] }
 0x4ff   :  { %3843 = vmatpush1.bf16.msra.mxu1 %v2479_v51  ;;  %3516 = vmatprep.subr.bf16.mxu0 %v2486_v10  ;;  %v3919_v51 = vmul.f32 %v3885_v45, %v6114_v32  ;;  %v3934_v10 = vrot.slane %v6138_v53, %v5898_v14  ;;  %v2558_v32 = vunpack.c.h.s8.bf16 %v1534_v47  ;;  %v4149_v45 = vunpack.c.h.s8.bf16 %v4013_v46 }
 0x500   :  { %3844 = vmatprep.subr.bf16.mxu1 %v2488_v7  ;;  %v2543_v7 = vunpack.c.h.s8.bf16 %v1527_v48 }
 0x502   :  { %3517 = vmatpush1.bf16.msra.mxu0 %v2485_v34  ;;  %v1533_v34 = vld [vmem:[#allocation6 + $0xfe0] sm:$0xff] }
 0x503   :  { %3845 = vmatpush1.bf16.msra.mxu1 %v2487_v23  ;;  %3518 = vmatprep.subr.bf16.mxu0 %v2494_v55  ;;  %v2552_v23 = vunpack.c.l.s8.bf16 %v1536_v49  ;;  %v1535_v55 = vld [vmem:[#allocation6 + $0xff0] sm:$0xff]  ;;  %v2549_v43 = vunpack.c.l.s8.bf16 %v1533_v34 }
 0x504   :  { %3846 = vmatprep.subr.bf16.mxu1 %v2496_v60  ;;  %v3968_v60 = vadd.f32 %v3934_v10, %v3919_v51  ;;  %v2551_v54 = vunpack.c.l.s8.bf16 %v1535_v55  ;;  %v2559_v4 = vunpack.c.h.s8.bf16 %v1535_v55  ;;  %v4156_v51 = vunpack.c.h.s8.bf16 %v4016_v28  ;;  %v4019_v55 = vld [vmem:[#allocation7 + $0x60] sm:$0xff] }
 0x506   :  { %3519 = vmatpush1.bf16.msra.mxu0 %v2493_v37  ;;  %v2560_v37 = vunpack.c.h.s8.bf16 %v1536_v49  ;;  %v3984_v3 = vmul.f32 0.01, %v3968_v60  ;;  %vm3976_vm1 = vcmp.gt.f32.partialorder %v3968_v60, 0.0 }
 0x507   :  { %3847 = vmatpush1.bf16.msra.mxu1 %v2495_v63  ;;  %3520 = vmatprep.subr.bf16.mxu0 %v2502_v1  ;;  %v4008_v63 = vld [vmem:[#allocation7 + $0x8] sm:$0xff]  ;;  %v4010_v1 = vld [vmem:[#allocation7 + $0x18] sm:$0xff] }
 0x508   :  { %3848 = vmatprep.subr.bf16.mxu1 %v2504_v18  ;;  %v2557_v18 = vunpack.c.h.s8.bf16 %v1533_v34  ;;  %v3992_v36 = vsel %vm3976_vm1, %v3968_v60, %v3984_v3  ;;  %v4026_v3 = vld [vmem:[#allocation7 + $0x98] sm:$0xff]  ;;  %vm5184_vm1 = vcmask 23552  }
 0x509   :  { %v4000_v29 = vpack.c.bf16 %v3992_v36, %v3992_v36 }
 0x50a   :  { %3521 = vmatpush1.bf16.msra.mxu0 %v2501_v6  ;;  %v4136_v6 = vunpack.c.l.s8.bf16 %v4008_v63 }
 0x50b   :  { %3849 = vmatpush1.bf16.msra.mxu1 %v2503_v8  ;;  %3522 = vmatprep.subr.bf16.mxu0 %v2510_v16  ;;  %v4007_v8 = vld [vmem:[#allocation7] sm:$0xff]  ;;  %v4138_v16 = vunpack.c.l.s8.bf16 %v4010_v1 }
 0x50c   :  { %3850 = vmatprep.subr.bf16.mxu1 %v2512_v17  ;;  %v4009_v17 = vld [vmem:[#allocation7 + $0x10] sm:$0xff]  ;;  %v4135_v24 = vunpack.c.l.s8.bf16 %v4007_v8 }
 0x50e   :  { %3523 = vmatpush1.bf16.msra.mxu0 %v2509_v21  ;;  %v4137_v21 = vunpack.c.l.s8.bf16 %v4009_v17 }
 0x50f   :  { %3851 = vmatpush1.bf16.msra.mxu1 %v2511_v22  ;;  %3524 = vmatprep.subr.bf16.mxu0 %v2518_v20  ;;  %v4140_v22 = vunpack.c.h.s8.bf16 %v4008_v63  ;;  %v4012_v20 = vld [vmem:[#allocation7 + $0x28] sm:$0xff] }
 0x510   :  { %3852 = vmatprep.subr.bf16.mxu1 %v2520_v27  ;;  %v4142_v27 = vunpack.c.h.s8.bf16 %v4010_v1  ;;  %v4024_v1 = vld [vmem:[#allocation7 + $0x88] sm:$0xff] }
 0x512   :  { %3525 = vmatpush1.bf16.msra.mxu0 %v2517_v15  ;;  %v4139_v15 = vunpack.c.h.s8.bf16 %v4007_v8  ;;  %v4023_v8 = vld [vmem:[#allocation7 + $0x80] sm:$0xff] }
 0x513   :  { %3853 = vmatpush1.bf16.msra.mxu1 %v2519_v40  ;;  %3526 = vmatprep.subr.bf16.mxu0 %v2526_v35  ;;  %v4141_v40 = vunpack.c.h.s8.bf16 %v4009_v17  ;;  %v4144_v35 = vunpack.c.l.s8.bf16 %v4012_v20  ;;  %v4025_v17 = vld [vmem:[#allocation7 + $0x90] sm:$0xff] }
 0x514   :  { %3854 = vmatprep.subr.bf16.mxu1 %v2528_v38  ;;  %v4011_v38 = vld [vmem:[#allocation7 + $0x20] sm:$0xff]  ;;  %v4169_v36 = vunpack.c.l.s8.bf16 %v4025_v17 }
 0x515   :  { %v4147_v48 = vunpack.c.h.s8.bf16 %v4011_v38 }
 0x516   :  { %3527 = vmatpush1.bf16.msra.mxu0 %v2525_v39  ;;  %v4143_v39 = vunpack.c.l.s8.bf16 %v4011_v38  ;;  %v4029_v38 = vld [vmem:[#allocation7 + $0xb0] sm:$0xff] }
 0x517   :  { %3855 = vmatpush1.bf16.msra.mxu1 %v2527_v5  ;;  %3528 = vmatprep.subr.bf16.mxu0 %v2534_v42  ;;  %v4145_v5 = vunpack.c.l.s8.bf16 %v4013_v46  ;;  %v4148_v42 = vunpack.c.h.s8.bf16 %v4012_v20  ;;  %v4028_v20 = vld [vmem:[#allocation7 + $0xa8] sm:$0xff]  ;;  %v4177_v46 = vunpack.c.l.s8.bf16 %v4029_v38 }
 0x518   :  { %3856 = vmatprep.subr.bf16.mxu1 %v2536_v58  ;;  %v4018_v58 = vld [vmem:[#allocation7 + $0x58] sm:$0xff] }
 0x519   :  { %v4158_v10 = vunpack.c.h.s8.bf16 %v4018_v58 }
 0x51a   :  { %3529 = vmatpush1.bf16.msra.mxu0 %v2533_v59  ;;  %v4152_v59 = vunpack.c.l.s8.bf16 %v4016_v28 }
 0x51b   :  { %3857 = vmatpush1.bf16.msra.mxu1 %v2535_v13  ;;  %3530 = vmatprep.subr.bf16.mxu0 %v2542_v9  ;;  %v4015_v13 = vld [vmem:[#allocation7 + $0x40] sm:$0xff]  ;;  %v4154_v9 = vunpack.c.l.s8.bf16 %v4018_v58  ;;  %v4181_v58 = vunpack.c.h.s8.bf16 %v4029_v38 }
 0x51c   :  { %3858 = vmatprep.subr.bf16.mxu1 %v2544_v2  ;;  %v4017_v2 = vld [vmem:[#allocation7 + $0x50] sm:$0xff]  ;;  %v4151_v47 = vunpack.c.l.s8.bf16 %v4015_v13 }
 0x51d   :  { %v4153_v49 = vunpack.c.l.s8.bf16 %v4017_v2  ;;  %v4157_v34 = vunpack.c.h.s8.bf16 %v4017_v2  ;;  %v3893_v2 = vrot.slane %v6134_v41, %v5911_v25 }
 0x51e   :  { %3531 = vmatpush1.bf16.msra.mxu0 %v2541_v52  ;;  %v4020_v52 = vld [vmem:[#allocation7 + $0x68] sm:$0xff] }
 0x51f   :  { %3859 = vmatpush1.bf16.msra.mxu1 %v2543_v7  ;;  %3532 = vmatprep.subr.bf16.mxu0 %v2550_v56  ;;  %v4022_v7 = vld [vmem:[#allocation7 + $0x78] sm:$0xff]  ;;  %v4155_v56 = vunpack.c.h.s8.bf16 %v4015_v13 }
 0x520   :  { %3860 = vmatprep.subr.bf16.mxu1 %v2552_v23  ;;  %v4160_v23 = vunpack.c.l.s8.bf16 %v4020_v52  ;;  %v4162_v60 = vunpack.c.l.s8.bf16 %v4022_v7  ;;  %v4166_v63 = vunpack.c.h.s8.bf16 %v4022_v7 }
 0x522   :  { %3533 = vmatpush1.bf16.msra.mxu0 %v2549_v43  ;;  %v4021_v43 = vld [vmem:[#allocation7 + $0x70] sm:$0xff] }
 0x523   :  { %3861 = vmatpush1.bf16.msra.mxu1 %v2551_v54  ;;  %3534 = vmatprep.subr.bf16.mxu0 %v2558_v32  ;;  %v4159_v54 = vunpack.c.l.s8.bf16 %v4019_v55  ;;  %v4161_v32 = vunpack.c.l.s8.bf16 %v4021_v43 }
 0x524   :  { %3862 = vmatprep.subr.bf16.mxu1 %v2560_v37  ;;  %v4164_v37 = vunpack.c.h.s8.bf16 %v4020_v52  ;;  %v3930_v52 = vrot.slane %v6138_v53, %v5893_v12 }
 0x526   :  { %3535 = vmatpush1.bf16.msra.mxu0 %v2557_v18  ;;  %v4163_v18 = vunpack.c.h.s8.bf16 %v4019_v55  ;;  %v3942_v55 = vrot.slane %v6138_v53, %v5911_v25 }
 0x527   :  { %3863 = vmatpush1.bf16.msra.mxu1 %v2559_v4  ;;  %4391 = vmatprep.subr.bf16.mxu0 %v4136_v6  ;;  %v4165_v4 = vunpack.c.h.s8.bf16 %v4021_v43  ;;  %v4168_v6 = vunpack.c.l.s8.bf16 %v4024_v1 }
 0x528   :  { %4555 = vmatprep.subr.bf16.mxu1 %v4138_v16  ;;  %v4170_v16 = vunpack.c.l.s8.bf16 %v4026_v3 }
 0x529   :  { %3537 = vmatmul.mubr.bf16.vlgmr.msra.gmra.mrb[4].mxu0 %v6092_v19 }
 0x52a   :  { %3865 = vmatmul.mubr.bf16.vlgmr.msra.gmra.mrb[20].mxu1 %v6092_v19  ;;  %4392 = vmatpush1.bf16.msra.mxu0 %v4135_v24  ;;  %v4150_v19 = vunpack.c.h.s8.bf16 %v4014_v30  ;;  %v4167_v24 = vunpack.c.l.s8.bf16 %v4023_v8  ;;  %v4173_v30 = vunpack.c.h.s8.bf16 %v4025_v17 }
 0x52b   :  { %4423 = vmatprep.mubr.bf16.mxu0 %v4000_v29  ;;  %4556 = vmatpush1.bf16.msra.mxu1 %v4137_v21  ;;  %v4172_v21 = vunpack.c.h.s8.bf16 %v4024_v1 }
 0x52c   :  { %4587 = vmatprep.mubr.bf16.mxu1 %v4000_v29  ;;  %4393 = vmatprep.subr.bf16.mxu0 %v4140_v22  ;;  %v4174_v22 = vunpack.c.h.s8.bf16 %v4026_v3  ;;  %v4030_v29 = vld [vmem:[#allocation7 + $0xb8] sm:$0xff] }
 0x52d   :  { %4557 = vmatprep.subr.bf16.mxu1 %v4142_v27  ;;  %v4171_v27 = vunpack.c.h.s8.bf16 %v4023_v8  ;;  %v4040_v8 = vld [vmem:[#allocation7 + $0x108] sm:$0xff] }
 0x52e   :  { %4394 = vmatpush1.bf16.msra.mxu0 %v4139_v15  ;;  %v4176_v15 = vunpack.c.l.s8.bf16 %v4028_v20  ;;  %v4204_v38 = vunpack.c.h.s8.bf16 %v4040_v8 }
 0x52f   :  { %4558 = vmatpush1.bf16.msra.mxu1 %v4141_v40  ;;  %4395 = vmatprep.subr.bf16.mxu0 %v4144_v35  ;;  %v4027_v40 = vld [vmem:[#allocation7 + $0xa0] sm:$0xff]  ;;  %v4178_v35 = vunpack.c.l.s8.bf16 %v4030_v29 }
 0x530   :  { %4559 = vmatprep.subr.bf16.mxu1 %v4146_v11  ;;  %v4175_v11 = vunpack.c.l.s8.bf16 %v4027_v40  ;;  %v4179_v28 = vunpack.c.h.s8.bf16 %v4027_v40 }
 0x532   :  { %4396 = vmatpush1.bf16.msra.mxu0 %v4143_v39  ;;  %v4180_v39 = vunpack.c.h.s8.bf16 %v4028_v20 }
 0x533   :  { %4560 = vmatpush1.bf16.msra.mxu1 %v4145_v5  ;;  %4397 = vmatprep.subr.bf16.mxu0 %v4148_v42  ;;  %v4182_v5 = vunpack.c.h.s8.bf16 %v4030_v29  ;;  %v4032_v42 = vld [vmem:[#allocation7 + $0xc8] sm:$0xff] }
 0x534   :  { %4561 = vmatprep.subr.bf16.mxu1 %v4150_v19  ;;  %v4034_v19 = vld [vmem:[#allocation7 + $0xd8] sm:$0xff] }
 0x535   :  { %v4186_v13 = vunpack.c.l.s8.bf16 %v4034_v19  ;;  %v4190_v7 = vunpack.c.h.s8.bf16 %v4034_v19 }
 0x536   :  { %4398 = vmatpush1.bf16.msra.mxu0 %v4147_v48  ;;  %v4184_v48 = vunpack.c.l.s8.bf16 %v4032_v42 }
 0x537   :  { %4562 = vmatpush1.bf16.msra.mxu1 %v4149_v45  ;;  %4399 = vmatprep.subr.bf16.mxu0 %v4152_v59  ;;  %v4031_v45 = vld [vmem:[#allocation7 + $0xc0] sm:$0xff]  ;;  %v3881_v59 = vrot.slane %v6134_v41, %v5893_v12 }
 0x538   :  { %4563 = vmatprep.subr.bf16.mxu1 %v4154_v9  ;;  %v4033_v9 = vld [vmem:[#allocation7 + $0xd0] sm:$0xff] }
 0x539   :  { %v4189_v43 = vunpack.c.h.s8.bf16 %v4033_v9 }
 0x53a   :  { %4400 = vmatpush1.bf16.msra.mxu0 %v4151_v47  ;;  %v4183_v47 = vunpack.c.l.s8.bf16 %v4031_v45 }
 0x53b   :  { %4564 = vmatpush1.bf16.msra.mxu1 %v4153_v49  ;;  %4401 = vmatprep.subr.bf16.mxu0 %v4156_v51  ;;  %v4185_v49 = vunpack.c.l.s8.bf16 %v4033_v9  ;;  %v4188_v51 = vunpack.c.h.s8.bf16 %v4032_v42 }
 0x53c   :  { %4565 = vmatprep.subr.bf16.mxu1 %v4158_v10  ;;  %v3918_v10 = vmul.f32 %v3881_v59, %v6110_v44 }
 0x53e   :  { %4402 = vmatpush1.bf16.msra.mxu0 %v4155_v56  ;;  %v4036_v56 = vld [vmem:[#allocation7 + $0xe8] sm:$0xff]  ;;  %v3967_v44 = vadd.f32 %v3930_v52, %v3918_v10 }
 0x53f   :  { %4566 = vmatpush1.bf16.msra.mxu1 %v4157_v34  ;;  %4403 = vmatprep.subr.bf16.mxu0 %v4160_v23  ;;  %v4038_v34 = vld [vmem:[#allocation7 + $0xf8] sm:$0xff]  ;;  %v3921_v23 = vmul.f32 %v3893_v2, %v6116_v33 }
 0x540   :  { %4567 = vmatprep.subr.bf16.mxu1 %v4162_v60  ;;  %v4187_v60 = vunpack.c.h.s8.bf16 %v4031_v45  ;;  %vm3975_vm2 = vcmp.gt.f32.partialorder %v3967_v44, 0.0  ;;  %v4045_v45 = vld [vmem:[#allocation7 + $0x130] sm:$0xff] }
 0x541   :  { %v3970_v1 = vadd.f32 %v3942_v55, %v3921_v23  ;;  %v4213_v10 = vunpack.c.h.s8.bf16 %v4045_v45 }
 0x542   :  { %4404 = vmatpush1.bf16.msra.mxu0 %v4159_v54  ;;  %v4192_v54 = vunpack.c.l.s8.bf16 %v4036_v56 }
 0x543   :  { %4568 = vmatpush1.bf16.msra.mxu1 %v4161_v32  ;;  %4405 = vmatprep.subr.bf16.mxu0 %v4164_v37  ;;  %v4035_v32 = vld [vmem:[#allocation7 + $0xe0] sm:$0xff]  ;;  %v4194_v37 = vunpack.c.l.s8.bf16 %v4038_v34  ;;  %v3986_v17 = vmul.f32 0.01, %v3970_v1  ;;  %vm3978_vm3 = vcmp.gt.f32.partialorder %v3970_v1, 0.0 }
 0x544   :  { %4569 = vmatprep.subr.bf16.mxu1 %v4166_v63  ;;  %v4037_v63 = vld [vmem:[#allocation7 + $0xf0] sm:$0xff]  ;;  %v4191_v3 = vunpack.c.l.s8.bf16 %v4035_v32 }
 0x545   :  { %v4193_v33 = vunpack.c.l.s8.bf16 %v4037_v63 }
 0x546   :  { %4406 = vmatpush1.bf16.msra.mxu0 %v4163_v18  ;;  %v4196_v18 = vunpack.c.h.s8.bf16 %v4036_v56 }
 0x547   :  { %4570 = vmatpush1.bf16.msra.mxu1 %v4165_v4  ;;  %4407 = vmatprep.subr.bf16.mxu0 %v4168_v6  ;;  %v3983_v4 = vmul.f32 0.01, %v3967_v44  ;;  %v4198_v6 = vunpack.c.h.s8.bf16 %v4038_v34  ;;  %v4049_v34 = vld [vmem:[#allocation7 + $0x150] sm:$0xff] }
 0x548   :  { %4571 = vmatprep.subr.bf16.mxu1 %v4170_v16  ;;  %v4042_v16 = vld [vmem:[#allocation7 + $0x118] sm:$0xff]  ;;  %v4217_v55 = vunpack.c.l.s8.bf16 %v4049_v34 }
 0x549   :  { %v3991_v20 = vsel %vm3975_vm2, %v3967_v44, %v3983_v4  ;;  %v4202_v29 = vunpack.c.l.s8.bf16 %v4042_v16 }
 0x54a   :  { %4408 = vmatpush1.bf16.msra.mxu0 %v4167_v24  ;;  %v4195_v24 = vunpack.c.h.s8.bf16 %v4035_v32  ;;  %v3999_v40 = vpack.c.bf16 %v3991_v20, %v3991_v20  ;;  %v4054_v32 = vld [vmem:[#allocation7 + $0x178] sm:$0xff] }
 0x54b   :  { %4572 = vmatpush1.bf16.msra.mxu1 %v4169_v36  ;;  %4409 = vmatprep.subr.bf16.mxu0 %v4172_v21  ;;  %v4197_v36 = vunpack.c.h.s8.bf16 %v4037_v63  ;;  %v4200_v21 = vunpack.c.l.s8.bf16 %v4040_v8  ;;  %v4230_v8 = vunpack.c.h.s8.bf16 %v4054_v32 }
 0x54c   :  { %4573 = vmatprep.subr.bf16.mxu1 %v4174_v22  ;;  %v4039_v22 = vld [vmem:[#allocation7 + $0x100] sm:$0xff] }
 0x54d   :  { %v4203_v42 = vunpack.c.h.s8.bf16 %v4039_v22 }
 0x54e   :  { %4410 = vmatpush1.bf16.msra.mxu0 %v4171_v27  ;;  %v4041_v27 = vld [vmem:[#allocation7 + $0x110] sm:$0xff] }
 0x54f   :  { %4574 = vmatpush1.bf16.msra.mxu1 %v4173_v30  ;;  %4411 = vmatprep.subr.bf16.mxu0 %v4176_v15  ;;  %v4199_v30 = vunpack.c.l.s8.bf16 %v4039_v22  ;;  %v3994_v15 = vsel %vm3978_vm3, %v3970_v1, %v3986_v17  ;;  %v4205_v19 = vunpack.c.h.s8.bf16 %v4041_v27  ;;  %v4051_v1 = vld [vmem:[#allocation7 + $0x160] sm:$0xff]  ;;  %v4058_v17 = vld [vmem:[#allocation7 + $0x198] sm:$0xff] }
 0x550   :  { %4575 = vmatprep.subr.bf16.mxu1 %v4178_v35  ;;  %v4201_v35 = vunpack.c.l.s8.bf16 %v4041_v27  ;;  %v4055_v22 = vld [vmem:[#allocation7 + $0x180] sm:$0xff]  ;;  %v4234_v20 = vunpack.c.l.s8.bf16 %v4058_v17 }
 0x551   :  { %v4231_v27 = vunpack.c.l.s8.bf16 %v4055_v22 }
 0x552   :  { %4412 = vmatpush1.bf16.msra.mxu0 %v4175_v11  ;;  %v4044_v11 = vld [vmem:[#allocation7 + $0x128] sm:$0xff] }
 0x553   :  { %4576 = vmatpush1.bf16.msra.mxu1 %v4177_v46  ;;  %4413 = vmatprep.subr.bf16.mxu0 %v4180_v39  ;;  %v4002_v46 = vpack.c.bf16 %v3994_v15, %v3994_v15  ;;  %v4206_v39 = vunpack.c.h.s8.bf16 %v4042_v16  ;;  %v4212_v9 = vunpack.c.h.s8.bf16 %v4044_v11  ;;  %v4056_v16 = vld [vmem:[#allocation7 + $0x188] sm:$0xff] }
 0x554   :  { %4577 = vmatprep.subr.bf16.mxu1 %v4182_v5  ;;  %v4046_v5 = vld [vmem:[#allocation7 + $0x138] sm:$0xff]  ;;  %v4236_v15 = vunpack.c.h.s8.bf16 %v4056_v16 }
 0x555   :  { %v4214_v2 = vunpack.c.h.s8.bf16 %v4046_v5 }
 0x556   :  { %4414 = vmatpush1.bf16.msra.mxu0 %v4179_v28  ;;  %v4208_v28 = vunpack.c.l.s8.bf16 %v4044_v11  ;;  %v4235_v11 = vunpack.c.h.s8.bf16 %v4055_v22 }
 0x557   :  { %4578 = vmatpush1.bf16.msra.mxu1 %v4181_v58  ;;  %4415 = vmatprep.subr.bf16.mxu0 %v4184_v48  ;;  %v4043_v58 = vld [vmem:[#allocation7 + $0x120] sm:$0xff]  ;;  %v4210_v48 = vunpack.c.l.s8.bf16 %v4046_v5 }
 0x558   :  { %4579 = vmatprep.subr.bf16.mxu1 %v4186_v13  ;;  %v4207_v59 = vunpack.c.l.s8.bf16 %v4043_v58  ;;  %v4209_v13 = vunpack.c.l.s8.bf16 %v4045_v45  ;;  %v4059_v5 = vld [vmem:[#allocation7 + $0x1a0] sm:$0xff] }
 0x55a   :  { %4416 = vmatpush1.bf16.msra.mxu0 %v4183_v47  ;;  %v4048_v47 = vld [vmem:[#allocation7 + $0x148] sm:$0xff] }
 0x55b   :  { %4580 = vmatpush1.bf16.msra.mxu1 %v4185_v49  ;;  %4417 = vmatprep.subr.bf16.mxu0 %v4188_v51  ;;  %v4050_v49 = vld [vmem:[#allocation7 + $0x158] sm:$0xff]  ;;  %v4211_v51 = vunpack.c.h.s8.bf16 %v4043_v58  ;;  %v4216_v52 = vunpack.c.l.s8.bf16 %v4048_v47 }
 0x55c   :  { %4581 = vmatprep.subr.bf16.mxu1 %v4190_v7  ;;  %v4047_v7 = vld [vmem:[#allocation7 + $0x140] sm:$0xff]  ;;  %v4218_v56 = vunpack.c.l.s8.bf16 %v4050_v49 }
 0x55d   :  { %v4215_v23 = vunpack.c.l.s8.bf16 %v4047_v7  ;;  %v4219_v44 = vunpack.c.h.s8.bf16 %v4047_v7 }
 0x55e   :  { %4418 = vmatpush1.bf16.msra.mxu0 %v4187_v60  ;;  %v4220_v60 = vunpack.c.h.s8.bf16 %v4048_v47 }
 0x55f   :  { %4582 = vmatpush1.bf16.msra.mxu1 %v4189_v43  ;;  %4419 = vmatprep.subr.bf16.mxu0 %v4192_v54  ;;  %v4222_v43 = vunpack.c.h.s8.bf16 %v4050_v49  ;;  %v4052_v54 = vld [vmem:[#allocation7 + $0x168] sm:$0xff]  ;;  %v4063_v49 = vld [vmem:[#allocation7 + $0x1c0] sm:$0xff] }
 0x560   :  { %4583 = vmatprep.subr.bf16.mxu1 %v4194_v37  ;;  %v4221_v37 = vunpack.c.h.s8.bf16 %v4049_v34  ;;  %v4224_v63 = vunpack.c.l.s8.bf16 %v4052_v54  ;;  %v4247_v7 = vunpack.c.l.s8.bf16 %v4063_v49 }
 0x562   :  { %4420 = vmatpush1.bf16.msra.mxu0 %v4191_v3  ;;  %v4226_v3 = vunpack.c.l.s8.bf16 %v4054_v32 }
 0x563   :  { %4584 = vmatpush1.bf16.msra.mxu1 %v4193_v33  ;;  %4421 = vmatprep.subr.bf16.mxu0 %v4196_v18  ;;  %v4053_v33 = vld [vmem:[#allocation7 + $0x170] sm:$0xff]  ;;  %v4223_v18 = vunpack.c.l.s8.bf16 %v4051_v1 }
 0x564   :  { %4585 = vmatprep.subr.bf16.mxu1 %v4198_v6  ;;  %v4225_v4 = vunpack.c.l.s8.bf16 %v4053_v33  ;;  %v4228_v6 = vunpack.c.h.s8.bf16 %v4052_v54  ;;  %v4070_v54 = vld [vmem:[#allocation7 + $0x1f8] sm:$0xff] }
 0x566   :  { %4422 = vmatpush1.bf16.msra.mxu0 %v4195_v24  ;;  %v4227_v24 = vunpack.c.h.s8.bf16 %v4051_v1  ;;  %v4258_v1 = vunpack.c.l.s8.bf16 %v4070_v54 }
 0x567   :  { %4586 = vmatpush1.bf16.msra.mxu1 %v4197_v36  ;;  %4432 = vmatprep.subr.bf16.mxu0 %v4200_v21  ;;  %v4229_v36 = vunpack.c.h.s8.bf16 %v4053_v33  ;;  %v4232_v21 = vunpack.c.l.s8.bf16 %v4056_v16 }
 0x568   :  { %4596 = vmatprep.subr.bf16.mxu1 %v4202_v29  ;;  %v4057_v29 = vld [vmem:[#allocation7 + $0x190] sm:$0xff] }
 0x569   :  { %4424 = vmatmul.mubr.bf16.vlgmr.msra.gmra.mrb[8].mxu0 %v3999_v40 }
 0x56a   :  { %4588 = vmatmul.mubr.bf16.vlgmr.msra.gmra.mrb[24].mxu1 %v3999_v40  ;;  %4433 = vmatpush1.bf16.msra.mxu0 %v4199_v30  ;;  %v4233_v30 = vunpack.c.l.s8.bf16 %v4057_v29  ;;  %v4238_v40 = vunpack.c.h.s8.bf16 %v4058_v17 }
 0x56b   :  { %4464 = vmatprep.mubr.bf16.mxu0 %v4002_v46  ;;  %4597 = vmatpush1.bf16.msra.mxu1 %v4201_v35  ;;  %v4060_v35 = vld [vmem:[#allocation7 + $0x1a8] sm:$0xff] }
 0x56c   :  { %4628 = vmatprep.mubr.bf16.mxu1 %v4002_v46  ;;  %4434 = vmatprep.subr.bf16.mxu0 %v4204_v38  ;;  %v4062_v38 = vld [vmem:[#allocation7 + $0x1b8] sm:$0xff]  ;;  %v4237_v46 = vunpack.c.h.s8.bf16 %v4057_v29 }
 0x56d   :  { %4598 = vmatprep.subr.bf16.mxu1 %v4206_v39  ;;  %v4240_v39 = vunpack.c.l.s8.bf16 %v4060_v35  ;;  %v4246_v45 = vunpack.c.h.s8.bf16 %v4062_v38 }
 0x56e   :  { %4435 = vmatpush1.bf16.msra.mxu0 %v4203_v42  ;;  %v4242_v42 = vunpack.c.l.s8.bf16 %v4062_v38  ;;  %v4078_v38 = vld [vmem:[#allocation7 + $0x238] sm:$0xff] }
 0x56f   :  { %4599 = vmatpush1.bf16.msra.mxu1 %v4205_v19  ;;  %4436 = vmatprep.subr.bf16.mxu0 %v4208_v28  ;;  %v4061_v19 = vld [vmem:[#allocation7 + $0x1b0] sm:$0xff]  ;;  %v4239_v28 = vunpack.c.l.s8.bf16 %v4059_v5 }
 0x570   :  { %4600 = vmatprep.subr.bf16.mxu1 %v4210_v48  ;;  %v4241_v58 = vunpack.c.l.s8.bf16 %v4061_v19  ;;  %v4244_v48 = vunpack.c.h.s8.bf16 %v4060_v35  ;;  %v4076_v35 = vld [vmem:[#allocation7 + $0x228] sm:$0xff] }
 0x572   :  { %4437 = vmatpush1.bf16.msra.mxu0 %v4207_v59  ;;  %v4064_v59 = vld [vmem:[#allocation7 + $0x1c8] sm:$0xff] }
 0x573   :  { %4601 = vmatpush1.bf16.msra.mxu1 %v4209_v13  ;;  %4438 = vmatprep.subr.bf16.mxu0 %v4212_v9  ;;  %v4066_v13 = vld [vmem:[#allocation7 + $0x1d8] sm:$0xff]  ;;  %v4243_v9 = vunpack.c.h.s8.bf16 %v4059_v5  ;;  %v4248_v47 = vunpack.c.l.s8.bf16 %v4064_v59  ;;  %v4252_v34 = vunpack.c.h.s8.bf16 %v4064_v59  ;;  %v4075_v5 = vld [vmem:[#allocation7 + $0x220] sm:$0xff]  ;;  %v4080_v59 = vld [vmem:[#allocation7 + $0x248] sm:$0xff] }
 0x574   :  { %4602 = vmatprep.subr.bf16.mxu1 %v4214_v2  ;;  %v4245_v2 = vunpack.c.h.s8.bf16 %v4061_v19  ;;  %v4077_v19 = vld [vmem:[#allocation7 + $0x230] sm:$0xff] }
 0x576   :  { %4439 = vmatpush1.bf16.msra.mxu0 %v4211_v51  ;;  %v3889_v51 = vrot.slane %v6134_v41, %v5937_v61  ;;  %v4251_v41 = vunpack.c.h.s8.bf16 %v4063_v49  ;;  %v4079_v49 = vld [vmem:[#allocation7 + $0x240] sm:$0xff] }
 0x577   :  { %4603 = vmatpush1.bf16.msra.mxu1 %v4213_v10  ;;  %4440 = vmatprep.subr.bf16.mxu0 %v4216_v52  ;;  %v4250_v10 = vunpack.c.l.s8.bf16 %v4066_v13  ;;  %v4065_v52 = vld [vmem:[#allocation7 + $0x1d0] sm:$0xff] }
 0x578   :  { %4604 = vmatprep.subr.bf16.mxu1 %v4218_v56  ;;  %v4249_v56 = vunpack.c.l.s8.bf16 %v4065_v52  ;;  %v4253_v32 = vunpack.c.h.s8.bf16 %v4065_v52  ;;  %v4279_v52 = vunpack.c.l.s8.bf16 %v4079_v49 }
 0x57a   :  { %4441 = vmatpush1.bf16.msra.mxu0 %v4215_v23  ;;  %v3920_v23 = vmul.f32 %v3889_v51, %v6112_v31 }
 0x57b   :  { %4605 = vmatpush1.bf16.msra.mxu1 %v4217_v55  ;;  %4442 = vmatprep.subr.bf16.mxu0 %v4220_v60  ;;  %v3938_v55 = vrot.slane %v6138_v53, %v5937_v61  ;;  %v4254_v60 = vunpack.c.h.s8.bf16 %v4066_v13  ;;  %v4082_v13 = vld [vmem:[#allocation7 + $0x258] sm:$0xff] }
 0x57c   :  { %4606 = vmatprep.subr.bf16.mxu1 %v4222_v43  ;;  %v4068_v43 = vld [vmem:[#allocation7 + $0x1e8] sm:$0xff]  ;;  %v4282_v51 = vunpack.c.l.s8.bf16 %v4082_v13 }
 0x57d   :  { %v4260_v33 = vunpack.c.h.s8.bf16 %v4068_v43 }
 0x57e   :  { %4443 = vmatpush1.bf16.msra.mxu0 %v4219_v44  ;;  %v4256_v44 = vunpack.c.l.s8.bf16 %v4068_v43 }
 0x57f   :  { %4607 = vmatpush1.bf16.msra.mxu1 %v4221_v37  ;;  %4444 = vmatprep.subr.bf16.mxu0 %v4224_v63  ;;  %v4067_v37 = vld [vmem:[#allocation7 + $0x1e0] sm:$0xff]  ;;  %v3969_v63 = vadd.f32 %v3938_v55, %v3920_v23  ;;  %v4084_v23 = vld [vmem:[#allocation7 + $0x268] sm:$0xff]  ;;  %v4086_v55 = vld [vmem:[#allocation7 + $0x278] sm:$0xff] }
 0x580   :  { %4608 = vmatprep.subr.bf16.mxu1 %v4226_v3  ;;  %v4069_v3 = vld [vmem:[#allocation7 + $0x1f0] sm:$0xff]  ;;  %v4255_v31 = vunpack.c.l.s8.bf16 %v4067_v37  ;;  %v4259_v16 = vunpack.c.h.s8.bf16 %v4067_v37 }
 0x581   :  { %v4257_v53 = vunpack.c.l.s8.bf16 %v4069_v3  ;;  %vm3977_vm4 = vcmp.gt.f32.partialorder %v3969_v63, 0.0  ;;  %v4261_v17 = vunpack.c.h.s8.bf16 %v4069_v3  ;;  %v4294_v3 = vunpack.c.h.s8.bf16 %v4086_v55 }
 0x582   :  { %4445 = vmatpush1.bf16.msra.mxu0 %v4223_v18  ;;  %v3985_v18 = vmul.f32 0.01, %v3969_v63 }
 0x583   :  { %4609 = vmatpush1.bf16.msra.mxu1 %v4225_v4  ;;  %4446 = vmatprep.subr.bf16.mxu0 %v4228_v6  ;;  %v4262_v4 = vunpack.c.h.s8.bf16 %v4070_v54  ;;  %v4072_v6 = vld [vmem:[#allocation7 + $0x208] sm:$0xff]  ;;  %v4288_v54 = vunpack.c.l.s8.bf16 %v4084_v23 }
 0x584   :  { %4610 = vmatprep.subr.bf16.mxu1 %v4230_v8  ;;  %v4074_v8 = vld [vmem:[#allocation7 + $0x218] sm:$0xff] }
 0x585   :  { %v4266_v22 = vunpack.c.l.s8.bf16 %v4074_v8 }
 0x586   :  { %4447 = vmatpush1.bf16.msra.mxu0 %v4227_v24  ;;  %v4264_v24 = vunpack.c.l.s8.bf16 %v4072_v6 }
 0x587   :  { %4611 = vmatpush1.bf16.msra.mxu1 %v4229_v36  ;;  %4448 = vmatprep.subr.bf16.mxu0 %v4232_v21  ;;  %v4071_v36 = vld [vmem:[#allocation7 + $0x200] sm:$0xff]  ;;  %v3993_v21 = vsel %vm3977_vm4, %v3969_v63, %v3985_v18 }
 0x588   :  { %4612 = vmatprep.subr.bf16.mxu1 %v4234_v20  ;;  %v4073_v20 = vld [vmem:[#allocation7 + $0x210] sm:$0xff]  ;;  %v4263_v29 = vunpack.c.l.s8.bf16 %v4071_v36 }
 0x58a   :  { %4449 = vmatpush1.bf16.msra.mxu0 %v4231_v27  ;;  %v4001_v27 = vpack.c.bf16 %v3993_v21, %v3993_v21 }
 0x58b   :  { %4613 = vmatpush1.bf16.msra.mxu1 %v4233_v30  ;;  %4450 = vmatprep.subr.bf16.mxu0 %v4236_v15  ;;  %v4265_v30 = vunpack.c.l.s8.bf16 %v4073_v20  ;;  %v4268_v15 = vunpack.c.h.s8.bf16 %v4072_v6  ;;  %v4087_v6 = vld [vmem:[#allocation7 + $0x280] sm:$0xff] }
 0x58c   :  { %4614 = vmatprep.subr.bf16.mxu1 %v4238_v40  ;;  %v4270_v40 = vunpack.c.h.s8.bf16 %v4074_v8 }
 0x58e   :  { %4451 = vmatpush1.bf16.msra.mxu0 %v4235_v11  ;;  %v4267_v11 = vunpack.c.h.s8.bf16 %v4071_v36 }
 0x58f   :  { %4615 = vmatpush1.bf16.msra.mxu1 %v4237_v46  ;;  %4452 = vmatprep.subr.bf16.mxu0 %v4240_v39  ;;  %v4269_v46 = vunpack.c.h.s8.bf16 %v4073_v20  ;;  %v4272_v39 = vunpack.c.l.s8.bf16 %v4076_v35  ;;  %v4094_v20 = vld [vmem:[#allocation7 + $0x2b8] sm:$0xff] }
 0x590   :  { %4616 = vmatprep.subr.bf16.mxu1 %v4242_v42  ;;  %v4274_v42 = vunpack.c.l.s8.bf16 %v4078_v38 }
 0x592   :  { %4453 = vmatpush1.bf16.msra.mxu0 %v4239_v28  ;;  %v4271_v28 = vunpack.c.l.s8.bf16 %v4075_v5 }
 0x593   :  { %4617 = vmatpush1.bf16.msra.mxu1 %v4241_v58  ;;  %4454 = vmatprep.subr.bf16.mxu0 %v4244_v48  ;;  %v4273_v58 = vunpack.c.l.s8.bf16 %v4077_v19  ;;  %v4276_v48 = vunpack.c.h.s8.bf16 %v4076_v35  ;;  %v4093_v35 = vld [vmem:[#allocation7 + $0x2b0] sm:$0xff] }
 0x594   :  { %4618 = vmatprep.subr.bf16.mxu1 %v4246_v45  ;;  %v4278_v45 = vunpack.c.h.s8.bf16 %v4078_v38 }
 0x596   :  { %4455 = vmatpush1.bf16.msra.mxu0 %v4243_v9  ;;  %v4275_v9 = vunpack.c.h.s8.bf16 %v4075_v5  ;;  %v4096_v5 = vld [vmem:[#allocation7 + $0x2c8] sm:$0xff] }
 0x597   :  { %4619 = vmatpush1.bf16.msra.mxu1 %v4245_v2  ;;  %4456 = vmatprep.subr.bf16.mxu0 %v4248_v47  ;;  %v4277_v2 = vunpack.c.h.s8.bf16 %v4077_v19  ;;  %v4280_v47 = vunpack.c.l.s8.bf16 %v4080_v59 }
 0x598   :  { %4620 = vmatprep.subr.bf16.mxu1 %v4250_v10  ;;  %v4081_v10 = vld [vmem:[#allocation7 + $0x250] sm:$0xff] }
 0x599   :  { %v4285_v43 = vunpack.c.h.s8.bf16 %v4081_v10 }
 0x59a   :  { %4457 = vmatpush1.bf16.msra.mxu0 %v4247_v7  ;;  %v4281_v7 = vunpack.c.l.s8.bf16 %v4081_v10 }
 0x59b   :  { %4621 = vmatpush1.bf16.msra.mxu1 %v4249_v56  ;;  %4458 = vmatprep.subr.bf16.mxu0 %v4252_v34  ;;  %v4284_v56 = vunpack.c.h.s8.bf16 %v4080_v59  ;;  %v4286_v34 = vunpack.c.h.s8.bf16 %v4082_v13  ;;  %v4097_v59 = vld [vmem:[#allocation7 + $0x2d0] sm:$0xff] }
 0x59c   :  { %4622 = vmatprep.subr.bf16.mxu1 %v4254_v60  ;;  %v4283_v60 = vunpack.c.h.s8.bf16 %v4079_v49  ;;  %v4100_v49 = vld [vmem:[#allocation7 + $0x2e8] sm:$0xff] }
 0x59e   :  { %4459 = vmatpush1.bf16.msra.mxu0 %v4251_v41  ;;  %v4083_v41 = vld [vmem:[#allocation7 + $0x260] sm:$0xff] }
 0x59f   :  { %4623 = vmatpush1.bf16.msra.mxu1 %v4253_v32  ;;  %4460 = vmatprep.subr.bf16.mxu0 %v4256_v44  ;;  %v4290_v32 = vunpack.c.l.s8.bf16 %v4086_v55  ;;  %v4085_v44 = vld [vmem:[#allocation7 + $0x270] sm:$0xff]  ;;  %v4287_v37 = vunpack.c.l.s8.bf16 %v4083_v41 }
 0x5a0   :  { %4624 = vmatprep.subr.bf16.mxu1 %v4258_v1  ;;  %v4289_v63 = vunpack.c.l.s8.bf16 %v4085_v44  ;;  %v4292_v1 = vunpack.c.h.s8.bf16 %v4084_v23  ;;  %v4293_v18 = vunpack.c.h.s8.bf16 %v4085_v44  ;;  %v4101_v23 = vld [vmem:[#allocation7 + $0x2f0] sm:$0xff] }
 0x5a2   :  { %4461 = vmatpush1.bf16.msra.mxu0 %v4255_v31  ;;  %v4088_v31 = vld [vmem:[#allocation7 + $0x288] sm:$0xff] }
 0x5a3   :  { %4625 = vmatpush1.bf16.msra.mxu1 %v4257_v53  ;;  %4462 = vmatprep.subr.bf16.mxu0 %v4260_v33  ;;  %v4090_v53 = vld [vmem:[#allocation7 + $0x298] sm:$0xff]  ;;  %v4291_v33 = vunpack.c.h.s8.bf16 %v4083_v41  ;;  %v4300_v36 = vunpack.c.h.s8.bf16 %v4088_v31  ;;  %v6160_v41 = vld [vmem:[#allocation7 + $0x308] sm:$0xff] }
 0x5a4   :  { %4626 = vmatprep.subr.bf16.mxu1 %v4262_v4  ;;  %v4296_v4 = vunpack.c.l.s8.bf16 %v4088_v31  ;;  %v4298_v8 = vunpack.c.l.s8.bf16 %v4090_v53  ;;  %v4302_v21 = vunpack.c.h.s8.bf16 %v4090_v53 }
 0x5a6   :  { %4463 = vmatpush1.bf16.msra.mxu0 %v4259_v16  ;;  %v4089_v16 = vld [vmem:[#allocation7 + $0x290] sm:$0xff] }
 0x5a7   :  { %4627 = vmatpush1.bf16.msra.mxu1 %v4261_v17  ;;  %4473 = vmatprep.subr.bf16.mxu0 %v4264_v24  ;;  %v4295_v17 = vunpack.c.l.s8.bf16 %v4087_v6  ;;  %v4297_v24 = vunpack.c.l.s8.bf16 %v4089_v16 }
 0x5a8   :  { %4637 = vmatprep.subr.bf16.mxu1 %v4266_v22  ;;  %v4092_v22 = vld [vmem:[#allocation7 + $0x2a8] sm:$0xff] }
 0x5a9   :  { %4465 = vmatmul.mubr.bf16.vlgmr.msra.gmra.mrb[8].mxu0 %v4001_v27 }
 0x5aa   :  { %4629 = vmatmul.mubr.bf16.vlgmr.msra.gmra.mrb[24].mxu1 %v4001_v27  ;;  %4474 = vmatpush1.bf16.msra.mxu0 %v4263_v29  ;;  %v4299_v29 = vunpack.c.h.s8.bf16 %v4087_v6  ;;  %v4301_v27 = vunpack.c.h.s8.bf16 %v4089_v16 }
 0x5ab   :  { %4638 = vmatpush1.bf16.msra.mxu1 %v4265_v30  ;;  %4475 = vmatprep.subr.bf16.mxu0 %v4268_v15  ;;  %v4304_v30 = vunpack.c.l.s8.bf16 %v4092_v22  ;;  %v4091_v15 = vld [vmem:[#allocation7 + $0x2a0] sm:$0xff] }
 0x5ac   :  { %4639 = vmatprep.subr.bf16.mxu1 %v4270_v40  ;;  %v4306_v40 = vunpack.c.l.s8.bf16 %v4094_v20  ;;  %v4303_v38 = vunpack.c.l.s8.bf16 %v4091_v15  ;;  %v4307_v19 = vunpack.c.h.s8.bf16 %v4091_v15 }
 0x5ae   :  { %4476 = vmatpush1.bf16.msra.mxu0 %v4267_v11  ;;  %v4305_v11 = vunpack.c.l.s8.bf16 %v4093_v35 }
 0x5af   :  { %4640 = vmatpush1.bf16.msra.mxu1 %v4269_v46  ;;  %4477 = vmatprep.subr.bf16.mxu0 %v4272_v39  ;;  %v4308_v46 = vunpack.c.h.s8.bf16 %v4092_v22  ;;  %v4310_v39 = vunpack.c.h.s8.bf16 %v4094_v20 }
 0x5b0   :  { %4641 = vmatprep.subr.bf16.mxu1 %v4274_v42  ;;  %v4098_v42 = vld [vmem:[#allocation7 + $0x2d8] sm:$0xff] }
 0x5b2   :  { %4478 = vmatpush1.bf16.msra.mxu0 %v4271_v28  ;;  %v4309_v28 = vunpack.c.h.s8.bf16 %v4093_v35 }
 0x5b3   :  { %4642 = vmatpush1.bf16.msra.mxu1 %v4273_v58  ;;  %4479 = vmatprep.subr.bf16.mxu0 %v4276_v48  ;;  %v4312_v58 = vunpack.c.l.s8.bf16 %v4096_v5  ;;  %v4095_v48 = vld [vmem:[#allocation7 + $0x2c0] sm:$0xff] }
 0x5b4   :  { %4643 = vmatprep.subr.bf16.mxu1 %v4278_v45  ;;  %v4314_v45 = vunpack.c.l.s8.bf16 %v4098_v42  ;;  %v4311_v13 = vunpack.c.l.s8.bf16 %v4095_v48  ;;  %v4315_v10 = vunpack.c.h.s8.bf16 %v4095_v48 }
 0x5b6   :  { %4480 = vmatpush1.bf16.msra.mxu0 %v4275_v9  ;;  %v4313_v9 = vunpack.c.l.s8.bf16 %v4097_v59 }
 0x5b7   :  { %4644 = vmatpush1.bf16.msra.mxu1 %v4277_v2  ;;  %4481 = vmatprep.subr.bf16.mxu0 %v4280_v47  ;;  %v4316_v2 = vunpack.c.h.s8.bf16 %v4096_v5  ;;  %v4318_v47 = vunpack.c.h.s8.bf16 %v4098_v42 }
 0x5b8   :  { %4645 = vmatprep.subr.bf16.mxu1 %v4282_v51  ;;  %v4102_v51 = vld [vmem:[#allocation7 + $0x2f8] sm:$0xff] }
 0x5ba   :  { %4482 = vmatpush1.bf16.msra.mxu0 %v4279_v52  ;;  %v4317_v52 = vunpack.c.h.s8.bf16 %v4097_v59 }
 0x5bb   :  { %4646 = vmatpush1.bf16.msra.mxu1 %v4281_v7  ;;  %4483 = vmatprep.subr.bf16.mxu0 %v4284_v56  ;;  %v4320_v7 = vunpack.c.l.s8.bf16 %v4100_v49  ;;  %v4099_v56 = vld [vmem:[#allocation7 + $0x2e0] sm:$0xff] }
 0x5bc   :  { %4647 = vmatprep.subr.bf16.mxu1 %v4286_v34  ;;  %v4322_v34 = vunpack.c.l.s8.bf16 %v4102_v51  ;;  %v4319_v55 = vunpack.c.l.s8.bf16 %v4099_v56  ;;  %v4323_v44 = vunpack.c.h.s8.bf16 %v4099_v56 }
 0x5be   :  { %4484 = vmatpush1.bf16.msra.mxu0 %v4283_v60  ;;  %v4321_v60 = vunpack.c.l.s8.bf16 %v4101_v23 }
 0x5bf   :  { %4648 = vmatpush1.bf16.msra.mxu1 %v4285_v43  ;;  %4485 = vmatprep.subr.bf16.mxu0 %v4288_v54  ;;  %v4324_v43 = vunpack.c.h.s8.bf16 %v4100_v49  ;;  %v4326_v54 = vunpack.c.h.s8.bf16 %v4102_v51 }
 0x5c0   :  { %4649 = vmatprep.subr.bf16.mxu1 %v4290_v32  ;;  %v6162_v32 = vld [vmem:[#allocation7 + $0x318] sm:$0xff] }
 0x5c1   :  { %v4334_v59 = vunpack.c.h.s8.bf16 %v6162_v32 }
 0x5c2   :  { %4486 = vmatpush1.bf16.msra.mxu0 %v4287_v37  ;;  %v4325_v37 = vunpack.c.h.s8.bf16 %v4101_v23 }
 0x5c3   :  { %4650 = vmatpush1.bf16.msra.mxu1 %v4289_v63  ;;  %4487 = vmatprep.subr.bf16.mxu0 %v4292_v1  ;;  %v4328_v63 = vunpack.c.l.s8.bf16 %v6160_v41  ;;  %v4330_v1 = vunpack.c.l.s8.bf16 %v6162_v32 }
 0x5c4   :  { %4651 = vmatprep.subr.bf16.mxu1 %v4294_v3  ;;  %v6166_v3 = vld [vmem:[#allocation12 + $0x20] ss:$2 sm:$0xff] }
 0x5c5   :  { %v3897_v31 = vrot.slane %v6166_v3, %v5979_v26  ;;  %v3901_v53 = vrot.slane %v6166_v3, %v5940_v62 }
 0x5c6   :  { %4488 = vmatpush1.bf16.msra.mxu0 %v4291_v33  ;;  %v6172_v33 = vld [vmem:[#allocation12 + $0x21] ss:$2 sm:$0xff] }
 0x5c7   :  { %4652 = vmatpush1.bf16.msra.mxu1 %v4293_v18  ;;  %4489 = vmatprep.subr.bf16.mxu0 %v4296_v4  ;;  %v3946_v18 = vrot.slane %v6172_v33, %v5979_v26  ;;  %v3909_v4 = vrot.slane %v6166_v3, %v5999_v57 }
 0x5c8   :  { %4653 = vmatprep.subr.bf16.mxu1 %v4298_v8  ;;  %v3950_v8 = vrot.slane %v6172_v33, %v5940_v62 }
 0x5ca   :  { %4490 = vmatpush1.bf16.msra.mxu0 %v4295_v17 }
 0x5cb   :  { %4654 = vmatpush1.bf16.msra.mxu1 %v4297_v24  ;;  %4491 = vmatprep.subr.bf16.mxu0 %v4300_v36  ;;  %v3958_v36 = vrot.slane %v6172_v33, %v5999_v57 }
 0x5cc   :  { %4655 = vmatprep.subr.bf16.mxu1 %v4302_v21 }
 0x5ce   :  { %4492 = vmatpush1.bf16.msra.mxu0 %v4299_v29 }
 0x5cf   :  { %4656 = vmatpush1.bf16.msra.mxu1 %v4301_v27  ;;  %4493 = vmatprep.subr.bf16.mxu0 %v4304_v30 }
 0x5d0   :  { %4657 = vmatprep.subr.bf16.mxu1 %v4306_v40 }
 0x5d2   :  { %4494 = vmatpush1.bf16.msra.mxu0 %v4303_v38 }
 0x5d3   :  { %4658 = vmatpush1.bf16.msra.mxu1 %v4305_v11  ;;  %4495 = vmatprep.subr.bf16.mxu0 %v4308_v46  ;;  %v4103_v11 = vld [vmem:[#allocation7 + $0x300] sm:$0xff]  ;;  %v4105_v46 = vld [vmem:[#allocation7 + $0x310] sm:$0xff] }
 0x5d4   :  { %4659 = vmatprep.subr.bf16.mxu1 %v4310_v39  ;;  %v4333_v49 = vunpack.c.h.s8.bf16 %v4105_v46 }
 0x5d6   :  { %4496 = vmatpush1.bf16.msra.mxu0 %v4307_v19  ;;  %v4327_v19 = vunpack.c.l.s8.bf16 %v4103_v11 }
 0x5d7   :  { %4660 = vmatpush1.bf16.msra.mxu1 %v4309_v28  ;;  %4497 = vmatprep.subr.bf16.mxu0 %v4312_v58  ;;  %v4329_v28 = vunpack.c.l.s8.bf16 %v4105_v46  ;;  %v4121_v46 = vld [vmem:[#allocation7 + $0x390] sm:$0xff] }
 0x5d8   :  { %4661 = vmatprep.subr.bf16.mxu1 %v4314_v45  ;;  %v4332_v45 = vunpack.c.h.s8.bf16 %v6160_v41 }
 0x5da   :  { %4498 = vmatpush1.bf16.msra.mxu0 %v4311_v13  ;;  %v4108_v13 = vld [vmem:[#allocation7 + $0x328] sm:$0xff] }
 0x5db   :  { %4662 = vmatpush1.bf16.msra.mxu1 %v4313_v9  ;;  %4499 = vmatprep.subr.bf16.mxu0 %v4316_v2  ;;  %v4110_v9 = vld [vmem:[#allocation7 + $0x338] sm:$0xff]  ;;  %v4336_v51 = vunpack.c.l.s8.bf16 %v4108_v13  ;;  %v4340_v23 = vunpack.c.h.s8.bf16 %v4108_v13  ;;  %v4123_v13 = vld [vmem:[#allocation7 + $0x3a0] sm:$0xff] }
 0x5dc   :  { %4663 = vmatprep.subr.bf16.mxu1 %v4318_v47  ;;  %v4331_v47 = vunpack.c.h.s8.bf16 %v4103_v11  ;;  %v4119_v11 = vld [vmem:[#allocation7 + $0x380] sm:$0xff] }
 0x5de   :  { %4500 = vmatpush1.bf16.msra.mxu0 %v4315_v10  ;;  %v4338_v10 = vunpack.c.l.s8.bf16 %v4110_v9 }
 0x5df   :  { %4664 = vmatpush1.bf16.msra.mxu1 %v4317_v52  ;;  %4501 = vmatprep.subr.bf16.mxu0 %v4320_v7  ;;  %v4107_v52 = vld [vmem:[#allocation7 + $0x320] sm:$0xff]  ;;  %v4109_v7 = vld [vmem:[#allocation7 + $0x330] sm:$0xff] }
 0x5e0   :  { %4665 = vmatprep.subr.bf16.mxu1 %v4322_v34  ;;  %v4335_v56 = vunpack.c.l.s8.bf16 %v4107_v52  ;;  %v4337_v34 = vunpack.c.l.s8.bf16 %v4109_v7  ;;  %v4341_v41 = vunpack.c.h.s8.bf16 %v4109_v7  ;;  %v4371_v7 = vunpack.c.h.s8.bf16 %v4123_v13 }
 0x5e2   :  { %4502 = vmatpush1.bf16.msra.mxu0 %v4319_v55  ;;  %v4342_v55 = vunpack.c.h.s8.bf16 %v4110_v9  ;;  %v4125_v9 = vld [vmem:[#allocation7 + $0x3b0] sm:$0xff] }
 0x5e3   :  { %4666 = vmatpush1.bf16.msra.mxu1 %v4321_v60  ;;  %4503 = vmatprep.subr.bf16.mxu0 %v4324_v43  ;;  %v4112_v60 = vld [vmem:[#allocation7 + $0x348] sm:$0xff]  ;;  %v4114_v43 = vld [vmem:[#allocation7 + $0x358] sm:$0xff] }
 0x5e4   :  { %4667 = vmatprep.subr.bf16.mxu1 %v4326_v54  ;;  %v4339_v54 = vunpack.c.h.s8.bf16 %v4107_v52  ;;  %v4344_v32 = vunpack.c.l.s8.bf16 %v4112_v60  ;;  %v4130_v52 = vld [vmem:[#allocation7 + $0x3d8] sm:$0xff] }
 0x5e6   :  { %4504 = vmatpush1.bf16.msra.mxu0 %v4323_v44  ;;  %v4346_v44 = vunpack.c.l.s8.bf16 %v4114_v43 }
 0x5e7   :  { %4668 = vmatpush1.bf16.msra.mxu1 %v4325_v37  ;;  %4514 = vmatprep.subr.bf16.mxu0 %v4328_v63  ;;  %v4111_v37 = vld [vmem:[#allocation7 + $0x340] sm:$0xff]  ;;  %v4113_v63 = vld [vmem:[#allocation7 + $0x350] sm:$0xff] }
 0x5e8   :  { %4678 = vmatprep.subr.bf16.mxu1 %v4330_v1  ;;  %v4343_v1 = vunpack.c.l.s8.bf16 %v4111_v37 }
 0x5fc   :  { %v3538_v6 = vpop.f32.mrb[4].mxu0 }
 0x5fd   :  { %v3922_v16 = vmul.f32 %v3897_v31, %v3538_v6  ;;  %v6180_v17 = vpop.f32.mrb[20].mxu1  ;;  %v3540_v24 = vpop.f32.mrb[5].mxu0  ;;  %v4345_v31 = vunpack.c.l.s8.bf16 %v4113_v63  ;;  %v4118_v6 = vld [vmem:[#allocation7 + $0x378] sm:$0xff] }
 0x5fe   :  { %v3923_v21 = vmul.f32 %v3901_v53, %v3540_v24  ;;  %v3868_v22 = vpop.f32.mrb[21].mxu1  ;;  %v3542_v20 = vpop.f32.mrb[6].mxu0  ;;  %v4348_v53 = vunpack.c.h.s8.bf16 %v4112_v60  ;;  %v4129_v60 = vld [vmem:[#allocation7 + $0x3d0] sm:$0xff] }
 0x5ff   :  { %v3971_v29 = vadd.f32 %v3946_v18, %v3922_v16  ;;  %v3925_v27 = vmul.f32 %v3909_v4, %v3868_v22  ;;  %v3870_v26 = vpop.f32.mrb[22].mxu1  ;;  %v3543_v30 = vpop.f32.mrb[7].mxu0  ;;  %v4350_v18 = vunpack.c.h.s8.bf16 %v4114_v43  ;;  %v4116_v4 = vld [vmem:[#allocation7 + $0x368] sm:$0xff]  ;;  %v4349_v16 = vunpack.c.h.s8.bf16 %v4113_v63  ;;  %v4117_v22 = vld [vmem:[#allocation7 + $0x370] sm:$0xff] }
 0x600   :  { %v3972_v15 = vadd.f32 %v3950_v8, %v3923_v21  ;;  %v3871_v40 = vpop.f32.mrb[23].mxu1  ;;  %v4347_v8 = vunpack.c.h.s8.bf16 %v4111_v37  ;;  %v4352_v24 = vunpack.c.l.s8.bf16 %v4116_v4  ;;  %v4115_v21 = vld [vmem:[#allocation7 + $0x360] sm:$0xff]  ;;  %v4358_v26 = vunpack.c.h.s8.bf16 %v4118_v6  ;;  %v4120_v30 = vld [vmem:[#allocation7 + $0x388] sm:$0xff] }
 0x601   :  { %vm3979_vm5 = vcmp.gt.f32.partialorder %v3971_v29, 0.0  ;;  %v3987_v35 = vmul.f32 0.01, %v3971_v29  ;;  %v3974_v38 = vadd.f32 %v3958_v36, %v3925_v27  ;;  %v4354_v36 = vunpack.c.l.s8.bf16 %v4118_v6  ;;  %v4131_v6 = vld [vmem:[#allocation7 + $0x3e0] sm:$0xff] }
 0x602   :  { %v3988_v62 = vmul.f32 0.01, %v3972_v15  ;;  %vm3980_vm6 = vcmp.gt.f32.partialorder %v3972_v15, 0.0  ;;  %v4351_v20 = vunpack.c.l.s8.bf16 %v4115_v21  ;;  %v4356_v27 = vunpack.c.h.s8.bf16 %v4116_v4 }
 0x603   :  { %v3995_v39 = vsel %vm3979_vm5, %v3971_v29, %v3987_v35  ;;  %v3990_v5 = vmul.f32 0.01, %v3974_v38  ;;  %vm3982_vm7 = vcmp.gt.f32.partialorder %v3974_v38, 0.0  ;;  %v4353_v29 = vunpack.c.l.s8.bf16 %v4117_v22 }
 0x604   :  { %v3996_v57 = vsel %vm3980_vm6, %v3972_v15, %v3988_v62  ;;  %v4003_v48 = vpack.c.bf16 %v3995_v39, %v3995_v39  ;;  %v4122_v15 = vld [vmem:[#allocation7 + $0x398] sm:$0xff]  ;;  %v4355_v40 = vunpack.c.h.s8.bf16 %v4115_v21  ;;  %v4357_v35 = vunpack.c.h.s8.bf16 %v4117_v22  ;;  %v4790_v21 = vld [vmem:[#allocation9 + $0x8] sm:$0xff] }
 0x605   :  { %v4004_v42 = vpack.c.bf16 %v3996_v57, %v3996_v57  ;;  %v3998_v58 = vsel %vm3982_vm7, %v3974_v38, %v3990_v5  ;;  %v4360_v38 = vunpack.c.l.s8.bf16 %v4120_v30  ;;  %v4362_v62 = vunpack.c.l.s8.bf16 %v4122_v15 }
 0x606   :  { %v4006_v2 = vpack.c.bf16 %v3998_v58, %v3998_v58  ;;  %v4359_v39 = vunpack.c.l.s8.bf16 %v4119_v11  ;;  %v4361_v5 = vunpack.c.l.s8.bf16 %v4121_v46  ;;  %v4364_v57 = vunpack.c.h.s8.bf16 %v4120_v30 }
 0x607   :  { %4505 = vmatprep.mubr.bf16.mxu0 %v4004_v42  ;;  %4669 = vmatprep.mubr.bf16.mxu1 %v4004_v42  ;;  %v4366_v42 = vunpack.c.h.s8.bf16 %v4122_v15  ;;  %v4363_v58 = vunpack.c.h.s8.bf16 %v4119_v11  ;;  %v3905_v43 = vrot.slane %v6166_v3, %v5994_v50  ;;  %v3954_v63 = vrot.slane %v6172_v33, %v5994_v50  ;;  %v4791_v11 = vld [vmem:[#allocation9 + $0x10] sm:$0xff] }
 0x608   :  { %4506 = vmatmul.mubr.bf16.vlgmr.msra.gmra.mrb[8].mxu0 %v4003_v48  ;;  %4670 = vmatmul.mubr.bf16.vlgmr.msra.gmra.mrb[24].mxu1 %v4003_v48  ;;  %v4365_v48 = vunpack.c.h.s8.bf16 %v4121_v46  ;;  %v4387_v22 = vunpack.c.h.s8.bf16 %v4131_v6  ;;  %v4825_v46 = vunpack.c.l.s8.bf16 %v4791_v11 }
 0x609   :  { %4515 = vmatpush1.bf16.msra.mxu0 %v4327_v19  ;;  %4679 = vmatpush1.bf16.msra.mxu1 %v4329_v28  ;;  %v4124_v19 = vld [vmem:[#allocation7 + $0x3a8] sm:$0xff]  ;;  %v4126_v28 = vld [vmem:[#allocation7 + $0x3b8] sm:$0xff]  ;;  %v3924_v37 = vmul.f32 %v3905_v43, %v6180_v17 }
 0x60a   :  { %4546 = vmatprep.mubr.bf16.mxu0 %v4006_v2  ;;  %4710 = vmatprep.mubr.bf16.mxu1 %v4006_v2  ;;  %v4367_v2 = vunpack.c.l.s8.bf16 %v4123_v13  ;;  %v4795_v13 = vld [vmem:[#allocation9 + $0x30] sm:$0xff] }
 0x60b   :  { %4516 = vmatprep.subr.bf16.mxu0 %v4332_v45  ;;  %4680 = vmatprep.subr.bf16.mxu1 %v4334_v59  ;;  %v4368_v45 = vunpack.c.l.s8.bf16 %v4124_v19  ;;  %v4370_v59 = vunpack.c.l.s8.bf16 %v4126_v28 }
 0x60d   :  { %4517 = vmatpush1.bf16.msra.mxu0 %v4331_v47  ;;  %4681 = vmatpush1.bf16.msra.mxu1 %v4333_v49  ;;  %v4369_v47 = vunpack.c.l.s8.bf16 %v4125_v9  ;;  %v4372_v49 = vunpack.c.h.s8.bf16 %v4124_v19  ;;  %v4793_v19 = vld [vmem:[#allocation9 + $0x20] sm:$0xff] }
 0x60e   :  { %4518 = vmatprep.subr.bf16.mxu0 %v4336_v51  ;;  %4682 = vmatprep.subr.bf16.mxu1 %v4338_v10  ;;  %v4374_v51 = vunpack.c.h.s8.bf16 %v4126_v28  ;;  %v4128_v10 = vld [vmem:[#allocation7 + $0x3c8] sm:$0xff]  ;;  %v4829_v28 = vunpack.c.l.s8.bf16 %v4793_v19 }
 0x611   :  { %4519 = vmatpush1.bf16.msra.mxu0 %v4335_v56  ;;  %4683 = vmatpush1.bf16.msra.mxu1 %v4337_v34  ;;  %v4373_v56 = vunpack.c.h.s8.bf16 %v4125_v9  ;;  %v4376_v34 = vunpack.c.l.s8.bf16 %v4128_v10  ;;  %v4833_v9 = vunpack.c.l.s8.bf16 %v4795_v13 }
 0x612   :  { %4520 = vmatprep.subr.bf16.mxu0 %v4340_v23  ;;  %4684 = vmatprep.subr.bf16.mxu1 %v4342_v55  ;;  %v4378_v23 = vunpack.c.l.s8.bf16 %v4130_v52  ;;  %v4127_v55 = vld [vmem:[#allocation7 + $0x3c0] sm:$0xff] }
 0x615   :  { %4521 = vmatpush1.bf16.msra.mxu0 %v4339_v54  ;;  %4685 = vmatpush1.bf16.msra.mxu1 %v4341_v41  ;;  %v4375_v54 = vunpack.c.l.s8.bf16 %v4127_v55  ;;  %v4377_v41 = vunpack.c.l.s8.bf16 %v4129_v60 }
 0x616   :  { %4522 = vmatprep.subr.bf16.mxu0 %v4344_v32  ;;  %4686 = vmatprep.subr.bf16.mxu1 %v4346_v44  ;;  %v4380_v32 = vunpack.c.h.s8.bf16 %v4128_v10  ;;  %v4382_v44 = vunpack.c.h.s8.bf16 %v4130_v52  ;;  %v4797_v10 = vld [vmem:[#allocation9 + $0x40] sm:$0xff] }
 0x617   :  { %v4837_v52 = vunpack.c.l.s8.bf16 %v4797_v10 }
 0x619   :  { %4523 = vmatpush1.bf16.msra.mxu0 %v4343_v1  ;;  %4687 = vmatpush1.bf16.msra.mxu1 %v4345_v31  ;;  %v4132_v1 = vld [vmem:[#allocation7 + $0x3e8] sm:$0xff]  ;;  %v4134_v31 = vld [vmem:[#allocation7 + $0x3f8] sm:$0xff] }
 0x61a   :  { %4524 = vmatprep.subr.bf16.mxu0 %v4348_v53  ;;  %4688 = vmatprep.subr.bf16.mxu1 %v4350_v18  ;;  %v4379_v53 = vunpack.c.h.s8.bf16 %v4127_v55  ;;  %v4381_v18 = vunpack.c.h.s8.bf16 %v4129_v60  ;;  %v4384_v3 = vunpack.c.l.s8.bf16 %v4132_v1  ;;  %v4386_v4 = vunpack.c.l.s8.bf16 %v4134_v31  ;;  %v4799_v55 = vld [vmem:[#allocation9 + $0x50] sm:$0xff] }
 0x61b   :  { %v4388_v50 = vunpack.c.h.s8.bf16 %v4132_v1  ;;  %v4390_v33 = vunpack.c.h.s8.bf16 %v4134_v31  ;;  %v4841_v60 = vunpack.c.l.s8.bf16 %v4799_v55  ;;  %v4804_v31 = vld [vmem:[#allocation9 + $0x78] sm:$0xff] }
 0x61d   :  { %4525 = vmatpush1.bf16.msra.mxu0 %v4347_v8  ;;  %4689 = vmatpush1.bf16.msra.mxu1 %v4349_v16  ;;  %v4133_v8 = vld [vmem:[#allocation7 + $0x3f0] sm:$0xff]  ;;  %v3973_v16 = vadd.f32 %v3954_v63, %v3924_v37 }
 0x61e   :  { %4526 = vmatprep.subr.bf16.mxu0 %v4352_v24  ;;  %4690 = vmatprep.subr.bf16.mxu1 %v4354_v36  ;;  %v4383_v24 = vunpack.c.l.s8.bf16 %v4131_v6  ;;  %v4385_v17 = vunpack.c.l.s8.bf16 %v4133_v8 }
 0x61f   :  { %v3989_v36 = vmul.f32 0.01, %v3973_v16  ;;  %vm3981_vm8 = vcmp.gt.f32.partialorder %v3973_v16, 0.0 }
 0x621   :  { %4527 = vmatpush1.bf16.msra.mxu0 %v4351_v20  ;;  %4691 = vmatpush1.bf16.msra.mxu1 %v4353_v29  ;;  %v4389_v20 = vunpack.c.h.s8.bf16 %v4133_v8  ;;  %v4822_v29 = vunpack.c.l.s8.bf16 %v4790_v21  ;;  %v6191_v8 = vld [vmem:[#allocation9 + $0x88] sm:$0xff] }
 0x622   :  { %4528 = vmatprep.subr.bf16.mxu0 %v4356_v27  ;;  %4692 = vmatprep.subr.bf16.mxu1 %v4358_v26  ;;  %v4789_v27 = vld [vmem:[#allocation9] sm:$0xff]  ;;  %v3997_v26 = vsel %vm3981_vm8, %v3973_v16, %v3989_v36  ;;  %v4854_v16 = vunpack.c.l.s8.bf16 %v6191_v8 }
 0x623   :  { %v4821_v30 = vunpack.c.l.s8.bf16 %v4789_v27  ;;  %v4005_v15 = vpack.c.bf16 %v3997_v26, %v3997_v26 }
 0x625   :  { %4529 = vmatpush1.bf16.msra.mxu0 %v4355_v40  ;;  %4693 = vmatpush1.bf16.msra.mxu1 %v4357_v35  ;;  %v4824_v40 = vunpack.c.h.s8.bf16 %v4790_v21  ;;  %v4792_v35 = vld [vmem:[#allocation9 + $0x18] sm:$0xff]  ;;  %v5010_v21 = vld [vmem:[#allocation10 + $0x28] sm:$0xff] }
 0x626   :  { %4530 = vmatprep.subr.bf16.mxu0 %v4360_v38  ;;  %4694 = vmatprep.subr.bf16.mxu1 %v4362_v62  ;;  %v4823_v38 = vunpack.c.h.s8.bf16 %v4789_v27  ;;  %v4826_v62 = vunpack.c.l.s8.bf16 %v4792_v35  ;;  %v5024_v26 = vunpack.c.h.s8.bf16 %v5010_v21 }
 0x629   :  { %4531 = vmatpush1.bf16.msra.mxu0 %v4359_v39  ;;  %4695 = vmatpush1.bf16.msra.mxu1 %v4361_v5  ;;  %v4828_v39 = vunpack.c.h.s8.bf16 %v4792_v35  ;;  %v4794_v5 = vld [vmem:[#allocation9 + $0x28] sm:$0xff]  ;;  %v6197_v35 = vld [vmem:[#allocation10 + $0x10] sm:$0xff] }
 0x62a   :  { %4532 = vmatprep.subr.bf16.mxu0 %v4364_v57  ;;  %4696 = vmatprep.subr.bf16.mxu1 %v4366_v42  ;;  %v4827_v57 = vunpack.c.h.s8.bf16 %v4791_v11  ;;  %v4830_v42 = vunpack.c.l.s8.bf16 %v4794_v5  ;;  %v4722_v11 = vld [vmem:[#allocation12 + $0x31] ss:$2 sm:$0xf] }
 0x62d   :  { %4533 = vmatpush1.bf16.msra.mxu0 %v4363_v58  ;;  %4697 = vmatpush1.bf16.msra.mxu1 %v4365_v48  ;;  %v4832_v58 = vunpack.c.h.s8.bf16 %v4794_v5  ;;  %v4796_v48 = vld [vmem:[#allocation9 + $0x38] sm:$0xff] }
 0x62e   :  { %4534 = vmatprep.subr.bf16.mxu0 %v4368_v45  ;;  %4698 = vmatprep.subr.bf16.mxu1 %v4370_v59  ;;  %v4831_v45 = vunpack.c.h.s8.bf16 %v4793_v19  ;;  %v4834_v59 = vunpack.c.l.s8.bf16 %v4796_v48  ;;  %v4760_v19 = vrot.slane %v4722_v11, %v5937_v61 }
 0x631   :  { %4535 = vmatpush1.bf16.msra.mxu0 %v4367_v2  ;;  %4699 = vmatpush1.bf16.msra.mxu1 %v4369_v47  ;;  %v4836_v2 = vunpack.c.h.s8.bf16 %v4796_v48  ;;  %v4798_v47 = vld [vmem:[#allocation9 + $0x48] sm:$0xff]  ;;  %v4756_v48 = vrot.slane %v4722_v11, %v5898_v14 }
 0x632   :  { %4536 = vmatprep.subr.bf16.mxu0 %v4372_v49  ;;  %4700 = vmatprep.subr.bf16.mxu1 %v4374_v51  ;;  %v4835_v49 = vunpack.c.h.s8.bf16 %v4795_v13  ;;  %v4838_v51 = vunpack.c.l.s8.bf16 %v4798_v47 }
 0x635   :  { %4537 = vmatpush1.bf16.msra.mxu0 %v4371_v7  ;;  %4701 = vmatpush1.bf16.msra.mxu1 %v4373_v56  ;;  %v4840_v7 = vunpack.c.h.s8.bf16 %v4798_v47  ;;  %v4800_v56 = vld [vmem:[#allocation9 + $0x58] sm:$0xff] }
 0x636   :  { %4538 = vmatprep.subr.bf16.mxu0 %v4376_v34  ;;  %4702 = vmatprep.subr.bf16.mxu1 %v4378_v23  ;;  %v4839_v34 = vunpack.c.h.s8.bf16 %v4797_v10  ;;  %v4842_v23 = vunpack.c.l.s8.bf16 %v4800_v56  ;;  %v4844_v43 = vunpack.c.h.s8.bf16 %v4800_v56 }
 0x639   :  { %4539 = vmatpush1.bf16.msra.mxu0 %v4375_v54  ;;  %4703 = vmatpush1.bf16.msra.mxu1 %v4377_v41  ;;  %v4802_v54 = vld [vmem:[#allocation9 + $0x68] sm:$0xff]  ;;  %v4843_v41 = vunpack.c.h.s8.bf16 %v4799_v55 }
 0x63a   :  { %4540 = vmatprep.subr.bf16.mxu0 %v4380_v32  ;;  %4704 = vmatprep.subr.bf16.mxu1 %v4382_v44  ;;  %v4846_v32 = vunpack.c.l.s8.bf16 %v4802_v54  ;;  %v4801_v44 = vld [vmem:[#allocation9 + $0x60] sm:$0xff]  ;;  %v4848_v63 = vunpack.c.h.s8.bf16 %v4802_v54 }
 0x63b   :  { %v4845_v37 = vunpack.c.l.s8.bf16 %v4801_v44  ;;  %v4847_v1 = vunpack.c.h.s8.bf16 %v4801_v44 }
 0x63d   :  { %4541 = vmatpush1.bf16.msra.mxu0 %v4379_v53  ;;  %4705 = vmatpush1.bf16.msra.mxu1 %v4381_v18  ;;  %v4850_v53 = vunpack.c.l.s8.bf16 %v4804_v31  ;;  %v4803_v18 = vld [vmem:[#allocation9 + $0x70] sm:$0xff] }
 0x63e   :  { %4542 = vmatprep.subr.bf16.mxu0 %v4384_v3  ;;  %4706 = vmatprep.subr.bf16.mxu1 %v4386_v4  ;;  %v4849_v3 = vunpack.c.l.s8.bf16 %v4803_v18  ;;  %v4852_v4 = vunpack.c.h.s8.bf16 %v4804_v31  ;;  %v4851_v6 = vunpack.c.h.s8.bf16 %v4803_v18 }
 0x641   :  { %4543 = vmatpush1.bf16.msra.mxu0 %v4383_v24  ;;  %4707 = vmatpush1.bf16.msra.mxu1 %v4385_v17  ;;  %v5009_v24 = vld [vmem:[#allocation10 + $0x20] sm:$0xff] }
 0x642   :  { %4544 = vmatprep.subr.bf16.mxu0 %v4388_v50  ;;  %4708 = vmatprep.subr.bf16.mxu1 %v4390_v33  ;;  %v5005_v17 = vld [vmem:[#allocation10] sm:$0xff]  ;;  %v5021_v50 = vunpack.c.l.s8.bf16 %v5009_v24  ;;  %v5022_v36 = vunpack.c.h.s8.bf16 %v5009_v24  ;;  %v4810_v24 = vld [vmem:[#allocation9 + $0xa8] sm:$0xff] }
 0x643   :  { %v5013_v33 = vunpack.c.l.s8.bf16 %v5005_v17 }
 0x645   :  { %4545 = vmatpush1.bf16.msra.mxu0 %v4387_v22  ;;  %4709 = vmatpush1.bf16.msra.mxu1 %v4389_v20  ;;  %v5014_v22 = vunpack.c.h.s8.bf16 %v5005_v17  ;;  %v5023_v20 = vunpack.c.l.s8.bf16 %v5010_v21  ;;  %v4812_v21 = vld [vmem:[#allocation9 + $0xb8] sm:$0xff] }
 0x646   :  { %4885 = vmatprep.subr.bf16.mxu0 %v4822_v29  ;;  %5217 = vmatprep.subr.bf16.mxu1 %v5021_v50  ;;  %v5006_v29 = vld [vmem:[#allocation10 + $0x8] sm:$0xff]  ;;  %v4862_v50 = vunpack.c.l.s8.bf16 %v4810_v24 }
 0x647   :  { %v5015_v27 = vunpack.c.l.s8.bf16 %v5006_v29 }
 0x648   :  { %4547 = vmatmul.mubr.bf16.vlgmr.msra.gmra.mrb[8].mxu0 %v4005_v15  ;;  %4711 = vmatmul.mubr.bf16.vlgmr.msra.gmra.mrb[24].mxu1 %v4005_v15  ;;  %v5016_v15 = vunpack.c.h.s8.bf16 %v5006_v29  ;;  %v4811_v29 = vld [vmem:[#allocation9 + $0xb0] sm:$0xff] }
 0x649   :  { %4886 = vmatpush1.bf16.msra.mxu0 %v4821_v30  ;;  %5218 = vmatpush3.bf16.msra.mxu1 %v5013_v33  ;;  %v6194_v30 = vld [vmem:[#allocation10 + $0x30] sm:$0xff] }
 0x64a   :  { %4887 = vmatprep.subr.bf16.mxu0 %v4824_v40  ;;  %5219 = vmatprep.subr.bf16.mxu1 %v5022_v36  ;;  %v5025_v40 = vunpack.c.l.s8.bf16 %v6194_v30  ;;  %v4864_v36 = vunpack.c.h.s8.bf16 %v4810_v24 }
 0x64d   :  { %4888 = vmatpush1.bf16.msra.mxu0 %v4823_v38  ;;  %5220 = vmatpush3.bf16.msra.mxu1 %v5014_v22  ;;  %v5017_v38 = vunpack.c.l.s8.bf16 %v6197_v35 }
 0x64e   :  { %4889 = vmatprep.subr.bf16.mxu0 %v4826_v62  ;;  %5221 = vmatprep.subr.bf16.mxu1 %v5023_v20  ;;  %v4720_v62 = vld [vmem:[#allocation12 + $0x30] ss:$2 sm:$0xf]  ;;  %v4866_v20 = vunpack.c.l.s8.bf16 %v4812_v21 }
 0x64f   :  { %v4731_v5 = vrot.slane %v4720_v62, %v5898_v14 }
 0x651   :  { %4890 = vmatpush1.bf16.msra.mxu0 %v4825_v46  ;;  %5222 = vmatpush3.bf16.msra.mxu1 %v5015_v27  ;;  %v4727_v46 = vrot.slane %v4720_v62, %v5893_v12  ;;  %v4865_v27 = vunpack.c.l.s8.bf16 %v4811_v29 }
 0x652   :  { %4891 = vmatprep.subr.bf16.mxu0 %v4828_v39  ;;  %5223 = vmatprep.subr.bf16.mxu1 %v5024_v26  ;;  %v4735_v39 = vrot.slane %v4720_v62, %v5937_v61  ;;  %v4868_v26 = vunpack.c.h.s8.bf16 %v4812_v21 }
 0x655   :  { %4892 = vmatpush1.bf16.msra.mxu0 %v4827_v57  ;;  %5224 = vmatpush3.bf16.msra.mxu1 %v5016_v15  ;;  %v4739_v57 = vrot.slane %v4720_v62, %v5911_v25  ;;  %v4814_v15 = vld [vmem:[#allocation9 + $0xc8] sm:$0xff]  ;;  %v4813_v62 = vld [vmem:[#allocation9 + $0xc0] sm:$0xff] }
 0x656   :  { %4893 = vmatprep.subr.bf16.mxu0 %v4830_v42  ;;  %5225 = vmatprep.subr.bf16.mxu1 %v5025_v40  ;;  %v4752_v42 = vrot.slane %v4722_v11, %v5893_v12  ;;  %v4867_v40 = vunpack.c.h.s8.bf16 %v4811_v29  ;;  %v5087_v29 = vld [vmem:[%s6278_s6 + $0x10] sm:$0xff] }
 0x659   :  { %4894 = vmatpush1.bf16.msra.mxu0 %v4829_v28  ;;  %5226 = vmatpush3.bf16.msra.mxu1 %v5017_v38  ;;  %v4870_v38 = vunpack.c.l.s8.bf16 %v4814_v15 }
 0x65a   :  { %4895 = vmatprep.subr.bf16.mxu0 %v4832_v58 }
 0x65d   :  { %4896 = vmatpush1.bf16.msra.mxu0 %v4831_v45  ;;  %v4764_v45 = vrot.slane %v4722_v11, %v5911_v25  ;;  %v4869_v11 = vunpack.c.l.s8.bf16 %v4813_v62 }
 0x65e   :  { %4897 = vmatprep.subr.bf16.mxu0 %v4834_v59 }
 0x661   :  { %4898 = vmatpush1.bf16.msra.mxu0 %v4833_v9 }
 0x662   :  { %4899 = vmatprep.subr.bf16.mxu0 %v4836_v2 }
 0x665   :  { %4900 = vmatpush1.bf16.msra.mxu0 %v4835_v49 }
 0x666   :  { %4901 = vmatprep.subr.bf16.mxu0 %v4838_v51 }
 0x669   :  { %4902 = vmatpush1.bf16.msra.mxu0 %v4837_v52 }
 0x66a   :  { %4903 = vmatprep.subr.bf16.mxu0 %v4840_v7 }
 0x66d   :  { %4904 = vmatpush1.bf16.msra.mxu0 %v4839_v34 }
 0x66e   :  { %4905 = vmatprep.subr.bf16.mxu0 %v4842_v23 }
 0x671   :  { %4906 = vmatpush1.bf16.msra.mxu0 %v4841_v60  ;;  %v4805_v60 = vld [vmem:[#allocation9 + $0x80] sm:$0xff] }
 0x672   :  { %4907 = vmatprep.subr.bf16.mxu0 %v4844_v43  ;;  %v4855_v18 = vunpack.c.h.s8.bf16 %v4805_v60 }
 0x675   :  { %4908 = vmatpush1.bf16.msra.mxu0 %v4843_v41 }
 0x676   :  { %4909 = vmatprep.subr.bf16.mxu0 %v4846_v32 }
 0x679   :  { %4910 = vmatpush1.bf16.msra.mxu0 %v4845_v37  ;;  %v4853_v37 = vunpack.c.l.s8.bf16 %v4805_v60  ;;  %v5018_v60 = vunpack.c.h.s8.bf16 %v6197_v35 }
 0x67a   :  { %4911 = vmatprep.subr.bf16.mxu0 %v4848_v63 }
 0x67d   :  { %4912 = vmatpush1.bf16.msra.mxu0 %v4847_v1  ;;  %v4856_v1 = vunpack.c.h.s8.bf16 %v6191_v8  ;;  %v4809_v8 = vld [vmem:[#allocation9 + $0xa0] sm:$0xff] }
 0x67e   :  { %4913 = vmatprep.subr.bf16.mxu0 %v4850_v53  ;;  %v4808_v53 = vld [vmem:[#allocation9 + $0x98] sm:$0xff]  ;;  %v4861_v33 = vunpack.c.l.s8.bf16 %v4809_v8  ;;  %v4863_v22 = vunpack.c.h.s8.bf16 %v4809_v8 }
 0x681   :  { %4914 = vmatpush1.bf16.msra.mxu0 %v4849_v3  ;;  %v4858_v3 = vunpack.c.l.s8.bf16 %v4808_v53 }
 0x682   :  { %4915 = vmatprep.subr.bf16.mxu0 %v4852_v4  ;;  %v4807_v4 = vld [vmem:[#allocation9 + $0x90] sm:$0xff] }
 0x683   :  { %v4859_v17 = vunpack.c.h.s8.bf16 %v4807_v4 }
 0x685   :  { %4916 = vmatpush1.bf16.msra.mxu0 %v4851_v6  ;;  %v4857_v6 = vunpack.c.l.s8.bf16 %v4807_v4 }
 0x686   :  { %4926 = vmatprep.subr.bf16.mxu0 %v4854_v16  ;;  %v4860_v16 = vunpack.c.h.s8.bf16 %v4808_v53 }
 0x71b   :  { %v4548_v28 = vpop.f32.mrb[8].mxu0  ;;  %v4712_v58 = vpop.f32.mrb[24].mxu1 }
 0x71c   :  { %v4744_v59 = vmul.f32 %v4727_v46, %v4548_v28  ;;  %v4746_v13 = vmul.f32 %v4735_v39, %v4712_v58  ;;  %v4550_v9 = vpop.f32.mrb[9].mxu0  ;;  %v4714_v2 = vpop.f32.mrb[25].mxu1  ;;  %v4872_v46 = vunpack.c.h.s8.bf16 %v4814_v15  ;;  %v4816_v39 = vld [vmem:[#allocation9 + $0xd8] sm:$0xff]  ;;  %v4818_v58 = vld [vmem:[#allocation9 + $0xe8] sm:$0xff] }
 0x71d   :  { %v4745_v47 = vmul.f32 %v4731_v5, %v4550_v9  ;;  %v4747_v49 = vmul.f32 %v4739_v57, %v4714_v2  ;;  %v4552_v51 = vpop.f32.mrb[10].mxu0  ;;  %v4716_v10 = vpop.f32.mrb[26].mxu1  ;;  %v4871_v5 = vunpack.c.h.s8.bf16 %v4813_v62  ;;  %v4874_v57 = vunpack.c.l.s8.bf16 %v4816_v39  ;;  %v4820_v2 = vld [vmem:[#allocation9 + $0xf8] sm:$0xff]  ;;  %v5091_v62 = vld [vmem:[%s6278_s6 + $0x30] sm:$0xff] }
 0x71e   :  { %v4769_v52 = vadd.f32 %v4752_v42, %v4744_v59  ;;  %v6208_v7 = vadd.f32 %v4760_v19, %v4746_v13  ;;  %v4553_v56 = vpop.f32.mrb[11].mxu0  ;;  %v4717_v34 = vpop.f32.mrb[27].mxu1  ;;  %v4815_v42 = vld [vmem:[#allocation9 + $0xd0] sm:$0xff]  ;;  %v4876_v28 = vunpack.c.h.s8.bf16 %v4816_v39  ;;  %v4817_v59 = vld [vmem:[#allocation9 + $0xe0] sm:$0xff]  ;;  %v4880_v9 = vunpack.c.h.s8.bf16 %v4818_v58  ;;  %v5089_v15 = vld [vmem:[%s6278_s6 + $0x20] sm:$0xff] }
 0x71f   :  { %v4770_v61 = vadd.f32 %v4756_v48, %v4745_v47  ;;  %v4772_v23 = vadd.f32 %v4764_v45, %v4747_v49  ;;  %v4873_v19 = vunpack.c.l.s8.bf16 %v4815_v42  ;;  %v4875_v48 = vunpack.c.h.s8.bf16 %v4815_v42  ;;  %v4819_v51 = vld [vmem:[#allocation9 + $0xf0] sm:$0xff]  ;;  %v5093_v39 = vld [vmem:[%s6278_s6 + $0x40] sm:$0xff]  ;;  %v5095_v42 = vld [vmem:[%s6278_s6 + $0x50] sm:$0xff] }
 0x720   :  { %vm4773_vm9 = vcmp.gt.f32.partialorder %v4769_v52, 0.0  ;;  %v4777_v55 = vmul.f32 0.01, %v4769_v52  ;;  %v4878_v45 = vunpack.c.l.s8.bf16 %v4818_v58  ;;  %v4877_v13 = vunpack.c.l.s8.bf16 %v4817_v59  ;;  %v5097_v58 = vld [vmem:[%s6278_s6 + $0x60] sm:$0xff] }
 0x721   :  { %v4778_v43 = vmul.f32 0.01, %v4770_v61  ;;  %v4780_v25 = vmul.f32 0.01, %v4772_v23  ;;  %vm4774_vm10 = vcmp.gt.f32.partialorder %v4770_v61, 0.0  ;;  %vm4776_vm11 = vcmp.gt.f32.partialorder %v4772_v23, 0.0 }
 0x722   :  { %v4781_v54 = vsel %vm4773_vm9, %v4769_v52, %v4777_v55  ;;  %v4879_v47 = vunpack.c.h.s8.bf16 %v4817_v59  ;;  %v4882_v49 = vunpack.c.l.s8.bf16 %v4820_v2  ;;  %v4881_v10 = vunpack.c.l.s8.bf16 %v4819_v51  ;;  %v5099_v59 = vld [vmem:[%s6278_s6 + $0x70] sm:$0xff] }
 0x723   :  { %v4782_v41 = vsel %vm4774_vm10, %v4770_v61, %v4778_v43  ;;  %v4784_v32 = vsel %vm4776_vm11, %v4772_v23, %v4780_v25  ;;  %v4785_v63 = vpack.c.bf16 %v4781_v54, %v4781_v54  ;;  %v4884_v52 = vunpack.c.h.s8.bf16 %v4820_v2  ;;  %v5012_v43 = vld [vmem:[#allocation10 + $0x38] sm:$0xff] }
 0x724   :  { %v4786_v44 = vpack.c.bf16 %v4782_v41, %v4782_v41  ;;  %v4788_v31 = vpack.c.bf16 %v4784_v32, %v4784_v32  ;;  %v4779_v56 = vmul.f32 0.01, %v6208_v7  ;;  %vm4775_vm12 = vcmp.gt.f32.partialorder %v6208_v7, 0.0  ;;  %v5008_v54 = vld [vmem:[#allocation10 + $0x18] sm:$0xff] }
 0x725   :  { %v4883_v34 = vunpack.c.h.s8.bf16 %v4819_v51  ;;  %v5026_v55 = vunpack.c.h.s8.bf16 %v6194_v30  ;;  %v5027_v25 = vunpack.c.l.s8.bf16 %v5012_v43  ;;  %v5019_v41 = vunpack.c.l.s8.bf16 %v5008_v54 }
 0x726   :  { %4917 = vmatprep.mubr.bf16.mxu0 %v4786_v44  ;;  %v4783_v61 = vsel %vm4775_vm12, %v6208_v7, %v4779_v56  ;;  %v5028_v32 = vunpack.c.h.s8.bf16 %v5012_v43  ;;  %v5020_v44 = vunpack.c.h.s8.bf16 %v5008_v54  ;;  %v5727_v7 = vmov 0.0|0.0  }
 0x727   :  { %4918 = vmatmul.mubr.bf16.vlgmr.msra.gmra.mrb[12].mxu0 %v4785_v63  ;;  %v4787_v23 = vpack.c.bf16 %v4783_v61, %v4783_v61  ;;  %5227 = vmatprep.subr.bf16.mxu1 %v5026_v55  ;;  %v4970_v63 = vld [vmem:[#allocation12 + $0x39] ss:$2 sm:$0x3] }
 0x728   :  { %4927 = vmatpush1.bf16.msra.mxu0 %v4853_v37  ;;  %4958 = vmatprep.mubr.bf16.mxu0 %v4788_v31  ;;  %v4968_v37 = vld [vmem:[#allocation12 + $0x38] ss:$2 sm:$0x3]  ;;  %v4992_v53 = vrot.slane %v4970_v63, %v5898_v14 }
 0x729   :  { %4928 = vmatprep.subr.bf16.mxu0 %v4856_v1  ;;  %5228 = vmatpush3.bf16.msra.mxu1 %v5018_v60  ;;  %v4975_v30 = vrot.slane %v4968_v37, %v5893_v12  ;;  %v4979_v35 = vrot.slane %v4968_v37, %v5898_v14  ;;  %v4988_v1 = vrot.slane %v4970_v63, %v5893_v12  ;;  %v5086_v12 = vld [vmem:[%s6278_s6 + $0x8] sm:$0xff]  ;;  %v5215_v60 = vld [vmem:[#allocation12 + $0x3e] ss:$0 sm:$0xff] }
 0x72a   :  { %5229 = vmatprep.subr.bf16.mxu1 %v5027_v25  ;;  %v5216_v25 = vld [vmem:[#allocation12 + $0x3f] ss:$0 sm:$0xff] }
 0x72c   :  { %4929 = vmatpush1.bf16.msra.mxu0 %v4855_v18 }
 0x72d   :  { %4930 = vmatprep.subr.bf16.mxu0 %v4858_v3  ;;  %5230 = vmatpush3.bf16.msra.mxu1 %v5019_v41 }
 0x72e   :  { %5231 = vmatprep.subr.bf16.mxu1 %v5028_v32 }
 0x730   :  { %4931 = vmatpush1.bf16.msra.mxu0 %v4857_v6 }
 0x731   :  { %4932 = vmatprep.subr.bf16.mxu0 %v4860_v16  ;;  %5232 = vmatpush3.bf16.msra.mxu1 %v5020_v44 }
 0x732   :  { %5355 = vmatprep.subr.bf16.mxu1 %v5727_v7 }
 0x734   :  { %4933 = vmatpush1.bf16.msra.mxu0 %v4859_v17 }
 0x735   :  { %4934 = vmatprep.subr.bf16.mxu0 %v4862_v50 }
 0x738   :  { %4935 = vmatpush1.bf16.msra.mxu0 %v4861_v33  ;;  %v5085_v33 = vld [vmem:[%s6278_s6] sm:$0xff] }
 0x739   :  { %4936 = vmatprep.subr.bf16.mxu0 %v4864_v36 }
 0x73c   :  { %4937 = vmatpush1.bf16.msra.mxu0 %v4863_v22  ;;  %v5356_v22 = vpack.c.bf16 %v5086_v12, %v5085_v33 }
 0x73d   :  { %4938 = vmatprep.subr.bf16.mxu0 %v4866_v20 }
 0x740   :  { %4939 = vmatpush1.bf16.msra.mxu0 %v4865_v27  ;;  %v5088_v27 = vld [vmem:[%s6278_s6 + $0x18] sm:$0xff] }
 0x741   :  { %4940 = vmatprep.subr.bf16.mxu0 %v4868_v26  ;;  %v5359_v26 = vpack.c.bf16 %v5088_v27, %v5087_v29 }
 0x744   :  { %4941 = vmatpush1.bf16.msra.mxu0 %v4867_v40  ;;  %v5090_v40 = vld [vmem:[%s6278_s6 + $0x28] sm:$0xff] }
 0x745   :  { %4942 = vmatprep.subr.bf16.mxu0 %v4870_v38  ;;  %v5362_v38 = vpack.c.bf16 %v5090_v40, %v5089_v15 }
 0x748   :  { %4943 = vmatpush1.bf16.msra.mxu0 %v4869_v11  ;;  %v5092_v11 = vld [vmem:[%s6278_s6 + $0x38] sm:$0xff] }
 0x749   :  { %4944 = vmatprep.subr.bf16.mxu0 %v4872_v46  ;;  %v5365_v46 = vpack.c.bf16 %v5092_v11, %v5091_v62 }
 0x74c   :  { %4945 = vmatpush1.bf16.msra.mxu0 %v4871_v5  ;;  %v5094_v5 = vld [vmem:[%s6278_s6 + $0x48] sm:$0xff] }
 0x74d   :  { %4946 = vmatprep.subr.bf16.mxu0 %v4874_v57  ;;  %v5368_v57 = vpack.c.bf16 %v5094_v5, %v5093_v39 }
 0x750   :  { %4947 = vmatpush1.bf16.msra.mxu0 %v4873_v19  ;;  %v5096_v19 = vld [vmem:[%s6278_s6 + $0x58] sm:$0xff] }
 0x751   :  { %4948 = vmatprep.subr.bf16.mxu0 %v4876_v28  ;;  %v5371_v28 = vpack.c.bf16 %v5096_v19, %v5095_v42 }
 0x754   :  { %4949 = vmatpush1.bf16.msra.mxu0 %v4875_v48  ;;  %v5098_v48 = vld [vmem:[%s6278_s6 + $0x68] sm:$0xff] }
 0x755   :  { %4950 = vmatprep.subr.bf16.mxu0 %v4878_v45  ;;  %v5374_v45 = vpack.c.bf16 %v5098_v48, %v5097_v58 }
 0x758   :  { %4951 = vmatpush1.bf16.msra.mxu0 %v4877_v13  ;;  %v5100_v13 = vld [vmem:[%s6278_s6 + $0x78] sm:$0xff] }
 0x759   :  { %4952 = vmatprep.subr.bf16.mxu0 %v4880_v9  ;;  %v5377_v9 = vpack.c.bf16 %v5100_v13, %v5099_v59 }
 0x75c   :  { %4953 = vmatpush1.bf16.msra.mxu0 %v4879_v47 }
 0x75d   :  { %4954 = vmatprep.subr.bf16.mxu0 %v4882_v49  ;;  %v5213_v49 = vld [vmem:[#allocation12 + $0x3c] ss:$0 sm:$0xff] }
 0x760   :  { %4955 = vmatpush1.bf16.msra.mxu0 %v4881_v10 }
 0x761   :  { %4956 = vmatprep.subr.bf16.mxu0 %v4884_v52  ;;  %v5214_v52 = vld [vmem:[#allocation12 + $0x3d] ss:$0 sm:$0xff] }
 0x764   :  { %4957 = vmatpush1.bf16.msra.mxu0 %v4883_v34 }
 0x767   :  { %4959 = vmatmul.mubr.bf16.vlgmr.msra.gmra.mrb[12].mxu0 %v4787_v23 }
 0x83a   :  { %v4960_v31 = vpop.f32.mrb[12].mxu0 }
 0x83b   :  { %v4982_v18 = vmul.f32 %v4975_v30, %v4960_v31  ;;  %v4962_v3 = vpop.f32.mrb[13].mxu0 }
 0x83c   :  { %v4983_v4 = vmul.f32 %v4979_v35, %v4962_v3  ;;  %v4964_v6 = vpop.f32.mrb[14].mxu0 }
 0x83d   :  { %v4995_v16 = vadd.f32 %v4988_v1, %v4982_v18  ;;  %v4965_v24 = vpop.f32.mrb[15].mxu0 }
 0x83e   :  { %v4996_v17 = vadd.f32 %v4992_v53, %v4983_v4 }
 0x83f   :  { %vm4997_vm13 = vcmp.gt.f32.partialorder %v4995_v16, 0.0  ;;  %v4999_v50 = vmul.f32 0.01, %v4995_v16 }
 0x840   :  { %v5000_v8 = vmul.f32 0.01, %v4996_v17  ;;  %vm4998_vm14 = vcmp.gt.f32.partialorder %v4996_v17, 0.0 }
 0x841   :  { %v5001_v14 = vsel %vm4997_vm13, %v4995_v16, %v4999_v50 }
 0x842   :  { %v5002_v36 = vsel %vm4998_vm14, %v4996_v17, %v5000_v8  ;;  %v5003_v20 = vpack.c.bf16 %v5001_v14, %v5001_v14 }
 0x843   :  { %v5004_v21 = vpack.c.bf16 %v5002_v36, %v5002_v36 }
 0x845   :  { %5061 = vmatprep.mubr.bf16.mxu1 %v5004_v21 }
 0x846   :  { %5062 = vmatmul.mubr.bf16.vlgmr.msra.gmra.mrb[28].mxu1 %v5003_v20 }
 0x847   :  { %5357 = vmatpush3.bf16.msra.mxu1 %v5356_v22  ;;  %5288 = vmatprep.mubr.msk.f32.mxu1 %vm5728_vm15, %v5726_v0 }
 0x848   :  { %5358 = vmatprep.subr.bf16.mxu1 %v5727_v7 }
 0x84b   :  { %5360 = vmatpush3.bf16.msra.mxu1 %v5359_v26 }
 0x84c   :  { %5361 = vmatprep.subr.bf16.mxu1 %v5727_v7 }
 0x84f   :  { %5363 = vmatpush3.bf16.msra.mxu1 %v5362_v38 }
 0x850   :  { %5364 = vmatprep.subr.bf16.mxu1 %v5727_v7 }
 0x853   :  { %5366 = vmatpush3.bf16.msra.mxu1 %v5365_v46 }
 0x854   :  { %5367 = vmatprep.subr.bf16.mxu1 %v5727_v7 }
 0x857   :  { %5369 = vmatpush3.bf16.msra.mxu1 %v5368_v57 }
 0x858   :  { %5370 = vmatprep.subr.bf16.mxu1 %v5727_v7 }
 0x85b   :  { %5372 = vmatpush3.bf16.msra.mxu1 %v5371_v28 }
 0x85c   :  { %5373 = vmatprep.subr.bf16.mxu1 %v5727_v7 }
 0x85f   :  { %5375 = vmatpush3.bf16.msra.mxu1 %v5374_v45 }
 0x860   :  { %5376 = vmatprep.subr.bf16.mxu1 %v5727_v7 }
 0x863   :  { %5378 = vmatpush3.bf16.msra.mxu1 %v5377_v9 }
 0x919   :  { %v5233_v2 = vpop.f32.mrb[28].mxu1 }
 0x91a   :  { %v5234_v47 = vpop.f32.mrb[29].mxu1 }
 0x91b   :  { %v5235_v51 = vadd.f32 %v5234_v47, %v5233_v2  ;;  %v5236_v10 = vpop.f32.mrb[30].mxu1 }
 0x91c   :  { %v5237_v56 = vpop.f32.mrb[31].mxu1 }
 0x91d   :  { %v5075_v34 = vmul.f32 %v5235_v51, %v5213_v49 }
 0x91f   :  { %v5080_v61 = vadd.f32 %v5214_v52, %v5075_v34 }
 0x921   :  { %vm5081_vm0 = vcmp.gt.f32.partialorder %v5080_v61, 0.0  ;;  %v5082_v23 = vmul.f32 0.01, %v5080_v61 }
 0x923   :  { %v5083_v55 = vsel %vm5081_vm0, %v5080_v61, %v5082_v23 }
 0x924   :  { %5289 = vmatmul.mubr.f32.vlgmr.msra.gmra.mrb[32].mxu1 %v5083_v55 }
 0x9f7   :  { %v5168_v43 = vpop.f32.mrb[32].mxu1 }
 0x9f8   :  { %v5178_v54 = vmul.f32 %v5215_v60, %v5168_v43  ;;  %v5290_v41 = vpop.f32.mrb[33].mxu1 }
 0x9fa   :  { %v5183_v0 = vadd.f32 %v5216_v25, %v5178_v54 }
 0x9fc   :  { %v5185_v32 = vsel %vm5184_vm1, %v5183_v0, -inf }
 0x9fd   :  { %5186 = vmax.xlane.f32.xlu0 %v5185_v32 }
 0xa8a   :  { %v5187_v44 = vpop.xlane.xlu0 %5186 }
 0xa8b   :  { %v5188_v7 = vsub.f32 %v5183_v0, %v5187_v44 }
 0xa8d   :  { %v5189_v37 = vmul.f32 1.442695, %v5188_v7 }
 0xa8f   :  { %5538 = vpow2.f32 %v5189_v37 }
 0xa99   :  { %v5539_v63 = vpop.eup %5538 }
 0xa9a   :  { %v5191_v30 = vsel %vm5184_vm1, %v5539_v63, 0.0 }
 0xa9b   :  { %5192 = vadd.xlane.f32.xlu0 %v5191_v30 }
 0xb28   :  { %v5193_v35 = vpop.xlane.xlu0 %5192 }
 0xb29   :  { %5540 = vrcp.f32 %v5193_v35 }
 0xb33   :  { %v5541_v1 = vpop.eup %5540 }
 0xb34   :  { %v5195_v31 = vmul.f32 %v5541_v1, %v5539_v63 }
 0xb36   :  { %5196 = vst.msk [vmem:[%s6280_s8] sm:$0xff] %vm5184_vm1, %v5195_v31 }
 0xb37   :  { %5201 = vsyncpa [#allocation3], 1 }
 0xb38   :  { %5202 = vsyncpa [#allocation5], 1 }
 0xb39   :  { %5203 = vsyncpa [#allocation8], 1 }
 0xb3a   :  { %5204 = vsyncpa [#allocation11], 1 }

</bundles_post_ra>
